<compile_context>
chip_gen: v6e
topology: v6e:2x2x1
jax: 0.10.0
libtpu: 0.0.40
codegen_flags: <defaults>
</compile_context>

<pallas_src>
import functools

import jax
import jax.numpy as jnp
from jax.experimental import pallas as pl
from jax.experimental.pallas import tpu as pltpu

HIDDEN_SIZE = 128
NUM_LAYERS = 3


# ------------------------------ fused kernel -------------------------------

def _wavefront_lstm_kernel(x_ref, wih0_ref, whh0_ref, b0_ref,
                           wcat1_ref, b1_ref, wcat2_ref, b2_ref,
                           outw_ref, outb_ref, o_ref, gx_ref, *, T, B, H):
    """Single-invocation fused 3-layer LSTM (wavefront schedule) + output head.

    x_ref    : (T*B, H)  bf16  time-major embedded input (row = t*B + b)
    wih0_ref : (H, 4H)   bf16  layer-0 input-hidden weights (cols [i,f,o,g])
    whh0_ref : (H, 4H)   bf16  layer-0 hidden-hidden weights
    b0_ref   : (1, 4H)   f32   layer-0 combined bias (b_ih + b_hh)
    wcatL_ref: (2H, 4H)  bf16  layer L fused [W_ih; W_hh]
    bL_ref   : (1, 4H)   f32   layer L combined bias
    outw_ref : (1, H)    f32   output projection weights
    outb_ref : (1, 1)    f32   output projection bias
    o_ref    : (B, 1)    f32   model output (padded batch)
    gx_ref   : (T*B, 4H) f32   VMEM scratch for the hoisted layer-0 projection
    """
    f32 = jnp.float32
    bf16 = jnp.bfloat16

    # Layer-0 input projection hoisted off the recurrence: one big matmul,
    # staged in VMEM scratch so it never lives in vregs across the loop.
    gx_ref[...] = (
        jnp.dot(x_ref[...], wih0_ref[...], preferred_element_type=f32)
        + b0_ref[...])

    def cell(gates, c):
        # Gate columns pre-permuted to [i, f, o | g]: one sigmoid, one tanh.
        sig = jax.nn.sigmoid(gates[:, :3 * H])
        g_t = jnp.tanh(gates[:, 3 * H:])
        i_g = sig[:, 0 * H:1 * H]
        f_g = sig[:, 1 * H:2 * H]
        o_g = sig[:, 2 * H:3 * H]
        c_new = f_g * c + i_g * g_t
        return o_g * jnp.tanh(c_new), c_new

    zeros = jnp.zeros((B, H), f32)
    h0, c0 = zeros, zeros
    h1, c1 = zeros, zeros
    h2, c2 = zeros, zeros

    # Wavefront: iteration s -> layer0@t=s, layer1@t=s-1, layer2@t=s-2.
    for s in range(T + 2):
        h0_prev = h0          # layer-0 output at time s-1 (input to layer 1)
        h1_prev = h1          # layer-1 output at time s-2 (input to layer 2)

        if s < T:             # ---- layer 0, time s
            g0 = gx_ref[s * B:(s + 1) * B, :] + jnp.dot(
                h0.astype(bf16), whh0_ref[...], preferred_element_type=f32)
            h0, c0 = cell(g0, c0)

        if 1 <= s <= T:       # ---- layer 1, time s-1
            xh = jnp.concatenate(
                [h0_prev.astype(bf16), h1.astype(bf16)], axis=-1)   # (B, 2H)
            g1 = jnp.dot(xh, wcat1_ref[...],
                         preferred_element_type=f32) + b1_ref[...]
            h1, c1 = cell(g1, c1)

        if 2 <= s <= T + 1:   # ---- layer 2, time s-2
            xh = jnp.concatenate(
                [h1_prev.astype(bf16), h2.astype(bf16)], axis=-1)   # (B, 2H)
            g2 = jnp.dot(xh, wcat2_ref[...],
                         preferred_element_type=f32) + b2_ref[...]
            h2, c2 = cell(g2, c2)

    # outlay: Linear(H -> 1) on the top layer's last hidden state, done as a
    # VPU multiply + lane reduction (no N=1 MXU matmul).
    o_ref[...] = (jnp.sum(h2 * outw_ref[...], axis=-1, keepdims=True)
                  + outb_ref[...])


def _fused_forward(x_tm, w_ih0, w_hh0, b0, w_cat1, b1, w_cat2, b2,
                   out_w, out_b, T, B):
    H = w_ih0.shape[0]
    kernel = functools.partial(_wavefront_lstm_kernel, T=T, B=B, H=H)
    return pl.pallas_call(
        kernel,
        out_shape=jax.ShapeDtypeStruct((B, 1), jnp.float32),
        scratch_shapes=[
            pltpu.VMEM((T * B, 4 * H), jnp.float32),   # hoisted layer-0 gates
        ],
    )(x_tm, w_ih0, w_hh0, b0, w_cat1, b1, w_cat2, b2, out_w, out_b)


# ------------------------------- parameters --------------------------------

def init_params(key, hidden=HIDDEN_SIZE, num_layers=NUM_LAYERS):
    """Deterministic synthetic parameters in the PyTorch module's layouts."""
    params = {}
    k = key
    k, k1, k2 = jax.random.split(k, 3)
    params["feat_w"] = jax.random.uniform(k1, (hidden, 1), jnp.float32, -1.0, 1.0)
    params["feat_b"] = jax.random.uniform(k2, (hidden,), jnp.float32, -1.0, 1.0)

    s = 1.0 / (hidden ** 0.5)
    for l in range(num_layers):
        k, k1, k2, k3, k4 = jax.random.split(k, 5)
        params[f"w_ih_l{l}"] = jax.random.uniform(
            k1, (4 * hidden, hidden), jnp.float32, -s, s)
        params[f"w_hh_l{l}"] = jax.random.uniform(
            k2, (4 * hidden, hidden), jnp.float32, -s, s)
        params[f"b_ih_l{l}"] = jax.random.uniform(k3, (4 * hidden,), jnp.float32, -s, s)
        params[f"b_hh_l{l}"] = jax.random.uniform(k4, (4 * hidden,), jnp.float32, -s, s)

    k, k1, k2 = jax.random.split(k, 3)
    params["out_w"] = jax.random.uniform(k1, (1, hidden), jnp.float32, -s, s)
    params["out_b"] = jax.random.uniform(k2, (1,), jnp.float32, -s, s)
    return params


def prepare_params(params, hidden=HIDDEN_SIZE, num_layers=NUM_LAYERS):
    """One-time prep: transpose, permute gate cols [i,f,g,o]->[i,f,o,g],
    fuse [W_ih; W_hh] for layers 1-2, combine biases, cast matmul weights to
    bf16 (done once, outside jit, so the kernel DMAs half the bytes)."""
    assert num_layers == 3, "kernel is specialized for NUM_LAYERS == 3"
    H = hidden

    def reorder_cols(w):      # last axis is 4H in PyTorch order [i, f, g, o]
        return jnp.concatenate(
            [w[..., :2 * H], w[..., 3 * H:4 * H], w[..., 2 * H:3 * H]], axis=-1)

    prepped = {
        "feat_w": params["feat_w"][:, 0],            # (H,)
        "feat_b": params["feat_b"],                  # (H,)
        "out_w": params["out_w"],                    # (1, H) f32
        "out_b": params["out_b"].reshape(1, 1),      # (1, 1) f32
    }

    # Layer 0: keep W_ih / W_hh separate (input projection is hoisted).
    prepped["w_ih0"] = reorder_cols(params["w_ih_l0"].T).astype(jnp.bfloat16)
    prepped["w_hh0"] = reorder_cols(params["w_hh_l0"].T).astype(jnp.bfloat16)
    prepped["b0"] = reorder_cols(
        (params["b_ih_l0"] + params["b_hh_l0"])[None, :])

    # Layers 1-2: fused [W_ih; W_hh] -> (2H, 4H) for the per-step matmul.
    for l in (1, 2):
        w_cat = jnp.concatenate(
            [params[f"w_ih_l{l}"].T, params[f"w_hh_l{l}"].T], axis=0)
        prepped[f"w_cat{l}"] = reorder_cols(w_cat).astype(jnp.bfloat16)
        prepped[f"b{l}"] = reorder_cols(
            (params[f"b_ih_l{l}"] + params[f"b_hh_l{l}"])[None, :])
    return prepped


# -------------------------------- forward ----------------------------------

@jax.jit
def model_forward(prepped, x):
    """x: (B, T, 1) -> (B, 1), matching Model.forward."""
    B, T, _ = x.shape
    H = HIDDEN_SIZE
    B_pad = ((B + 7) // 8) * 8                  # fill vreg sublanes

    # Pad batch once (padded rows are independent and sliced off at the end).
    x_p = jnp.pad(x[..., 0], ((0, B_pad - B), (0, 0)))             # (B_pad, T)

    # feat_embed: Linear(1 -> H) as a broadcast multiply-add (pure VPU work,
    # fuses with the transpose below — no K=1 MXU matmul, no extra launch).
    h0 = x_p[:, :, None] * prepped["feat_w"] + prepped["feat_b"]   # (B_pad,T,H)

    # Time-major flatten (row = t * B_pad + b), bf16 for the MXU.
    h0_tm = jnp.transpose(h0, (1, 0, 2)).reshape(T * B_pad, H).astype(jnp.bfloat16)

    out = _fused_forward(
        h0_tm, prepped["w_ih0"], prepped["w_hh0"], prepped["b0"],
        prepped["w_cat1"], prepped["b1"], prepped["w_cat2"], prepped["b2"],
        prepped["out_w"], prepped["out_b"], T, B_pad)
    return out[:B]


if __name__ == "__main__":
    key = jax.random.PRNGKey(0)
    kp, kx = jax.random.split(key)

    params = init_params(kp)
    prepped = prepare_params(params)

    B, T = 2, 8
    x = jax.random.normal(kx, (B, T, 1), dtype=jnp.float32)

    out = model_forward(prepped, x)
    jax.block_until_ready(out)
    assert out.shape == (B, 1), out.shape
    print("KERNEL_OK")
</pallas_src>

<mosaic_0001>
module attributes {stable_mosaic.version = 11 : i64} {
  func.func @_wavefront_lstm_kernel(%arg0: memref<64x128xbf16, #tpu.memory_space<vmem>>, %arg1: memref<128x512xbf16, #tpu.memory_space<vmem>>, %arg2: memref<128x512xbf16, #tpu.memory_space<vmem>>, %arg3: memref<1x512xf32, #tpu.memory_space<vmem>>, %arg4: memref<256x512xbf16, #tpu.memory_space<vmem>>, %arg5: memref<1x512xf32, #tpu.memory_space<vmem>>, %arg6: memref<256x512xbf16, #tpu.memory_space<vmem>>, %arg7: memref<1x512xf32, #tpu.memory_space<vmem>>, %arg8: memref<1x128xf32, #tpu.memory_space<vmem>>, %arg9: memref<1x1xf32, #tpu.memory_space<vmem>>, %arg10: memref<8x1xf32, #tpu.memory_space<vmem>>, %arg11: memref<64x512xf32, #tpu.memory_space<vmem>>) attributes {dimension_semantics = [], scalar_prefetch = 0 : i64, scratch_operands = 1 : i64, tpu.core_type = #tpu.core_type<tc>} {
    %c0 = arith.constant 0 : index
    %c0_0 = arith.constant 0 : index
    %0 = vector.load %arg0[%c0, %c0_0] : memref<64x128xbf16, #tpu.memory_space<vmem>>, vector<64x128xbf16>
    %c0_1 = arith.constant 0 : index
    %c0_2 = arith.constant 0 : index
    %1 = vector.load %arg1[%c0_1, %c0_2] : memref<128x512xbf16, #tpu.memory_space<vmem>>, vector<128x512xbf16>
    %cst = arith.constant dense<0.000000e+00> : vector<64x512xf32>
    %2 = tpu.matmul %0, %1, %cst {dimension_numbers = #tpu.dot_dimension_numbers<[1], [0], [0], [1], [0, 0, 1, 1], [], []>} : vector<64x128xbf16>, vector<128x512xbf16>, vector<64x512xf32> -> vector<64x512xf32>
    %c0_3 = arith.constant 0 : index
    %c0_4 = arith.constant 0 : index
    %3 = vector.load %arg3[%c0_3, %c0_4] : memref<1x512xf32, #tpu.memory_space<vmem>>, vector<1x512xf32>
    %4 = vector.broadcast %3 : vector<1x512xf32> to vector<64x512xf32>
    %5 = arith.addf %2, %4 : vector<64x512xf32>
    %c0_5 = arith.constant 0 : index
    %c0_6 = arith.constant 0 : index
    %6 = vector.load %arg11[%c0_5, %c0_6] : memref<64x512xf32, #tpu.memory_space<vmem>>, vector<64x512xf32>
    tpu.vector_store %arg11[%c0_5, %c0_6], %5 {strides = array<i32>} : memref<64x512xf32, #tpu.memory_space<vmem>>, vector<64x512xf32>,
    %cst_7 = arith.constant 0.000000e+00 : f32
    %7 = vector.broadcast %cst_7 : f32 to vector<8x128xf32>
    %c0_8 = arith.constant 0 : index
    %c0_9 = arith.constant 0 : index
    %8 = vector.load %arg11[%c0_8, %c0_9] : memref<64x512xf32, #tpu.memory_space<vmem>>, vector<8x512xf32>
    %9 = arith.truncf %7 : vector<8x128xf32> to vector<8x128xbf16>
    %c0_10 = arith.constant 0 : index
    %c0_11 = arith.constant 0 : index
    %10 = vector.load %arg2[%c0_10, %c0_11] : memref<128x512xbf16, #tpu.memory_space<vmem>>, vector<128x512xbf16>
    %cst_12 = arith.constant dense<0.000000e+00> : vector<8x512xf32>
    %11 = tpu.matmul %9, %10, %cst_12 {dimension_numbers = #tpu.dot_dimension_numbers<[1], [0], [0], [1], [0, 0, 1, 1], [], []>} : vector<8x128xbf16>, vector<128x512xbf16>, vector<8x512xf32> -> vector<8x512xf32>
    %12 = arith.addf %8, %11 : vector<8x512xf32>
    %13 = vector.extract_strided_slice %12 {offsets = [0, 0], sizes = [8, 384], strides = [1, 1]} : vector<8x512xf32> to vector<8x384xf32>
    %14 = arith.negf %13 : vector<8x384xf32>
    %15 = math.exp %14 : vector<8x384xf32>
    %cst_13 = arith.constant 1.000000e+00 : f32
    %16 = vector.broadcast %cst_13 : f32 to vector<8x384xf32>
    %17 = arith.addf %16, %15 : vector<8x384xf32>
    %18 = arith.divf %16, %17 : vector<8x384xf32>
    %19 = vector.extract_strided_slice %12 {offsets = [0, 384], sizes = [8, 128], strides = [1, 1]} : vector<8x512xf32> to vector<8x128xf32>
    %20 = math.tanh %19 : vector<8x128xf32>
    %21 = vector.extract_strided_slice %18 {offsets = [0, 0], sizes = [8, 128], strides = [1, 1]} : vector<8x384xf32> to vector<8x128xf32>
    %22 = vector.extract_strided_slice %18 {offsets = [0, 128], sizes = [8, 128], strides = [1, 1]} : vector<8x384xf32> to vector<8x128xf32>
    %23 = vector.extract_strided_slice %18 {offsets = [0, 256], sizes = [8, 128], strides = [1, 1]} : vector<8x384xf32> to vector<8x128xf32>
    %24 = arith.mulf %22, %7 : vector<8x128xf32>
    %25 = arith.mulf %21, %20 : vector<8x128xf32>
    %26 = arith.addf %24, %25 : vector<8x128xf32>
    %27 = math.tanh %26 : vector<8x128xf32>
    %28 = arith.mulf %23, %27 : vector<8x128xf32>
    %c8 = arith.constant 8 : index
    %c0_14 = arith.constant 0 : index
    %29 = vector.load %arg11[%c8, %c0_14] : memref<64x512xf32, #tpu.memory_space<vmem>>, vector<8x512xf32>
    %30 = arith.truncf %28 : vector<8x128xf32> to vector<8x128xbf16>
    %c0_15 = arith.constant 0 : index
    %c0_16 = arith.constant 0 : index
    %31 = vector.load %arg2[%c0_15, %c0_16] : memref<128x512xbf16, #tpu.memory_space<vmem>>, vector<128x512xbf16>
    %cst_17 = arith.constant dense<0.000000e+00> : vector<8x512xf32>
    %32 = tpu.matmul %30, %31, %cst_17 {dimension_numbers = #tpu.dot_dimension_numbers<[1], [0], [0], [1], [0, 0, 1, 1], [], []>} : vector<8x128xbf16>, vector<128x512xbf16>, vector<8x512xf32> -> vector<8x512xf32>
    %33 = arith.addf %29, %32 : vector<8x512xf32>
    %34 = vector.extract_strided_slice %33 {offsets = [0, 0], sizes = [8, 384], strides = [1, 1]} : vector<8x512xf32> to vector<8x384xf32>
    %35 = arith.negf %34 : vector<8x384xf32>
    %36 = math.exp %35 : vector<8x384xf32>
    %cst_18 = arith.constant 1.000000e+00 : f32
    %37 = vector.broadcast %cst_18 : f32 to vector<8x384xf32>
    %38 = arith.addf %37, %36 : vector<8x384xf32>
    %39 = arith.divf %37, %38 : vector<8x384xf32>
    %40 = vector.extract_strided_slice %33 {offsets = [0, 384], sizes = [8, 128], strides = [1, 1]} : vector<8x512xf32> to vector<8x128xf32>
    %41 = math.tanh %40 : vector<8x128xf32>
    %42 = vector.extract_strided_slice %39 {offsets = [0, 0], sizes = [8, 128], strides = [1, 1]} : vector<8x384xf32> to vector<8x128xf32>
    %43 = vector.extract_strided_slice %39 {offsets = [0, 128], sizes = [8, 128], strides = [1, 1]} : vector<8x384xf32> to vector<8x128xf32>
    %44 = vector.extract_strided_slice %39 {offsets = [0, 256], sizes = [8, 128], strides = [1, 1]} : vector<8x384xf32> to vector<8x128xf32>
    %45 = arith.mulf %43, %26 : vector<8x128xf32>
    %46 = arith.mulf %42, %41 : vector<8x128xf32>
    %47 = arith.addf %45, %46 : vector<8x128xf32>
    %48 = math.tanh %47 : vector<8x128xf32>
    %49 = arith.mulf %44, %48 : vector<8x128xf32>
    %50 = arith.truncf %28 : vector<8x128xf32> to vector<8x128xbf16>
    %51 = arith.truncf %7 : vector<8x128xf32> to vector<8x128xbf16>
    %52 = tpu.concatenate %50, %51 in 1 : vector<8x128xbf16>, vector<8x128xbf16> -> vector<8x256xbf16>
    %c0_19 = arith.constant 0 : index
    %c0_20 = arith.constant 0 : index
    %53 = vector.load %arg4[%c0_19, %c0_20] : memref<256x512xbf16, #tpu.memory_space<vmem>>, vector<256x512xbf16>
    %cst_21 = arith.constant dense<0.000000e+00> : vector<8x512xf32>
    %54 = tpu.matmul %52, %53, %cst_21 {dimension_numbers = #tpu.dot_dimension_numbers<[1], [0], [0], [1], [0, 0, 1, 1], [], []>} : vector<8x256xbf16>, vector<256x512xbf16>, vector<8x512xf32> -> vector<8x512xf32>
    %c0_22 = arith.constant 0 : index
    %c0_23 = arith.constant 0 : index
    %55 = vector.load %arg5[%c0_22, %c0_23] : memref<1x512xf32, #tpu.memory_space<vmem>>, vector<1x512xf32>
    %56 = vector.broadcast %55 : vector<1x512xf32> to vector<8x512xf32>
    %57 = arith.addf %54, %56 : vector<8x512xf32>
    %58 = vector.extract_strided_slice %57 {offsets = [0, 0], sizes = [8, 384], strides = [1, 1]} : vector<8x512xf32> to vector<8x384xf32>
    %59 = arith.negf %58 : vector<8x384xf32>
    %60 = math.exp %59 : vector<8x384xf32>
    %cst_24 = arith.constant 1.000000e+00 : f32
    %61 = vector.broadcast %cst_24 : f32 to vector<8x384xf32>
    %62 = arith.addf %61, %60 : vector<8x384xf32>
    %63 = arith.divf %61, %62 : vector<8x384xf32>
    %64 = vector.extract_strided_slice %57 {offsets = [0, 384], sizes = [8, 128], strides = [1, 1]} : vector<8x512xf32> to vector<8x128xf32>
    %65 = math.tanh %64 : vector<8x128xf32>
    %66 = vector.extract_strided_slice %63 {offsets = [0, 0], sizes = [8, 128], strides = [1, 1]} : vector<8x384xf32> to vector<8x128xf32>
    %67 = vector.extract_strided_slice %63 {offsets = [0, 128], sizes = [8, 128], strides = [1, 1]} : vector<8x384xf32> to vector<8x128xf32>
    %68 = vector.extract_strided_slice %63 {offsets = [0, 256], sizes = [8, 128], strides = [1, 1]} : vector<8x384xf32> to vector<8x128xf32>
    %69 = arith.mulf %67, %7 : vector<8x128xf32>
    %70 = arith.mulf %66, %65 : vector<8x128xf32>
    %71 = arith.addf %69, %70 : vector<8x128xf32>
    %72 = math.tanh %71 : vector<8x128xf32>
    %73 = arith.mulf %68, %72 : vector<8x128xf32>
    %c16 = arith.constant 16 : index
    %c0_25 = arith.constant 0 : index
    %74 = vector.load %arg11[%c16, %c0_25] : memref<64x512xf32, #tpu.memory_space<vmem>>, vector<8x512xf32>
    %75 = arith.truncf %49 : vector<8x128xf32> to vector<8x128xbf16>
    %c0_26 = arith.constant 0 : index
    %c0_27 = arith.constant 0 : index
    %76 = vector.load %arg2[%c0_26, %c0_27] : memref<128x512xbf16, #tpu.memory_space<vmem>>, vector<128x512xbf16>
    %cst_28 = arith.constant dense<0.000000e+00> : vector<8x512xf32>
    %77 = tpu.matmul %75, %76, %cst_28 {dimension_numbers = #tpu.dot_dimension_numbers<[1], [0], [0], [1], [0, 0, 1, 1], [], []>} : vector<8x128xbf16>, vector<128x512xbf16>, vector<8x512xf32> -> vector<8x512xf32>
    %78 = arith.addf %74, %77 : vector<8x512xf32>
    %79 = vector.extract_strided_slice %78 {offsets = [0, 0], sizes = [8, 384], strides = [1, 1]} : vector<8x512xf32> to vector<8x384xf32>
    %80 = arith.negf %79 : vector<8x384xf32>
    %81 = math.exp %80 : vector<8x384xf32>
    %cst_29 = arith.constant 1.000000e+00 : f32
    %82 = vector.broadcast %cst_29 : f32 to vector<8x384xf32>
    %83 = arith.addf %82, %81 : vector<8x384xf32>
    %84 = arith.divf %82, %83 : vector<8x384xf32>
    %85 = vector.extract_strided_slice %78 {offsets = [0, 384], sizes = [8, 128], strides = [1, 1]} : vector<8x512xf32> to vector<8x128xf32>
    %86 = math.tanh %85 : vector<8x128xf32>
    %87 = vector.extract_strided_slice %84 {offsets = [0, 0], sizes = [8, 128], strides = [1, 1]} : vector<8x384xf32> to vector<8x128xf32>
    %88 = vector.extract_strided_slice %84 {offsets = [0, 128], sizes = [8, 128], strides = [1, 1]} : vector<8x384xf32> to vector<8x128xf32>
    %89 = vector.extract_strided_slice %84 {offsets = [0, 256], sizes = [8, 128], strides = [1, 1]} : vector<8x384xf32> to vector<8x128xf32>
    %90 = arith.mulf %88, %47 : vector<8x128xf32>
    %91 = arith.mulf %87, %86 : vector<8x128xf32>
    %92 = arith.addf %90, %91 : vector<8x128xf32>
    %93 = math.tanh %92 : vector<8x128xf32>
    %94 = arith.mulf %89, %93 : vector<8x128xf32>
    %95 = arith.truncf %49 : vector<8x128xf32> to vector<8x128xbf16>
    %96 = arith.truncf %73 : vector<8x128xf32> to vector<8x128xbf16>
    %97 = tpu.concatenate %95, %96 in 1 : vector<8x128xbf16>, vector<8x128xbf16> -> vector<8x256xbf16>
    %c0_30 = arith.constant 0 : index
    %c0_31 = arith.constant 0 : index
    %98 = vector.load %arg4[%c0_30, %c0_31] : memref<256x512xbf16, #tpu.memory_space<vmem>>, vector<256x512xbf16>
    %cst_32 = arith.constant dense<0.000000e+00> : vector<8x512xf32>
    %99 = tpu.matmul %97, %98, %cst_32 {dimension_numbers = #tpu.dot_dimension_numbers<[1], [0], [0], [1], [0, 0, 1, 1], [], []>} : vector<8x256xbf16>, vector<256x512xbf16>, vector<8x512xf32> -> vector<8x512xf32>
    %c0_33 = arith.constant 0 : index
    %c0_34 = arith.constant 0 : index
    %100 = vector.load %arg5[%c0_33, %c0_34] : memref<1x512xf32, #tpu.memory_space<vmem>>, vector<1x512xf32>
    %101 = vector.broadcast %100 : vector<1x512xf32> to vector<8x512xf32>
    %102 = arith.addf %99, %101 : vector<8x512xf32>
    %103 = vector.extract_strided_slice %102 {offsets = [0, 0], sizes = [8, 384], strides = [1, 1]} : vector<8x512xf32> to vector<8x384xf32>
    %104 = arith.negf %103 : vector<8x384xf32>
    %105 = math.exp %104 : vector<8x384xf32>
    %cst_35 = arith.constant 1.000000e+00 : f32
    %106 = vector.broadcast %cst_35 : f32 to vector<8x384xf32>
    %107 = arith.addf %106, %105 : vector<8x384xf32>
    %108 = arith.divf %106, %107 : vector<8x384xf32>
    %109 = vector.extract_strided_slice %102 {offsets = [0, 384], sizes = [8, 128], strides = [1, 1]} : vector<8x512xf32> to vector<8x128xf32>
    %110 = math.tanh %109 : vector<8x128xf32>
    %111 = vector.extract_strided_slice %108 {offsets = [0, 0], sizes = [8, 128], strides = [1, 1]} : vector<8x384xf32> to vector<8x128xf32>
    %112 = vector.extract_strided_slice %108 {offsets = [0, 128], sizes = [8, 128], strides = [1, 1]} : vector<8x384xf32> to vector<8x128xf32>
    %113 = vector.extract_strided_slice %108 {offsets = [0, 256], sizes = [8, 128], strides = [1, 1]} : vector<8x384xf32> to vector<8x128xf32>
    %114 = arith.mulf %112, %71 : vector<8x128xf32>
    %115 = arith.mulf %111, %110 : vector<8x128xf32>
    %116 = arith.addf %114, %115 : vector<8x128xf32>
    %117 = math.tanh %116 : vector<8x128xf32>
    %118 = arith.mulf %113, %117 : vector<8x128xf32>
    %119 = arith.truncf %73 : vector<8x128xf32> to vector<8x128xbf16>
    %120 = arith.truncf %7 : vector<8x128xf32> to vector<8x128xbf16>
    %121 = tpu.concatenate %119, %120 in 1 : vector<8x128xbf16>, vector<8x128xbf16> -> vector<8x256xbf16>
    %c0_36 = arith.constant 0 : index
    %c0_37 = arith.constant 0 : index
    %122 = vector.load %arg6[%c0_36, %c0_37] : memref<256x512xbf16, #tpu.memory_space<vmem>>, vector<256x512xbf16>
    %cst_38 = arith.constant dense<0.000000e+00> : vector<8x512xf32>
    %123 = tpu.matmul %121, %122, %cst_38 {dimension_numbers = #tpu.dot_dimension_numbers<[1], [0], [0], [1], [0, 0, 1, 1], [], []>} : vector<8x256xbf16>, vector<256x512xbf16>, vector<8x512xf32> -> vector<8x512xf32>
    %c0_39 = arith.constant 0 : index
    %c0_40 = arith.constant 0 : index
    %124 = vector.load %arg7[%c0_39, %c0_40] : memref<1x512xf32, #tpu.memory_space<vmem>>, vector<1x512xf32>
    %125 = vector.broadcast %124 : vector<1x512xf32> to vector<8x512xf32>
    %126 = arith.addf %123, %125 : vector<8x512xf32>
    %127 = vector.extract_strided_slice %126 {offsets = [0, 0], sizes = [8, 384], strides = [1, 1]} : vector<8x512xf32> to vector<8x384xf32>
    %128 = arith.negf %127 : vector<8x384xf32>
    %129 = math.exp %128 : vector<8x384xf32>
    %cst_41 = arith.constant 1.000000e+00 : f32
    %130 = vector.broadcast %cst_41 : f32 to vector<8x384xf32>
    %131 = arith.addf %130, %129 : vector<8x384xf32>
    %132 = arith.divf %130, %131 : vector<8x384xf32>
    %133 = vector.extract_strided_slice %126 {offsets = [0, 384], sizes = [8, 128], strides = [1, 1]} : vector<8x512xf32> to vector<8x128xf32>
    %134 = math.tanh %133 : vector<8x128xf32>
    %135 = vector.extract_strided_slice %132 {offsets = [0, 0], sizes = [8, 128], strides = [1, 1]} : vector<8x384xf32> to vector<8x128xf32>
    %136 = vector.extract_strided_slice %132 {offsets = [0, 128], sizes = [8, 128], strides = [1, 1]} : vector<8x384xf32> to vector<8x128xf32>
    %137 = vector.extract_strided_slice %132 {offsets = [0, 256], sizes = [8, 128], strides = [1, 1]} : vector<8x384xf32> to vector<8x128xf32>
    %138 = arith.mulf %136, %7 : vector<8x128xf32>
    %139 = arith.mulf %135, %134 : vector<8x128xf32>
    %140 = arith.addf %138, %139 : vector<8x128xf32>
    %141 = math.tanh %140 : vector<8x128xf32>
    %142 = arith.mulf %137, %141 : vector<8x128xf32>
    %c24 = arith.constant 24 : index
    %c0_42 = arith.constant 0 : index
    %143 = vector.load %arg11[%c24, %c0_42] : memref<64x512xf32, #tpu.memory_space<vmem>>, vector<8x512xf32>
    %144 = arith.truncf %94 : vector<8x128xf32> to vector<8x128xbf16>
    %c0_43 = arith.constant 0 : index
    %c0_44 = arith.constant 0 : index
    %145 = vector.load %arg2[%c0_43, %c0_44] : memref<128x512xbf16, #tpu.memory_space<vmem>>, vector<128x512xbf16>
    %cst_45 = arith.constant dense<0.000000e+00> : vector<8x512xf32>
    %146 = tpu.matmul %144, %145, %cst_45 {dimension_numbers = #tpu.dot_dimension_numbers<[1], [0], [0], [1], [0, 0, 1, 1], [], []>} : vector<8x128xbf16>, vector<128x512xbf16>, vector<8x512xf32> -> vector<8x512xf32>
    %147 = arith.addf %143, %146 : vector<8x512xf32>
    %148 = vector.extract_strided_slice %147 {offsets = [0, 0], sizes = [8, 384], strides = [1, 1]} : vector<8x512xf32> to vector<8x384xf32>
    %149 = arith.negf %148 : vector<8x384xf32>
    %150 = math.exp %149 : vector<8x384xf32>
    %cst_46 = arith.constant 1.000000e+00 : f32
    %151 = vector.broadcast %cst_46 : f32 to vector<8x384xf32>
    %152 = arith.addf %151, %150 : vector<8x384xf32>
    %153 = arith.divf %151, %152 : vector<8x384xf32>
    %154 = vector.extract_strided_slice %147 {offsets = [0, 384], sizes = [8, 128], strides = [1, 1]} : vector<8x512xf32> to vector<8x128xf32>
    %155 = math.tanh %154 : vector<8x128xf32>
    %156 = vector.extract_strided_slice %153 {offsets = [0, 0], sizes = [8, 128], strides = [1, 1]} : vector<8x384xf32> to vector<8x128xf32>
    %157 = vector.extract_strided_slice %153 {offsets = [0, 128], sizes = [8, 128], strides = [1, 1]} : vector<8x384xf32> to vector<8x128xf32>
    %158 = vector.extract_strided_slice %153 {offsets = [0, 256], sizes = [8, 128], strides = [1, 1]} : vector<8x384xf32> to vector<8x128xf32>
    %159 = arith.mulf %157, %92 : vector<8x128xf32>
    %160 = arith.mulf %156, %155 : vector<8x128xf32>
    %161 = arith.addf %159, %160 : vector<8x128xf32>
    %162 = math.tanh %161 : vector<8x128xf32>
    %163 = arith.mulf %158, %162 : vector<8x128xf32>
    %164 = arith.truncf %94 : vector<8x128xf32> to vector<8x128xbf16>
    %165 = arith.truncf %118 : vector<8x128xf32> to vector<8x128xbf16>
    %166 = tpu.concatenate %164, %165 in 1 : vector<8x128xbf16>, vector<8x128xbf16> -> vector<8x256xbf16>
    %c0_47 = arith.constant 0 : index
    %c0_48 = arith.constant 0 : index
    %167 = vector.load %arg4[%c0_47, %c0_48] : memref<256x512xbf16, #tpu.memory_space<vmem>>, vector<256x512xbf16>
    %cst_49 = arith.constant dense<0.000000e+00> : vector<8x512xf32>
    %168 = tpu.matmul %166, %167, %cst_49 {dimension_numbers = #tpu.dot_dimension_numbers<[1], [0], [0], [1], [0, 0, 1, 1], [], []>} : vector<8x256xbf16>, vector<256x512xbf16>, vector<8x512xf32> -> vector<8x512xf32>
    %c0_50 = arith.constant 0 : index
    %c0_51 = arith.constant 0 : index
    %169 = vector.load %arg5[%c0_50, %c0_51] : memref<1x512xf32, #tpu.memory_space<vmem>>, vector<1x512xf32>
    %170 = vector.broadcast %169 : vector<1x512xf32> to vector<8x512xf32>
    %171 = arith.addf %168, %170 : vector<8x512xf32>
    %172 = vector.extract_strided_slice %171 {offsets = [0, 0], sizes = [8, 384], strides = [1, 1]} : vector<8x512xf32> to vector<8x384xf32>
    %173 = arith.negf %172 : vector<8x384xf32>
    %174 = math.exp %173 : vector<8x384xf32>
    %cst_52 = arith.constant 1.000000e+00 : f32
    %175 = vector.broadcast %cst_52 : f32 to vector<8x384xf32>
    %176 = arith.addf %175, %174 : vector<8x384xf32>
    %177 = arith.divf %175, %176 : vector<8x384xf32>
    %178 = vector.extract_strided_slice %171 {offsets = [0, 384], sizes = [8, 128], strides = [1, 1]} : vector<8x512xf32> to vector<8x128xf32>
    %179 = math.tanh %178 : vector<8x128xf32>
    %180 = vector.extract_strided_slice %177 {offsets = [0, 0], sizes = [8, 128], strides = [1, 1]} : vector<8x384xf32> to vector<8x128xf32>
    %181 = vector.extract_strided_slice %177 {offsets = [0, 128], sizes = [8, 128], strides = [1, 1]} : vector<8x384xf32> to vector<8x128xf32>
    %182 = vector.extract_strided_slice %177 {offsets = [0, 256], sizes = [8, 128], strides = [1, 1]} : vector<8x384xf32> to vector<8x128xf32>
    %183 = arith.mulf %181, %116 : vector<8x128xf32>
    %184 = arith.mulf %180, %179 : vector<8x128xf32>
    %185 = arith.addf %183, %184 : vector<8x128xf32>
    %186 = math.tanh %185 : vector<8x128xf32>
    %187 = arith.mulf %182, %186 : vector<8x128xf32>
    %188 = arith.truncf %118 : vector<8x128xf32> to vector<8x128xbf16>
    %189 = arith.truncf %142 : vector<8x128xf32> to vector<8x128xbf16>
    %190 = tpu.concatenate %188, %189 in 1 : vector<8x128xbf16>, vector<8x128xbf16> -> vector<8x256xbf16>
    %c0_53 = arith.constant 0 : index
    %c0_54 = arith.constant 0 : index
    %191 = vector.load %arg6[%c0_53, %c0_54] : memref<256x512xbf16, #tpu.memory_space<vmem>>, vector<256x512xbf16>
    %cst_55 = arith.constant dense<0.000000e+00> : vector<8x512xf32>
    %192 = tpu.matmul %190, %191, %cst_55 {dimension_numbers = #tpu.dot_dimension_numbers<[1], [0], [0], [1], [0, 0, 1, 1], [], []>} : vector<8x256xbf16>, vector<256x512xbf16>, vector<8x512xf32> -> vector<8x512xf32>
    %c0_56 = arith.constant 0 : index
    %c0_57 = arith.constant 0 : index
    %193 = vector.load %arg7[%c0_56, %c0_57] : memref<1x512xf32, #tpu.memory_space<vmem>>, vector<1x512xf32>
    %194 = vector.broadcast %193 : vector<1x512xf32> to vector<8x512xf32>
    %195 = arith.addf %192, %194 : vector<8x512xf32>
    %196 = vector.extract_strided_slice %195 {offsets = [0, 0], sizes = [8, 384], strides = [1, 1]} : vector<8x512xf32> to vector<8x384xf32>
    %197 = arith.negf %196 : vector<8x384xf32>
    %198 = math.exp %197 : vector<8x384xf32>
    %cst_58 = arith.constant 1.000000e+00 : f32
    %199 = vector.broadcast %cst_58 : f32 to vector<8x384xf32>
    %200 = arith.addf %199, %198 : vector<8x384xf32>
    %201 = arith.divf %199, %200 : vector<8x384xf32>
    %202 = vector.extract_strided_slice %195 {offsets = [0, 384], sizes = [8, 128], strides = [1, 1]} : vector<8x512xf32> to vector<8x128xf32>
    %203 = math.tanh %202 : vector<8x128xf32>
    %204 = vector.extract_strided_slice %201 {offsets = [0, 0], sizes = [8, 128], strides = [1, 1]} : vector<8x384xf32> to vector<8x128xf32>
    %205 = vector.extract_strided_slice %201 {offsets = [0, 128], sizes = [8, 128], strides = [1, 1]} : vector<8x384xf32> to vector<8x128xf32>
    %206 = vector.extract_strided_slice %201 {offsets = [0, 256], sizes = [8, 128], strides = [1, 1]} : vector<8x384xf32> to vector<8x128xf32>
    %207 = arith.mulf %205, %140 : vector<8x128xf32>
    %208 = arith.mulf %204, %203 : vector<8x128xf32>
    %209 = arith.addf %207, %208 : vector<8x128xf32>
    %210 = math.tanh %209 : vector<8x128xf32>
    %211 = arith.mulf %206, %210 : vector<8x128xf32>
    %c32 = arith.constant 32 : index
    %c0_59 = arith.constant 0 : index
    %212 = vector.load %arg11[%c32, %c0_59] : memref<64x512xf32, #tpu.memory_space<vmem>>, vector<8x512xf32>
    %213 = arith.truncf %163 : vector<8x128xf32> to vector<8x128xbf16>
    %c0_60 = arith.constant 0 : index
    %c0_61 = arith.constant 0 : index
    %214 = vector.load %arg2[%c0_60, %c0_61] : memref<128x512xbf16, #tpu.memory_space<vmem>>, vector<128x512xbf16>
    %cst_62 = arith.constant dense<0.000000e+00> : vector<8x512xf32>
    %215 = tpu.matmul %213, %214, %cst_62 {dimension_numbers = #tpu.dot_dimension_numbers<[1], [0], [0], [1], [0, 0, 1, 1], [], []>} : vector<8x128xbf16>, vector<128x512xbf16>, vector<8x512xf32> -> vector<8x512xf32>
    %216 = arith.addf %212, %215 : vector<8x512xf32>
    %217 = vector.extract_strided_slice %216 {offsets = [0, 0], sizes = [8, 384], strides = [1, 1]} : vector<8x512xf32> to vector<8x384xf32>
    %218 = arith.negf %217 : vector<8x384xf32>
    %219 = math.exp %218 : vector<8x384xf32>
    %cst_63 = arith.constant 1.000000e+00 : f32
    %220 = vector.broadcast %cst_63 : f32 to vector<8x384xf32>
    %221 = arith.addf %220, %219 : vector<8x384xf32>
    %222 = arith.divf %220, %221 : vector<8x384xf32>
    %223 = vector.extract_strided_slice %216 {offsets = [0, 384], sizes = [8, 128], strides = [1, 1]} : vector<8x512xf32> to vector<8x128xf32>
    %224 = math.tanh %223 : vector<8x128xf32>
    %225 = vector.extract_strided_slice %222 {offsets = [0, 0], sizes = [8, 128], strides = [1, 1]} : vector<8x384xf32> to vector<8x128xf32>
    %226 = vector.extract_strided_slice %222 {offsets = [0, 128], sizes = [8, 128], strides = [1, 1]} : vector<8x384xf32> to vector<8x128xf32>
    %227 = vector.extract_strided_slice %222 {offsets = [0, 256], sizes = [8, 128], strides = [1, 1]} : vector<8x384xf32> to vector<8x128xf32>
    %228 = arith.mulf %226, %161 : vector<8x128xf32>
    %229 = arith.mulf %225, %224 : vector<8x128xf32>
    %230 = arith.addf %228, %229 : vector<8x128xf32>
    %231 = math.tanh %230 : vector<8x128xf32>
    %232 = arith.mulf %227, %231 : vector<8x128xf32>
    %233 = arith.truncf %163 : vector<8x128xf32> to vector<8x128xbf16>
    %234 = arith.truncf %187 : vector<8x128xf32> to vector<8x128xbf16>
    %235 = tpu.concatenate %233, %234 in 1 : vector<8x128xbf16>, vector<8x128xbf16> -> vector<8x256xbf16>
    %c0_64 = arith.constant 0 : index
    %c0_65 = arith.constant 0 : index
    %236 = vector.load %arg4[%c0_64, %c0_65] : memref<256x512xbf16, #tpu.memory_space<vmem>>, vector<256x512xbf16>
    %cst_66 = arith.constant dense<0.000000e+00> : vector<8x512xf32>
    %237 = tpu.matmul %235, %236, %cst_66 {dimension_numbers = #tpu.dot_dimension_numbers<[1], [0], [0], [1], [0, 0, 1, 1], [], []>} : vector<8x256xbf16>, vector<256x512xbf16>, vector<8x512xf32> -> vector<8x512xf32>
    %c0_67 = arith.constant 0 : index
    %c0_68 = arith.constant 0 : index
    %238 = vector.load %arg5[%c0_67, %c0_68] : memref<1x512xf32, #tpu.memory_space<vmem>>, vector<1x512xf32>
    %239 = vector.broadcast %238 : vector<1x512xf32> to vector<8x512xf32>
    %240 = arith.addf %237, %239 : vector<8x512xf32>
    %241 = vector.extract_strided_slice %240 {offsets = [0, 0], sizes = [8, 384], strides = [1, 1]} : vector<8x512xf32> to vector<8x384xf32>
    %242 = arith.negf %241 : vector<8x384xf32>
    %243 = math.exp %242 : vector<8x384xf32>
    %cst_69 = arith.constant 1.000000e+00 : f32
    %244 = vector.broadcast %cst_69 : f32 to vector<8x384xf32>
    %245 = arith.addf %244, %243 : vector<8x384xf32>
    %246 = arith.divf %244, %245 : vector<8x384xf32>
    %247 = vector.extract_strided_slice %240 {offsets = [0, 384], sizes = [8, 128], strides = [1, 1]} : vector<8x512xf32> to vector<8x128xf32>
    %248 = math.tanh %247 : vector<8x128xf32>
    %249 = vector.extract_strided_slice %246 {offsets = [0, 0], sizes = [8, 128], strides = [1, 1]} : vector<8x384xf32> to vector<8x128xf32>
    %250 = vector.extract_strided_slice %246 {offsets = [0, 128], sizes = [8, 128], strides = [1, 1]} : vector<8x384xf32> to vector<8x128xf32>
    %251 = vector.extract_strided_slice %246 {offsets = [0, 256], sizes = [8, 128], strides = [1, 1]} : vector<8x384xf32> to vector<8x128xf32>
    %252 = arith.mulf %250, %185 : vector<8x128xf32>
    %253 = arith.mulf %249, %248 : vector<8x128xf32>
    %254 = arith.addf %252, %253 : vector<8x128xf32>
    %255 = math.tanh %254 : vector<8x128xf32>
    %256 = arith.mulf %251, %255 : vector<8x128xf32>
    %257 = arith.truncf %187 : vector<8x128xf32> to vector<8x128xbf16>
    %258 = arith.truncf %211 : vector<8x128xf32> to vector<8x128xbf16>
    %259 = tpu.concatenate %257, %258 in 1 : vector<8x128xbf16>, vector<8x128xbf16> -> vector<8x256xbf16>
    %c0_70 = arith.constant 0 : index
    %c0_71 = arith.constant 0 : index
    %260 = vector.load %arg6[%c0_70, %c0_71] : memref<256x512xbf16, #tpu.memory_space<vmem>>, vector<256x512xbf16>
    %cst_72 = arith.constant dense<0.000000e+00> : vector<8x512xf32>
    %261 = tpu.matmul %259, %260, %cst_72 {dimension_numbers = #tpu.dot_dimension_numbers<[1], [0], [0], [1], [0, 0, 1, 1], [], []>} : vector<8x256xbf16>, vector<256x512xbf16>, vector<8x512xf32> -> vector<8x512xf32>
    %c0_73 = arith.constant 0 : index
    %c0_74 = arith.constant 0 : index
    %262 = vector.load %arg7[%c0_73, %c0_74] : memref<1x512xf32, #tpu.memory_space<vmem>>, vector<1x512xf32>
    %263 = vector.broadcast %262 : vector<1x512xf32> to vector<8x512xf32>
    %264 = arith.addf %261, %263 : vector<8x512xf32>
    %265 = vector.extract_strided_slice %264 {offsets = [0, 0], sizes = [8, 384], strides = [1, 1]} : vector<8x512xf32> to vector<8x384xf32>
    %266 = arith.negf %265 : vector<8x384xf32>
    %267 = math.exp %266 : vector<8x384xf32>
    %cst_75 = arith.constant 1.000000e+00 : f32
    %268 = vector.broadcast %cst_75 : f32 to vector<8x384xf32>
    %269 = arith.addf %268, %267 : vector<8x384xf32>
    %270 = arith.divf %268, %269 : vector<8x384xf32>
    %271 = vector.extract_strided_slice %264 {offsets = [0, 384], sizes = [8, 128], strides = [1, 1]} : vector<8x512xf32> to vector<8x128xf32>
    %272 = math.tanh %271 : vector<8x128xf32>
    %273 = vector.extract_strided_slice %270 {offsets = [0, 0], sizes = [8, 128], strides = [1, 1]} : vector<8x384xf32> to vector<8x128xf32>
    %274 = vector.extract_strided_slice %270 {offsets = [0, 128], sizes = [8, 128], strides = [1, 1]} : vector<8x384xf32> to vector<8x128xf32>
    %275 = vector.extract_strided_slice %270 {offsets = [0, 256], sizes = [8, 128], strides = [1, 1]} : vector<8x384xf32> to vector<8x128xf32>
    %276 = arith.mulf %274, %209 : vector<8x128xf32>
    %277 = arith.mulf %273, %272 : vector<8x128xf32>
    %278 = arith.addf %276, %277 : vector<8x128xf32>
    %279 = math.tanh %278 : vector<8x128xf32>
    %280 = arith.mulf %275, %279 : vector<8x128xf32>
    %c40 = arith.constant 40 : index
    %c0_76 = arith.constant 0 : index
    %281 = vector.load %arg11[%c40, %c0_76] : memref<64x512xf32, #tpu.memory_space<vmem>>, vector<8x512xf32>
    %282 = arith.truncf %232 : vector<8x128xf32> to vector<8x128xbf16>
    %c0_77 = arith.constant 0 : index
    %c0_78 = arith.constant 0 : index
    %283 = vector.load %arg2[%c0_77, %c0_78] : memref<128x512xbf16, #tpu.memory_space<vmem>>, vector<128x512xbf16>
    %cst_79 = arith.constant dense<0.000000e+00> : vector<8x512xf32>
    %284 = tpu.matmul %282, %283, %cst_79 {dimension_numbers = #tpu.dot_dimension_numbers<[1], [0], [0], [1], [0, 0, 1, 1], [], []>} : vector<8x128xbf16>, vector<128x512xbf16>, vector<8x512xf32> -> vector<8x512xf32>
    %285 = arith.addf %281, %284 : vector<8x512xf32>
    %286 = vector.extract_strided_slice %285 {offsets = [0, 0], sizes = [8, 384], strides = [1, 1]} : vector<8x512xf32> to vector<8x384xf32>
    %287 = arith.negf %286 : vector<8x384xf32>
    %288 = math.exp %287 : vector<8x384xf32>
    %cst_80 = arith.constant 1.000000e+00 : f32
    %289 = vector.broadcast %cst_80 : f32 to vector<8x384xf32>
    %290 = arith.addf %289, %288 : vector<8x384xf32>
    %291 = arith.divf %289, %290 : vector<8x384xf32>
    %292 = vector.extract_strided_slice %285 {offsets = [0, 384], sizes = [8, 128], strides = [1, 1]} : vector<8x512xf32> to vector<8x128xf32>
    %293 = math.tanh %292 : vector<8x128xf32>
    %294 = vector.extract_strided_slice %291 {offsets = [0, 0], sizes = [8, 128], strides = [1, 1]} : vector<8x384xf32> to vector<8x128xf32>
    %295 = vector.extract_strided_slice %291 {offsets = [0, 128], sizes = [8, 128], strides = [1, 1]} : vector<8x384xf32> to vector<8x128xf32>
    %296 = vector.extract_strided_slice %291 {offsets = [0, 256], sizes = [8, 128], strides = [1, 1]} : vector<8x384xf32> to vector<8x128xf32>
    %297 = arith.mulf %295, %230 : vector<8x128xf32>
    %298 = arith.mulf %294, %293 : vector<8x128xf32>
    %299 = arith.addf %297, %298 : vector<8x128xf32>
    %300 = math.tanh %299 : vector<8x128xf32>
    %301 = arith.mulf %296, %300 : vector<8x128xf32>
    %302 = arith.truncf %232 : vector<8x128xf32> to vector<8x128xbf16>
    %303 = arith.truncf %256 : vector<8x128xf32> to vector<8x128xbf16>
    %304 = tpu.concatenate %302, %303 in 1 : vector<8x128xbf16>, vector<8x128xbf16> -> vector<8x256xbf16>
    %c0_81 = arith.constant 0 : index
    %c0_82 = arith.constant 0 : index
    %305 = vector.load %arg4[%c0_81, %c0_82] : memref<256x512xbf16, #tpu.memory_space<vmem>>, vector<256x512xbf16>
    %cst_83 = arith.constant dense<0.000000e+00> : vector<8x512xf32>
    %306 = tpu.matmul %304, %305, %cst_83 {dimension_numbers = #tpu.dot_dimension_numbers<[1], [0], [0], [1], [0, 0, 1, 1], [], []>} : vector<8x256xbf16>, vector<256x512xbf16>, vector<8x512xf32> -> vector<8x512xf32>
    %c0_84 = arith.constant 0 : index
    %c0_85 = arith.constant 0 : index
    %307 = vector.load %arg5[%c0_84, %c0_85] : memref<1x512xf32, #tpu.memory_space<vmem>>, vector<1x512xf32>
    %308 = vector.broadcast %307 : vector<1x512xf32> to vector<8x512xf32>
    %309 = arith.addf %306, %308 : vector<8x512xf32>
    %310 = vector.extract_strided_slice %309 {offsets = [0, 0], sizes = [8, 384], strides = [1, 1]} : vector<8x512xf32> to vector<8x384xf32>
    %311 = arith.negf %310 : vector<8x384xf32>
    %312 = math.exp %311 : vector<8x384xf32>
    %cst_86 = arith.constant 1.000000e+00 : f32
    %313 = vector.broadcast %cst_86 : f32 to vector<8x384xf32>
    %314 = arith.addf %313, %312 : vector<8x384xf32>
    %315 = arith.divf %313, %314 : vector<8x384xf32>
    %316 = vector.extract_strided_slice %309 {offsets = [0, 384], sizes = [8, 128], strides = [1, 1]} : vector<8x512xf32> to vector<8x128xf32>
    %317 = math.tanh %316 : vector<8x128xf32>
    %318 = vector.extract_strided_slice %315 {offsets = [0, 0], sizes = [8, 128], strides = [1, 1]} : vector<8x384xf32> to vector<8x128xf32>
    %319 = vector.extract_strided_slice %315 {offsets = [0, 128], sizes = [8, 128], strides = [1, 1]} : vector<8x384xf32> to vector<8x128xf32>
    %320 = vector.extract_strided_slice %315 {offsets = [0, 256], sizes = [8, 128], strides = [1, 1]} : vector<8x384xf32> to vector<8x128xf32>
    %321 = arith.mulf %319, %254 : vector<8x128xf32>
    %322 = arith.mulf %318, %317 : vector<8x128xf32>
    %323 = arith.addf %321, %322 : vector<8x128xf32>
    %324 = math.tanh %323 : vector<8x128xf32>
    %325 = arith.mulf %320, %324 : vector<8x128xf32>
    %326 = arith.truncf %256 : vector<8x128xf32> to vector<8x128xbf16>
    %327 = arith.truncf %280 : vector<8x128xf32> to vector<8x128xbf16>
    %328 = tpu.concatenate %326, %327 in 1 : vector<8x128xbf16>, vector<8x128xbf16> -> vector<8x256xbf16>
    %c0_87 = arith.constant 0 : index
    %c0_88 = arith.constant 0 : index
    %329 = vector.load %arg6[%c0_87, %c0_88] : memref<256x512xbf16, #tpu.memory_space<vmem>>, vector<256x512xbf16>
    %cst_89 = arith.constant dense<0.000000e+00> : vector<8x512xf32>
    %330 = tpu.matmul %328, %329, %cst_89 {dimension_numbers = #tpu.dot_dimension_numbers<[1], [0], [0], [1], [0, 0, 1, 1], [], []>} : vector<8x256xbf16>, vector<256x512xbf16>, vector<8x512xf32> -> vector<8x512xf32>
    %c0_90 = arith.constant 0 : index
    %c0_91 = arith.constant 0 : index
    %331 = vector.load %arg7[%c0_90, %c0_91] : memref<1x512xf32, #tpu.memory_space<vmem>>, vector<1x512xf32>
    %332 = vector.broadcast %331 : vector<1x512xf32> to vector<8x512xf32>
    %333 = arith.addf %330, %332 : vector<8x512xf32>
    %334 = vector.extract_strided_slice %333 {offsets = [0, 0], sizes = [8, 384], strides = [1, 1]} : vector<8x512xf32> to vector<8x384xf32>
    %335 = arith.negf %334 : vector<8x384xf32>
    %336 = math.exp %335 : vector<8x384xf32>
    %cst_92 = arith.constant 1.000000e+00 : f32
    %337 = vector.broadcast %cst_92 : f32 to vector<8x384xf32>
    %338 = arith.addf %337, %336 : vector<8x384xf32>
    %339 = arith.divf %337, %338 : vector<8x384xf32>
    %340 = vector.extract_strided_slice %333 {offsets = [0, 384], sizes = [8, 128], strides = [1, 1]} : vector<8x512xf32> to vector<8x128xf32>
    %341 = math.tanh %340 : vector<8x128xf32>
    %342 = vector.extract_strided_slice %339 {offsets = [0, 0], sizes = [8, 128], strides = [1, 1]} : vector<8x384xf32> to vector<8x128xf32>
    %343 = vector.extract_strided_slice %339 {offsets = [0, 128], sizes = [8, 128], strides = [1, 1]} : vector<8x384xf32> to vector<8x128xf32>
    %344 = vector.extract_strided_slice %339 {offsets = [0, 256], sizes = [8, 128], strides = [1, 1]} : vector<8x384xf32> to vector<8x128xf32>
    %345 = arith.mulf %343, %278 : vector<8x128xf32>
    %346 = arith.mulf %342, %341 : vector<8x128xf32>
    %347 = arith.addf %345, %346 : vector<8x128xf32>
    %348 = math.tanh %347 : vector<8x128xf32>
    %349 = arith.mulf %344, %348 : vector<8x128xf32>
    %c48 = arith.constant 48 : index
    %c0_93 = arith.constant 0 : index
    %350 = vector.load %arg11[%c48, %c0_93] : memref<64x512xf32, #tpu.memory_space<vmem>>, vector<8x512xf32>
    %351 = arith.truncf %301 : vector<8x128xf32> to vector<8x128xbf16>
    %c0_94 = arith.constant 0 : index
    %c0_95 = arith.constant 0 : index
    %352 = vector.load %arg2[%c0_94, %c0_95] : memref<128x512xbf16, #tpu.memory_space<vmem>>, vector<128x512xbf16>
    %cst_96 = arith.constant dense<0.000000e+00> : vector<8x512xf32>
    %353 = tpu.matmul %351, %352, %cst_96 {dimension_numbers = #tpu.dot_dimension_numbers<[1], [0], [0], [1], [0, 0, 1, 1], [], []>} : vector<8x128xbf16>, vector<128x512xbf16>, vector<8x512xf32> -> vector<8x512xf32>
    %354 = arith.addf %350, %353 : vector<8x512xf32>
    %355 = vector.extract_strided_slice %354 {offsets = [0, 0], sizes = [8, 384], strides = [1, 1]} : vector<8x512xf32> to vector<8x384xf32>
    %356 = arith.negf %355 : vector<8x384xf32>
    %357 = math.exp %356 : vector<8x384xf32>
    %cst_97 = arith.constant 1.000000e+00 : f32
    %358 = vector.broadcast %cst_97 : f32 to vector<8x384xf32>
    %359 = arith.addf %358, %357 : vector<8x384xf32>
    %360 = arith.divf %358, %359 : vector<8x384xf32>
    %361 = vector.extract_strided_slice %354 {offsets = [0, 384], sizes = [8, 128], strides = [1, 1]} : vector<8x512xf32> to vector<8x128xf32>
    %362 = math.tanh %361 : vector<8x128xf32>
    %363 = vector.extract_strided_slice %360 {offsets = [0, 0], sizes = [8, 128], strides = [1, 1]} : vector<8x384xf32> to vector<8x128xf32>
    %364 = vector.extract_strided_slice %360 {offsets = [0, 128], sizes = [8, 128], strides = [1, 1]} : vector<8x384xf32> to vector<8x128xf32>
    %365 = vector.extract_strided_slice %360 {offsets = [0, 256], sizes = [8, 128], strides = [1, 1]} : vector<8x384xf32> to vector<8x128xf32>
    %366 = arith.mulf %364, %299 : vector<8x128xf32>
    %367 = arith.mulf %363, %362 : vector<8x128xf32>
    %368 = arith.addf %366, %367 : vector<8x128xf32>
    %369 = math.tanh %368 : vector<8x128xf32>
    %370 = arith.mulf %365, %369 : vector<8x128xf32>
    %371 = arith.truncf %301 : vector<8x128xf32> to vector<8x128xbf16>
    %372 = arith.truncf %325 : vector<8x128xf32> to vector<8x128xbf16>
    %373 = tpu.concatenate %371, %372 in 1 : vector<8x128xbf16>, vector<8x128xbf16> -> vector<8x256xbf16>
    %c0_98 = arith.constant 0 : index
    %c0_99 = arith.constant 0 : index
    %374 = vector.load %arg4[%c0_98, %c0_99] : memref<256x512xbf16, #tpu.memory_space<vmem>>, vector<256x512xbf16>
    %cst_100 = arith.constant dense<0.000000e+00> : vector<8x512xf32>
    %375 = tpu.matmul %373, %374, %cst_100 {dimension_numbers = #tpu.dot_dimension_numbers<[1], [0], [0], [1], [0, 0, 1, 1], [], []>} : vector<8x256xbf16>, vector<256x512xbf16>, vector<8x512xf32> -> vector<8x512xf32>
    %c0_101 = arith.constant 0 : index
    %c0_102 = arith.constant 0 : index
    %376 = vector.load %arg5[%c0_101, %c0_102] : memref<1x512xf32, #tpu.memory_space<vmem>>, vector<1x512xf32>
    %377 = vector.broadcast %376 : vector<1x512xf32> to vector<8x512xf32>
    %378 = arith.addf %375, %377 : vector<8x512xf32>
    %379 = vector.extract_strided_slice %378 {offsets = [0, 0], sizes = [8, 384], strides = [1, 1]} : vector<8x512xf32> to vector<8x384xf32>
    %380 = arith.negf %379 : vector<8x384xf32>
    %381 = math.exp %380 : vector<8x384xf32>
    %cst_103 = arith.constant 1.000000e+00 : f32
    %382 = vector.broadcast %cst_103 : f32 to vector<8x384xf32>
    %383 = arith.addf %382, %381 : vector<8x384xf32>
    %384 = arith.divf %382, %383 : vector<8x384xf32>
    %385 = vector.extract_strided_slice %378 {offsets = [0, 384], sizes = [8, 128], strides = [1, 1]} : vector<8x512xf32> to vector<8x128xf32>
    %386 = math.tanh %385 : vector<8x128xf32>
    %387 = vector.extract_strided_slice %384 {offsets = [0, 0], sizes = [8, 128], strides = [1, 1]} : vector<8x384xf32> to vector<8x128xf32>
    %388 = vector.extract_strided_slice %384 {offsets = [0, 128], sizes = [8, 128], strides = [1, 1]} : vector<8x384xf32> to vector<8x128xf32>
    %389 = vector.extract_strided_slice %384 {offsets = [0, 256], sizes = [8, 128], strides = [1, 1]} : vector<8x384xf32> to vector<8x128xf32>
    %390 = arith.mulf %388, %323 : vector<8x128xf32>
    %391 = arith.mulf %387, %386 : vector<8x128xf32>
    %392 = arith.addf %390, %391 : vector<8x128xf32>
    %393 = math.tanh %392 : vector<8x128xf32>
    %394 = arith.mulf %389, %393 : vector<8x128xf32>
    %395 = arith.truncf %325 : vector<8x128xf32> to vector<8x128xbf16>
    %396 = arith.truncf %349 : vector<8x128xf32> to vector<8x128xbf16>
    %397 = tpu.concatenate %395, %396 in 1 : vector<8x128xbf16>, vector<8x128xbf16> -> vector<8x256xbf16>
    %c0_104 = arith.constant 0 : index
    %c0_105 = arith.constant 0 : index
    %398 = vector.load %arg6[%c0_104, %c0_105] : memref<256x512xbf16, #tpu.memory_space<vmem>>, vector<256x512xbf16>
    %cst_106 = arith.constant dense<0.000000e+00> : vector<8x512xf32>
    %399 = tpu.matmul %397, %398, %cst_106 {dimension_numbers = #tpu.dot_dimension_numbers<[1], [0], [0], [1], [0, 0, 1, 1], [], []>} : vector<8x256xbf16>, vector<256x512xbf16>, vector<8x512xf32> -> vector<8x512xf32>
    %c0_107 = arith.constant 0 : index
    %c0_108 = arith.constant 0 : index
    %400 = vector.load %arg7[%c0_107, %c0_108] : memref<1x512xf32, #tpu.memory_space<vmem>>, vector<1x512xf32>
    %401 = vector.broadcast %400 : vector<1x512xf32> to vector<8x512xf32>
    %402 = arith.addf %399, %401 : vector<8x512xf32>
    %403 = vector.extract_strided_slice %402 {offsets = [0, 0], sizes = [8, 384], strides = [1, 1]} : vector<8x512xf32> to vector<8x384xf32>
    %404 = arith.negf %403 : vector<8x384xf32>
    %405 = math.exp %404 : vector<8x384xf32>
    %cst_109 = arith.constant 1.000000e+00 : f32
    %406 = vector.broadcast %cst_109 : f32 to vector<8x384xf32>
    %407 = arith.addf %406, %405 : vector<8x384xf32>
    %408 = arith.divf %406, %407 : vector<8x384xf32>
    %409 = vector.extract_strided_slice %402 {offsets = [0, 384], sizes = [8, 128], strides = [1, 1]} : vector<8x512xf32> to vector<8x128xf32>
    %410 = math.tanh %409 : vector<8x128xf32>
    %411 = vector.extract_strided_slice %408 {offsets = [0, 0], sizes = [8, 128], strides = [1, 1]} : vector<8x384xf32> to vector<8x128xf32>
    %412 = vector.extract_strided_slice %408 {offsets = [0, 128], sizes = [8, 128], strides = [1, 1]} : vector<8x384xf32> to vector<8x128xf32>
    %413 = vector.extract_strided_slice %408 {offsets = [0, 256], sizes = [8, 128], strides = [1, 1]} : vector<8x384xf32> to vector<8x128xf32>
    %414 = arith.mulf %412, %347 : vector<8x128xf32>
    %415 = arith.mulf %411, %410 : vector<8x128xf32>
    %416 = arith.addf %414, %415 : vector<8x128xf32>
    %417 = math.tanh %416 : vector<8x128xf32>
    %418 = arith.mulf %413, %417 : vector<8x128xf32>
    %c56 = arith.constant 56 : index
    %c0_110 = arith.constant 0 : index
    %419 = vector.load %arg11[%c56, %c0_110] : memref<64x512xf32, #tpu.memory_space<vmem>>, vector<8x512xf32>
    %420 = arith.truncf %370 : vector<8x128xf32> to vector<8x128xbf16>
    %c0_111 = arith.constant 0 : index
    %c0_112 = arith.constant 0 : index
    %421 = vector.load %arg2[%c0_111, %c0_112] : memref<128x512xbf16, #tpu.memory_space<vmem>>, vector<128x512xbf16>
    %cst_113 = arith.constant dense<0.000000e+00> : vector<8x512xf32>
    %422 = tpu.matmul %420, %421, %cst_113 {dimension_numbers = #tpu.dot_dimension_numbers<[1], [0], [0], [1], [0, 0, 1, 1], [], []>} : vector<8x128xbf16>, vector<128x512xbf16>, vector<8x512xf32> -> vector<8x512xf32>
    %423 = arith.addf %419, %422 : vector<8x512xf32>
    %424 = vector.extract_strided_slice %423 {offsets = [0, 0], sizes = [8, 384], strides = [1, 1]} : vector<8x512xf32> to vector<8x384xf32>
    %425 = arith.negf %424 : vector<8x384xf32>
    %426 = math.exp %425 : vector<8x384xf32>
    %cst_114 = arith.constant 1.000000e+00 : f32
    %427 = vector.broadcast %cst_114 : f32 to vector<8x384xf32>
    %428 = arith.addf %427, %426 : vector<8x384xf32>
    %429 = arith.divf %427, %428 : vector<8x384xf32>
    %430 = vector.extract_strided_slice %423 {offsets = [0, 384], sizes = [8, 128], strides = [1, 1]} : vector<8x512xf32> to vector<8x128xf32>
    %431 = math.tanh %430 : vector<8x128xf32>
    %432 = vector.extract_strided_slice %429 {offsets = [0, 0], sizes = [8, 128], strides = [1, 1]} : vector<8x384xf32> to vector<8x128xf32>
    %433 = vector.extract_strided_slice %429 {offsets = [0, 128], sizes = [8, 128], strides = [1, 1]} : vector<8x384xf32> to vector<8x128xf32>
    %434 = vector.extract_strided_slice %429 {offsets = [0, 256], sizes = [8, 128], strides = [1, 1]} : vector<8x384xf32> to vector<8x128xf32>
    %435 = arith.mulf %433, %368 : vector<8x128xf32>
    %436 = arith.mulf %432, %431 : vector<8x128xf32>
    %437 = arith.addf %435, %436 : vector<8x128xf32>
    %438 = math.tanh %437 : vector<8x128xf32>
    %439 = arith.mulf %434, %438 : vector<8x128xf32>
    %440 = arith.truncf %370 : vector<8x128xf32> to vector<8x128xbf16>
    %441 = arith.truncf %394 : vector<8x128xf32> to vector<8x128xbf16>
    %442 = tpu.concatenate %440, %441 in 1 : vector<8x128xbf16>, vector<8x128xbf16> -> vector<8x256xbf16>
    %c0_115 = arith.constant 0 : index
    %c0_116 = arith.constant 0 : index
    %443 = vector.load %arg4[%c0_115, %c0_116] : memref<256x512xbf16, #tpu.memory_space<vmem>>, vector<256x512xbf16>
    %cst_117 = arith.constant dense<0.000000e+00> : vector<8x512xf32>
    %444 = tpu.matmul %442, %443, %cst_117 {dimension_numbers = #tpu.dot_dimension_numbers<[1], [0], [0], [1], [0, 0, 1, 1], [], []>} : vector<8x256xbf16>, vector<256x512xbf16>, vector<8x512xf32> -> vector<8x512xf32>
    %c0_118 = arith.constant 0 : index
    %c0_119 = arith.constant 0 : index
    %445 = vector.load %arg5[%c0_118, %c0_119] : memref<1x512xf32, #tpu.memory_space<vmem>>, vector<1x512xf32>
    %446 = vector.broadcast %445 : vector<1x512xf32> to vector<8x512xf32>
    %447 = arith.addf %444, %446 : vector<8x512xf32>
    %448 = vector.extract_strided_slice %447 {offsets = [0, 0], sizes = [8, 384], strides = [1, 1]} : vector<8x512xf32> to vector<8x384xf32>
    %449 = arith.negf %448 : vector<8x384xf32>
    %450 = math.exp %449 : vector<8x384xf32>
    %cst_120 = arith.constant 1.000000e+00 : f32
    %451 = vector.broadcast %cst_120 : f32 to vector<8x384xf32>
    %452 = arith.addf %451, %450 : vector<8x384xf32>
    %453 = arith.divf %451, %452 : vector<8x384xf32>
    %454 = vector.extract_strided_slice %447 {offsets = [0, 384], sizes = [8, 128], strides = [1, 1]} : vector<8x512xf32> to vector<8x128xf32>
    %455 = math.tanh %454 : vector<8x128xf32>
    %456 = vector.extract_strided_slice %453 {offsets = [0, 0], sizes = [8, 128], strides = [1, 1]} : vector<8x384xf32> to vector<8x128xf32>
    %457 = vector.extract_strided_slice %453 {offsets = [0, 128], sizes = [8, 128], strides = [1, 1]} : vector<8x384xf32> to vector<8x128xf32>
    %458 = vector.extract_strided_slice %453 {offsets = [0, 256], sizes = [8, 128], strides = [1, 1]} : vector<8x384xf32> to vector<8x128xf32>
    %459 = arith.mulf %457, %392 : vector<8x128xf32>
    %460 = arith.mulf %456, %455 : vector<8x128xf32>
    %461 = arith.addf %459, %460 : vector<8x128xf32>
    %462 = math.tanh %461 : vector<8x128xf32>
    %463 = arith.mulf %458, %462 : vector<8x128xf32>
    %464 = arith.truncf %394 : vector<8x128xf32> to vector<8x128xbf16>
    %465 = arith.truncf %418 : vector<8x128xf32> to vector<8x128xbf16>
    %466 = tpu.concatenate %464, %465 in 1 : vector<8x128xbf16>, vector<8x128xbf16> -> vector<8x256xbf16>
    %c0_121 = arith.constant 0 : index
    %c0_122 = arith.constant 0 : index
    %467 = vector.load %arg6[%c0_121, %c0_122] : memref<256x512xbf16, #tpu.memory_space<vmem>>, vector<256x512xbf16>
    %cst_123 = arith.constant dense<0.000000e+00> : vector<8x512xf32>
    %468 = tpu.matmul %466, %467, %cst_123 {dimension_numbers = #tpu.dot_dimension_numbers<[1], [0], [0], [1], [0, 0, 1, 1], [], []>} : vector<8x256xbf16>, vector<256x512xbf16>, vector<8x512xf32> -> vector<8x512xf32>
    %c0_124 = arith.constant 0 : index
    %c0_125 = arith.constant 0 : index
    %469 = vector.load %arg7[%c0_124, %c0_125] : memref<1x512xf32, #tpu.memory_space<vmem>>, vector<1x512xf32>
    %470 = vector.broadcast %469 : vector<1x512xf32> to vector<8x512xf32>
    %471 = arith.addf %468, %470 : vector<8x512xf32>
    %472 = vector.extract_strided_slice %471 {offsets = [0, 0], sizes = [8, 384], strides = [1, 1]} : vector<8x512xf32> to vector<8x384xf32>
    %473 = arith.negf %472 : vector<8x384xf32>
    %474 = math.exp %473 : vector<8x384xf32>
    %cst_126 = arith.constant 1.000000e+00 : f32
    %475 = vector.broadcast %cst_126 : f32 to vector<8x384xf32>
    %476 = arith.addf %475, %474 : vector<8x384xf32>
    %477 = arith.divf %475, %476 : vector<8x384xf32>
    %478 = vector.extract_strided_slice %471 {offsets = [0, 384], sizes = [8, 128], strides = [1, 1]} : vector<8x512xf32> to vector<8x128xf32>
    %479 = math.tanh %478 : vector<8x128xf32>
    %480 = vector.extract_strided_slice %477 {offsets = [0, 0], sizes = [8, 128], strides = [1, 1]} : vector<8x384xf32> to vector<8x128xf32>
    %481 = vector.extract_strided_slice %477 {offsets = [0, 128], sizes = [8, 128], strides = [1, 1]} : vector<8x384xf32> to vector<8x128xf32>
    %482 = vector.extract_strided_slice %477 {offsets = [0, 256], sizes = [8, 128], strides = [1, 1]} : vector<8x384xf32> to vector<8x128xf32>
    %483 = arith.mulf %481, %416 : vector<8x128xf32>
    %484 = arith.mulf %480, %479 : vector<8x128xf32>
    %485 = arith.addf %483, %484 : vector<8x128xf32>
    %486 = math.tanh %485 : vector<8x128xf32>
    %487 = arith.mulf %482, %486 : vector<8x128xf32>
    %488 = arith.truncf %439 : vector<8x128xf32> to vector<8x128xbf16>
    %489 = arith.truncf %463 : vector<8x128xf32> to vector<8x128xbf16>
    %490 = tpu.concatenate %488, %489 in 1 : vector<8x128xbf16>, vector<8x128xbf16> -> vector<8x256xbf16>
    %c0_127 = arith.constant 0 : index
    %c0_128 = arith.constant 0 : index
    %491 = vector.load %arg4[%c0_127, %c0_128] : memref<256x512xbf16, #tpu.memory_space<vmem>>, vector<256x512xbf16>
    %cst_129 = arith.constant dense<0.000000e+00> : vector<8x512xf32>
    %492 = tpu.matmul %490, %491, %cst_129 {dimension_numbers = #tpu.dot_dimension_numbers<[1], [0], [0], [1], [0, 0, 1, 1], [], []>} : vector<8x256xbf16>, vector<256x512xbf16>, vector<8x512xf32> -> vector<8x512xf32>
    %c0_130 = arith.constant 0 : index
    %c0_131 = arith.constant 0 : index
    %493 = vector.load %arg5[%c0_130, %c0_131] : memref<1x512xf32, #tpu.memory_space<vmem>>, vector<1x512xf32>
    %494 = vector.broadcast %493 : vector<1x512xf32> to vector<8x512xf32>
    %495 = arith.addf %492, %494 : vector<8x512xf32>
    %496 = vector.extract_strided_slice %495 {offsets = [0, 0], sizes = [8, 384], strides = [1, 1]} : vector<8x512xf32> to vector<8x384xf32>
    %497 = arith.negf %496 : vector<8x384xf32>
    %498 = math.exp %497 : vector<8x384xf32>
    %cst_132 = arith.constant 1.000000e+00 : f32
    %499 = vector.broadcast %cst_132 : f32 to vector<8x384xf32>
    %500 = arith.addf %499, %498 : vector<8x384xf32>
    %501 = arith.divf %499, %500 : vector<8x384xf32>
    %502 = vector.extract_strided_slice %495 {offsets = [0, 384], sizes = [8, 128], strides = [1, 1]} : vector<8x512xf32> to vector<8x128xf32>
    %503 = math.tanh %502 : vector<8x128xf32>
    %504 = vector.extract_strided_slice %501 {offsets = [0, 0], sizes = [8, 128], strides = [1, 1]} : vector<8x384xf32> to vector<8x128xf32>
    %505 = vector.extract_strided_slice %501 {offsets = [0, 128], sizes = [8, 128], strides = [1, 1]} : vector<8x384xf32> to vector<8x128xf32>
    %506 = vector.extract_strided_slice %501 {offsets = [0, 256], sizes = [8, 128], strides = [1, 1]} : vector<8x384xf32> to vector<8x128xf32>
    %507 = arith.mulf %505, %461 : vector<8x128xf32>
    %508 = arith.mulf %504, %503 : vector<8x128xf32>
    %509 = arith.addf %507, %508 : vector<8x128xf32>
    %510 = math.tanh %509 : vector<8x128xf32>
    %511 = arith.mulf %506, %510 : vector<8x128xf32>
    %512 = arith.truncf %463 : vector<8x128xf32> to vector<8x128xbf16>
    %513 = arith.truncf %487 : vector<8x128xf32> to vector<8x128xbf16>
    %514 = tpu.concatenate %512, %513 in 1 : vector<8x128xbf16>, vector<8x128xbf16> -> vector<8x256xbf16>
    %c0_133 = arith.constant 0 : index
    %c0_134 = arith.constant 0 : index
    %515 = vector.load %arg6[%c0_133, %c0_134] : memref<256x512xbf16, #tpu.memory_space<vmem>>, vector<256x512xbf16>
    %cst_135 = arith.constant dense<0.000000e+00> : vector<8x512xf32>
    %516 = tpu.matmul %514, %515, %cst_135 {dimension_numbers = #tpu.dot_dimension_numbers<[1], [0], [0], [1], [0, 0, 1, 1], [], []>} : vector<8x256xbf16>, vector<256x512xbf16>, vector<8x512xf32> -> vector<8x512xf32>
    %c0_136 = arith.constant 0 : index
    %c0_137 = arith.constant 0 : index
    %517 = vector.load %arg7[%c0_136, %c0_137] : memref<1x512xf32, #tpu.memory_space<vmem>>, vector<1x512xf32>
    %518 = vector.broadcast %517 : vector<1x512xf32> to vector<8x512xf32>
    %519 = arith.addf %516, %518 : vector<8x512xf32>
    %520 = vector.extract_strided_slice %519 {offsets = [0, 0], sizes = [8, 384], strides = [1, 1]} : vector<8x512xf32> to vector<8x384xf32>
    %521 = arith.negf %520 : vector<8x384xf32>
    %522 = math.exp %521 : vector<8x384xf32>
    %cst_138 = arith.constant 1.000000e+00 : f32
    %523 = vector.broadcast %cst_138 : f32 to vector<8x384xf32>
    %524 = arith.addf %523, %522 : vector<8x384xf32>
    %525 = arith.divf %523, %524 : vector<8x384xf32>
    %526 = vector.extract_strided_slice %519 {offsets = [0, 384], sizes = [8, 128], strides = [1, 1]} : vector<8x512xf32> to vector<8x128xf32>
    %527 = math.tanh %526 : vector<8x128xf32>
    %528 = vector.extract_strided_slice %525 {offsets = [0, 0], sizes = [8, 128], strides = [1, 1]} : vector<8x384xf32> to vector<8x128xf32>
    %529 = vector.extract_strided_slice %525 {offsets = [0, 128], sizes = [8, 128], strides = [1, 1]} : vector<8x384xf32> to vector<8x128xf32>
    %530 = vector.extract_strided_slice %525 {offsets = [0, 256], sizes = [8, 128], strides = [1, 1]} : vector<8x384xf32> to vector<8x128xf32>
    %531 = arith.mulf %529, %485 : vector<8x128xf32>
    %532 = arith.mulf %528, %527 : vector<8x128xf32>
    %533 = arith.addf %531, %532 : vector<8x128xf32>
    %534 = math.tanh %533 : vector<8x128xf32>
    %535 = arith.mulf %530, %534 : vector<8x128xf32>
    %536 = arith.truncf %511 : vector<8x128xf32> to vector<8x128xbf16>
    %537 = arith.truncf %535 : vector<8x128xf32> to vector<8x128xbf16>
    %538 = tpu.concatenate %536, %537 in 1 : vector<8x128xbf16>, vector<8x128xbf16> -> vector<8x256xbf16>
    %c0_139 = arith.constant 0 : index
    %c0_140 = arith.constant 0 : index
    %539 = vector.load %arg6[%c0_139, %c0_140] : memref<256x512xbf16, #tpu.memory_space<vmem>>, vector<256x512xbf16>
    %cst_141 = arith.constant dense<0.000000e+00> : vector<8x512xf32>
    %540 = tpu.matmul %538, %539, %cst_141 {dimension_numbers = #tpu.dot_dimension_numbers<[1], [0], [0], [1], [0, 0, 1, 1], [], []>} : vector<8x256xbf16>, vector<256x512xbf16>, vector<8x512xf32> -> vector<8x512xf32>
    %c0_142 = arith.constant 0 : index
    %c0_143 = arith.constant 0 : index
    %541 = vector.load %arg7[%c0_142, %c0_143] : memref<1x512xf32, #tpu.memory_space<vmem>>, vector<1x512xf32>
    %542 = vector.broadcast %541 : vector<1x512xf32> to vector<8x512xf32>
    %543 = arith.addf %540, %542 : vector<8x512xf32>
    %544 = vector.extract_strided_slice %543 {offsets = [0, 0], sizes = [8, 384], strides = [1, 1]} : vector<8x512xf32> to vector<8x384xf32>
    %545 = arith.negf %544 : vector<8x384xf32>
    %546 = math.exp %545 : vector<8x384xf32>
    %cst_144 = arith.constant 1.000000e+00 : f32
    %547 = vector.broadcast %cst_144 : f32 to vector<8x384xf32>
    %548 = arith.addf %547, %546 : vector<8x384xf32>
    %549 = arith.divf %547, %548 : vector<8x384xf32>
    %550 = vector.extract_strided_slice %543 {offsets = [0, 384], sizes = [8, 128], strides = [1, 1]} : vector<8x512xf32> to vector<8x128xf32>
    %551 = math.tanh %550 : vector<8x128xf32>
    %552 = vector.extract_strided_slice %549 {offsets = [0, 0], sizes = [8, 128], strides = [1, 1]} : vector<8x384xf32> to vector<8x128xf32>
    %553 = vector.extract_strided_slice %549 {offsets = [0, 128], sizes = [8, 128], strides = [1, 1]} : vector<8x384xf32> to vector<8x128xf32>
    %554 = vector.extract_strided_slice %549 {offsets = [0, 256], sizes = [8, 128], strides = [1, 1]} : vector<8x384xf32> to vector<8x128xf32>
    %555 = arith.mulf %553, %533 : vector<8x128xf32>
    %556 = arith.mulf %552, %551 : vector<8x128xf32>
    %557 = arith.addf %555, %556 : vector<8x128xf32>
    %558 = math.tanh %557 : vector<8x128xf32>
    %559 = arith.mulf %554, %558 : vector<8x128xf32>
    %c0_145 = arith.constant 0 : index
    %c0_146 = arith.constant 0 : index
    %560 = vector.load %arg8[%c0_145, %c0_146] : memref<1x128xf32, #tpu.memory_space<vmem>>, vector<1x128xf32>
    %561 = vector.broadcast %560 : vector<1x128xf32> to vector<8x128xf32>
    %562 = arith.mulf %559, %561 : vector<8x128xf32>
    %cst_147 = arith.constant dense<0.000000e+00> : vector<8xf32>
    %563 = vector.multi_reduction <add>, %562, %cst_147 [1] : vector<8x128xf32> to vector<8xf32>
    %564 = vector.shape_cast %563 : vector<8xf32> to vector<8x1xf32>
    %c0_148 = arith.constant 0 : index
    %c0_149 = arith.constant 0 : index
    %565 = vector.load %arg9[%c0_148, %c0_149] : memref<1x1xf32, #tpu.memory_space<vmem>>, vector<1x1xf32>
    %566 = vector.broadcast %565 : vector<1x1xf32> to vector<8x1xf32>
    %567 = arith.addf %564, %566 : vector<8x1xf32>
    %c0_150 = arith.constant 0 : index
    %c0_151 = arith.constant 0 : index
    %568 = vector.load %arg10[%c0_150, %c0_151] : memref<8x1xf32, #tpu.memory_space<vmem>>, vector<8x1xf32>
    tpu.vector_store %arg10[%c0_150, %c0_151], %567 {strides = array<i32>} : memref<8x1xf32, #tpu.memory_space<vmem>>, vector<8x1xf32>,
    return
  }
}

</mosaic_0001>

<bundles_post_ra>
// kernel: model_forward.1
= control target key start
LH: loop header
LB: loop body
LE: loop exit
PB: predicated region body
PF: predicated region fallthrough
CT: control target
= control target key end

     0   :  { %s8652_s0 = inlined_call_operand.vmem [shape: bf16[64,128], index: 0, kind: input, shape index: {}]   ;;  %s8653_s1 = inlined_call_operand.hbm [shape: bf16[128,512], index: 1, kind: input, shape index: {}]   ;;  %s8654_s2 = inlined_call_operand.hbm [shape: bf16[128,512], index: 2, kind: input, shape index: {}]   ;;  %s8655_s3 = inlined_call_operand.vmem [shape: f32[1,512], index: 3, kind: input, shape index: {}]   ;;  %s8656_s4 = inlined_call_operand.hbm [shape: bf16[256,512], index: 4, kind: input, shape index: {}]   ;;  %s8657_s5 = inlined_call_operand.vmem [shape: f32[1,512], index: 5, kind: input, shape index: {}]   ;;  %s8658_s6 = inlined_call_operand.hbm [shape: bf16[256,512], index: 6, kind: input, shape index: {}]   ;;  %s8659_s7 = inlined_call_operand.vmem [shape: f32[1,512], index: 7, kind: input, shape index: {}]   ;;  %s8660_s8 = inlined_call_operand.vmem [shape: f32[1,128], index: 8, kind: input, shape index: {}]   ;;  %s8661_s9 = inlined_call_operand.<no memory space> [shape: f32[1,1], index: 9, kind: input, shape index: {}]   ;;  %s8662_s10 = inlined_call_operand.vmem [shape: f32[8,1], index: 10, kind: output, shape index: {}]  }
   0x1   :  { %v15_v0 = vstv %s8661_s9 }
   0x2   :  { %16 = vst [vmem:[#allocation3] sm:$0x1] %v15_v0 }
   0x3   :  { %17 = vsyncpa [#allocation5], 0 }
   0x4   :  { %18 = vsyncpa [#allocation7], 0 }
   0x5   :  { %19 = vsyncpa [#allocation10], 0  ;;  %s5682_s15 = smov [#allocation6]   ;;  %s5683_s17 = smov [#allocation4]  }
   0x6   :  { %s39_s16 = sshll.u32 %s5682_s15, 4  ;;  %s27_s18 = sshll.u32 %s5683_s17, 4  ;;  %s40_s16 = int_to_ptr.vmem [resolvable:$true] %s39_s16  ;;  %s28_s18 = int_to_ptr.vmem [resolvable:$true] %s27_s18 }
   0x7   :  { %s5604_s19 = scalar_lea.vmem %s40_s16, 4096  ;;  %p5609_p1 = scmp.lt.s32.totalorder %s40_s16, %s40_s16 }
   0x8   :  { %p5605_p0 = scmp.ne.s32.totalorder %s40_s16, %s5604_s19  ;;  %p5610_p2 = scmp.lt.s32.totalorder %s5604_s19, %s5604_s19 }
   0xa   :  { %p5611_p3 = por %p5610_p2, %p5609_p1 }
   0xc   :  { %p5612_p4 = pnand %p5611_p3, %p5605_p0 }
   0xe   :  { %5615 = shalt.err (!%p5612_p4)
}
   0xf   :  { %s5684_s20 = smov 256   ;;  %s5685_s21 = smov 16  }
  0x10   :  { %45 = dma.hbm_to_vmem [thread:$0]  %s8654_s2, 4096, %s40_s16, [#allocation7], %s5684_s20, %s5684_s20, %s5685_s21  }
  0x11   :  { %s5624_s23 = scalar_lea.vmem %s28_s18, 4096  ;;  %p5629_p6 = scmp.lt.s32.totalorder %s28_s18, %s28_s18 }
  0x12   :  { %p5625_p5 = scmp.ne.s32.totalorder %s28_s18, %s5624_s23  ;;  %p5630_p7 = scmp.lt.s32.totalorder %s5624_s23, %s5624_s23 }
  0x14   :  { %p5631_p8 = por %p5630_p7, %p5629_p6 }
  0x16   :  { %p5632_p9 = pnand %p5631_p8, %p5625_p5 }
  0x18   :  { %5635 = shalt.err (!%p5632_p9)
}
  0x19   :  { %33 = dma.hbm_to_vmem [thread:$0]  %s8653_s1, 4096, %s28_s18, [#allocation5], %s5684_s20, %s5684_s20, %s5685_s21  }
  0x1a   :  { %s5686_s26 = smov [#allocation8]   ;;  %s5687_s28 = smov [#allocation9]  }
  0x1b   :  { %s53_s27 = sshll.u32 %s5686_s26, 4  ;;  %s67_s29 = sshll.u32 %s5687_s28, 4  ;;  %s54_s27 = int_to_ptr.vmem [resolvable:$true] %s53_s27  ;;  %s68_s29 = int_to_ptr.vmem [resolvable:$true] %s67_s29 }
  0x1c   :  { %s5644_s2 = scalar_lea.vmem %s54_s27, 8192  ;;  %p5649_p11 = scmp.lt.s32.totalorder %s54_s27, %s54_s27 }
  0x1d   :  { %p5645_p10 = scmp.ne.s32.totalorder %s54_s27, %s5644_s2  ;;  %p5650_p12 = scmp.lt.s32.totalorder %s5644_s2, %s5644_s2 }
  0x1f   :  { %p5651_p13 = por %p5650_p12, %p5649_p11 }
  0x21   :  { %p5652_p0 = pnand %p5651_p13, %p5645_p10 }
  0x23   :  { %5655 = shalt.err (!%p5652_p0)
}
  0x24   :  { %59 = dma.hbm_to_vmem [thread:$0]  %s8656_s4, 8192, %s54_s27, [#allocation7], %s5684_s20, %s5684_s20, %s5685_s21  }
  0x25   :  { %s5664_s1 = scalar_lea.vmem %s68_s29, 8192  ;;  %p5669_p2 = scmp.lt.s32.totalorder %s68_s29, %s68_s29 }
  0x26   :  { %p5665_p1 = scmp.ne.s32.totalorder %s68_s29, %s5664_s1  ;;  %p5670_p3 = scmp.lt.s32.totalorder %s5664_s1, %s5664_s1 }
  0x28   :  { %p5671_p4 = por %p5670_p3, %p5669_p2 }
  0x2a   :  { %p5672_p5 = pnand %p5671_p4, %p5665_p1 }
  0x2c   :  { %5675 = shalt.err (!%p5672_p5)
}
  0x2d   :  { %73 = dma.hbm_to_vmem [thread:$0]  %s8658_s6, 8192, %s68_s29, [#allocation10], %s5684_s20, %s5684_s20, %s5685_s21  }
  0x2e   :  { %5676 = dma.done.wait [#allocation5], 4096  }
  0x2f   :  { %5677 = vsyncadd [#allocation5], 4294963200 }
  0x30   :  { %5678 = dma.done.wait [#allocation7], 12288  }
  0x31   :  { %5679 = vsyncadd [#allocation7], 4294955008 }
  0x32   :  { %5680 = dma.done.wait [#allocation10], 8192  }
  0x33   :  { %5681 = vsyncadd [#allocation10], 4294959104  ;;  %v8663_v1 = vmov 0   ;;  %v4456_v2 = vld [vmem:[#allocation4 + $0xe4] ss:$16 sps:$4 sm:$0xff]   ;;  %vm4170_vm0 = vcmask 7168  }
  0x34   :  { %371 = vmatprep.mubr.bf16.mxu0 %v8663_v1  ;;  %444 = vmatprep.mubr.bf16.mxu1 %v8663_v1  ;;  %v4458_v3 = vld [vmem:[#allocation4 + $0xec] ss:$16 sps:$4 sm:$0xff]   ;;  %v4460_v4 = vld [vmem:[#allocation4 + $0xe0] ss:$16 sps:$4 sm:$0xff]   ;;  %v4461_v5 = vld [vmem:[#allocation4 + $0xe8] ss:$16 sps:$4 sm:$0xff]  }
  0x35   :  { %339 = vmatprep.subr.bf16.mxu0 %v4456_v2  ;;  %412 = vmatprep.subr.bf16.mxu1 %v4458_v3  ;;  %v4462_v6 = vld [vmem:[#allocation4 + $0xc4] ss:$16 sps:$4 sm:$0xff]   ;;  %v4464_v7 = vld [vmem:[#allocation4 + $0xcc] ss:$16 sps:$4 sm:$0xff]   ;;  %v4466_v8 = vld [vmem:[#allocation4 + $0xc0] ss:$16 sps:$4 sm:$0xff]  }
  0x36   :  { %340 = vmatpush1.bf16.msra.mxu0 %v4460_v4  ;;  %413 = vmatpush1.bf16.msra.mxu1 %v4461_v5  ;;  %v4467_v9 = vld [vmem:[#allocation4 + $0xc8] ss:$16 sps:$4 sm:$0xff]   ;;  %v4468_v10 = vld [vmem:[#allocation4 + $0xa4] ss:$16 sps:$4 sm:$0xff]   ;;  %v4470_v11 = vld [vmem:[#allocation4 + $0xac] ss:$16 sps:$4 sm:$0xff]  }
  0x37   :  { %341 = vmatprep.subr.bf16.mxu0 %v4462_v6  ;;  %414 = vmatprep.subr.bf16.mxu1 %v4464_v7  ;;  %v4472_v12 = vld [vmem:[#allocation4 + $0xa0] ss:$16 sps:$4 sm:$0xff]   ;;  %v4473_v13 = vld [vmem:[#allocation4 + $0xa8] ss:$16 sps:$4 sm:$0xff]   ;;  %v4474_v14 = vld [vmem:[#allocation4 + $0x84] ss:$16 sps:$4 sm:$0xff]  }
  0x38   :  { %v4476_v15 = vld [vmem:[#allocation4 + $0x8c] ss:$16 sps:$4 sm:$0xff]   ;;  %v4478_v16 = vld [vmem:[#allocation4 + $0x80] ss:$16 sps:$4 sm:$0xff]   ;;  %v4479_v17 = vld [vmem:[#allocation4 + $0x88] ss:$16 sps:$4 sm:$0xff]  }
  0x39   :  { %v4480_v18 = vld [vmem:[#allocation4 + $0x64] ss:$16 sps:$4 sm:$0xff]   ;;  %v4482_v19 = vld [vmem:[#allocation4 + $0x6c] ss:$16 sps:$4 sm:$0xff]   ;;  %v4484_v20 = vld [vmem:[#allocation4 + $0x60] ss:$16 sps:$4 sm:$0xff]  }
  0x3a   :  { %342 = vmatpush1.bf16.msra.mxu0 %v4466_v8  ;;  %415 = vmatpush1.bf16.msra.mxu1 %v4467_v9  ;;  %v4485_v21 = vld [vmem:[#allocation4 + $0x68] ss:$16 sps:$4 sm:$0xff]   ;;  %v4486_v22 = vld [vmem:[#allocation4 + $0x44] ss:$16 sps:$4 sm:$0xff]   ;;  %v4488_v23 = vld [vmem:[#allocation4 + $0x4c] ss:$16 sps:$4 sm:$0xff]   ;;  %v135_v9 = vlaneseq }
  0x3b   :  { %343 = vmatprep.subr.bf16.mxu0 %v4468_v10  ;;  %416 = vmatprep.subr.bf16.mxu1 %v4470_v11  ;;  %v4490_v24 = vld [vmem:[#allocation4 + $0x40] ss:$16 sps:$4 sm:$0xff]   ;;  %v4491_v25 = vld [vmem:[#allocation4 + $0x48] ss:$16 sps:$4 sm:$0xff]   ;;  %v4492_v26 = vld [vmem:[#allocation4 + $0x24] ss:$16 sps:$4 sm:$0xff]  }
  0x3c   :  { %v4494_v27 = vld [vmem:[#allocation4 + $0x2c] ss:$16 sps:$4 sm:$0xff]   ;;  %v4496_v28 = vld [vmem:[#allocation4 + $0x20] ss:$16 sps:$4 sm:$0xff]   ;;  %v4497_v29 = vld [vmem:[#allocation4 + $0x28] ss:$16 sps:$4 sm:$0xff]  }
  0x3d   :  { %v4498_v30 = vld [vmem:[#allocation4 + $0x4] ss:$16 sps:$4 sm:$0xff]   ;;  %v4500_v31 = vld [vmem:[#allocation4 + $0xc] ss:$16 sps:$4 sm:$0xff]   ;;  %v4502_v32 = vld [vmem:[#allocation4] ss:$16 sps:$4 sm:$0xff]  }
  0x3e   :  { %344 = vmatpush1.bf16.msra.mxu0 %v4472_v12  ;;  %417 = vmatpush1.bf16.msra.mxu1 %v4473_v13  ;;  %v4503_v33 = vld [vmem:[#allocation4 + $0x8] ss:$16 sps:$4 sm:$0xff]   ;;  %v5773_v34 = vld [vmem:[#allocation6 + $0xe4] ss:$16 sps:$4 sm:$0xff]   ;;  %v5775_v35 = vld [vmem:[#allocation6 + $0xec] ss:$16 sps:$4 sm:$0xff]  }
  0x3f   :  { %345 = vmatprep.subr.bf16.mxu0 %v4474_v14  ;;  %418 = vmatprep.subr.bf16.mxu1 %v4476_v15  ;;  %v4504_v36 = vld [vmem:[%s8652_s0] sm:$0xff]   ;;  %v5782_v38 = vld [vmem:[#allocation6 + $0xe8] ss:$16 sps:$4 sm:$0xff]   ;;  %v4530_v54 = vld [vmem:[%s8652_s0 + $0x10] sm:$0xff]   ;;  %v136_v10 = vshrl.u32 %v135_v9, 7 }
  0x40   :  { %v5780_v37 = vld [vmem:[#allocation6 + $0xe0] ss:$16 sps:$4 sm:$0xff]   ;;  %v5786_v39 = vld [vmem:[#allocation6 + $0xc4] ss:$16 sps:$4 sm:$0xff]   ;;  %v5788_v40 = vld [vmem:[#allocation6 + $0xcc] ss:$16 sps:$4 sm:$0xff]  }
  0x41   :  { %v5790_v41 = vld [vmem:[#allocation6 + $0xc0] ss:$16 sps:$4 sm:$0xff]   ;;  %v5794_v42 = vld [vmem:[#allocation6 + $0xc8] ss:$16 sps:$4 sm:$0xff]   ;;  %v5798_v43 = vld [vmem:[#allocation6 + $0xa4] ss:$16 sps:$4 sm:$0xff]  }
  0x42   :  { %346 = vmatpush1.bf16.msra.mxu0 %v4478_v16  ;;  %419 = vmatpush1.bf16.msra.mxu1 %v4479_v17  ;;  %v5800_v44 = vld [vmem:[#allocation6 + $0xac] ss:$16 sps:$4 sm:$0xff]   ;;  %v5807_v46 = vld [vmem:[#allocation6 + $0xa0] ss:$16 sps:$4 sm:$0xff]   ;;  %v5809_v47 = vld [vmem:[#allocation6 + $0xa8] ss:$16 sps:$4 sm:$0xff]  }
  0x43   :  { %347 = vmatprep.subr.bf16.mxu0 %v4480_v18  ;;  %420 = vmatprep.subr.bf16.mxu1 %v4482_v19  ;;  %v4517_v45 = vld [vmem:[%s8652_s0 + $0x8] sm:$0xff]   ;;  %v5819_v50 = vld [vmem:[#allocation6 + $0x80] ss:$16 sps:$4 sm:$0xff]   ;;  %v4543_v63 = vld [vmem:[%s8652_s0 + $0x18] sm:$0xff]   ;;  %v5931_v11 = vsub.s32 2, %v136_v10  ;;  %v5933_v12 = vsub.s32 0, %v136_v10 }
  0x44   :  { %v5813_v48 = vld [vmem:[#allocation6 + $0x84] ss:$16 sps:$4 sm:$0xff]   ;;  %v5817_v49 = vld [vmem:[#allocation6 + $0x8c] ss:$16 sps:$4 sm:$0xff]   ;;  %v5821_v51 = vld [vmem:[#allocation6 + $0x88] ss:$16 sps:$4 sm:$0xff]  }
  0x45   :  { %v5825_v52 = vld [vmem:[#allocation6 + $0x64] ss:$16 sps:$4 sm:$0xff]   ;;  %v5829_v53 = vld [vmem:[#allocation6 + $0x6c] ss:$16 sps:$4 sm:$0xff]   ;;  %v5836_v55 = vld [vmem:[#allocation6 + $0x60] ss:$16 sps:$4 sm:$0xff]  }
  0x46   :  { %348 = vmatpush1.bf16.msra.mxu0 %v4484_v20  ;;  %421 = vmatpush1.bf16.msra.mxu1 %v4485_v21  ;;  %v5838_v56 = vld [vmem:[#allocation6 + $0x68] ss:$16 sps:$4 sm:$0xff]   ;;  %v5840_v57 = vld [vmem:[#allocation6 + $0x44] ss:$16 sps:$4 sm:$0xff]   ;;  %v5842_v58 = vld [vmem:[#allocation6 + $0x4c] ss:$16 sps:$4 sm:$0xff]  }
  0x47   :  { %349 = vmatprep.subr.bf16.mxu0 %v4486_v22  ;;  %422 = vmatprep.subr.bf16.mxu1 %v4488_v23  ;;  %v5848_v59 = vld [vmem:[#allocation6 + $0x40] ss:$16 sps:$4 sm:$0xff]   ;;  %v5850_v60 = vld [vmem:[#allocation6 + $0x48] ss:$16 sps:$4 sm:$0xff]   ;;  %v5852_v61 = vld [vmem:[#allocation6 + $0x24] ss:$16 sps:$4 sm:$0xff]  }
  0x48   :  { %v5854_v62 = vld [vmem:[#allocation6 + $0x2c] ss:$16 sps:$4 sm:$0xff]   ;;  %v5865_v0 = vld [vmem:[#allocation6 + $0x20] ss:$16 sps:$4 sm:$0xff]   ;;  %v5867_v2 = vld [vmem:[#allocation6 + $0x28] ss:$16 sps:$4 sm:$0xff]  }
  0x49   :  { %v5869_v3 = vld [vmem:[#allocation6 + $0x4] ss:$16 sps:$4 sm:$0xff]   ;;  %v5871_v4 = vld [vmem:[#allocation6 + $0xc] ss:$16 sps:$4 sm:$0xff]   ;;  %v5877_v5 = vld [vmem:[#allocation6] ss:$16 sps:$4 sm:$0xff]  }
  0x4a   :  { %350 = vmatpush1.bf16.msra.mxu0 %v4490_v24  ;;  %423 = vmatpush1.bf16.msra.mxu1 %v4491_v25  ;;  %v5879_v6 = vld [vmem:[#allocation6 + $0x8] ss:$16 sps:$4 sm:$0xff]   ;;  %v5925_v7 = vld [vmem:[#allocation8 + $0xe4] ss:$16 sps:$4 sm:$0xff]   ;;  %v5927_v8 = vld [vmem:[#allocation8 + $0xec] ss:$16 sps:$4 sm:$0xff]  }
  0x4b   :  { %351 = vmatprep.subr.bf16.mxu0 %v4492_v26  ;;  %424 = vmatprep.subr.bf16.mxu1 %v4494_v27  ;;  %v5935_v13 = vsub.s32 3, %v136_v10  ;;  %v133_v14 = vld [vmem:[%s8655_s3] sm:$0xf]  ;;  %v5947_v18 = vsub.s32 1, %v136_v10 }
  0x4c   :  { %v5945_v17 = vrot.slane %v133_v14, %v5931_v11  ;;  %v138_v21 = vrot.slane %v133_v14, %v5933_v12 }
  0x4d   :  { %9038 = vst [vmem:[#allocation14_spill] sm:$0xff] %v5935_v13  ;;  %v5955_v22 = vrot.slane %v133_v14, %v5935_v13  ;;  %v142_v25 = vrot.slane %v133_v14, %v5947_v18  ;;  %v6115_v13 = vld [vmem:[#allocation8 + $0x28] ss:$16 sps:$4 sm:$0xff]  }
  0x4e   :  { %352 = vmatpush1.bf16.msra.mxu0 %v4496_v28  ;;  %425 = vmatpush1.bf16.msra.mxu1 %v4497_v29  ;;  %9072 = vst [vmem:[#allocation47_spill] sm:$0xff] %v6115_v13 }
  0x4f   :  { %353 = vmatprep.subr.bf16.mxu0 %v4498_v30  ;;  %426 = vmatprep.subr.bf16.mxu1 %v4500_v31 }
  0x52   :  { %354 = vmatpush1.bf16.msra.mxu0 %v4502_v32  ;;  %427 = vmatpush1.bf16.msra.mxu1 %v4503_v33 }
  0x53   :  { %713 = vmatprep.subr.bf16.mxu0 %v5773_v34  ;;  %754 = vmatprep.subr.bf16.mxu1 %v5775_v35 }
  0x55   :  { %372 = vmatmul.mubr.bf16.vlgmr.msra.gmra.mxu0 %v4504_v36  ;;  %445 = vmatmul.mubr.bf16.vlgmr.msra.gmra.mxu1 %v4504_v36 }
  0x56   :  { %714 = vmatpush1.bf16.msra.mxu0 %v5780_v37  ;;  %755 = vmatpush1.bf16.msra.mxu1 %v5782_v38 }
  0x57   :  { %715 = vmatprep.subr.bf16.mxu0 %v5786_v39  ;;  %756 = vmatprep.subr.bf16.mxu1 %v5788_v40 }
  0x58   :  { %381 = vmatprep.mubr.bf16.mxu0 %v8663_v1  ;;  %454 = vmatprep.mubr.bf16.mxu1 %v8663_v1 }
  0x5a   :  { %716 = vmatpush1.bf16.msra.mxu0 %v5790_v41  ;;  %757 = vmatpush1.bf16.msra.mxu1 %v5794_v42 }
  0x5b   :  { %717 = vmatprep.subr.bf16.mxu0 %v5798_v43  ;;  %758 = vmatprep.subr.bf16.mxu1 %v5800_v44 }
  0x5d   :  { %382 = vmatmul.mubr.bf16.gmra.mxu0 %v4517_v45  ;;  %455 = vmatmul.mubr.bf16.gmra.mxu1 %v4517_v45 }
  0x5e   :  { %718 = vmatpush1.bf16.msra.mxu0 %v5807_v46  ;;  %759 = vmatpush1.bf16.msra.mxu1 %v5809_v47 }
  0x5f   :  { %719 = vmatprep.subr.bf16.mxu0 %v5813_v48  ;;  %760 = vmatprep.subr.bf16.mxu1 %v5817_v49 }
  0x60   :  { %391 = vmatprep.mubr.bf16.mxu0 %v8663_v1  ;;  %464 = vmatprep.mubr.bf16.mxu1 %v8663_v1 }
  0x62   :  { %720 = vmatpush1.bf16.msra.mxu0 %v5819_v50  ;;  %761 = vmatpush1.bf16.msra.mxu1 %v5821_v51 }
  0x63   :  { %721 = vmatprep.subr.bf16.mxu0 %v5825_v52  ;;  %762 = vmatprep.subr.bf16.mxu1 %v5829_v53 }
  0x65   :  { %392 = vmatmul.mubr.bf16.gmra.mxu0 %v4530_v54  ;;  %465 = vmatmul.mubr.bf16.gmra.mxu1 %v4530_v54 }
  0x66   :  { %722 = vmatpush1.bf16.msra.mxu0 %v5836_v55  ;;  %763 = vmatpush1.bf16.msra.mxu1 %v5838_v56 }
  0x67   :  { %723 = vmatprep.subr.bf16.mxu0 %v5840_v57  ;;  %764 = vmatprep.subr.bf16.mxu1 %v5842_v58 }
  0x68   :  { %401 = vmatprep.mubr.bf16.mxu0 %v8663_v1  ;;  %474 = vmatprep.mubr.bf16.mxu1 %v8663_v1 }
  0x6a   :  { %724 = vmatpush1.bf16.msra.mxu0 %v5848_v59  ;;  %765 = vmatpush1.bf16.msra.mxu1 %v5850_v60 }
  0x6b   :  { %725 = vmatprep.subr.bf16.mxu0 %v5852_v61  ;;  %766 = vmatprep.subr.bf16.mxu1 %v5854_v62 }
  0x6d   :  { %402 = vmatmul.mubr.bf16.gmra.mxu0 %v4543_v63  ;;  %475 = vmatmul.mubr.bf16.gmra.mxu1 %v4543_v63 }
  0x6e   :  { %726 = vmatpush1.bf16.msra.mxu0 %v5865_v0  ;;  %767 = vmatpush1.bf16.msra.mxu1 %v5867_v2 }
  0x6f   :  { %727 = vmatprep.subr.bf16.mxu0 %v5869_v3  ;;  %768 = vmatprep.subr.bf16.mxu1 %v5871_v4 }
  0x70   :  { %745 = vmatprep.mubr.bf16.mxu0 %v8663_v1  ;;  %786 = vmatprep.mubr.bf16.mxu1 %v8663_v1 }
  0x72   :  { %728 = vmatpush1.bf16.msra.mxu0 %v5877_v5  ;;  %769 = vmatpush1.bf16.msra.mxu1 %v5879_v6 }
  0x73   :  { %828 = vmatprep.subr.bf16.mxu0 %v5773_v34  ;;  %869 = vmatprep.subr.bf16.mxu1 %v5775_v35 }
  0x75   :  { %746 = vmatmul.mubr.bf16.vlgmr.msra.gmra.mxu0 %v8663_v1  ;;  %787 = vmatmul.mubr.bf16.vlgmr.msra.gmra.mxu1 %v8663_v1 }
  0x76   :  { %829 = vmatpush1.bf16.msra.mxu0 %v5780_v37  ;;  %870 = vmatpush1.bf16.msra.mxu1 %v5782_v38 }
  0x77   :  { %830 = vmatprep.subr.bf16.mxu0 %v5786_v39  ;;  %871 = vmatprep.subr.bf16.mxu1 %v5788_v40 }
  0x78   :  { %860 = vmatprep.mubr.bf16.mxu0 %v8663_v1  ;;  %901 = vmatprep.mubr.bf16.mxu1 %v8663_v1 }
  0x7a   :  { %831 = vmatpush1.bf16.msra.mxu0 %v5790_v41  ;;  %872 = vmatpush1.bf16.msra.mxu1 %v5794_v42 }
  0x7b   :  { %832 = vmatprep.subr.bf16.mxu0 %v5798_v43  ;;  %873 = vmatprep.subr.bf16.mxu1 %v5800_v44 }
  0x7e   :  { %833 = vmatpush1.bf16.msra.mxu0 %v5807_v46  ;;  %874 = vmatpush1.bf16.msra.mxu1 %v5809_v47 }
  0x7f   :  { %834 = vmatprep.subr.bf16.mxu0 %v5813_v48  ;;  %875 = vmatprep.subr.bf16.mxu1 %v5817_v49 }
  0x82   :  { %835 = vmatpush1.bf16.msra.mxu0 %v5819_v50  ;;  %876 = vmatpush1.bf16.msra.mxu1 %v5821_v51 }
  0x83   :  { %836 = vmatprep.subr.bf16.mxu0 %v5825_v52  ;;  %877 = vmatprep.subr.bf16.mxu1 %v5829_v53 }
  0x86   :  { %837 = vmatpush1.bf16.msra.mxu0 %v5836_v55  ;;  %878 = vmatpush1.bf16.msra.mxu1 %v5838_v56 }
  0x87   :  { %838 = vmatprep.subr.bf16.mxu0 %v5840_v57  ;;  %879 = vmatprep.subr.bf16.mxu1 %v5842_v58 }
  0x8a   :  { %839 = vmatpush1.bf16.msra.mxu0 %v5848_v59  ;;  %880 = vmatpush1.bf16.msra.mxu1 %v5850_v60 }
  0x8b   :  { %840 = vmatprep.subr.bf16.mxu0 %v5852_v61  ;;  %881 = vmatprep.subr.bf16.mxu1 %v5854_v62 }
  0x8e   :  { %841 = vmatpush1.bf16.msra.mxu0 %v5865_v0  ;;  %882 = vmatpush1.bf16.msra.mxu1 %v5867_v2 }
  0x8f   :  { %842 = vmatprep.subr.bf16.mxu0 %v5869_v3  ;;  %883 = vmatprep.subr.bf16.mxu1 %v5871_v4 }
  0x92   :  { %843 = vmatpush1.bf16.msra.mxu0 %v5877_v5  ;;  %884 = vmatpush1.bf16.msra.mxu1 %v5879_v6 }
  0x93   :  { %1344 = vmatprep.subr.bf16.mxu0 %v5925_v7  ;;  %1385 = vmatprep.subr.bf16.mxu1 %v5927_v8 }
 0x115   :  { %v5940_v15 = vpop.f32.mrf.mxu0  ;;  %v5942_v16 = vpop.f32.mrf.mxu1 }
 0x117   :  { %v5949_v19 = vpop.f32.mrf.mxu0  ;;  %v5951_v20 = vpop.f32.mrf.mxu1 }
 0x119   :  { %v377_v23 = vpop.f32.mrf.mxu0  ;;  %v450_v24 = vpop.f32.mrf.mxu1 }
 0x11a   :  { %v5958_v26 = vadd.f32 %v377_v23, %v138_v21  ;;  %v5961_v27 = vadd.f32 %v450_v24, %v5945_v17 }
 0x11b   :  { %v379_v28 = vpop.f32.mrf.mxu0  ;;  %v452_v29 = vpop.f32.mrf.mxu1 }
 0x11c   :  { %v5963_v30 = vadd.f32 %v379_v28, %v142_v25  ;;  %v5966_v31 = vadd.f32 %v452_v29, %v5955_v22 }
 0x11d   :  { %v383_v32 = vpop.f32.mrf.mxu0  ;;  %v456_v33 = vpop.f32.mrf.mxu1 }
 0x11e   :  { %v5968_v34 = vadd.f32 %v383_v32, %v138_v21  ;;  %v5971_v35 = vadd.f32 %v456_v33, %v5945_v17 }
 0x11f   :  { %v385_v36 = vpop.f32.mrf.mxu0  ;;  %v458_v37 = vpop.f32.mrf.mxu1 }
 0x120   :  { %9039 = vst [vmem:[#allocation15_spill] sm:$0xff] %v5968_v34  ;;  %9040 = vst [vmem:[#allocation16_spill] sm:$0xff] %v5971_v35  ;;  %v5973_v38 = vadd.f32 %v385_v36, %v142_v25  ;;  %v5976_v39 = vadd.f32 %v458_v37, %v5955_v22  ;;  %v6107_v35 = vld [vmem:[#allocation8 + $0x24] ss:$16 sps:$4 sm:$0xff]   ;;  %v6113_v34 = vld [vmem:[#allocation8 + $0x20] ss:$16 sps:$4 sm:$0xff]  }
 0x121   :  { %v387_v40 = vpop.f32.mrf.mxu0  ;;  %v460_v45 = vpop.f32.mrf.mxu1  ;;  %9069 = vst [vmem:[#allocation44_spill] sm:$0xff] %v6107_v35  ;;  %9071 = vst [vmem:[#allocation46_spill] sm:$0xff] %v6113_v34 }
 0x122   :  { %9041 = vst [vmem:[#allocation17_spill] sm:$0xff] %v5973_v38  ;;  %9042 = vst [vmem:[#allocation18_spill] sm:$0xff] %v5976_v39  ;;  %v5978_v54 = vadd.f32 %v387_v40, %v138_v21  ;;  %v5981_v63 = vadd.f32 %v460_v45, %v5945_v17  ;;  %v6109_v38 = vld [vmem:[#allocation8 + $0x2c] ss:$16 sps:$4 sm:$0xff]  }
 0x123   :  { %v389_v9 = vpop.f32.mrf.mxu0  ;;  %v462_v10 = vpop.f32.mrf.mxu1  ;;  %9070 = vst [vmem:[#allocation45_spill] sm:$0xff] %v6109_v38 }
 0x124   :  { %9043 = vst [vmem:[#allocation19_spill] sm:$0xff] %v5978_v54  ;;  %9044 = vst [vmem:[#allocation20_spill] sm:$0xff] %v5981_v63  ;;  %v5983_v14 = vadd.f32 %v389_v9, %v142_v25  ;;  %v5986_v23 = vadd.f32 %v462_v10, %v5955_v22 }
 0x125   :  { %v393_v24 = vpop.f32.mrf.mxu0  ;;  %v466_v28 = vpop.f32.mrf.mxu1 }
 0x126   :  { %9045 = vst [vmem:[#allocation21_spill] sm:$0xff] %v5983_v14  ;;  %9046 = vst [vmem:[#allocation22_spill] sm:$0xff] %v5986_v23  ;;  %v5988_v29 = vadd.f32 %v393_v24, %v138_v21  ;;  %v5991_v32 = vadd.f32 %v466_v28, %v5945_v17 }
 0x127   :  { %v395_v33 = vpop.f32.mrf.mxu0  ;;  %v468_v36 = vpop.f32.mrf.mxu1 }
 0x128   :  { %9047 = vst [vmem:[#allocation23_spill] sm:$0xff] %v5988_v29  ;;  %9048 = vst [vmem:[#allocation24_spill] sm:$0xff] %v5991_v32  ;;  %v5993_v37 = vadd.f32 %v395_v33, %v142_v25  ;;  %v5996_v40 = vadd.f32 %v468_v36, %v5955_v22 }
 0x129   :  { %v397_v45 = vpop.f32.mrf.mxu0  ;;  %v470_v9 = vpop.f32.mrf.mxu1 }
 0x12a   :  { %9049 = vst [vmem:[#allocation25_spill] sm:$0xff] %v5993_v37  ;;  %9050 = vst [vmem:[#allocation26_spill] sm:$0xff] %v5996_v40  ;;  %v5998_v1 = vadd.f32 %v397_v45, %v138_v21  ;;  %v6001_v10 = vadd.f32 %v470_v9, %v5945_v17 }
 0x12b   :  { %v399_v23 = vpop.f32.mrf.mxu0  ;;  %v472_v24 = vpop.f32.mrf.mxu1 }
 0x12c   :  { %9051 = vst [vmem:[#allocation27_spill] sm:$0xff] %v5998_v1  ;;  %9052 = vst [vmem:[#allocation28_spill] sm:$0xff] %v6001_v10  ;;  %v6003_v29 = vadd.f32 %v399_v23, %v142_v25  ;;  %v6006_v28 = vadd.f32 %v472_v24, %v5955_v22 }
 0x12d   :  { %v403_v32 = vpop.f32.mrf.mxu0  ;;  %v476_v33 = vpop.f32.mrf.mxu1 }
 0x12e   :  { %9053 = vst [vmem:[#allocation29_spill] sm:$0xff] %v6003_v29  ;;  %9054 = vst [vmem:[#allocation30_spill] sm:$0xff] %v6006_v28  ;;  %v6008_v37 = vadd.f32 %v403_v32, %v138_v21  ;;  %v6011_v36 = vadd.f32 %v476_v33, %v5945_v17 }
 0x12f   :  { %v405_v40 = vpop.f32.mrf.mxu0  ;;  %v478_v45 = vpop.f32.mrf.mxu1 }
 0x130   :  { %9055 = vst [vmem:[#allocation31_spill] sm:$0xff] %v6008_v37  ;;  %9056 = vst [vmem:[#allocation32_spill] sm:$0xff] %v6011_v36  ;;  %v6013_v1 = vadd.f32 %v405_v40, %v142_v25  ;;  %v6016_v9 = vadd.f32 %v478_v45, %v5955_v22  ;;  %v374_v37 = vadd.f32 %v5940_v15, %v138_v21 }
 0x131   :  { %v407_v10 = vpop.f32.mrf.mxu0  ;;  %v480_v23 = vpop.f32.mrf.mxu1  ;;  %v376_v45 = vadd.f32 %v5949_v19, %v142_v25 }
 0x132   :  { %9057 = vst [vmem:[#allocation33_spill] sm:$0xff] %v6013_v1  ;;  %9058 = vst [vmem:[#allocation34_spill] sm:$0xff] %v6016_v9  ;;  %v6018_v29 = vadd.f32 %v407_v10, %v138_v21  ;;  %v6021_v24 = vadd.f32 %v480_v23, %v5945_v17  ;;  %v447_v21 = vadd.f32 %v5942_v16, %v5945_v17 }
 0x133   :  { %v409_v28 = vpop.f32.mrf.mxu0  ;;  %v482_v32 = vpop.f32.mrf.mxu1 }
 0x134   :  { %9059 = vst [vmem:[#allocation35_spill] sm:$0xff] %v6018_v29  ;;  %9060 = vst [vmem:[#allocation36_spill] sm:$0xff] %v6021_v24  ;;  %v6024_v33 = vadd.f32 %v409_v28, %v142_v25  ;;  %v6027_v36 = vadd.f32 %v482_v32, %v5955_v22  ;;  %v449_v32 = vadd.f32 %v5951_v20, %v5955_v22 }
 0x135   :  { %v747_v40 = vpop.f32.mrf.mxu0  ;;  %v788_v1 = vpop.f32.mrf.mxu1 }
 0x136   :  { %9061 = vst [vmem:[#allocation37_spill] sm:$0xff] %v6024_v33  ;;  %9062 = vst [vmem:[#allocation38_spill] sm:$0xff] %v6027_v36  ;;  %v795_v9 = vadd.f32 %v747_v40, %v374_v37  ;;  %v797_v28 = vadd.f32 %v788_v1, %v447_v21  ;;  %v6043_v21 = vld [vmem:[#allocation8 + $0xc4] ss:$16 sps:$4 sm:$0xff]   ;;  %v6101_v36 = vld [vmem:[#allocation8 + $0x40] ss:$16 sps:$4 sm:$0xff]  }
 0x137   :  { %v749_v63 = vpop.f32.mrf.mxu0  ;;  %v790_v10 = vpop.f32.mrf.mxu1  ;;  %9067 = vst [vmem:[#allocation42_spill] sm:$0xff] %v6101_v36  ;;  %v6103_v33 = vld [vmem:[#allocation8 + $0x48] ss:$16 sps:$4 sm:$0xff]  }
 0x138   :  { %v4247_v29 = vmul.f32 -1.442695, %v795_v9  ;;  %v796_v14 = vadd.f32 %v749_v63, %v376_v45  ;;  %v4249_v19 = vmul.f32 -1.442695, %v797_v28  ;;  %v798_v37 = vadd.f32 %v790_v10, %v449_v32  ;;  %v6037_v10 = vld [vmem:[#allocation8 + $0xe0] ss:$16 sps:$4 sm:$0xff]  }
 0x139   :  { %v751_v23 = vpop.f32.mrf.mxu0  ;;  %v792_v24 = vpop.f32.mrf.mxu1  ;;  %v6045_v28 = vld [vmem:[#allocation8 + $0xcc] ss:$16 sps:$4 sm:$0xff]   ;;  %v6051_v32 = vld [vmem:[#allocation8 + $0xc0] ss:$16 sps:$4 sm:$0xff]   ;;  %9068 = vst [vmem:[#allocation43_spill] sm:$0xff] %v6103_v33 }
 0x13a   :  { %4748 = vpow2.f32 %v4247_v29  ;;  %v4248_v54 = vmul.f32 -1.442695, %v796_v14  ;;  %v6039_v23 = vld [vmem:[#allocation8 + $0xe8] ss:$16 sps:$4 sm:$0xff]  }
 0x13b   :  { %v752_v39 = vpop.f32.mrf.mxu0  ;;  %v793_v15 = vpop.f32.mrf.mxu1 }
 0x13c   :  { %4750 = vpow2.f32 %v4248_v54 }
 0x13d   :  { %4752 = vpow2.f32 %v4249_v19  ;;  %v6053_v19 = vld [vmem:[#allocation8 + $0xc8] ss:$16 sps:$4 sm:$0xff]  }
 0x147   :  { %v4749_v25 = vpop.eup %4748 }
 0x148   :  { %v808_v40 = vadd.f32 1.0, %v4749_v25  ;;  %v6057_v25 = vld [vmem:[#allocation8 + $0xa4] ss:$16 sps:$4 sm:$0xff]  }
 0x149   :  { %v4751_v9 = vpop.eup %4750 }
 0x14a   :  { %4754 = vrcp.f32 %v808_v40  ;;  %v809_v63 = vadd.f32 1.0, %v4751_v9  ;;  %v4753_v39 = vpop.eup %4752  ;;  %v9063_v40 = vmov 0   ;;  %v6065_v9 = vld [vmem:[#allocation8 + $0xa0] ss:$16 sps:$4 sm:$0xff]  }
 0x14b   :  { %4756 = vtanh.f32 %v798_v37  ;;  %v810_v24 = vadd.f32 1.0, %v4753_v39  ;;  %v6059_v37 = vld [vmem:[#allocation8 + $0xac] ss:$16 sps:$4 sm:$0xff]   ;;  %v6071_v39 = vld [vmem:[#allocation8 + $0x84] ss:$16 sps:$4 sm:$0xff]  }
 0x14c   :  { %4758 = vrcp.f32 %v809_v63  ;;  %v6067_v63 = vld [vmem:[#allocation8 + $0xa8] ss:$16 sps:$4 sm:$0xff]  }
 0x14d   :  { %4760 = vrcp.f32 %v810_v24  ;;  %v6083_v24 = vld [vmem:[#allocation8 + $0x64] ss:$16 sps:$4 sm:$0xff]  }
 0x157   :  { %v4755_v14 = vpop.eup %4754 }
 0x158   :  { %v4757_v54 = vpop.eup %4756 }
 0x159   :  { %v4759_v29 = vpop.eup %4758  ;;  %v819_v1 = vmul.f32 %v4757_v54, %v4755_v14  ;;  %v6073_v14 = vld [vmem:[#allocation8 + $0x8c] ss:$16 sps:$4 sm:$0xff]   ;;  %v6077_v54 = vld [vmem:[#allocation8 + $0x80] ss:$16 sps:$4 sm:$0xff]  }
 0x15a   :  { %v818_v16 = vmul.f32 0.0, %v4759_v29  ;;  %v4761_v20 = vpop.eup %4760  ;;  %v6079_v29 = vld [vmem:[#allocation8 + $0x88] ss:$16 sps:$4 sm:$0xff]  }
 0x15c   :  { %v6034_v17 = vadd.f32 %v819_v1, %v818_v16  ;;  %v6085_v16 = vld [vmem:[#allocation8 + $0x6c] ss:$16 sps:$4 sm:$0xff]   ;;  %v6089_v1 = vld [vmem:[#allocation8 + $0x60] ss:$16 sps:$4 sm:$0xff]  }
 0x15e   :  { %4762 = vtanh.f32 %v6034_v17 }
 0x16b   :  { %v4763_v22 = vpop.eup %4762 }
 0x16c   :  { %v822_v45 = vmul.f32 %v4763_v22, %v4761_v20  ;;  %v6091_v20 = vld [vmem:[#allocation8 + $0x68] ss:$16 sps:$4 sm:$0xff]   ;;  %v6095_v22 = vld [vmem:[#allocation8 + $0x44] ss:$16 sps:$4 sm:$0xff]  }
 0x16d   :  { %9064 = vst [vmem:[#allocation39_spill] sm:$0xff] %v6091_v20  ;;  %9065 = vst [vmem:[#allocation40_spill] sm:$0xff] %v6095_v22 }
 0x16e   :  { %v6041_v15 = vpack.c.bf16 %v822_v45, %v822_v45  ;;  %v6097_v45 = vld [vmem:[#allocation8 + $0x4c] ss:$16 sps:$4 sm:$0xff]  }
 0x16f   :  { %9066 = vst [vmem:[#allocation41_spill] sm:$0xff] %v6097_v45 }
 0x170   :  { %861 = vmatmul.mubr.bf16.vlgmr.msra.gmra.mxu0 %v6041_v15  ;;  %902 = vmatmul.mubr.bf16.vlgmr.msra.gmra.mxu1 %v6041_v15 }
 0x171   :  { %1345 = vmatpush1.bf16.msra.mxu0 %v6037_v10  ;;  %1386 = vmatpush1.bf16.msra.mxu1 %v6039_v23 }
 0x172   :  { %1346 = vmatprep.subr.bf16.mxu0 %v6043_v21  ;;  %1387 = vmatprep.subr.bf16.mxu1 %v6045_v28 }
 0x173   :  { %1376 = vmatprep.mubr.bf16.mxu0 %v9063_v40  ;;  %1417 = vmatprep.mubr.bf16.mxu1 %v9063_v40 }
 0x175   :  { %1347 = vmatpush1.bf16.msra.mxu0 %v6051_v32  ;;  %1388 = vmatpush1.bf16.msra.mxu1 %v6053_v19 }
 0x176   :  { %1348 = vmatprep.subr.bf16.mxu0 %v6057_v25  ;;  %1389 = vmatprep.subr.bf16.mxu1 %v6059_v37 }
 0x179   :  { %1349 = vmatpush1.bf16.msra.mxu0 %v6065_v9  ;;  %1390 = vmatpush1.bf16.msra.mxu1 %v6067_v63 }
 0x17a   :  { %1350 = vmatprep.subr.bf16.mxu0 %v6071_v39  ;;  %1391 = vmatprep.subr.bf16.mxu1 %v6073_v14 }
 0x17d   :  { %1351 = vmatpush1.bf16.msra.mxu0 %v6077_v54  ;;  %1392 = vmatpush1.bf16.msra.mxu1 %v6079_v29 }
 0x17e   :  { %1352 = vmatprep.subr.bf16.mxu0 %v6083_v24  ;;  %1393 = vmatprep.subr.bf16.mxu1 %v6085_v16 }
 0x181   :  { %1353 = vmatpush1.bf16.msra.mxu0 %v6089_v1  ;;  %1394 = vmatpush1.bf16.msra.mxu1 %v6091_v20  ;;  %v6119_v20 = vld [vmem:[#allocation8 + $0x4] ss:$16 sps:$4 sm:$0xff]  }
 0x182   :  { %1354 = vmatprep.subr.bf16.mxu0 %v6095_v22  ;;  %1395 = vmatprep.subr.bf16.mxu1 %v6097_v45  ;;  %9073 = vst [vmem:[#allocation48_spill] sm:$0xff] %v6119_v20  ;;  %v6121_v22 = vld [vmem:[#allocation8 + $0xc] ss:$16 sps:$4 sm:$0xff]   ;;  %v6125_v45 = vld [vmem:[#allocation8] ss:$16 sps:$4 sm:$0xff]  }
 0x183   :  { %9074 = vst [vmem:[#allocation49_spill] sm:$0xff] %v6121_v22  ;;  %9075 = vst [vmem:[#allocation50_spill] sm:$0xff] %v6125_v45 }
 0x185   :  { %1355 = vmatpush1.bf16.msra.mxu0 %v6101_v36  ;;  %1396 = vmatpush1.bf16.msra.mxu1 %v6103_v33  ;;  %v6127_v36 = vld [vmem:[#allocation8 + $0x8] ss:$16 sps:$4 sm:$0xff]   ;;  %v6131_v33 = vld [vmem:[#allocation8 + $0x1e4] ss:$16 sps:$4 sm:$0xff]  }
 0x186   :  { %1356 = vmatprep.subr.bf16.mxu0 %v6107_v35  ;;  %1397 = vmatprep.subr.bf16.mxu1 %v6109_v38  ;;  %9076 = vst [vmem:[#allocation51_spill] sm:$0xff] %v6127_v36  ;;  %9077 = vst [vmem:[#allocation52_spill] sm:$0xff] %v6131_v33  ;;  %v6133_v35 = vld [vmem:[#allocation8 + $0x1ec] ss:$16 sps:$4 sm:$0xff]   ;;  %v6137_v38 = vld [vmem:[#allocation8 + $0x1e0] ss:$16 sps:$4 sm:$0xff]  }
 0x187   :  { %9078 = vst [vmem:[#allocation53_spill] sm:$0xff] %v6133_v35  ;;  %9079 = vst [vmem:[#allocation54_spill] sm:$0xff] %v6137_v38 }
 0x189   :  { %1357 = vmatpush1.bf16.msra.mxu0 %v6113_v34  ;;  %1398 = vmatpush1.bf16.msra.mxu1 %v6115_v13  ;;  %v6139_v34 = vld [vmem:[#allocation8 + $0x1e8] ss:$16 sps:$4 sm:$0xff]   ;;  %v6143_v13 = vld [vmem:[#allocation8 + $0x1c4] ss:$16 sps:$4 sm:$0xff]  }
 0x18a   :  { %1358 = vmatprep.subr.bf16.mxu0 %v6119_v20  ;;  %1399 = vmatprep.subr.bf16.mxu1 %v6121_v22  ;;  %9080 = vst [vmem:[#allocation55_spill] sm:$0xff] %v6139_v34  ;;  %9081 = vst [vmem:[#allocation56_spill] sm:$0xff] %v6143_v13  ;;  %v6145_v20 = vld [vmem:[#allocation8 + $0x1cc] ss:$16 sps:$4 sm:$0xff]   ;;  %v6149_v22 = vld [vmem:[#allocation8 + $0x1c0] ss:$16 sps:$4 sm:$0xff]  }
 0x18b   :  { %9082 = vst [vmem:[#allocation57_spill] sm:$0xff] %v6145_v20  ;;  %9083 = vst [vmem:[#allocation58_spill] sm:$0xff] %v6149_v22 }
 0x18d   :  { %1359 = vmatpush1.bf16.msra.mxu0 %v6125_v45  ;;  %1400 = vmatpush1.bf16.msra.mxu1 %v6127_v36  ;;  %v6151_v45 = vld [vmem:[#allocation8 + $0x1c8] ss:$16 sps:$4 sm:$0xff]   ;;  %v6155_v36 = vld [vmem:[#allocation8 + $0x1a4] ss:$16 sps:$4 sm:$0xff]  }
 0x18e   :  { %1360 = vmatprep.subr.bf16.mxu0 %v6131_v33  ;;  %1401 = vmatprep.subr.bf16.mxu1 %v6133_v35  ;;  %9084 = vst [vmem:[#allocation59_spill] sm:$0xff] %v6151_v45  ;;  %9085 = vst [vmem:[#allocation60_spill] sm:$0xff] %v6155_v36  ;;  %v6157_v33 = vld [vmem:[#allocation8 + $0x1ac] ss:$16 sps:$4 sm:$0xff]   ;;  %v6161_v35 = vld [vmem:[#allocation8 + $0x1a0] ss:$16 sps:$4 sm:$0xff]  }
 0x18f   :  { %9086 = vst [vmem:[#allocation61_spill] sm:$0xff] %v6157_v33  ;;  %9087 = vst [vmem:[#allocation62_spill] sm:$0xff] %v6161_v35 }
 0x191   :  { %1361 = vmatpush2.bf16.msra.mxu0 %v6137_v38  ;;  %1402 = vmatpush2.bf16.msra.mxu1 %v6139_v34  ;;  %v6163_v38 = vld [vmem:[#allocation8 + $0x1a8] ss:$16 sps:$4 sm:$0xff]   ;;  %v6167_v34 = vld [vmem:[#allocation8 + $0x184] ss:$16 sps:$4 sm:$0xff]  }
 0x192   :  { %1362 = vmatprep.subr.bf16.mxu0 %v6143_v13  ;;  %1403 = vmatprep.subr.bf16.mxu1 %v6145_v20  ;;  %9088 = vst [vmem:[#allocation63_spill] sm:$0xff] %v6163_v38  ;;  %9089 = vst [vmem:[#allocation64_spill] sm:$0xff] %v6167_v34  ;;  %v6169_v13 = vld [vmem:[#allocation8 + $0x18c] ss:$16 sps:$4 sm:$0xff]   ;;  %v6173_v20 = vld [vmem:[#allocation8 + $0x180] ss:$16 sps:$4 sm:$0xff]  }
 0x193   :  { %9090 = vst [vmem:[#allocation65_spill] sm:$0xff] %v6169_v13  ;;  %9091 = vst [vmem:[#allocation66_spill] sm:$0xff] %v6173_v20 }
 0x195   :  { %1363 = vmatpush2.bf16.msra.mxu0 %v6149_v22  ;;  %1404 = vmatpush2.bf16.msra.mxu1 %v6151_v45  ;;  %v6175_v22 = vld [vmem:[#allocation8 + $0x188] ss:$16 sps:$4 sm:$0xff]   ;;  %v6179_v45 = vld [vmem:[#allocation8 + $0x164] ss:$16 sps:$4 sm:$0xff]  }
 0x196   :  { %1364 = vmatprep.subr.bf16.mxu0 %v6155_v36  ;;  %1405 = vmatprep.subr.bf16.mxu1 %v6157_v33  ;;  %9092 = vst [vmem:[#allocation67_spill] sm:$0xff] %v6175_v22  ;;  %9093 = vst [vmem:[#allocation68_spill] sm:$0xff] %v6179_v45  ;;  %v6181_v36 = vld [vmem:[#allocation8 + $0x16c] ss:$16 sps:$4 sm:$0xff]   ;;  %v6185_v33 = vld [vmem:[#allocation8 + $0x160] ss:$16 sps:$4 sm:$0xff]  }
 0x197   :  { %9094 = vst [vmem:[#allocation69_spill] sm:$0xff] %v6181_v36  ;;  %9095 = vst [vmem:[#allocation70_spill] sm:$0xff] %v6185_v33 }
 0x199   :  { %1365 = vmatpush2.bf16.msra.mxu0 %v6161_v35  ;;  %1406 = vmatpush2.bf16.msra.mxu1 %v6163_v38  ;;  %v6187_v35 = vld [vmem:[#allocation8 + $0x168] ss:$16 sps:$4 sm:$0xff]   ;;  %v6191_v38 = vld [vmem:[#allocation8 + $0x144] ss:$16 sps:$4 sm:$0xff]  }
 0x19a   :  { %1366 = vmatprep.subr.bf16.mxu0 %v6167_v34  ;;  %1407 = vmatprep.subr.bf16.mxu1 %v6169_v13  ;;  %9096 = vst [vmem:[#allocation71_spill] sm:$0xff] %v6187_v35  ;;  %9097 = vst [vmem:[#allocation72_spill] sm:$0xff] %v6191_v38  ;;  %v6193_v34 = vld [vmem:[#allocation8 + $0x14c] ss:$16 sps:$4 sm:$0xff]   ;;  %v6197_v13 = vld [vmem:[#allocation8 + $0x140] ss:$16 sps:$4 sm:$0xff]  }
 0x19b   :  { %9098 = vst [vmem:[#allocation73_spill] sm:$0xff] %v6193_v34  ;;  %9099 = vst [vmem:[#allocation74_spill] sm:$0xff] %v6197_v13 }
 0x19d   :  { %1367 = vmatpush2.bf16.msra.mxu0 %v6173_v20  ;;  %1408 = vmatpush2.bf16.msra.mxu1 %v6175_v22  ;;  %v6199_v20 = vld [vmem:[#allocation8 + $0x148] ss:$16 sps:$4 sm:$0xff]   ;;  %v6203_v22 = vld [vmem:[#allocation8 + $0x124] ss:$16 sps:$4 sm:$0xff]  }
 0x19e   :  { %1368 = vmatprep.subr.bf16.mxu0 %v6179_v45  ;;  %1409 = vmatprep.subr.bf16.mxu1 %v6181_v36  ;;  %9100 = vst [vmem:[#allocation75_spill] sm:$0xff] %v6203_v22  ;;  %v6205_v45 = vld [vmem:[#allocation8 + $0x12c] ss:$16 sps:$4 sm:$0xff]   ;;  %v6209_v36 = vld [vmem:[#allocation8 + $0x120] ss:$16 sps:$4 sm:$0xff]  }
 0x19f   :  { %9101 = vst [vmem:[#allocation76_spill] sm:$0xff] %v6205_v45 }
 0x1a1   :  { %1369 = vmatpush2.bf16.msra.mxu0 %v6185_v33  ;;  %1410 = vmatpush2.bf16.msra.mxu1 %v6187_v35  ;;  %v6211_v33 = vld [vmem:[#allocation8 + $0x128] ss:$16 sps:$4 sm:$0xff]   ;;  %v6215_v35 = vld [vmem:[#allocation8 + $0x104] ss:$16 sps:$4 sm:$0xff]  }
 0x1a2   :  { %1370 = vmatprep.subr.bf16.mxu0 %v6191_v38  ;;  %1411 = vmatprep.subr.bf16.mxu1 %v6193_v34  ;;  %9102 = vst [vmem:[#allocation77_spill] sm:$0xff] %v6211_v33  ;;  %v6217_v38 = vld [vmem:[#allocation8 + $0x10c] ss:$16 sps:$4 sm:$0xff]   ;;  %v6221_v34 = vld [vmem:[#allocation8 + $0x100] ss:$16 sps:$4 sm:$0xff]  }
 0x1a3   :  { %9103 = vst [vmem:[#allocation78_spill] sm:$0xff] %v6217_v38 }
 0x1a5   :  { %1371 = vmatpush2.bf16.msra.mxu0 %v6197_v13  ;;  %1412 = vmatpush2.bf16.msra.mxu1 %v6199_v20  ;;  %v6223_v13 = vld [vmem:[#allocation8 + $0x108] ss:$16 sps:$4 sm:$0xff]  }
 0x1a6   :  { %1372 = vmatprep.subr.bf16.mxu0 %v6203_v22  ;;  %1413 = vmatprep.subr.bf16.mxu1 %v6205_v45  ;;  %9104 = vst [vmem:[#allocation79_spill] sm:$0xff] %v6223_v13  ;;  %v6229_v45 = vld [vmem:[#allocation6 + $0xe4] ss:$16 sps:$4 sm:$0xff]   ;;  %v6232_v22 = vld [vmem:[#allocation6 + $0xec] ss:$16 sps:$4 sm:$0xff]  }
 0x1a7   :  { %9105 = vst [vmem:[#allocation80_spill] sm:$0xff] %v6229_v45 }
 0x1a9   :  { %1373 = vmatpush2.bf16.msra.mxu0 %v6209_v36  ;;  %1414 = vmatpush2.bf16.msra.mxu1 %v6211_v33  ;;  %v6237_v33 = vld [vmem:[#allocation6 + $0xe0] ss:$16 sps:$4 sm:$0xff]  }
 0x1aa   :  { %1374 = vmatprep.subr.bf16.mxu0 %v6215_v35  ;;  %1415 = vmatprep.subr.bf16.mxu1 %v6217_v38  ;;  %v6240_v38 = vld [vmem:[#allocation6 + $0xe8] ss:$16 sps:$4 sm:$0xff]  }
 0x1ad   :  { %1375 = vmatpush2.bf16.msra.mxu0 %v6221_v34  ;;  %1416 = vmatpush2.bf16.msra.mxu1 %v6223_v13  ;;  %v6243_v13 = vld [vmem:[#allocation6 + $0xc4] ss:$16 sps:$4 sm:$0xff]  }
 0x1ae   :  { %1455 = vmatprep.subr.bf16.mxu0 %v6229_v45  ;;  %1496 = vmatprep.subr.bf16.mxu1 %v6232_v22  ;;  %v6246_v45 = vld [vmem:[#allocation6 + $0xcc] ss:$16 sps:$4 sm:$0xff]  }
 0x1b0   :  { %1377 = vmatmul.mubr.bf16.vlgmr.msra.gmra.mxu0 %v6041_v15  ;;  %1418 = vmatmul.mubr.bf16.vlgmr.msra.gmra.mxu1 %v6041_v15 }
 0x1b1   :  { %1456 = vmatpush1.bf16.msra.mxu0 %v6237_v33  ;;  %1497 = vmatpush1.bf16.msra.mxu1 %v6240_v38 }
 0x1b2   :  { %1457 = vmatprep.subr.bf16.mxu0 %v6243_v13  ;;  %1498 = vmatprep.subr.bf16.mxu1 %v6246_v45 }
 0x1b3   :  { %1487 = vmatprep.mubr.bf16.mxu0 %v9063_v40  ;;  %1528 = vmatprep.mubr.bf16.mxu1 %v9063_v40 }
 0x1b5   :  { %1458 = vmatpush1.bf16.msra.mxu0 %v5790_v41  ;;  %1499 = vmatpush1.bf16.msra.mxu1 %v5794_v42 }
 0x1b6   :  { %1459 = vmatprep.subr.bf16.mxu0 %v5798_v43  ;;  %1500 = vmatprep.subr.bf16.mxu1 %v5800_v44 }
 0x1b9   :  { %1460 = vmatpush1.bf16.msra.mxu0 %v5807_v46  ;;  %1501 = vmatpush1.bf16.msra.mxu1 %v5809_v47 }
 0x1ba   :  { %1461 = vmatprep.subr.bf16.mxu0 %v5813_v48  ;;  %1502 = vmatprep.subr.bf16.mxu1 %v5817_v49 }
 0x1bd   :  { %1462 = vmatpush1.bf16.msra.mxu0 %v5819_v50  ;;  %1503 = vmatpush1.bf16.msra.mxu1 %v5821_v51 }
 0x1be   :  { %1463 = vmatprep.subr.bf16.mxu0 %v5825_v52  ;;  %1504 = vmatprep.subr.bf16.mxu1 %v5829_v53 }
 0x1c1   :  { %1464 = vmatpush1.bf16.msra.mxu0 %v5836_v55  ;;  %1505 = vmatpush1.bf16.msra.mxu1 %v5838_v56 }
 0x1c2   :  { %1465 = vmatprep.subr.bf16.mxu0 %v5840_v57  ;;  %1506 = vmatprep.subr.bf16.mxu1 %v5842_v58 }
 0x1c5   :  { %1466 = vmatpush1.bf16.msra.mxu0 %v5848_v59  ;;  %1507 = vmatpush1.bf16.msra.mxu1 %v5850_v60 }
 0x1c6   :  { %1467 = vmatprep.subr.bf16.mxu0 %v5852_v61  ;;  %1508 = vmatprep.subr.bf16.mxu1 %v5854_v62 }
 0x1c9   :  { %1468 = vmatpush1.bf16.msra.mxu0 %v5865_v0  ;;  %1509 = vmatpush1.bf16.msra.mxu1 %v5867_v2 }
 0x1ca   :  { %1469 = vmatprep.subr.bf16.mxu0 %v5869_v3  ;;  %1510 = vmatprep.subr.bf16.mxu1 %v5871_v4 }
 0x1cd   :  { %1470 = vmatpush1.bf16.msra.mxu0 %v5877_v5  ;;  %1511 = vmatpush1.bf16.msra.mxu1 %v5879_v6 }
 0x1ce   :  { %1566 = vmatprep.subr.bf16.mxu0 %v5925_v7  ;;  %1607 = vmatprep.subr.bf16.mxu1 %v5927_v8 }
 0x230   :  { %v862_v41 = vpop.f32.mrf.mxu0  ;;  %v903_v42 = vpop.f32.mrf.mxu1 }
 0x231   :  { %v910_v43 = vadd.f32 %v862_v41, %v5958_v26  ;;  %v912_v55 = vadd.f32 %v903_v42, %v5961_v27 }
 0x232   :  { %v864_v44 = vpop.f32.mrf.mxu0  ;;  %v905_v46 = vpop.f32.mrf.mxu1 }
 0x233   :  { %v4250_v47 = vmul.f32 -1.442695, %v910_v43  ;;  %v911_v48 = vadd.f32 %v864_v44, %v5963_v30  ;;  %v4252_v56 = vmul.f32 -1.442695, %v912_v55  ;;  %v913_v57 = vadd.f32 %v905_v46, %v5966_v31  ;;  %v1002_v31 = vld [vmem:[%s8657_s5] sm:$0xf] }
 0x234   :  { %v866_v49 = vpop.f32.mrf.mxu0  ;;  %v907_v50 = vpop.f32.mrf.mxu1  ;;  %v6302_v15 = vrot.slane %v1002_v31, %v5947_v18  ;;  %v9119_v55 = vld [vmem:[#allocation47_spill] sm:$0xff] }
 0x235   :  { %4764 = vpow2.f32 %v4250_v47  ;;  %v4251_v51 = vmul.f32 -1.442695, %v911_v48  ;;  %v9112_v47 = vld [vmem:[#allocation14_spill] sm:$0xff] }
 0x236   :  { %v867_v52 = vpop.f32.mrf.mxu0  ;;  %v908_v53 = vpop.f32.mrf.mxu1  ;;  %9107 = vst [vmem:[#allocation82_spill] sm:$0xff] %v6302_v15  ;;  %v6327_v48 = vrot.slane %v1002_v31, %v9112_v47  ;;  %v9114_v49 = vld [vmem:[#allocation42_spill] sm:$0xff] }
 0x237   :  { %4766 = vpow2.f32 %v4251_v51  ;;  %v9118_v53 = vld [vmem:[#allocation46_spill] sm:$0xff] }
 0x238   :  { %4768 = vpow2.f32 %v4252_v56 }
 0x239   :  { %4770 = vtanh.f32 %v913_v57  ;;  %v9120_v57 = vld [vmem:[#allocation48_spill] sm:$0xff] }
 0x242   :  { %v4765_v58 = vpop.eup %4764 }
 0x243   :  { %v923_v59 = vadd.f32 1.0, %v4765_v58  ;;  %v9121_v58 = vld [vmem:[#allocation49_spill] sm:$0xff] }
 0x244   :  { %v4767_v60 = vpop.eup %4766 }
 0x245   :  { %4772 = vrcp.f32 %v923_v59  ;;  %v924_v61 = vadd.f32 1.0, %v4767_v60  ;;  %v4769_v62 = vpop.eup %4768  ;;  %v9122_v59 = vld [vmem:[#allocation50_spill] sm:$0xff]  ;;  %v9123_v60 = vld [vmem:[#allocation51_spill] sm:$0xff] }
 0x246   :  { %v4771_v0 = vpop.eup %4770  ;;  %v925_v5 = vadd.f32 1.0, %v4769_v62  ;;  %v9125_v62 = vld [vmem:[#allocation53_spill] sm:$0xff] }
 0x247   :  { %4774 = vrcp.f32 %v924_v61  ;;  %v9124_v61 = vld [vmem:[#allocation52_spill] sm:$0xff] }
 0x248   :  { %4776 = vrcp.f32 %v925_v5  ;;  %v9130_v5 = vld [vmem:[#allocation58_spill] sm:$0xff] }
 0x252   :  { %v4773_v2 = vpop.eup %4772 }
 0x253   :  { %v934_v3 = vmul.f32 %v4773_v2, %v4771_v0  ;;  %v9126_v0 = vld [vmem:[#allocation54_spill] sm:$0xff]  ;;  %v9127_v2 = vld [vmem:[#allocation55_spill] sm:$0xff] }
 0x254   :  { %v4775_v4 = vpop.eup %4774 }
 0x255   :  { %v933_v6 = vmul.f32 %v4775_v4, %v6034_v17  ;;  %v4777_v8 = vpop.eup %4776  ;;  %v6299_v17 = vrot.slane %v1002_v31, %v5933_v12  ;;  %v9129_v4 = vld [vmem:[#allocation57_spill] sm:$0xff] }
 0x257   :  { %v6284_v7 = vadd.f32 %v934_v3, %v933_v6  ;;  %9106 = vst [vmem:[#allocation81_spill] sm:$0xff] %v6299_v17  ;;  %v9128_v3 = vld [vmem:[#allocation56_spill] sm:$0xff]  ;;  %v9131_v6 = vld [vmem:[#allocation59_spill] sm:$0xff] }
 0x259   :  { %4778 = vtanh.f32 %v6284_v7 }
 0x266   :  { %v4779_v26 = vpop.eup %4778 }
 0x267   :  { %v937_v27 = vmul.f32 %v4779_v26, %v4777_v8  ;;  %v9132_v26 = vld [vmem:[#allocation60_spill] sm:$0xff] }
 0x269   :  { %v6287_v30 = vpack.c.bf16 %v937_v27, %v937_v27  ;;  %v9133_v27 = vld [vmem:[#allocation61_spill] sm:$0xff] }
 0x26b   :  { %1488 = vmatmul.mubr.bf16.vlgmr.msra.gmra.mxu0 %v6287_v30  ;;  %1529 = vmatmul.mubr.bf16.vlgmr.msra.gmra.mxu1 %v6287_v30 }
 0x26c   :  { %1567 = vmatpush1.bf16.msra.mxu0 %v6037_v10  ;;  %1608 = vmatpush1.bf16.msra.mxu1 %v6039_v23 }
 0x26d   :  { %1568 = vmatprep.subr.bf16.mxu0 %v6043_v21  ;;  %1609 = vmatprep.subr.bf16.mxu1 %v6045_v28 }
 0x270   :  { %v1378_v41 = vpop.f32.mrf.mxu0  ;;  %v1419_v42 = vpop.f32.mrf.mxu1  ;;  %1569 = vmatpush1.bf16.msra.mxu0 %v6051_v32  ;;  %1610 = vmatpush1.bf16.msra.mxu1 %v6053_v19 }
 0x271   :  { %v1379_v10 = vadd.f32 %v1378_v41, %v6299_v17  ;;  %1570 = vmatprep.subr.bf16.mxu0 %v6057_v25  ;;  %1611 = vmatprep.subr.bf16.mxu1 %v6059_v37  ;;  %v6315_v37 = vrot.slane %v1002_v31, %v5931_v11 }
 0x272   :  { %v1380_v23 = vpop.f32.mrf.mxu0  ;;  %v1421_v21 = vpop.f32.mrf.mxu1 }
 0x273   :  { %v4317_v28 = vmul.f32 -1.442695, %v1379_v10  ;;  %v1381_v43 = vadd.f32 %v1380_v23, %v6302_v15  ;;  %9108 = vst [vmem:[#allocation83_spill] sm:$0xff] %v6315_v37  ;;  %v9134_v23 = vld [vmem:[#allocation62_spill] sm:$0xff] }
 0x274   :  { %v1382_v44 = vpop.f32.mrf.mxu0  ;;  %v1423_v46 = vpop.f32.mrf.mxu1  ;;  %1571 = vmatpush1.bf16.msra.mxu0 %v6065_v9  ;;  %1612 = vmatpush1.bf16.msra.mxu1 %v6067_v63  ;;  %v1420_v9 = vadd.f32 %v1419_v42, %v6315_v37  ;;  %v9109_v63 = vld [vmem:[#allocation39_spill] sm:$0xff] }
 0x275   :  { %4780 = vpow2.f32 %v4317_v28  ;;  %v4318_v32 = vmul.f32 -1.442695, %v1381_v43  ;;  %1572 = vmatprep.subr.bf16.mxu0 %v6071_v39  ;;  %1613 = vmatprep.subr.bf16.mxu1 %v6073_v14  ;;  %v9110_v39 = vld [vmem:[#allocation40_spill] sm:$0xff]  ;;  %v9111_v14 = vld [vmem:[#allocation41_spill] sm:$0xff]  ;;  %9113 = vst [vmem:[#allocation39_spill] sm:$0xff] %v6327_v48 }
 0x276   :  { %v1383_v19 = vpop.f32.mrf.mxu0  ;;  %v1424_v25 = vpop.f32.mrf.mxu1  ;;  %v9136_v44 = vld [vmem:[#allocation64_spill] sm:$0xff]  ;;  %v9137_v46 = vld [vmem:[#allocation65_spill] sm:$0xff] }
 0x277   :  { %4782 = vpow2.f32 %v4318_v32  ;;  %v9138_v19 = vld [vmem:[#allocation66_spill] sm:$0xff]  ;;  %v9139_v25 = vld [vmem:[#allocation67_spill] sm:$0xff] }
 0x278   :  { %1573 = vmatpush1.bf16.msra.mxu0 %v6077_v54  ;;  %1614 = vmatpush1.bf16.msra.mxu1 %v6079_v29  ;;  %v4319_v54 = vmul.f32 -1.442695, %v1420_v9  ;;  %v9115_v29 = vld [vmem:[#allocation43_spill] sm:$0xff]  ;;  %v9140_v9 = vld [vmem:[#allocation68_spill] sm:$0xff] }
 0x279   :  { %1574 = vmatprep.subr.bf16.mxu0 %v6083_v24  ;;  %1615 = vmatprep.subr.bf16.mxu1 %v6085_v16  ;;  %v9116_v24 = vld [vmem:[#allocation44_spill] sm:$0xff]  ;;  %v9117_v16 = vld [vmem:[#allocation45_spill] sm:$0xff] }
 0x27a   :  { %4784 = vpow2.f32 %v4319_v54  ;;  %v9144_v54 = vld [vmem:[#allocation72_spill] sm:$0xff] }
 0x27c   :  { %1575 = vmatpush1.bf16.msra.mxu0 %v6089_v1  ;;  %1616 = vmatpush1.bf16.msra.mxu1 %v9109_v63  ;;  %v1422_v1 = vadd.f32 %v1421_v21, %v6327_v48  ;;  %v9135_v21 = vld [vmem:[#allocation63_spill] sm:$0xff]  ;;  %v9141_v63 = vld [vmem:[#allocation69_spill] sm:$0xff] }
 0x27d   :  { %1576 = vmatprep.subr.bf16.mxu0 %v9110_v39  ;;  %1617 = vmatprep.subr.bf16.mxu1 %v9111_v14  ;;  %v9142_v39 = vld [vmem:[#allocation70_spill] sm:$0xff]  ;;  %v9143_v14 = vld [vmem:[#allocation71_spill] sm:$0xff] }
 0x280   :  { %1577 = vmatpush1.bf16.msra.mxu0 %v9114_v49  ;;  %1618 = vmatpush1.bf16.msra.mxu1 %v9115_v29  ;;  %v9145_v49 = vld [vmem:[#allocation73_spill] sm:$0xff]  ;;  %v9146_v29 = vld [vmem:[#allocation74_spill] sm:$0xff] }
 0x281   :  { %1578 = vmatprep.subr.bf16.mxu0 %v9116_v24  ;;  %1619 = vmatprep.subr.bf16.mxu1 %v9117_v16  ;;  %v9147_v24 = vld [vmem:[#allocation75_spill] sm:$0xff]  ;;  %v9148_v16 = vld [vmem:[#allocation76_spill] sm:$0xff] }
 0x282   :  { %v4781_v50 = vpop.eup %4780 }
 0x283   :  { %v1435_v51 = vadd.f32 1.0, %v4781_v50  ;;  %v9149_v50 = vld [vmem:[#allocation77_spill] sm:$0xff] }
 0x284   :  { %v4783_v52 = vpop.eup %4782  ;;  %1579 = vmatpush1.bf16.msra.mxu0 %v9118_v53  ;;  %1620 = vmatpush1.bf16.msra.mxu1 %v9119_v55  ;;  %v6375_v53 = vld [vmem:[#allocation9 + $0xec] ss:$16 sps:$4 sm:$0xff]  }
 0x285   :  { %4786 = vrcp.f32 %v1435_v51  ;;  %v1436_v56 = vadd.f32 1.0, %v4783_v52  ;;  %1580 = vmatprep.subr.bf16.mxu0 %v9120_v57  ;;  %1621 = vmatprep.subr.bf16.mxu1 %v9121_v58  ;;  %v9150_v51 = vld [vmem:[#allocation78_spill] sm:$0xff]  ;;  %v9151_v57 = vld [vmem:[#allocation79_spill] sm:$0xff] }
 0x286   :  { %4788 = vtanh.f32 %v1422_v1  ;;  %v6373_v52 = vld [vmem:[#allocation9 + $0xe4] ss:$16 sps:$4 sm:$0xff]  }
 0x287   :  { %4790 = vrcp.f32 %v1436_v56  ;;  %v4785_v8 = vpop.eup %4784 }
 0x288   :  { %1581 = vmatpush1.bf16.msra.mxu0 %v9122_v59  ;;  %1622 = vmatpush1.bf16.msra.mxu1 %v9123_v60  ;;  %v1437_v10 = vadd.f32 1.0, %v4785_v8  ;;  %v6383_v59 = vld [vmem:[#allocation9 + $0xe0] ss:$16 sps:$4 sm:$0xff]   ;;  %v6385_v60 = vld [vmem:[#allocation9 + $0xe8] ss:$16 sps:$4 sm:$0xff]  }
 0x289   :  { %1582 = vmatprep.subr.bf16.mxu0 %v9124_v61  ;;  %1623 = vmatprep.subr.bf16.mxu1 %v9125_v62  ;;  %v6387_v61 = vld [vmem:[#allocation9 + $0xc4] ss:$16 sps:$4 sm:$0xff]   ;;  %v6389_v62 = vld [vmem:[#allocation9 + $0xcc] ss:$16 sps:$4 sm:$0xff]  }
 0x28a   :  { %4792 = vrcp.f32 %v1437_v10  ;;  %v6419_v8 = vld [vmem:[#allocation9 + $0x8c] ss:$16 sps:$4 sm:$0xff]  }
 0x28b   :  { %v6431_v10 = vld [vmem:[#allocation9 + $0x6c] ss:$16 sps:$4 sm:$0xff]  }
 0x28c   :  { %1583 = vmatpush2.bf16.msra.mxu0 %v9126_v0  ;;  %1624 = vmatpush2.bf16.msra.mxu1 %v9127_v2  ;;  %v6397_v0 = vld [vmem:[#allocation9 + $0xc0] ss:$16 sps:$4 sm:$0xff]   ;;  %v6399_v2 = vld [vmem:[#allocation9 + $0xc8] ss:$16 sps:$4 sm:$0xff]  }
 0x28d   :  { %1584 = vmatprep.subr.bf16.mxu0 %v9128_v3  ;;  %1625 = vmatprep.subr.bf16.mxu1 %v9129_v4  ;;  %v6403_v3 = vld [vmem:[#allocation9 + $0xa4] ss:$16 sps:$4 sm:$0xff]   ;;  %v6405_v4 = vld [vmem:[#allocation9 + $0xac] ss:$16 sps:$4 sm:$0xff]  }
 0x290   :  { %1585 = vmatpush2.bf16.msra.mxu0 %v9130_v5  ;;  %1626 = vmatpush2.bf16.msra.mxu1 %v9131_v6  ;;  %v6413_v5 = vld [vmem:[#allocation9 + $0xa8] ss:$16 sps:$4 sm:$0xff]   ;;  %v6417_v6 = vld [vmem:[#allocation9 + $0x84] ss:$16 sps:$4 sm:$0xff]  }
 0x291   :  { %1586 = vmatprep.subr.bf16.mxu0 %v9132_v26  ;;  %1627 = vmatprep.subr.bf16.mxu1 %v9133_v27 }
 0x292   :  { %v4787_v31 = vpop.eup %4786 }
 0x293   :  { %v4789_v41 = vpop.eup %4788 }
 0x294   :  { %v4791_v42 = vpop.eup %4790  ;;  %1587 = vmatpush2.bf16.msra.mxu0 %v9134_v23  ;;  %1628 = vmatpush2.bf16.msra.mxu1 %v9135_v21  ;;  %v1446_v43 = vmul.f32 %v4789_v41, %v4787_v31  ;;  %v6423_v31 = vld [vmem:[#allocation9 + $0x80] ss:$16 sps:$4 sm:$0xff]   ;;  %v6425_v41 = vld [vmem:[#allocation9 + $0x88] ss:$16 sps:$4 sm:$0xff]  }
 0x295   :  { %v1445_v28 = vmul.f32 0.0, %v4791_v42  ;;  %1588 = vmatprep.subr.bf16.mxu0 %v9136_v44  ;;  %1629 = vmatprep.subr.bf16.mxu1 %v9137_v46  ;;  %v6429_v42 = vld [vmem:[#allocation9 + $0x64] ss:$16 sps:$4 sm:$0xff]   ;;  %v6435_v23 = vld [vmem:[#allocation9 + $0x60] ss:$16 sps:$4 sm:$0xff]  }
 0x296   :  { %9152 = vst [vmem:[#allocation40_spill] sm:$0xff] %v6435_v23  ;;  %v6437_v21 = vld [vmem:[#allocation9 + $0x68] ss:$16 sps:$4 sm:$0xff]   ;;  %v6447_v44 = vld [vmem:[#allocation9 + $0x40] ss:$16 sps:$4 sm:$0xff]  }
 0x297   :  { %v6354_v32 = vadd.f32 %v1446_v43, %v1445_v28  ;;  %v4793_v1 = vpop.eup %4792  ;;  %9153 = vst [vmem:[#allocation41_spill] sm:$0xff] %v6437_v21  ;;  %v6441_v28 = vld [vmem:[#allocation9 + $0x44] ss:$16 sps:$4 sm:$0xff]   ;;  %v6443_v43 = vld [vmem:[#allocation9 + $0x4c] ss:$16 sps:$4 sm:$0xff]   ;;  %9156 = vst [vmem:[#allocation44_spill] sm:$0xff] %v6447_v44 }
 0x298   :  { %1589 = vmatpush2.bf16.msra.mxu0 %v9138_v19  ;;  %1630 = vmatpush2.bf16.msra.mxu1 %v9139_v25  ;;  %9154 = vst [vmem:[#allocation42_spill] sm:$0xff] %v6441_v28  ;;  %9155 = vst [vmem:[#allocation43_spill] sm:$0xff] %v6443_v43  ;;  %v6449_v46 = vld [vmem:[#allocation9 + $0x48] ss:$16 sps:$4 sm:$0xff]   ;;  %v6453_v19 = vld [vmem:[#allocation9 + $0x24] ss:$16 sps:$4 sm:$0xff]  }
 0x299   :  { %4794 = vtanh.f32 %v6354_v32  ;;  %1590 = vmatprep.subr.bf16.mxu0 %v9140_v9  ;;  %1631 = vmatprep.subr.bf16.mxu1 %v9141_v63  ;;  %9157 = vst [vmem:[#allocation45_spill] sm:$0xff] %v6449_v46  ;;  %9158 = vst [vmem:[#allocation46_spill] sm:$0xff] %v6453_v19  ;;  %v6455_v25 = vld [vmem:[#allocation9 + $0x2c] ss:$16 sps:$4 sm:$0xff]   ;;  %v6459_v9 = vld [vmem:[#allocation9 + $0x20] ss:$16 sps:$4 sm:$0xff]  }
 0x29a   :  { %9159 = vst [vmem:[#allocation47_spill] sm:$0xff] %v6455_v25  ;;  %9160 = vst [vmem:[#allocation48_spill] sm:$0xff] %v6459_v9  ;;  %v6461_v63 = vld [vmem:[#allocation9 + $0x28] ss:$16 sps:$4 sm:$0xff]  }
 0x29b   :  { %9161 = vst [vmem:[#allocation49_spill] sm:$0xff] %v6461_v63 }
 0x29c   :  { %1591 = vmatpush2.bf16.msra.mxu0 %v9142_v39  ;;  %1632 = vmatpush2.bf16.msra.mxu1 %v9143_v14 }
 0x29d   :  { %1592 = vmatprep.subr.bf16.mxu0 %v9144_v54  ;;  %1633 = vmatprep.subr.bf16.mxu1 %v9145_v49 }
 0x2a0   :  { %1593 = vmatpush2.bf16.msra.mxu0 %v9146_v29  ;;  %1634 = vmatpush2.bf16.msra.mxu1 %v6199_v20 }
 0x2a1   :  { %1594 = vmatprep.subr.bf16.mxu0 %v9147_v24  ;;  %1635 = vmatprep.subr.bf16.mxu1 %v9148_v16 }
 0x2a4   :  { %1595 = vmatpush2.bf16.msra.mxu0 %v6209_v36  ;;  %1636 = vmatpush2.bf16.msra.mxu1 %v9149_v50 }
 0x2a5   :  { %1596 = vmatprep.subr.bf16.mxu0 %v6215_v35  ;;  %1637 = vmatprep.subr.bf16.mxu1 %v9150_v51 }
 0x2a6   :  { %v4795_v55 = vpop.eup %4794 }
 0x2a7   :  { %v1449_v56 = vmul.f32 %v4795_v55, %v4793_v1  ;;  %v6465_v1 = vld [vmem:[#allocation9 + $0x4] ss:$16 sps:$4 sm:$0xff]   ;;  %v6467_v55 = vld [vmem:[#allocation9 + $0xc] ss:$16 sps:$4 sm:$0xff]  }
 0x2a8   :  { %1597 = vmatpush2.bf16.msra.mxu0 %v6221_v34  ;;  %1638 = vmatpush2.bf16.msra.mxu1 %v9151_v57  ;;  %9162 = vst [vmem:[#allocation50_spill] sm:$0xff] %v6465_v1  ;;  %9163 = vst [vmem:[#allocation51_spill] sm:$0xff] %v6467_v55 }
 0x2a9   :  { %v6379_v58 = vpack.c.bf16 %v1449_v56, %v1449_v56  ;;  %2078 = vmatprep.subr.bf16.mxu0 %v6373_v52  ;;  %2119 = vmatprep.subr.bf16.mxu1 %v6375_v53  ;;  %v6471_v56 = vld [vmem:[#allocation9] ss:$16 sps:$4 sm:$0xff]  }
 0x2aa   :  { %9164 = vst [vmem:[#allocation52_spill] sm:$0xff] %v6471_v56 }
 0x2ab   :  { %1598 = vmatprep.mubr.bf16.mxu0 %v6379_v58  ;;  %1639 = vmatprep.mubr.bf16.mxu1 %v6379_v58 }
 0x2ac   :  { %1599 = vmatmul.mubr.bf16.vlgmr.msra.gmra.mxu0 %v6287_v30  ;;  %1640 = vmatmul.mubr.bf16.vlgmr.msra.gmra.mxu1 %v6287_v30  ;;  %v6411_v30 = vld [vmem:[#allocation9 + $0xa0] ss:$16 sps:$4 sm:$0xff]  }
 0x2ad   :  { %2079 = vmatpush1.bf16.msra.mxu0 %v6383_v59  ;;  %2120 = vmatpush1.bf16.msra.mxu1 %v6385_v60 }
 0x2ae   :  { %2080 = vmatprep.subr.bf16.mxu0 %v6387_v61  ;;  %2121 = vmatprep.subr.bf16.mxu1 %v6389_v62 }
 0x2af   :  { %2110 = vmatprep.mubr.bf16.mxu0 %v9063_v40  ;;  %2151 = vmatprep.mubr.bf16.mxu1 %v9063_v40 }
 0x2b1   :  { %2081 = vmatpush1.bf16.msra.mxu0 %v6397_v0  ;;  %2122 = vmatpush1.bf16.msra.mxu1 %v6399_v2 }
 0x2b2   :  { %2082 = vmatprep.subr.bf16.mxu0 %v6403_v3  ;;  %2123 = vmatprep.subr.bf16.mxu1 %v6405_v4 }
 0x2b5   :  { %2083 = vmatpush1.bf16.msra.mxu0 %v6411_v30  ;;  %2124 = vmatpush1.bf16.msra.mxu1 %v6413_v5 }
 0x2b6   :  { %2084 = vmatprep.subr.bf16.mxu0 %v6417_v6  ;;  %2125 = vmatprep.subr.bf16.mxu1 %v6419_v8 }
 0x2b9   :  { %2085 = vmatpush1.bf16.msra.mxu0 %v6423_v31  ;;  %2126 = vmatpush1.bf16.msra.mxu1 %v6425_v41 }
 0x2ba   :  { %2086 = vmatprep.subr.bf16.mxu0 %v6429_v42  ;;  %2127 = vmatprep.subr.bf16.mxu1 %v6431_v10 }
 0x2bd   :  { %2087 = vmatpush1.bf16.msra.mxu0 %v6435_v23  ;;  %2128 = vmatpush1.bf16.msra.mxu1 %v6437_v21 }
 0x2be   :  { %2088 = vmatprep.subr.bf16.mxu0 %v6441_v28  ;;  %2129 = vmatprep.subr.bf16.mxu1 %v6443_v43 }
 0x2c1   :  { %2089 = vmatpush1.bf16.msra.mxu0 %v6447_v44  ;;  %2130 = vmatpush1.bf16.msra.mxu1 %v6449_v46  ;;  %v6473_v44 = vld [vmem:[#allocation9 + $0x8] ss:$16 sps:$4 sm:$0xff]   ;;  %v6477_v46 = vld [vmem:[#allocation9 + $0x1e4] ss:$16 sps:$4 sm:$0xff]  }
 0x2c2   :  { %2090 = vmatprep.subr.bf16.mxu0 %v6453_v19  ;;  %2131 = vmatprep.subr.bf16.mxu1 %v6455_v25  ;;  %9165 = vst [vmem:[#allocation53_spill] sm:$0xff] %v6473_v44  ;;  %9166 = vst [vmem:[#allocation54_spill] sm:$0xff] %v6477_v46  ;;  %v6479_v19 = vld [vmem:[#allocation9 + $0x1ec] ss:$16 sps:$4 sm:$0xff]   ;;  %v6483_v25 = vld [vmem:[#allocation9 + $0x1e0] ss:$16 sps:$4 sm:$0xff]  }
 0x2c3   :  { %9167 = vst [vmem:[#allocation55_spill] sm:$0xff] %v6479_v19  ;;  %9168 = vst [vmem:[#allocation56_spill] sm:$0xff] %v6483_v25 }
 0x2c5   :  { %2091 = vmatpush1.bf16.msra.mxu0 %v6459_v9  ;;  %2132 = vmatpush1.bf16.msra.mxu1 %v6461_v63  ;;  %v6485_v9 = vld [vmem:[#allocation9 + $0x1e8] ss:$16 sps:$4 sm:$0xff]   ;;  %v6489_v63 = vld [vmem:[#allocation9 + $0x1c4] ss:$16 sps:$4 sm:$0xff]  }
 0x2c6   :  { %2092 = vmatprep.subr.bf16.mxu0 %v6465_v1  ;;  %2133 = vmatprep.subr.bf16.mxu1 %v6467_v55  ;;  %9169 = vst [vmem:[#allocation57_spill] sm:$0xff] %v6485_v9  ;;  %9170 = vst [vmem:[#allocation58_spill] sm:$0xff] %v6489_v63  ;;  %v6491_v1 = vld [vmem:[#allocation9 + $0x1cc] ss:$16 sps:$4 sm:$0xff]   ;;  %v6495_v55 = vld [vmem:[#allocation9 + $0x1c0] ss:$16 sps:$4 sm:$0xff]  }
 0x2c7   :  { %9171 = vst [vmem:[#allocation59_spill] sm:$0xff] %v6491_v1  ;;  %9172 = vst [vmem:[#allocation60_spill] sm:$0xff] %v6495_v55 }
 0x2c9   :  { %2093 = vmatpush1.bf16.msra.mxu0 %v6471_v56  ;;  %2134 = vmatpush1.bf16.msra.mxu1 %v6473_v44  ;;  %v6497_v56 = vld [vmem:[#allocation9 + $0x1c8] ss:$16 sps:$4 sm:$0xff]   ;;  %v6501_v44 = vld [vmem:[#allocation9 + $0x1a4] ss:$16 sps:$4 sm:$0xff]  }
 0x2ca   :  { %2094 = vmatprep.subr.bf16.mxu0 %v6477_v46  ;;  %2135 = vmatprep.subr.bf16.mxu1 %v6479_v19  ;;  %9173 = vst [vmem:[#allocation61_spill] sm:$0xff] %v6497_v56  ;;  %9174 = vst [vmem:[#allocation62_spill] sm:$0xff] %v6501_v44  ;;  %v6503_v46 = vld [vmem:[#allocation9 + $0x1ac] ss:$16 sps:$4 sm:$0xff]   ;;  %v6507_v19 = vld [vmem:[#allocation9 + $0x1a0] ss:$16 sps:$4 sm:$0xff]  }
 0x2cb   :  { %9175 = vst [vmem:[#allocation63_spill] sm:$0xff] %v6503_v46  ;;  %9176 = vst [vmem:[#allocation64_spill] sm:$0xff] %v6507_v19 }
 0x2cd   :  { %2095 = vmatpush2.bf16.msra.mxu0 %v6483_v25  ;;  %2136 = vmatpush2.bf16.msra.mxu1 %v6485_v9  ;;  %v6509_v25 = vld [vmem:[#allocation9 + $0x1a8] ss:$16 sps:$4 sm:$0xff]   ;;  %v6513_v9 = vld [vmem:[#allocation9 + $0x184] ss:$16 sps:$4 sm:$0xff]  }
 0x2ce   :  { %2096 = vmatprep.subr.bf16.mxu0 %v6489_v63  ;;  %2137 = vmatprep.subr.bf16.mxu1 %v6491_v1  ;;  %9177 = vst [vmem:[#allocation65_spill] sm:$0xff] %v6509_v25  ;;  %9178 = vst [vmem:[#allocation66_spill] sm:$0xff] %v6513_v9  ;;  %v6515_v63 = vld [vmem:[#allocation9 + $0x18c] ss:$16 sps:$4 sm:$0xff]   ;;  %v6519_v1 = vld [vmem:[#allocation9 + $0x180] ss:$16 sps:$4 sm:$0xff]  }
 0x2cf   :  { %9179 = vst [vmem:[#allocation67_spill] sm:$0xff] %v6515_v63  ;;  %9180 = vst [vmem:[#allocation68_spill] sm:$0xff] %v6519_v1 }
 0x2d1   :  { %2097 = vmatpush2.bf16.msra.mxu0 %v6495_v55  ;;  %2138 = vmatpush2.bf16.msra.mxu1 %v6497_v56  ;;  %v6521_v55 = vld [vmem:[#allocation9 + $0x188] ss:$16 sps:$4 sm:$0xff]   ;;  %v6525_v56 = vld [vmem:[#allocation9 + $0x164] ss:$16 sps:$4 sm:$0xff]  }
 0x2d2   :  { %2098 = vmatprep.subr.bf16.mxu0 %v6501_v44  ;;  %2139 = vmatprep.subr.bf16.mxu1 %v6503_v46  ;;  %9181 = vst [vmem:[#allocation69_spill] sm:$0xff] %v6521_v55  ;;  %9182 = vst [vmem:[#allocation70_spill] sm:$0xff] %v6525_v56  ;;  %v6527_v44 = vld [vmem:[#allocation9 + $0x16c] ss:$16 sps:$4 sm:$0xff]   ;;  %v6531_v46 = vld [vmem:[#allocation9 + $0x160] ss:$16 sps:$4 sm:$0xff]  }
 0x2d3   :  { %9183 = vst [vmem:[#allocation71_spill] sm:$0xff] %v6527_v44  ;;  %9184 = vst [vmem:[#allocation72_spill] sm:$0xff] %v6531_v46 }
 0x2d5   :  { %2099 = vmatpush2.bf16.msra.mxu0 %v6507_v19  ;;  %2140 = vmatpush2.bf16.msra.mxu1 %v6509_v25  ;;  %v6533_v19 = vld [vmem:[#allocation9 + $0x168] ss:$16 sps:$4 sm:$0xff]   ;;  %v6537_v25 = vld [vmem:[#allocation9 + $0x144] ss:$16 sps:$4 sm:$0xff]  }
 0x2d6   :  { %2100 = vmatprep.subr.bf16.mxu0 %v6513_v9  ;;  %2141 = vmatprep.subr.bf16.mxu1 %v6515_v63  ;;  %9185 = vst [vmem:[#allocation73_spill] sm:$0xff] %v6533_v19  ;;  %9186 = vst [vmem:[#allocation74_spill] sm:$0xff] %v6537_v25  ;;  %v6539_v9 = vld [vmem:[#allocation9 + $0x14c] ss:$16 sps:$4 sm:$0xff]   ;;  %v6543_v63 = vld [vmem:[#allocation9 + $0x140] ss:$16 sps:$4 sm:$0xff]  }
 0x2d7   :  { %9187 = vst [vmem:[#allocation75_spill] sm:$0xff] %v6539_v9  ;;  %9188 = vst [vmem:[#allocation76_spill] sm:$0xff] %v6543_v63 }
 0x2d9   :  { %2101 = vmatpush2.bf16.msra.mxu0 %v6519_v1  ;;  %2142 = vmatpush2.bf16.msra.mxu1 %v6521_v55  ;;  %v6545_v1 = vld [vmem:[#allocation9 + $0x148] ss:$16 sps:$4 sm:$0xff]   ;;  %v6549_v55 = vld [vmem:[#allocation9 + $0x124] ss:$16 sps:$4 sm:$0xff]  }
 0x2da   :  { %2102 = vmatprep.subr.bf16.mxu0 %v6525_v56  ;;  %2143 = vmatprep.subr.bf16.mxu1 %v6527_v44  ;;  %9189 = vst [vmem:[#allocation77_spill] sm:$0xff] %v6545_v1  ;;  %9190 = vst [vmem:[#allocation78_spill] sm:$0xff] %v6549_v55  ;;  %v6551_v56 = vld [vmem:[#allocation9 + $0x12c] ss:$16 sps:$4 sm:$0xff]   ;;  %v6555_v44 = vld [vmem:[#allocation9 + $0x120] ss:$16 sps:$4 sm:$0xff]  }
 0x2db   :  { %9191 = vst [vmem:[#allocation79_spill] sm:$0xff] %v6551_v56  ;;  %9192 = vst [vmem:[#allocation84_spill] sm:$0xff] %v6555_v44 }
 0x2dd   :  { %2103 = vmatpush2.bf16.msra.mxu0 %v6531_v46  ;;  %2144 = vmatpush2.bf16.msra.mxu1 %v6533_v19  ;;  %v6557_v46 = vld [vmem:[#allocation9 + $0x128] ss:$16 sps:$4 sm:$0xff]   ;;  %v6561_v19 = vld [vmem:[#allocation9 + $0x104] ss:$16 sps:$4 sm:$0xff]  }
 0x2de   :  { %2104 = vmatprep.subr.bf16.mxu0 %v6537_v25  ;;  %2145 = vmatprep.subr.bf16.mxu1 %v6539_v9  ;;  %9193 = vst [vmem:[#allocation85_spill] sm:$0xff] %v6557_v46  ;;  %9194 = vst [vmem:[#allocation86_spill] sm:$0xff] %v6561_v19  ;;  %v6563_v25 = vld [vmem:[#allocation9 + $0x10c] ss:$16 sps:$4 sm:$0xff]   ;;  %v6567_v9 = vld [vmem:[#allocation9 + $0x100] ss:$16 sps:$4 sm:$0xff]  }
 0x2df   :  { %9195 = vst [vmem:[#allocation87_spill] sm:$0xff] %v6563_v25  ;;  %9196 = vst [vmem:[#allocation88_spill] sm:$0xff] %v6567_v9 }
 0x2e1   :  { %2105 = vmatpush2.bf16.msra.mxu0 %v6543_v63  ;;  %2146 = vmatpush2.bf16.msra.mxu1 %v6545_v1  ;;  %v6569_v63 = vld [vmem:[#allocation9 + $0x108] ss:$16 sps:$4 sm:$0xff]  }
 0x2e2   :  { %2106 = vmatprep.subr.bf16.mxu0 %v6549_v55  ;;  %2147 = vmatprep.subr.bf16.mxu1 %v6551_v56  ;;  %9197 = vst [vmem:[#allocation89_spill] sm:$0xff] %v6569_v63  ;;  %v9198_v56 = vld [vmem:[#allocation80_spill] sm:$0xff] }
 0x2e5   :  { %2107 = vmatpush2.bf16.msra.mxu0 %v6555_v44  ;;  %2148 = vmatpush2.bf16.msra.mxu1 %v6557_v46 }
 0x2e6   :  { %2108 = vmatprep.subr.bf16.mxu0 %v6561_v19  ;;  %2149 = vmatprep.subr.bf16.mxu1 %v6563_v25 }
 0x2e9   :  { %2109 = vmatpush2.bf16.msra.mxu0 %v6567_v9  ;;  %2150 = vmatpush2.bf16.msra.mxu1 %v6569_v63  ;;  %v6585_v63 = vld [vmem:[#allocation6 + $0xc0] ss:$16 sps:$4 sm:$0xff]  }
 0x2ea   :  { %2189 = vmatprep.subr.bf16.mxu0 %v9198_v56  ;;  %2230 = vmatprep.subr.bf16.mxu1 %v6232_v22  ;;  %9199 = vst [vmem:[#allocation80_spill] sm:$0xff] %v6585_v63  ;;  %v6588_v22 = vld [vmem:[#allocation6 + $0xc8] ss:$16 sps:$4 sm:$0xff]   ;;  %v6606_v56 = vld [vmem:[#allocation6 + $0x8c] ss:$16 sps:$4 sm:$0xff]  }
 0x2eb   :  { %9200 = vst [vmem:[#allocation90_spill] sm:$0xff] %v6588_v22  ;;  %9206 = vst [vmem:[#allocation96_spill] sm:$0xff] %v6606_v56 }
 0x2ec   :  { %2111 = vmatmul.mubr.bf16.vlgmr.msra.gmra.mxu0 %v6379_v58  ;;  %2152 = vmatmul.mubr.bf16.vlgmr.msra.gmra.mxu1 %v6379_v58  ;;  %v6591_v58 = vld [vmem:[#allocation6 + $0xa4] ss:$16 sps:$4 sm:$0xff]  }
 0x2ed   :  { %2190 = vmatpush1.bf16.msra.mxu0 %v6237_v33  ;;  %2231 = vmatpush1.bf16.msra.mxu1 %v6240_v38  ;;  %9201 = vst [vmem:[#allocation91_spill] sm:$0xff] %v6591_v58  ;;  %v6594_v38 = vld [vmem:[#allocation6 + $0xac] ss:$16 sps:$4 sm:$0xff]   ;;  %v6600_v33 = vld [vmem:[#allocation6 + $0xa8] ss:$16 sps:$4 sm:$0xff]  }
 0x2ee   :  { %2191 = vmatprep.subr.bf16.mxu0 %v6243_v13  ;;  %2232 = vmatprep.subr.bf16.mxu1 %v6246_v45  ;;  %9202 = vst [vmem:[#allocation92_spill] sm:$0xff] %v6594_v38  ;;  %v6597_v13 = vld [vmem:[#allocation6 + $0xa0] ss:$16 sps:$4 sm:$0xff]   ;;  %9204 = vst [vmem:[#allocation94_spill] sm:$0xff] %v6600_v33  ;;  %v6603_v45 = vld [vmem:[#allocation6 + $0x84] ss:$16 sps:$4 sm:$0xff]  }
 0x2ef   :  { %2221 = vmatprep.mubr.bf16.mxu0 %v9063_v40  ;;  %2262 = vmatprep.mubr.bf16.mxu1 %v9063_v40  ;;  %9203 = vst [vmem:[#allocation93_spill] sm:$0xff] %v6597_v13  ;;  %9205 = vst [vmem:[#allocation95_spill] sm:$0xff] %v6603_v45 }
 0x2f1   :  { %2192 = vmatpush1.bf16.msra.mxu0 %v6585_v63  ;;  %2233 = vmatpush1.bf16.msra.mxu1 %v6588_v22  ;;  %v9227_v63 = vld [vmem:[#allocation15_spill] sm:$0xff] }
 0x2f2   :  { %2193 = vmatprep.subr.bf16.mxu0 %v6591_v58  ;;  %2234 = vmatprep.subr.bf16.mxu1 %v6594_v38  ;;  %v6609_v58 = vld [vmem:[#allocation6 + $0x80] ss:$16 sps:$4 sm:$0xff]   ;;  %v6612_v38 = vld [vmem:[#allocation6 + $0x88] ss:$16 sps:$4 sm:$0xff]  }
 0x2f3   :  { %9207 = vst [vmem:[#allocation97_spill] sm:$0xff] %v6609_v58  ;;  %9208 = vst [vmem:[#allocation98_spill] sm:$0xff] %v6612_v38 }
 0x2f5   :  { %2194 = vmatpush1.bf16.msra.mxu0 %v6597_v13  ;;  %2235 = vmatpush1.bf16.msra.mxu1 %v6600_v33  ;;  %v6615_v13 = vld [vmem:[#allocation6 + $0x64] ss:$16 sps:$4 sm:$0xff]   ;;  %v6618_v33 = vld [vmem:[#allocation6 + $0x6c] ss:$16 sps:$4 sm:$0xff]  }
 0x2f6   :  { %2195 = vmatprep.subr.bf16.mxu0 %v6603_v45  ;;  %2236 = vmatprep.subr.bf16.mxu1 %v6606_v56  ;;  %9209 = vst [vmem:[#allocation99_spill] sm:$0xff] %v6615_v13  ;;  %9210 = vst [vmem:[#allocation100_spill] sm:$0xff] %v6618_v33  ;;  %v6621_v45 = vld [vmem:[#allocation6 + $0x60] ss:$16 sps:$4 sm:$0xff]   ;;  %v6624_v56 = vld [vmem:[#allocation6 + $0x68] ss:$16 sps:$4 sm:$0xff]  }
 0x2f7   :  { %9211 = vst [vmem:[#allocation101_spill] sm:$0xff] %v6621_v45  ;;  %9212 = vst [vmem:[#allocation102_spill] sm:$0xff] %v6624_v56 }
 0x2f9   :  { %2196 = vmatpush1.bf16.msra.mxu0 %v6609_v58  ;;  %2237 = vmatpush1.bf16.msra.mxu1 %v6612_v38  ;;  %v6627_v58 = vld [vmem:[#allocation6 + $0x44] ss:$16 sps:$4 sm:$0xff]   ;;  %v6630_v38 = vld [vmem:[#allocation6 + $0x4c] ss:$16 sps:$4 sm:$0xff]  }
 0x2fa   :  { %2197 = vmatprep.subr.bf16.mxu0 %v6615_v13  ;;  %2238 = vmatprep.subr.bf16.mxu1 %v6618_v33  ;;  %9213 = vst [vmem:[#allocation103_spill] sm:$0xff] %v6627_v58  ;;  %9214 = vst [vmem:[#allocation104_spill] sm:$0xff] %v6630_v38  ;;  %v6633_v13 = vld [vmem:[#allocation6 + $0x40] ss:$16 sps:$4 sm:$0xff]   ;;  %v6636_v33 = vld [vmem:[#allocation6 + $0x48] ss:$16 sps:$4 sm:$0xff]  }
 0x2fb   :  { %9215 = vst [vmem:[#allocation105_spill] sm:$0xff] %v6633_v13  ;;  %9216 = vst [vmem:[#allocation106_spill] sm:$0xff] %v6636_v33 }
 0x2fd   :  { %2198 = vmatpush1.bf16.msra.mxu0 %v6621_v45  ;;  %2239 = vmatpush1.bf16.msra.mxu1 %v6624_v56  ;;  %v6639_v45 = vld [vmem:[#allocation6 + $0x24] ss:$16 sps:$4 sm:$0xff]   ;;  %v6642_v56 = vld [vmem:[#allocation6 + $0x2c] ss:$16 sps:$4 sm:$0xff]  }
 0x2fe   :  { %2199 = vmatprep.subr.bf16.mxu0 %v6627_v58  ;;  %2240 = vmatprep.subr.bf16.mxu1 %v6630_v38  ;;  %9217 = vst [vmem:[#allocation107_spill] sm:$0xff] %v6639_v45  ;;  %9218 = vst [vmem:[#allocation108_spill] sm:$0xff] %v6642_v56  ;;  %v6645_v58 = vld [vmem:[#allocation6 + $0x20] ss:$16 sps:$4 sm:$0xff]   ;;  %v6648_v38 = vld [vmem:[#allocation6 + $0x28] ss:$16 sps:$4 sm:$0xff]  }
 0x2ff   :  { %9219 = vst [vmem:[#allocation109_spill] sm:$0xff] %v6645_v58  ;;  %9220 = vst [vmem:[#allocation110_spill] sm:$0xff] %v6648_v38 }
 0x301   :  { %2200 = vmatpush1.bf16.msra.mxu0 %v6633_v13  ;;  %2241 = vmatpush1.bf16.msra.mxu1 %v6636_v33  ;;  %v6651_v13 = vld [vmem:[#allocation6 + $0x4] ss:$16 sps:$4 sm:$0xff]   ;;  %v6654_v33 = vld [vmem:[#allocation6 + $0xc] ss:$16 sps:$4 sm:$0xff]  }
 0x302   :  { %2201 = vmatprep.subr.bf16.mxu0 %v6639_v45  ;;  %2242 = vmatprep.subr.bf16.mxu1 %v6642_v56  ;;  %9221 = vst [vmem:[#allocation111_spill] sm:$0xff] %v6651_v13  ;;  %9222 = vst [vmem:[#allocation112_spill] sm:$0xff] %v6654_v33  ;;  %v6657_v45 = vld [vmem:[#allocation6] ss:$16 sps:$4 sm:$0xff]   ;;  %v6660_v56 = vld [vmem:[#allocation6 + $0x8] ss:$16 sps:$4 sm:$0xff]  }
 0x303   :  { %9223 = vst [vmem:[#allocation113_spill] sm:$0xff] %v6657_v45  ;;  %9224 = vst [vmem:[#allocation114_spill] sm:$0xff] %v6660_v56 }
 0x305   :  { %2202 = vmatpush1.bf16.msra.mxu0 %v6645_v58  ;;  %2243 = vmatpush1.bf16.msra.mxu1 %v6648_v38  ;;  %v6663_v58 = vld [vmem:[#allocation8 + $0xe4] ss:$16 sps:$4 sm:$0xff]   ;;  %v6666_v38 = vld [vmem:[#allocation8 + $0xec] ss:$16 sps:$4 sm:$0xff]  }
 0x306   :  { %2203 = vmatprep.subr.bf16.mxu0 %v6651_v13  ;;  %2244 = vmatprep.subr.bf16.mxu1 %v6654_v33  ;;  %9225 = vst [vmem:[#allocation115_spill] sm:$0xff] %v6663_v58  ;;  %9226 = vst [vmem:[#allocation116_spill] sm:$0xff] %v6666_v38 }
 0x309   :  { %2204 = vmatpush1.bf16.msra.mxu0 %v6657_v45  ;;  %2245 = vmatpush1.bf16.msra.mxu1 %v6660_v56  ;;  %v9228_v45 = vld [vmem:[#allocation17_spill] sm:$0xff] }
 0x30a   :  { %2300 = vmatprep.subr.bf16.mxu0 %v6663_v58  ;;  %2341 = vmatprep.subr.bf16.mxu1 %v6666_v38  ;;  %v9229_v58 = vld [vmem:[#allocation16_spill] sm:$0xff]  ;;  %v9230_v38 = vld [vmem:[#allocation18_spill] sm:$0xff] }
 0x32b   :  { %v1489_v13 = vpop.f32.mrf.mxu0  ;;  %v1530_v22 = vpop.f32.mrf.mxu1 }
 0x32c   :  { %v1537_v33 = vadd.f32 %v1489_v13, %v9227_v63  ;;  %v1539_v43 = vadd.f32 %v1530_v22, %v9229_v58  ;;  %v6690_v58 = vld [vmem:[#allocation8 + $0xcc] ss:$16 sps:$4 sm:$0xff]  }
 0x32d   :  { %v1491_v40 = vpop.f32.mrf.mxu0  ;;  %v1532_v9 = vpop.f32.mrf.mxu1 }
 0x32e   :  { %v4320_v25 = vmul.f32 -1.442695, %v1537_v33  ;;  %v1538_v19 = vadd.f32 %v1491_v40, %v9228_v45  ;;  %v4322_v28 = vmul.f32 -1.442695, %v1539_v43  ;;  %v1540_v47 = vadd.f32 %v1532_v9, %v9230_v38  ;;  %v6684_v9 = vld [vmem:[#allocation8 + $0xe8] ss:$16 sps:$4 sm:$0xff]  }
 0x32f   :  { %v1493_v46 = vpop.f32.mrf.mxu0  ;;  %v1534_v44 = vpop.f32.mrf.mxu1  ;;  %v6693_v38 = vld [vmem:[#allocation8 + $0xc0] ss:$16 sps:$4 sm:$0xff]   ;;  %v6696_v33 = vld [vmem:[#allocation8 + $0xc8] ss:$16 sps:$4 sm:$0xff]  }
 0x330   :  { %4796 = vpow2.f32 %v4320_v25  ;;  %v4321_v56 = vmul.f32 -1.442695, %v1538_v19 }
 0x331   :  { %v1494_v55 = vpop.f32.mrf.mxu0  ;;  %v1535_v1 = vpop.f32.mrf.mxu1 }
 0x332   :  { %4798 = vpow2.f32 %v4321_v56 }
 0x333   :  { %4800 = vpow2.f32 %v4322_v28 }
 0x334   :  { %4802 = vtanh.f32 %v1540_v47 }
 0x33d   :  { %v4797_v21 = vpop.eup %4796 }
 0x33e   :  { %v1550_v23 = vadd.f32 1.0, %v4797_v21 }
 0x33f   :  { %v4799_v63 = vpop.eup %4798 }
 0x340   :  { %4804 = vrcp.f32 %v1550_v23  ;;  %v1551_v13 = vadd.f32 1.0, %v4799_v63  ;;  %v4801_v40 = vpop.eup %4800  ;;  %v6681_v23 = vld [vmem:[#allocation8 + $0xe0] ss:$16 sps:$4 sm:$0xff]   ;;  %v6699_v63 = vld [vmem:[#allocation8 + $0xa4] ss:$16 sps:$4 sm:$0xff]  }
 0x341   :  { %v4803_v44 = vpop.eup %4802  ;;  %v1552_v1 = vadd.f32 1.0, %v4801_v40 }
 0x342   :  { %4806 = vrcp.f32 %v1551_v13  ;;  %v6702_v13 = vld [vmem:[#allocation8 + $0xac] ss:$16 sps:$4 sm:$0xff]  }
 0x343   :  { %4808 = vrcp.f32 %v1552_v1  ;;  %v6707_v1 = vld [vmem:[#allocation8 + $0xa0] ss:$16 sps:$4 sm:$0xff]  }
 0x344   :  { %9231 = vst [vmem:[#allocation15_spill] sm:$0xff] %v6707_v1 }
 0x34d   :  { %v4805_v46 = vpop.eup %4804 }
 0x34e   :  { %v1561_v19 = vmul.f32 %v4805_v46, %v4803_v44 }
 0x34f   :  { %v4807_v25 = vpop.eup %4806 }
 0x350   :  { %v1560_v55 = vmul.f32 %v4807_v25, %v6284_v7  ;;  %v4809_v21 = vpop.eup %4808  ;;  %v6687_v7 = vld [vmem:[#allocation8 + $0xc4] ss:$16 sps:$4 sm:$0xff]  }
 0x352   :  { %v6674_v22 = vadd.f32 %v1561_v19, %v1560_v55  ;;  %v6710_v55 = vld [vmem:[#allocation8 + $0xa8] ss:$16 sps:$4 sm:$0xff]  }
 0x353   :  { %9232 = vst [vmem:[#allocation17_spill] sm:$0xff] %v6710_v55 }
 0x354   :  { %4810 = vtanh.f32 %v6674_v22 }
 0x361   :  { %v4811_v28 = vpop.eup %4810 }
 0x362   :  { %v1564_v43 = vmul.f32 %v4811_v28, %v4809_v21 }
 0x364   :  { %v6677_v47 = vpack.c.bf16 %v1564_v43, %v1564_v43  ;;  %v6713_v43 = vld [vmem:[#allocation8 + $0x84] ss:$16 sps:$4 sm:$0xff]  }
 0x366   :  { %2222 = vmatmul.mubr.bf16.vlgmr.msra.gmra.mxu0 %v6677_v47  ;;  %2263 = vmatmul.mubr.bf16.vlgmr.msra.gmra.mxu1 %v6677_v47 }
 0x367   :  { %2301 = vmatpush1.bf16.msra.mxu0 %v6681_v23  ;;  %2342 = vmatpush1.bf16.msra.mxu1 %v6684_v9 }
 0x368   :  { %2302 = vmatprep.subr.bf16.mxu0 %v6687_v7  ;;  %2343 = vmatprep.subr.bf16.mxu1 %v6690_v58 }
 0x36b   :  { %2303 = vmatpush1.bf16.msra.mxu0 %v6693_v38  ;;  %2344 = vmatpush1.bf16.msra.mxu1 %v6696_v33 }
 0x36c   :  { %v1600_v45 = vpop.f32.mrf.mxu0  ;;  %v1641_v56 = vpop.f32.mrf.mxu1  ;;  %2304 = vmatprep.subr.bf16.mxu0 %v6699_v63  ;;  %2345 = vmatprep.subr.bf16.mxu1 %v6702_v13 }
 0x36d   :  { %v1601_v40 = vadd.f32 %v1600_v45, %v6299_v17  ;;  %v6716_v45 = vld [vmem:[#allocation8 + $0x8c] ss:$16 sps:$4 sm:$0xff]  }
 0x36e   :  { %v1602_v44 = vpop.f32.mrf.mxu0  ;;  %v1643_v46 = vpop.f32.mrf.mxu1 }
 0x36f   :  { %v4323_v19 = vmul.f32 -1.442695, %v1601_v40  ;;  %v1603_v25 = vadd.f32 %v1602_v44, %v6302_v15  ;;  %2305 = vmatpush1.bf16.msra.mxu0 %v6707_v1  ;;  %2346 = vmatpush1.bf16.msra.mxu1 %v6710_v55  ;;  %v6719_v1 = vld [vmem:[#allocation8 + $0x80] ss:$16 sps:$4 sm:$0xff]   ;;  %v6722_v55 = vld [vmem:[#allocation8 + $0x88] ss:$16 sps:$4 sm:$0xff]  }
 0x370   :  { %v1604_v21 = vpop.f32.mrf.mxu0  ;;  %v1645_v28 = vpop.f32.mrf.mxu1  ;;  %2306 = vmatprep.subr.bf16.mxu0 %v6713_v43  ;;  %2347 = vmatprep.subr.bf16.mxu1 %v6716_v45  ;;  %9233 = vst [vmem:[#allocation16_spill] sm:$0xff] %v6722_v55 }
 0x371   :  { %4812 = vpow2.f32 %v4323_v19  ;;  %v4324_v40 = vmul.f32 -1.442695, %v1603_v25  ;;  %v6725_v21 = vld [vmem:[#allocation8 + $0x64] ss:$16 sps:$4 sm:$0xff]   ;;  %v6728_v28 = vld [vmem:[#allocation8 + $0x6c] ss:$16 sps:$4 sm:$0xff]   ;;  %v1642_v25 = vadd.f32 %v1641_v56, %v6315_v37 }
 0x372   :  { %v1605_v44 = vpop.f32.mrf.mxu0  ;;  %v1646_v15 = vpop.f32.mrf.mxu1  ;;  %9234 = vst [vmem:[#allocation18_spill] sm:$0xff] %v6725_v21  ;;  %9235 = vst [vmem:[#allocation117_spill] sm:$0xff] %v6728_v28  ;;  %v6731_v19 = vld [vmem:[#allocation8 + $0x60] ss:$16 sps:$4 sm:$0xff]   ;;  %v6753_v56 = vld [vmem:[#allocation8 + $0x2c] ss:$16 sps:$4 sm:$0xff]  }
 0x373   :  { %4814 = vpow2.f32 %v4324_v40  ;;  %2307 = vmatpush1.bf16.msra.mxu0 %v6719_v1  ;;  %2348 = vmatpush1.bf16.msra.mxu1 %v6722_v55  ;;  %9236 = vst [vmem:[#allocation118_spill] sm:$0xff] %v6731_v19  ;;  %v6734_v15 = vld [vmem:[#allocation8 + $0x68] ss:$16 sps:$4 sm:$0xff]   ;;  %v6738_v40 = vld [vmem:[#allocation8 + $0x44] ss:$16 sps:$4 sm:$0xff]  }
 0x374   :  { %2308 = vmatprep.subr.bf16.mxu0 %v6725_v21  ;;  %2349 = vmatprep.subr.bf16.mxu1 %v6728_v28  ;;  %9237 = vst [vmem:[#allocation119_spill] sm:$0xff] %v6734_v15  ;;  %9238 = vst [vmem:[#allocation120_spill] sm:$0xff] %v6738_v40  ;;  %v6741_v44 = vld [vmem:[#allocation8 + $0x4c] ss:$16 sps:$4 sm:$0xff]   ;;  %v6744_v21 = vld [vmem:[#allocation8 + $0x40] ss:$16 sps:$4 sm:$0xff]  }
 0x375   :  { %9239 = vst [vmem:[#allocation121_spill] sm:$0xff] %v6741_v44  ;;  %9240 = vst [vmem:[#allocation122_spill] sm:$0xff] %v6744_v21  ;;  %v6747_v28 = vld [vmem:[#allocation8 + $0x48] ss:$16 sps:$4 sm:$0xff]   ;;  %v6757_v55 = vld [vmem:[#allocation8 + $0x20] ss:$16 sps:$4 sm:$0xff]  }
 0x376   :  { %9241 = vst [vmem:[#allocation123_spill] sm:$0xff] %v6747_v28  ;;  %9243 = vst [vmem:[#allocation125_spill] sm:$0xff] %v6757_v55 }
 0x377   :  { %2309 = vmatpush1.bf16.msra.mxu0 %v6731_v19  ;;  %2350 = vmatpush1.bf16.msra.mxu1 %v6734_v15  ;;  %v4325_v19 = vmul.f32 -1.442695, %v1642_v25  ;;  %v6750_v15 = vld [vmem:[#allocation8 + $0x24] ss:$16 sps:$4 sm:$0xff]  }
 0x378   :  { %2310 = vmatprep.subr.bf16.mxu0 %v6738_v40  ;;  %2351 = vmatprep.subr.bf16.mxu1 %v6741_v44  ;;  %9242 = vst [vmem:[#allocation124_spill] sm:$0xff] %v6750_v15  ;;  %v1644_v44 = vadd.f32 %v1643_v46, %v6327_v48  ;;  %v6769_v46 = vld [vmem:[#allocation8] ss:$16 sps:$4 sm:$0xff]  }
 0x379   :  { %4816 = vpow2.f32 %v4325_v19  ;;  %9247 = vst [vmem:[#allocation129_spill] sm:$0xff] %v6769_v46  ;;  %v6775_v19 = vld [vmem:[#allocation8 + $0x1e4] ss:$16 sps:$4 sm:$0xff]  }
 0x37a   :  { %9249 = vst [vmem:[#allocation131_spill] sm:$0xff] %v6775_v19 }
 0x37b   :  { %2311 = vmatpush1.bf16.msra.mxu0 %v6744_v21  ;;  %2352 = vmatpush1.bf16.msra.mxu1 %v6747_v28  ;;  %v6760_v21 = vld [vmem:[#allocation8 + $0x28] ss:$16 sps:$4 sm:$0xff]   ;;  %v6763_v28 = vld [vmem:[#allocation8 + $0x4] ss:$16 sps:$4 sm:$0xff]  }
 0x37c   :  { %2312 = vmatprep.subr.bf16.mxu0 %v6750_v15  ;;  %2353 = vmatprep.subr.bf16.mxu1 %v6753_v56  ;;  %9244 = vst [vmem:[#allocation126_spill] sm:$0xff] %v6760_v21  ;;  %9245 = vst [vmem:[#allocation127_spill] sm:$0xff] %v6763_v28  ;;  %v6766_v15 = vld [vmem:[#allocation8 + $0xc] ss:$16 sps:$4 sm:$0xff]  }
 0x37d   :  { %9246 = vst [vmem:[#allocation128_spill] sm:$0xff] %v6766_v15 }
 0x37e   :  { %v4813_v37 = vpop.eup %4812 }
 0x37f   :  { %v1657_v40 = vadd.f32 1.0, %v4813_v37  ;;  %2313 = vmatpush1.bf16.msra.mxu0 %v6757_v55  ;;  %2354 = vmatpush1.bf16.msra.mxu1 %v6760_v21  ;;  %v6772_v55 = vld [vmem:[#allocation8 + $0x8] ss:$16 sps:$4 sm:$0xff]  }
 0x380   :  { %v4815_v25 = vpop.eup %4814  ;;  %2314 = vmatprep.subr.bf16.mxu0 %v6763_v28  ;;  %2355 = vmatprep.subr.bf16.mxu1 %v6766_v15  ;;  %9248 = vst [vmem:[#allocation130_spill] sm:$0xff] %v6772_v55  ;;  %v6778_v28 = vld [vmem:[#allocation8 + $0x1ec] ss:$16 sps:$4 sm:$0xff]   ;;  %v6807_v15 = vld [vmem:[#allocation8 + $0x184] ss:$16 sps:$4 sm:$0xff]  }
 0x381   :  { %4818 = vrcp.f32 %v1657_v40  ;;  %v1658_v37 = vadd.f32 1.0, %v4815_v25  ;;  %9250 = vst [vmem:[#allocation132_spill] sm:$0xff] %v6778_v28  ;;  %v6781_v40 = vld [vmem:[#allocation8 + $0x1e0] ss:$16 sps:$4 sm:$0xff]   ;;  %v6787_v25 = vld [vmem:[#allocation8 + $0x1c4] ss:$16 sps:$4 sm:$0xff]  }
 0x382   :  { %4820 = vtanh.f32 %v1644_v44  ;;  %9251 = vst [vmem:[#allocation133_spill] sm:$0xff] %v6781_v40  ;;  %v6784_v44 = vld [vmem:[#allocation8 + $0x1e8] ss:$16 sps:$4 sm:$0xff]   ;;  %9253 = vst [vmem:[#allocation135_spill] sm:$0xff] %v6787_v25 }
 0x383   :  { %4822 = vrcp.f32 %v1658_v37  ;;  %2315 = vmatpush1.bf16.msra.mxu0 %v6769_v46  ;;  %2356 = vmatpush1.bf16.msra.mxu1 %v6772_v55  ;;  %9252 = vst [vmem:[#allocation134_spill] sm:$0xff] %v6784_v44  ;;  %v6790_v37 = vld [vmem:[#allocation8 + $0x1cc] ss:$16 sps:$4 sm:$0xff]   ;;  %9259 = vst [vmem:[#allocation141_spill] sm:$0xff] %v6807_v15 }
 0x384   :  { %2316 = vmatprep.subr.bf16.mxu0 %v6775_v19  ;;  %2357 = vmatprep.subr.bf16.mxu1 %v6778_v28  ;;  %9254 = vst [vmem:[#allocation136_spill] sm:$0xff] %v6790_v37  ;;  %v6793_v19 = vld [vmem:[#allocation8 + $0x1c0] ss:$16 sps:$4 sm:$0xff]   ;;  %v6796_v28 = vld [vmem:[#allocation8 + $0x1c8] ss:$16 sps:$4 sm:$0xff]  }
 0x385   :  { %9255 = vst [vmem:[#allocation137_spill] sm:$0xff] %v6793_v19  ;;  %9256 = vst [vmem:[#allocation138_spill] sm:$0xff] %v6796_v28 }
 0x387   :  { %2317 = vmatpush2.bf16.msra.mxu0 %v6781_v40  ;;  %2358 = vmatpush2.bf16.msra.mxu1 %v6784_v44  ;;  %v4817_v44 = vpop.eup %4816 }
 0x388   :  { %2318 = vmatprep.subr.bf16.mxu0 %v6787_v25  ;;  %2359 = vmatprep.subr.bf16.mxu1 %v6790_v37  ;;  %v6801_v25 = vld [vmem:[#allocation8 + $0x1a0] ss:$16 sps:$4 sm:$0xff]   ;;  %v6804_v37 = vld [vmem:[#allocation8 + $0x1a8] ss:$16 sps:$4 sm:$0xff]   ;;  %v1659_v46 = vadd.f32 1.0, %v4817_v44 }
 0x389   :  { %9257 = vst [vmem:[#allocation139_spill] sm:$0xff] %v6801_v25  ;;  %9258 = vst [vmem:[#allocation140_spill] sm:$0xff] %v6804_v37  ;;  %v6822_v44 = vld [vmem:[#allocation8 + $0x164] ss:$16 sps:$4 sm:$0xff]  }
 0x38a   :  { %4824 = vrcp.f32 %v1659_v46  ;;  %v9275_v46 = vld [vmem:[#allocation50_spill] sm:$0xff] }
 0x38b   :  { %2319 = vmatpush2.bf16.msra.mxu0 %v6793_v19  ;;  %2360 = vmatpush2.bf16.msra.mxu1 %v6796_v28 }
 0x38c   :  { %2320 = vmatprep.subr.bf16.mxu0 %v9132_v26  ;;  %2361 = vmatprep.subr.bf16.mxu1 %v9133_v27  ;;  %v6810_v26 = vld [vmem:[#allocation8 + $0x18c] ss:$16 sps:$4 sm:$0xff]  }
 0x38e   :  { %v4819_v40 = vpop.eup %4818 }
 0x38f   :  { %v4821_v55 = vpop.eup %4820  ;;  %2321 = vmatpush2.bf16.msra.mxu0 %v6801_v25  ;;  %2362 = vmatpush2.bf16.msra.mxu1 %v6804_v37  ;;  %v6816_v25 = vld [vmem:[#allocation8 + $0x180] ss:$16 sps:$4 sm:$0xff]   ;;  %v6819_v37 = vld [vmem:[#allocation8 + $0x188] ss:$16 sps:$4 sm:$0xff]  }
 0x390   :  { %v4823_v19 = vpop.eup %4822  ;;  %2322 = vmatprep.subr.bf16.mxu0 %v6807_v15  ;;  %2363 = vmatprep.subr.bf16.mxu1 %v6810_v26  ;;  %v1668_v28 = vmul.f32 %v4821_v55, %v4819_v40  ;;  %v6825_v15 = vld [vmem:[#allocation8 + $0x16c] ss:$16 sps:$4 sm:$0xff]   ;;  %v9273_v55 = vld [vmem:[#allocation48_spill] sm:$0xff] }
 0x391   :  { %v1667_v27 = vmul.f32 %v4823_v19, %v6354_v32  ;;  %v9276_v19 = vld [vmem:[#allocation51_spill] sm:$0xff]  ;;  %v9277_v40 = vld [vmem:[#allocation52_spill] sm:$0xff] }
 0x393   :  { %v6814_v21 = vadd.f32 %v1668_v28, %v1667_v27  ;;  %2323 = vmatpush2.bf16.msra.mxu0 %v6816_v25  ;;  %2364 = vmatpush2.bf16.msra.mxu1 %v6819_v37  ;;  %v9274_v28 = vld [vmem:[#allocation49_spill] sm:$0xff] }
 0x394   :  { %2324 = vmatprep.subr.bf16.mxu0 %v6822_v44  ;;  %2365 = vmatprep.subr.bf16.mxu1 %v6825_v15  ;;  %v9278_v27 = vld [vmem:[#allocation53_spill] sm:$0xff] }
 0x395   :  { %4826 = vtanh.f32 %v6814_v21 }
 0x397   :  { %2325 = vmatpush2.bf16.msra.mxu0 %v9142_v39  ;;  %2366 = vmatpush2.bf16.msra.mxu1 %v9143_v14  ;;  %v4825_v32 = vpop.eup %4824 }
 0x398   :  { %2326 = vmatprep.subr.bf16.mxu0 %v9144_v54  ;;  %2367 = vmatprep.subr.bf16.mxu1 %v9145_v49 }
 0x39b   :  { %2327 = vmatpush2.bf16.msra.mxu0 %v9146_v29  ;;  %2368 = vmatpush2.bf16.msra.mxu1 %v6199_v20 }
 0x39c   :  { %2328 = vmatprep.subr.bf16.mxu0 %v9147_v24  ;;  %2369 = vmatprep.subr.bf16.mxu1 %v9148_v16 }
 0x39f   :  { %2329 = vmatpush2.bf16.msra.mxu0 %v6209_v36  ;;  %2370 = vmatpush2.bf16.msra.mxu1 %v9149_v50  ;;  %v1736_v36 = vld [vmem:[%s8659_s7] sm:$0xf] }
 0x3a0   :  { %2330 = vmatprep.subr.bf16.mxu0 %v6215_v35  ;;  %2371 = vmatprep.subr.bf16.mxu1 %v9150_v51  ;;  %v6862_v35 = vrot.slane %v1736_v36, %v5947_v18 }
 0x3a2   :  { %v4827_v39 = vpop.eup %4826  ;;  %9261 = vst [vmem:[#allocation143_spill] sm:$0xff] %v6862_v35 }
 0x3a3   :  { %2331 = vmatpush2.bf16.msra.mxu0 %v6221_v34  ;;  %2372 = vmatpush2.bf16.msra.mxu1 %v9151_v57  ;;  %v1671_v14 = vmul.f32 %v4827_v39, %v4825_v32  ;;  %v6857_v34 = vrot.slane %v1736_v36, %v5933_v12  ;;  %v9279_v32 = vld [vmem:[#allocation54_spill] sm:$0xff]  ;;  %v9280_v39 = vld [vmem:[#allocation55_spill] sm:$0xff] }
 0x3a4   :  { %2407 = vmatprep.subr.bf16.mxu0 %v6373_v52  ;;  %2448 = vmatprep.subr.bf16.mxu1 %v6375_v53 }
 0x3a5   :  { %v6845_v20 = vpack.c.bf16 %v1671_v14, %v1671_v14  ;;  %9260 = vst [vmem:[#allocation142_spill] sm:$0xff] %v6857_v34  ;;  %v9281_v14 = vld [vmem:[#allocation56_spill] sm:$0xff] }
 0x3a7   :  { %2332 = vmatprep.mubr.bf16.mxu0 %v6845_v20  ;;  %2373 = vmatprep.mubr.bf16.mxu1 %v6845_v20 }
 0x3a8   :  { %2333 = vmatmul.mubr.bf16.vlgmr.msra.gmra.mxu0 %v6677_v47  ;;  %2374 = vmatmul.mubr.bf16.vlgmr.msra.gmra.mxu1 %v6677_v47 }
 0x3a9   :  { %2408 = vmatpush1.bf16.msra.mxu0 %v6383_v59  ;;  %2449 = vmatpush1.bf16.msra.mxu1 %v6385_v60  ;;  %v6875_v59 = vrot.slane %v1736_v36, %v5931_v11  ;;  %v9268_v11 = vld [vmem:[#allocation43_spill] sm:$0xff] }
 0x3aa   :  { %2409 = vmatprep.subr.bf16.mxu0 %v6387_v61  ;;  %2450 = vmatprep.subr.bf16.mxu1 %v6389_v62  ;;  %v9263_v61 = vld [vmem:[#allocation40_spill] sm:$0xff]  ;;  %v9264_v62 = vld [vmem:[#allocation41_spill] sm:$0xff] }
 0x3ab   :  { %9262 = vst [vmem:[#allocation144_spill] sm:$0xff] %v6875_v59 }
 0x3ac   :  { %v2112_v54 = vpop.f32.mrf.mxu0  ;;  %v2153_v49 = vpop.f32.mrf.mxu1 }
 0x3ad   :  { %v2113_v29 = vadd.f32 %v2112_v54, %v6857_v34  ;;  %2410 = vmatpush1.bf16.msra.mxu0 %v6397_v0  ;;  %2451 = vmatpush1.bf16.msra.mxu1 %v6399_v2  ;;  %v2154_v60 = vadd.f32 %v2153_v49, %v6875_v59  ;;  %v9265_v0 = vld [vmem:[#allocation14_spill] sm:$0xff]  ;;  %v9284_v49 = vld [vmem:[#allocation59_spill] sm:$0xff] }
 0x3ae   :  { %v2114_v24 = vpop.f32.mrf.mxu0  ;;  %v2155_v16 = vpop.f32.mrf.mxu1  ;;  %2411 = vmatprep.subr.bf16.mxu0 %v6403_v3  ;;  %2452 = vmatprep.subr.bf16.mxu1 %v6405_v4  ;;  %v6885_v2 = vrot.slane %v1736_v36, %v9265_v0  ;;  %v9267_v3 = vld [vmem:[#allocation42_spill] sm:$0xff]  ;;  %v9282_v36 = vld [vmem:[#allocation57_spill] sm:$0xff] }
 0x3af   :  { %v4390_v12 = vmul.f32 -1.442695, %v2113_v29  ;;  %v2115_v50 = vadd.f32 %v2114_v24, %v6862_v35  ;;  %v4392_v4 = vmul.f32 -1.442695, %v2154_v60  ;;  %v9283_v54 = vld [vmem:[#allocation58_spill] sm:$0xff]  ;;  %v9285_v24 = vld [vmem:[#allocation60_spill] sm:$0xff] }
 0x3b0   :  { %v2116_v51 = vpop.f32.mrf.mxu0  ;;  %v2157_v18 = vpop.f32.mrf.mxu1  ;;  %9266 = vst [vmem:[#allocation40_spill] sm:$0xff] %v6885_v2  ;;  %v9291_v0 = vld [vmem:[#allocation66_spill] sm:$0xff] }
 0x3b1   :  { %4828 = vpow2.f32 %v4390_v12  ;;  %v4391_v52 = vmul.f32 -1.442695, %v2115_v50  ;;  %2412 = vmatpush1.bf16.msra.mxu0 %v6411_v30  ;;  %2453 = vmatpush1.bf16.msra.mxu1 %v6413_v5  ;;  %v9269_v30 = vld [vmem:[#allocation44_spill] sm:$0xff]  ;;  %v9270_v5 = vld [vmem:[#allocation45_spill] sm:$0xff]  ;;  %v9287_v50 = vld [vmem:[#allocation62_spill] sm:$0xff] }
 0x3b2   :  { %v2117_v53 = vpop.f32.mrf.mxu0  ;;  %v2158_v57 = vpop.f32.mrf.mxu1  ;;  %2413 = vmatprep.subr.bf16.mxu0 %v6417_v6  ;;  %2454 = vmatprep.subr.bf16.mxu1 %v6419_v8  ;;  %v2156_v8 = vadd.f32 %v2155_v16, %v6885_v2  ;;  %v9286_v16 = vld [vmem:[#allocation61_spill] sm:$0xff]  ;;  %v9288_v51 = vld [vmem:[#allocation63_spill] sm:$0xff] }
 0x3b3   :  { %4830 = vpow2.f32 %v4391_v52 }
 0x3b4   :  { %4832 = vpow2.f32 %v4392_v4  ;;  %v9293_v4 = vld [vmem:[#allocation68_spill] sm:$0xff] }
 0x3b5   :  { %2414 = vmatpush1.bf16.msra.mxu0 %v6423_v31  ;;  %2455 = vmatpush1.bf16.msra.mxu1 %v6425_v41  ;;  %v9271_v31 = vld [vmem:[#allocation46_spill] sm:$0xff]  ;;  %v9272_v41 = vld [vmem:[#allocation47_spill] sm:$0xff] }
 0x3b6   :  { %2415 = vmatprep.subr.bf16.mxu0 %v6429_v42  ;;  %2456 = vmatprep.subr.bf16.mxu1 %v6431_v10 }
 0x3b9   :  { %2416 = vmatpush1.bf16.msra.mxu0 %v9263_v61  ;;  %2457 = vmatpush1.bf16.msra.mxu1 %v9264_v62  ;;  %v9289_v61 = vld [vmem:[#allocation64_spill] sm:$0xff]  ;;  %v9290_v62 = vld [vmem:[#allocation65_spill] sm:$0xff] }
 0x3ba   :  { %2417 = vmatprep.subr.bf16.mxu0 %v9267_v3  ;;  %2458 = vmatprep.subr.bf16.mxu1 %v9268_v11  ;;  %v9292_v3 = vld [vmem:[#allocation67_spill] sm:$0xff] }
 0x3bd   :  { %2418 = vmatpush1.bf16.msra.mxu0 %v9269_v30  ;;  %2459 = vmatpush1.bf16.msra.mxu1 %v9270_v5  ;;  %v9294_v30 = vld [vmem:[#allocation69_spill] sm:$0xff]  ;;  %v9295_v5 = vld [vmem:[#allocation70_spill] sm:$0xff] }
 0x3be   :  { %v4829_v6 = vpop.eup %4828  ;;  %2419 = vmatprep.subr.bf16.mxu0 %v9271_v31  ;;  %2460 = vmatprep.subr.bf16.mxu1 %v9272_v41  ;;  %v9298_v31 = vld [vmem:[#allocation73_spill] sm:$0xff]  ;;  %v9299_v41 = vld [vmem:[#allocation74_spill] sm:$0xff] }
 0x3bf   :  { %v2169_v42 = vadd.f32 1.0, %v4829_v6  ;;  %v9296_v6 = vld [vmem:[#allocation71_spill] sm:$0xff] }
 0x3c0   :  { %v4831_v10 = vpop.eup %4830 }
 0x3c1   :  { %4834 = vrcp.f32 %v2169_v42  ;;  %v2170_v47 = vadd.f32 1.0, %v4831_v10  ;;  %2420 = vmatpush1.bf16.msra.mxu0 %v9273_v55  ;;  %2461 = vmatpush1.bf16.msra.mxu1 %v9274_v28  ;;  %v4833_v29 = vpop.eup %4832  ;;  %v9300_v42 = vld [vmem:[#allocation75_spill] sm:$0xff]  ;;  %v9301_v10 = vld [vmem:[#allocation76_spill] sm:$0xff]  ;;  %v9303_v55 = vld [vmem:[#allocation78_spill] sm:$0xff] }
 0x3c2   :  { %4836 = vtanh.f32 %v2156_v8  ;;  %2421 = vmatprep.subr.bf16.mxu0 %v9275_v46  ;;  %2462 = vmatprep.subr.bf16.mxu1 %v9276_v19  ;;  %v2171_v53 = vadd.f32 1.0, %v4833_v29  ;;  %v9297_v8 = vld [vmem:[#allocation72_spill] sm:$0xff]  ;;  %v9304_v28 = vld [vmem:[#allocation79_spill] sm:$0xff] }
 0x3c3   :  { %4838 = vrcp.f32 %v2170_v47  ;;  %v9302_v47 = vld [vmem:[#allocation77_spill] sm:$0xff]  ;;  %v9305_v19 = vld [vmem:[#allocation84_spill] sm:$0xff] }
 0x3c4   :  { %4840 = vrcp.f32 %v2171_v53  ;;  %v6935_v29 = vld [vmem:[#allocation6 + $0xe4] ss:$16 sps:$4 sm:$0xff]   ;;  %v9314_v53 = vld [vmem:[#allocation91_spill] sm:$0xff] }
 0x3c5   :  { %2422 = vmatpush1.bf16.msra.mxu0 %v9277_v40  ;;  %2463 = vmatpush1.bf16.msra.mxu1 %v9278_v27  ;;  %v9306_v40 = vld [vmem:[#allocation85_spill] sm:$0xff] }
 0x3c6   :  { %2423 = vmatprep.subr.bf16.mxu0 %v9279_v32  ;;  %2464 = vmatprep.subr.bf16.mxu1 %v9280_v39  ;;  %v9307_v32 = vld [vmem:[#allocation86_spill] sm:$0xff]  ;;  %v9308_v39 = vld [vmem:[#allocation87_spill] sm:$0xff] }
 0x3c9   :  { %2424 = vmatpush2.bf16.msra.mxu0 %v9281_v14  ;;  %2465 = vmatpush2.bf16.msra.mxu1 %v9282_v36  ;;  %v9309_v36 = vld [vmem:[#allocation88_spill] sm:$0xff] }
 0x3ca   :  { %2425 = vmatprep.subr.bf16.mxu0 %v9283_v54  ;;  %2466 = vmatprep.subr.bf16.mxu1 %v9284_v49  ;;  %v9310_v54 = vld [vmem:[#allocation89_spill] sm:$0xff] }
 0x3cd   :  { %2426 = vmatpush2.bf16.msra.mxu0 %v9285_v24  ;;  %2467 = vmatpush2.bf16.msra.mxu1 %v9286_v16  ;;  %v6938_v24 = vld [vmem:[#allocation6 + $0xec] ss:$16 sps:$4 sm:$0xff]   ;;  %v6943_v16 = vld [vmem:[#allocation6 + $0xe0] ss:$16 sps:$4 sm:$0xff]  }
 0x3ce   :  { %v4835_v12 = vpop.eup %4834  ;;  %2427 = vmatprep.subr.bf16.mxu0 %v9287_v50  ;;  %2468 = vmatprep.subr.bf16.mxu1 %v9288_v51  ;;  %v6949_v50 = vld [vmem:[#allocation6 + $0xc4] ss:$16 sps:$4 sm:$0xff]   ;;  %v6952_v51 = vld [vmem:[#allocation6 + $0xcc] ss:$16 sps:$4 sm:$0xff]  }
 0x3cf   :  { %v4837_v18 = vpop.eup %4836 }
 0x3d0   :  { %v4839_v52 = vpop.eup %4838  ;;  %v2180_v60 = vmul.f32 %v4837_v18, %v4835_v12  ;;  %v6946_v12 = vld [vmem:[#allocation6 + $0xe8] ss:$16 sps:$4 sm:$0xff]   ;;  %v9311_v18 = vmov 0  }
 0x3d1   :  { %v2179_v57 = vmul.f32 0.0, %v4839_v52  ;;  %2428 = vmatpush2.bf16.msra.mxu0 %v9289_v61  ;;  %2469 = vmatpush2.bf16.msra.mxu1 %v9290_v62  ;;  %v4841_v46 = vpop.eup %4840  ;;  %v9313_v52 = vld [vmem:[#allocation90_spill] sm:$0xff]  ;;  %v9318_v62 = vld [vmem:[#allocation95_spill] sm:$0xff] }
 0x3d2   :  { %2429 = vmatprep.subr.bf16.mxu0 %v9291_v0  ;;  %2470 = vmatprep.subr.bf16.mxu1 %v9292_v3  ;;  %v9317_v61 = vld [vmem:[#allocation94_spill] sm:$0xff]  ;;  %v9319_v0 = vld [vmem:[#allocation96_spill] sm:$0xff]  ;;  %v9320_v3 = vld [vmem:[#allocation97_spill] sm:$0xff] }
 0x3d3   :  { %v6914_v11 = vadd.f32 %v2180_v60, %v2179_v57  ;;  %v9315_v57 = vld [vmem:[#allocation92_spill] sm:$0xff]  ;;  %v9316_v60 = vld [vmem:[#allocation93_spill] sm:$0xff] }
 0x3d5   :  { %2430 = vmatpush2.bf16.msra.mxu0 %v9293_v4  ;;  %2471 = vmatpush2.bf16.msra.mxu1 %v9294_v30  ;;  %4842 = vtanh.f32 %v6914_v11  ;;  %v9321_v4 = vld [vmem:[#allocation98_spill] sm:$0xff]  ;;  %v9322_v30 = vld [vmem:[#allocation99_spill] sm:$0xff] }
 0x3d6   :  { %2431 = vmatprep.subr.bf16.mxu0 %v9295_v5  ;;  %2472 = vmatprep.subr.bf16.mxu1 %v9296_v6  ;;  %v9323_v5 = vld [vmem:[#allocation100_spill] sm:$0xff]  ;;  %v9324_v6 = vld [vmem:[#allocation101_spill] sm:$0xff] }
 0x3d9   :  { %2432 = vmatpush2.bf16.msra.mxu0 %v9297_v8  ;;  %2473 = vmatpush2.bf16.msra.mxu1 %v9298_v31  ;;  %v9325_v8 = vld [vmem:[#allocation102_spill] sm:$0xff]  ;;  %v9326_v31 = vld [vmem:[#allocation103_spill] sm:$0xff] }
 0x3da   :  { %2433 = vmatprep.subr.bf16.mxu0 %v9299_v41  ;;  %2474 = vmatprep.subr.bf16.mxu1 %v9300_v42  ;;  %v9327_v41 = vld [vmem:[#allocation104_spill] sm:$0xff]  ;;  %v9328_v42 = vld [vmem:[#allocation105_spill] sm:$0xff] }
 0x3dd   :  { %2434 = vmatpush2.bf16.msra.mxu0 %v9301_v10  ;;  %2475 = vmatpush2.bf16.msra.mxu1 %v9302_v47  ;;  %v9329_v10 = vld [vmem:[#allocation106_spill] sm:$0xff]  ;;  %v9330_v47 = vld [vmem:[#allocation107_spill] sm:$0xff] }
 0x3de   :  { %2435 = vmatprep.subr.bf16.mxu0 %v9303_v55  ;;  %2476 = vmatprep.subr.bf16.mxu1 %v9304_v28  ;;  %v9331_v55 = vld [vmem:[#allocation108_spill] sm:$0xff]  ;;  %v9332_v28 = vld [vmem:[#allocation109_spill] sm:$0xff] }
 0x3e1   :  { %2436 = vmatpush2.bf16.msra.mxu0 %v9305_v19  ;;  %2477 = vmatpush2.bf16.msra.mxu1 %v9306_v40  ;;  %v9334_v19 = vld [vmem:[#allocation111_spill] sm:$0xff]  ;;  %v9335_v40 = vld [vmem:[#allocation112_spill] sm:$0xff] }
 0x3e2   :  { %v4843_v27 = vpop.eup %4842  ;;  %2437 = vmatprep.subr.bf16.mxu0 %v9307_v32  ;;  %2478 = vmatprep.subr.bf16.mxu1 %v9308_v39  ;;  %v9337_v32 = vld [vmem:[#allocation114_spill] sm:$0xff]  ;;  %v9338_v39 = vld [vmem:[#allocation115_spill] sm:$0xff] }
 0x3e3   :  { %v2183_v14 = vmul.f32 %v4843_v27, %v4841_v46  ;;  %v9333_v46 = vld [vmem:[#allocation110_spill] sm:$0xff]  ;;  %v9336_v27 = vld [vmem:[#allocation113_spill] sm:$0xff] }
 0x3e5   :  { %2438 = vmatpush2.bf16.msra.mxu0 %v9309_v36  ;;  %2479 = vmatpush2.bf16.msra.mxu1 %v9310_v54  ;;  %v2406_v49 = vpack.c.bf16 %v2183_v14, %v2183_v14  ;;  %v9339_v14 = vld [vmem:[#allocation116_spill] sm:$0xff] }
 0x3e6   :  { %2518 = vmatprep.subr.bf16.mxu0 %v6935_v29  ;;  %2559 = vmatprep.subr.bf16.mxu1 %v6938_v24 }
 0x3e7   :  { %2439 = vmatprep.mubr.bf16.mxu0 %v2406_v49  ;;  %2480 = vmatprep.mubr.bf16.mxu1 %v2406_v49  ;;  %v9340_v49 = vld [vmem:[#allocation19_spill] sm:$0xff] }
 0x3e8   :  { %2440 = vmatmul.mubr.bf16.vlgmr.msra.gmra.mxu0 %v6845_v20  ;;  %2481 = vmatmul.mubr.bf16.vlgmr.msra.gmra.mxu1 %v6845_v20  ;;  %v9312_v20 = vld [vmem:[#allocation80_spill] sm:$0xff] }
 0x3e9   :  { %2519 = vmatpush1.bf16.msra.mxu0 %v6943_v16  ;;  %2560 = vmatpush1.bf16.msra.mxu1 %v6946_v12 }
 0x3ea   :  { %2520 = vmatprep.subr.bf16.mxu0 %v6949_v50  ;;  %2561 = vmatprep.subr.bf16.mxu1 %v6952_v51 }
 0x3eb   :  { %2550 = vmatprep.mubr.bf16.mxu0 %v9311_v18  ;;  %2591 = vmatprep.mubr.bf16.mxu1 %v9311_v18 }
 0x3ed   :  { %2521 = vmatpush1.bf16.msra.mxu0 %v9312_v20  ;;  %2562 = vmatpush1.bf16.msra.mxu1 %v9313_v52 }
 0x3ee   :  { %2522 = vmatprep.subr.bf16.mxu0 %v9314_v53  ;;  %2563 = vmatprep.subr.bf16.mxu1 %v9315_v57 }
 0x3f1   :  { %2523 = vmatpush1.bf16.msra.mxu0 %v9316_v60  ;;  %2564 = vmatpush1.bf16.msra.mxu1 %v9317_v61  ;;  %v9341_v60 = vld [vmem:[#allocation21_spill] sm:$0xff] }
 0x3f2   :  { %2524 = vmatprep.subr.bf16.mxu0 %v9318_v62  ;;  %2565 = vmatprep.subr.bf16.mxu1 %v9319_v0 }
 0x3f5   :  { %2525 = vmatpush1.bf16.msra.mxu0 %v9320_v3  ;;  %2566 = vmatpush1.bf16.msra.mxu1 %v9321_v4 }
 0x3f6   :  { %2526 = vmatprep.subr.bf16.mxu0 %v9322_v30  ;;  %2567 = vmatprep.subr.bf16.mxu1 %v9323_v5  ;;  %v9342_v5 = vld [vmem:[#allocation20_spill] sm:$0xff] }
 0x3f9   :  { %2527 = vmatpush1.bf16.msra.mxu0 %v9324_v6  ;;  %2568 = vmatpush1.bf16.msra.mxu1 %v9325_v8 }
 0x3fa   :  { %2528 = vmatprep.subr.bf16.mxu0 %v9326_v31  ;;  %2569 = vmatprep.subr.bf16.mxu1 %v9327_v41  ;;  %v9343_v31 = vld [vmem:[#allocation22_spill] sm:$0xff] }
 0x3fd   :  { %2529 = vmatpush1.bf16.msra.mxu0 %v9328_v42  ;;  %2570 = vmatpush1.bf16.msra.mxu1 %v9329_v10 }
 0x3fe   :  { %2530 = vmatprep.subr.bf16.mxu0 %v9330_v47  ;;  %2571 = vmatprep.subr.bf16.mxu1 %v9331_v55 }
 0x401   :  { %2531 = vmatpush1.bf16.msra.mxu0 %v9332_v28  ;;  %2572 = vmatpush1.bf16.msra.mxu1 %v9333_v46 }
 0x402   :  { %2532 = vmatprep.subr.bf16.mxu0 %v9334_v19  ;;  %2573 = vmatprep.subr.bf16.mxu1 %v9335_v40 }
 0x405   :  { %2533 = vmatpush1.bf16.msra.mxu0 %v9336_v27  ;;  %2574 = vmatpush1.bf16.msra.mxu1 %v9337_v32 }
 0x406   :  { %2629 = vmatprep.subr.bf16.mxu0 %v9338_v39  ;;  %2670 = vmatprep.subr.bf16.mxu1 %v9339_v14 }
 0x426   :  { %v2223_v36 = vpop.f32.mrf.mxu0  ;;  %v2264_v54 = vpop.f32.mrf.mxu1 }
 0x427   :  { %v2271_v20 = vadd.f32 %v2223_v36, %v9340_v49  ;;  %v2273_v6 = vadd.f32 %v2264_v54, %v9342_v5  ;;  %v9353_v5 = vld [vmem:[#allocation121_spill] sm:$0xff] }
 0x428   :  { %v2225_v52 = vpop.f32.mrf.mxu0  ;;  %v2266_v53 = vpop.f32.mrf.mxu1 }
 0x429   :  { %v4393_v57 = vmul.f32 -1.442695, %v2271_v20  ;;  %v2272_v61 = vadd.f32 %v2225_v52, %v9341_v60  ;;  %v4395_v8 = vmul.f32 -1.442695, %v2273_v6  ;;  %v2274_v41 = vadd.f32 %v2266_v53, %v9343_v31  ;;  %v9344_v60 = vld [vmem:[#allocation15_spill] sm:$0xff]  ;;  %v9355_v31 = vld [vmem:[#allocation122_spill] sm:$0xff] }
 0x42a   :  { %v2227_v62 = vpop.f32.mrf.mxu0  ;;  %v2268_v0 = vpop.f32.mrf.mxu1  ;;  %v9354_v6 = vld [vmem:[#allocation83_spill] sm:$0xff] }
 0x42b   :  { %4844 = vpow2.f32 %v4393_v57  ;;  %v4394_v3 = vmul.f32 -1.442695, %v2272_v61  ;;  %v9347_v0 = vld [vmem:[#allocation16_spill] sm:$0xff] }
 0x42c   :  { %v2228_v4 = vpop.f32.mrf.mxu0  ;;  %v2269_v30 = vpop.f32.mrf.mxu1 }
 0x42d   :  { %4846 = vpow2.f32 %v4394_v3  ;;  %v9348_v3 = vld [vmem:[#allocation18_spill] sm:$0xff]  ;;  %v9349_v4 = vld [vmem:[#allocation117_spill] sm:$0xff] }
 0x42e   :  { %4848 = vpow2.f32 %v4395_v8  ;;  %v9350_v30 = vld [vmem:[#allocation118_spill] sm:$0xff] }
 0x42f   :  { %4850 = vtanh.f32 %v2274_v41  ;;  %v9357_v41 = vld [vmem:[#allocation124_spill] sm:$0xff] }
 0x438   :  { %v4845_v42 = vpop.eup %4844 }
 0x439   :  { %v2284_v10 = vadd.f32 1.0, %v4845_v42 }
 0x43a   :  { %v4847_v47 = vpop.eup %4846 }
 0x43b   :  { %4852 = vrcp.f32 %v2284_v10  ;;  %v2285_v55 = vadd.f32 1.0, %v4847_v47  ;;  %v4849_v28 = vpop.eup %4848 }
 0x43c   :  { %v4851_v46 = vpop.eup %4850  ;;  %v2286_v32 = vadd.f32 1.0, %v4849_v28  ;;  %v9359_v28 = vld [vmem:[#allocation126_spill] sm:$0xff] }
 0x43d   :  { %4854 = vrcp.f32 %v2285_v55  ;;  %v9358_v55 = vld [vmem:[#allocation125_spill] sm:$0xff] }
 0x43e   :  { %4856 = vrcp.f32 %v2286_v32 }
 0x448   :  { %v4853_v19 = vpop.eup %4852 }
 0x449   :  { %v2295_v40 = vmul.f32 %v4853_v19, %v4851_v46  ;;  %v9360_v19 = vld [vmem:[#allocation127_spill] sm:$0xff] }
 0x44a   :  { %v4855_v27 = vpop.eup %4854 }
 0x44b   :  { %v2294_v39 = vmul.f32 %v4855_v27, %v6674_v22  ;;  %v4857_v36 = vpop.eup %4856 }
 0x44d   :  { %v6990_v14 = vadd.f32 %v2295_v40, %v2294_v39  ;;  %v9361_v40 = vld [vmem:[#allocation128_spill] sm:$0xff]  ;;  %v9362_v39 = vld [vmem:[#allocation129_spill] sm:$0xff] }
 0x44f   :  { %4858 = vtanh.f32 %v6990_v14 }
 0x45c   :  { %v4859_v54 = vpop.eup %4858 }
 0x45d   :  { %v2298_v49 = vmul.f32 %v4859_v54, %v4857_v36  ;;  %v9364_v36 = vld [vmem:[#allocation131_spill] sm:$0xff]  ;;  %v9365_v54 = vld [vmem:[#allocation132_spill] sm:$0xff] }
 0x45f   :  { %v6993_v20 = vpack.c.bf16 %v2298_v49, %v2298_v49  ;;  %v9366_v49 = vld [vmem:[#allocation133_spill] sm:$0xff] }
 0x461   :  { %2551 = vmatmul.mubr.bf16.vlgmr.msra.gmra.mxu0 %v6993_v20  ;;  %2592 = vmatmul.mubr.bf16.vlgmr.msra.gmra.mxu1 %v6993_v20 }
 0x462   :  { %2630 = vmatpush1.bf16.msra.mxu0 %v6681_v23  ;;  %2671 = vmatpush1.bf16.msra.mxu1 %v6684_v9  ;;  %v9345_v9 = vld [vmem:[#allocation17_spill] sm:$0xff] }
 0x463   :  { %2631 = vmatprep.subr.bf16.mxu0 %v6687_v7  ;;  %2672 = vmatprep.subr.bf16.mxu1 %v6690_v58  ;;  %v9346_v58 = vld [vmem:[#allocation82_spill] sm:$0xff] }
 0x466   :  { %2632 = vmatpush1.bf16.msra.mxu0 %v6693_v38  ;;  %2673 = vmatpush1.bf16.msra.mxu1 %v6696_v33 }
 0x467   :  { %2633 = vmatprep.subr.bf16.mxu0 %v6699_v63  ;;  %2674 = vmatprep.subr.bf16.mxu1 %v6702_v13 }
 0x468   :  { %v2334_v22 = vpop.f32.mrf.mxu0  ;;  %v2375_v52 = vpop.f32.mrf.mxu1 }
 0x469   :  { %v2335_v53 = vadd.f32 %v2334_v22, %v6299_v17  ;;  %v2376_v8 = vadd.f32 %v2375_v52, %v9354_v6  ;;  %v9367_v22 = vld [vmem:[#allocation134_spill] sm:$0xff]  ;;  %v9368_v52 = vld [vmem:[#allocation135_spill] sm:$0xff] }
 0x46a   :  { %v2336_v57 = vpop.f32.mrf.mxu0  ;;  %v2377_v23 = vpop.f32.mrf.mxu1  ;;  %2634 = vmatpush1.bf16.msra.mxu0 %v9344_v60  ;;  %2675 = vmatpush1.bf16.msra.mxu1 %v9345_v9  ;;  %v7039_v60 = vld [vmem:[#allocation8 + $0x1a4] ss:$16 sps:$4 sm:$0xff]   ;;  %v7042_v9 = vld [vmem:[#allocation8 + $0x1ac] ss:$16 sps:$4 sm:$0xff]  }
 0x46b   :  { %v4396_v7 = vmul.f32 -1.442695, %v2335_v53  ;;  %v2337_v61 = vadd.f32 %v2336_v57, %v9346_v58  ;;  %2635 = vmatprep.subr.bf16.mxu0 %v6713_v43  ;;  %2676 = vmatprep.subr.bf16.mxu1 %v6716_v45  ;;  %v9351_v43 = vld [vmem:[#allocation119_spill] sm:$0xff]  ;;  %v9352_v45 = vld [vmem:[#allocation120_spill] sm:$0xff]  ;;  %v4398_v42 = vmul.f32 -1.442695, %v2376_v8  ;;  %v2378_v47 = vadd.f32 %v2377_v23, %v6327_v48 }
 0x46c   :  { %v2338_v38 = vpop.f32.mrf.mxu0  ;;  %v2379_v33 = vpop.f32.mrf.mxu1  ;;  %v9369_v53 = vld [vmem:[#allocation136_spill] sm:$0xff]  ;;  %v9370_v57 = vld [vmem:[#allocation137_spill] sm:$0xff]  ;;  %v9371_v23 = vld [vmem:[#allocation138_spill] sm:$0xff] }
 0x46d   :  { %4860 = vpow2.f32 %v4396_v7  ;;  %v4397_v63 = vmul.f32 -1.442695, %v2337_v61  ;;  %v9372_v38 = vld [vmem:[#allocation139_spill] sm:$0xff]  ;;  %v9373_v33 = vld [vmem:[#allocation140_spill] sm:$0xff] }
 0x46e   :  { %v2339_v13 = vpop.f32.mrf.mxu0  ;;  %v2380_v62 = vpop.f32.mrf.mxu1  ;;  %2636 = vmatpush1.bf16.msra.mxu0 %v6719_v1  ;;  %2677 = vmatpush1.bf16.msra.mxu1 %v9347_v0  ;;  %v9356_v1 = vld [vmem:[#allocation123_spill] sm:$0xff] }
 0x46f   :  { %4862 = vpow2.f32 %v4397_v63  ;;  %2637 = vmatprep.subr.bf16.mxu0 %v9348_v3  ;;  %2678 = vmatprep.subr.bf16.mxu1 %v9349_v4  ;;  %v9374_v13 = vld [vmem:[#allocation141_spill] sm:$0xff] }
 0x470   :  { %4864 = vpow2.f32 %v4398_v42  ;;  %v7084_v8 = vld [vmem:[#allocation8 + $0x128] ss:$16 sps:$4 sm:$0xff]  }
 0x472   :  { %2638 = vmatpush1.bf16.msra.mxu0 %v9350_v30  ;;  %2679 = vmatpush1.bf16.msra.mxu1 %v9351_v43  ;;  %v7057_v43 = vld [vmem:[#allocation8 + $0x160] ss:$16 sps:$4 sm:$0xff]  }
 0x473   :  { %2639 = vmatprep.subr.bf16.mxu0 %v9352_v45  ;;  %2680 = vmatprep.subr.bf16.mxu1 %v9353_v5  ;;  %v7078_v45 = vld [vmem:[#allocation8 + $0x12c] ss:$16 sps:$4 sm:$0xff]   ;;  %v7081_v5 = vld [vmem:[#allocation8 + $0x120] ss:$16 sps:$4 sm:$0xff]  }
 0x476   :  { %2640 = vmatpush1.bf16.msra.mxu0 %v9355_v31  ;;  %2681 = vmatpush1.bf16.msra.mxu1 %v9356_v1  ;;  %v7087_v31 = vld [vmem:[#allocation8 + $0x104] ss:$16 sps:$4 sm:$0xff]   ;;  %v7090_v1 = vld [vmem:[#allocation8 + $0x10c] ss:$16 sps:$4 sm:$0xff]  }
 0x477   :  { %2641 = vmatprep.subr.bf16.mxu0 %v9357_v41  ;;  %2682 = vmatprep.subr.bf16.mxu1 %v6753_v56  ;;  %v9363_v56 = vld [vmem:[#allocation130_spill] sm:$0xff] }
 0x47a   :  { %v4861_v10 = vpop.eup %4860  ;;  %2642 = vmatpush1.bf16.msra.mxu0 %v9358_v55  ;;  %2683 = vmatpush1.bf16.msra.mxu1 %v9359_v28  ;;  %v7099_v28 = vld [vmem:[#allocation9 + $0xe4] ss:$16 sps:$4 sm:$0xff]  }
 0x47b   :  { %v2391_v46 = vadd.f32 1.0, %v4861_v10  ;;  %2643 = vmatprep.subr.bf16.mxu0 %v9360_v19  ;;  %2684 = vmatprep.subr.bf16.mxu1 %v9361_v40  ;;  %v7093_v10 = vld [vmem:[#allocation8 + $0x100] ss:$16 sps:$4 sm:$0xff]  }
 0x47c   :  { %v4863_v27 = vpop.eup %4862  ;;  %v7111_v40 = vld [vmem:[#allocation9 + $0xe0] ss:$16 sps:$4 sm:$0xff]  }
 0x47d   :  { %4866 = vrcp.f32 %v2391_v46  ;;  %v2392_v32 = vadd.f32 1.0, %v4863_v27  ;;  %v4865_v7 = vpop.eup %4864  ;;  %v7102_v46 = vld [vmem:[#allocation9 + $0xec] ss:$16 sps:$4 sm:$0xff]   ;;  %v7114_v27 = vld [vmem:[#allocation9 + $0xe8] ss:$16 sps:$4 sm:$0xff]  }
 0x47e   :  { %4868 = vtanh.f32 %v2378_v47  ;;  %2644 = vmatpush1.bf16.msra.mxu0 %v9362_v39  ;;  %2685 = vmatpush1.bf16.msra.mxu1 %v9363_v56  ;;  %v2393_v0 = vadd.f32 1.0, %v4865_v7  ;;  %v7096_v47 = vld [vmem:[#allocation8 + $0x108] ss:$16 sps:$4 sm:$0xff]   ;;  %v7120_v39 = vld [vmem:[#allocation9 + $0xcc] ss:$16 sps:$4 sm:$0xff]  }
 0x47f   :  { %4870 = vrcp.f32 %v2392_v32  ;;  %2645 = vmatprep.subr.bf16.mxu0 %v9364_v36  ;;  %2686 = vmatprep.subr.bf16.mxu1 %v9365_v54  ;;  %v7117_v32 = vld [vmem:[#allocation9 + $0xc4] ss:$16 sps:$4 sm:$0xff]   ;;  %v7124_v54 = vld [vmem:[#allocation9 + $0xc0] ss:$16 sps:$4 sm:$0xff]  }
 0x480   :  { %4872 = vrcp.f32 %v2393_v0 }
 0x482   :  { %2646 = vmatpush2.bf16.msra.mxu0 %v9366_v49  ;;  %2687 = vmatpush2.bf16.msra.mxu1 %v9367_v22  ;;  %v7127_v49 = vld [vmem:[#allocation9 + $0xc8] ss:$16 sps:$4 sm:$0xff]  }
 0x483   :  { %2647 = vmatprep.subr.bf16.mxu0 %v9368_v52  ;;  %2688 = vmatprep.subr.bf16.mxu1 %v9369_v53  ;;  %v7130_v53 = vld [vmem:[#allocation9 + $0xa4] ss:$16 sps:$4 sm:$0xff]  }
 0x486   :  { %2648 = vmatpush2.bf16.msra.mxu0 %v9370_v57  ;;  %2689 = vmatpush2.bf16.msra.mxu1 %v9371_v23  ;;  %v7133_v57 = vld [vmem:[#allocation9 + $0xac] ss:$16 sps:$4 sm:$0xff]  }
 0x487   :  { %2649 = vmatprep.subr.bf16.mxu0 %v7039_v60  ;;  %2690 = vmatprep.subr.bf16.mxu1 %v7042_v9 }
 0x48a   :  { %v4867_v61 = vpop.eup %4866  ;;  %2650 = vmatpush2.bf16.msra.mxu0 %v9372_v38  ;;  %2691 = vmatpush2.bf16.msra.mxu1 %v9373_v33 }
 0x48b   :  { %v4869_v63 = vpop.eup %4868  ;;  %2651 = vmatprep.subr.bf16.mxu0 %v9374_v13  ;;  %2692 = vmatprep.subr.bf16.mxu1 %v6810_v26  ;;  %v7060_v26 = vld [vmem:[#allocation8 + $0x168] ss:$16 sps:$4 sm:$0xff]  }
 0x48c   :  { %v4871_v62 = vpop.eup %4870  ;;  %v2402_v4 = vmul.f32 %v4869_v63, %v4867_v61  ;;  %v7137_v63 = vld [vmem:[#allocation9 + $0xa0] ss:$16 sps:$4 sm:$0xff]   ;;  %v7140_v13 = vld [vmem:[#allocation9 + $0xa8] ss:$16 sps:$4 sm:$0xff]  }
 0x48d   :  { %v2401_v3 = vmul.f32 %v4871_v62, %v6814_v21  ;;  %v7063_v21 = vld [vmem:[#allocation8 + $0x144] ss:$16 sps:$4 sm:$0xff]   ;;  %v4873_v41 = vpop.eup %4872 }
 0x48e   :  { %2652 = vmatpush2.bf16.msra.mxu0 %v6816_v25  ;;  %2693 = vmatpush2.bf16.msra.mxu1 %v6819_v37  ;;  %v7066_v25 = vld [vmem:[#allocation8 + $0x14c] ss:$16 sps:$4 sm:$0xff]   ;;  %v7072_v37 = vld [vmem:[#allocation8 + $0x148] ss:$16 sps:$4 sm:$0xff]  }
 0x48f   :  { %v7052_v30 = vadd.f32 %v2402_v4, %v2401_v3  ;;  %2653 = vmatprep.subr.bf16.mxu0 %v6822_v44  ;;  %2694 = vmatprep.subr.bf16.mxu1 %v6825_v15  ;;  %v7069_v15 = vld [vmem:[#allocation8 + $0x140] ss:$16 sps:$4 sm:$0xff]   ;;  %v7075_v44 = vld [vmem:[#allocation8 + $0x124] ss:$16 sps:$4 sm:$0xff]   ;;  %v7146_v4 = vld [vmem:[#allocation9 + $0x8c] ss:$16 sps:$4 sm:$0xff]  }
 0x490   :  { %v7143_v3 = vld [vmem:[#allocation9 + $0x84] ss:$16 sps:$4 sm:$0xff]  }
 0x491   :  { %4874 = vtanh.f32 %v7052_v30 }
 0x492   :  { %2654 = vmatpush2.bf16.msra.mxu0 %v7057_v43  ;;  %2695 = vmatpush2.bf16.msra.mxu1 %v7060_v26 }
 0x493   :  { %2655 = vmatprep.subr.bf16.mxu0 %v7063_v21  ;;  %2696 = vmatprep.subr.bf16.mxu1 %v7066_v25 }
 0x496   :  { %2656 = vmatpush2.bf16.msra.mxu0 %v7069_v15  ;;  %2697 = vmatpush2.bf16.msra.mxu1 %v7072_v37 }
 0x497   :  { %2657 = vmatprep.subr.bf16.mxu0 %v7075_v44  ;;  %2698 = vmatprep.subr.bf16.mxu1 %v7078_v45 }
 0x49a   :  { %2658 = vmatpush2.bf16.msra.mxu0 %v7081_v5  ;;  %2699 = vmatpush2.bf16.msra.mxu1 %v7084_v8 }
 0x49b   :  { %2659 = vmatprep.subr.bf16.mxu0 %v7087_v31  ;;  %2700 = vmatprep.subr.bf16.mxu1 %v7090_v1 }
 0x49e   :  { %v4875_v42 = vpop.eup %4874  ;;  %2660 = vmatpush2.bf16.msra.mxu0 %v7093_v10  ;;  %2701 = vmatpush2.bf16.msra.mxu1 %v7096_v47 }
 0x49f   :  { %v2405_v55 = vmul.f32 %v4875_v42, %v4873_v41  ;;  %2736 = vmatprep.subr.bf16.mxu0 %v7099_v28  ;;  %2777 = vmatprep.subr.bf16.mxu1 %v7102_v46  ;;  %v7149_v41 = vld [vmem:[#allocation9 + $0x80] ss:$16 sps:$4 sm:$0xff]   ;;  %v7152_v42 = vld [vmem:[#allocation9 + $0x88] ss:$16 sps:$4 sm:$0xff]  }
 0x4a1   :  { %v7105_v19 = vpack.c.bf16 %v2405_v55, %v2405_v55  ;;  %v7155_v55 = vld [vmem:[#allocation9 + $0x64] ss:$16 sps:$4 sm:$0xff]  }
 0x4a3   :  { %2661 = vmatprep.mubr.bf16.mxu0 %v7105_v19  ;;  %2702 = vmatprep.mubr.bf16.mxu1 %v7105_v19 }
 0x4a4   :  { %2662 = vmatmul.mubr.bf16.vlgmr.msra.gmra.mxu0 %v6993_v20  ;;  %2703 = vmatmul.mubr.bf16.vlgmr.msra.gmra.mxu1 %v6993_v20 }
 0x4a5   :  { %2737 = vmatpush1.bf16.msra.mxu0 %v7111_v40  ;;  %2778 = vmatpush1.bf16.msra.mxu1 %v7114_v27 }
 0x4a6   :  { %2738 = vmatprep.subr.bf16.mxu0 %v7117_v32  ;;  %2779 = vmatprep.subr.bf16.mxu1 %v7120_v39 }
 0x4a8   :  { %v2441_v56 = vpop.f32.mrf.mxu0  ;;  %v2482_v36 = vpop.f32.mrf.mxu1 }
 0x4a9   :  { %v2442_v20 = vadd.f32 %v2441_v56, %v6857_v34  ;;  %2739 = vmatpush1.bf16.msra.mxu0 %v7124_v54  ;;  %2780 = vmatpush1.bf16.msra.mxu1 %v7127_v49  ;;  %v7158_v56 = vld [vmem:[#allocation9 + $0x6c] ss:$16 sps:$4 sm:$0xff]  }
 0x4aa   :  { %v2443_v22 = vpop.f32.mrf.mxu0  ;;  %v2484_v52 = vpop.f32.mrf.mxu1  ;;  %2740 = vmatprep.subr.bf16.mxu0 %v7130_v53  ;;  %2781 = vmatprep.subr.bf16.mxu1 %v7133_v57 }
 0x4ab   :  { %v4399_v23 = vmul.f32 -1.442695, %v2442_v20  ;;  %v2444_v7 = vadd.f32 %v2443_v22, %v6862_v35  ;;  %v2483_v20 = vadd.f32 %v2482_v36, %v6875_v59  ;;  %v7162_v22 = vld [vmem:[#allocation9 + $0x60] ss:$16 sps:$4 sm:$0xff]   ;;  %v7177_v36 = vld [vmem:[#allocation9 + $0x48] ss:$16 sps:$4 sm:$0xff]  }
 0x4ac   :  { %v2445_v61 = vpop.f32.mrf.mxu0  ;;  %v2486_v38 = vpop.f32.mrf.mxu1  ;;  %9375 = vst [vmem:[#allocation41_spill] sm:$0xff] %v7162_v22  ;;  %9380 = vst [vmem:[#allocation45_spill] sm:$0xff] %v7177_v36 }
 0x4ad   :  { %4876 = vpow2.f32 %v4399_v23  ;;  %v4400_v33 = vmul.f32 -1.442695, %v2444_v7  ;;  %2741 = vmatpush1.bf16.msra.mxu0 %v7137_v63  ;;  %2782 = vmatpush1.bf16.msra.mxu1 %v7140_v13  ;;  %v7165_v23 = vld [vmem:[#allocation9 + $0x68] ss:$16 sps:$4 sm:$0xff]   ;;  %v7168_v7 = vld [vmem:[#allocation9 + $0x44] ss:$16 sps:$4 sm:$0xff]  }
 0x4ae   :  { %v2446_v62 = vpop.f32.mrf.mxu0  ;;  %v2487_v0 = vpop.f32.mrf.mxu1  ;;  %2742 = vmatprep.subr.bf16.mxu0 %v7143_v3  ;;  %2783 = vmatprep.subr.bf16.mxu1 %v7146_v4  ;;  %9376 = vst [vmem:[#allocation14_spill] sm:$0xff] %v7165_v23  ;;  %9377 = vst [vmem:[#allocation42_spill] sm:$0xff] %v7168_v7  ;;  %v7171_v61 = vld [vmem:[#allocation9 + $0x4c] ss:$16 sps:$4 sm:$0xff]   ;;  %v4401_v38 = vmul.f32 -1.442695, %v2483_v20 }
 0x4af   :  { %4878 = vpow2.f32 %v4400_v33  ;;  %9378 = vst [vmem:[#allocation43_spill] sm:$0xff] %v7171_v61  ;;  %v7174_v33 = vld [vmem:[#allocation9 + $0x40] ss:$16 sps:$4 sm:$0xff]   ;;  %v2485_v0 = vadd.f32 %v2484_v52, %v6885_v2  ;;  %v7193_v52 = vld [vmem:[#allocation9 + $0x4] ss:$16 sps:$4 sm:$0xff]  }
 0x4b0   :  { %9379 = vst [vmem:[#allocation44_spill] sm:$0xff] %v7174_v33  ;;  %4880 = vpow2.f32 %v4401_v38  ;;  %9385 = vst [vmem:[#allocation50_spill] sm:$0xff] %v7193_v52  ;;  %v7199_v38 = vld [vmem:[#allocation9] ss:$16 sps:$4 sm:$0xff]   ;;  %v7242_v2 = vld [vmem:[#allocation9 + $0x184] ss:$16 sps:$4 sm:$0xff]  }
 0x4b1   :  { %2743 = vmatpush1.bf16.msra.mxu0 %v7149_v41  ;;  %2784 = vmatpush1.bf16.msra.mxu1 %v7152_v42  ;;  %9387 = vst [vmem:[#allocation52_spill] sm:$0xff] %v7199_v38  ;;  %9401 = vst [vmem:[#allocation66_spill] sm:$0xff] %v7242_v2 }
 0x4b2   :  { %2744 = vmatprep.subr.bf16.mxu0 %v7155_v55  ;;  %2785 = vmatprep.subr.bf16.mxu1 %v7158_v56 }
 0x4b5   :  { %2745 = vmatpush1.bf16.msra.mxu0 %v7162_v22  ;;  %2786 = vmatpush1.bf16.msra.mxu1 %v7165_v23  ;;  %v7181_v23 = vld [vmem:[#allocation9 + $0x24] ss:$16 sps:$4 sm:$0xff]   ;;  %v7187_v22 = vld [vmem:[#allocation9 + $0x20] ss:$16 sps:$4 sm:$0xff]  }
 0x4b6   :  { %2746 = vmatprep.subr.bf16.mxu0 %v7168_v7  ;;  %2787 = vmatprep.subr.bf16.mxu1 %v7171_v61  ;;  %9381 = vst [vmem:[#allocation46_spill] sm:$0xff] %v7181_v23  ;;  %v7184_v7 = vld [vmem:[#allocation9 + $0x2c] ss:$16 sps:$4 sm:$0xff]   ;;  %9383 = vst [vmem:[#allocation48_spill] sm:$0xff] %v7187_v22 }
 0x4b7   :  { %9382 = vst [vmem:[#allocation47_spill] sm:$0xff] %v7184_v7 }
 0x4b9   :  { %2747 = vmatpush1.bf16.msra.mxu0 %v7174_v33  ;;  %2788 = vmatpush1.bf16.msra.mxu1 %v7177_v36  ;;  %v7190_v36 = vld [vmem:[#allocation9 + $0x28] ss:$16 sps:$4 sm:$0xff]  }
 0x4ba   :  { %v4877_v62 = vpop.eup %4876  ;;  %2748 = vmatprep.subr.bf16.mxu0 %v7181_v23  ;;  %2789 = vmatprep.subr.bf16.mxu1 %v7184_v7  ;;  %9384 = vst [vmem:[#allocation49_spill] sm:$0xff] %v7190_v36  ;;  %v7196_v23 = vld [vmem:[#allocation9 + $0xc] ss:$16 sps:$4 sm:$0xff]  }
 0x4bb   :  { %v2498_v20 = vadd.f32 1.0, %v4877_v62  ;;  %9386 = vst [vmem:[#allocation51_spill] sm:$0xff] %v7196_v23  ;;  %v7205_v62 = vld [vmem:[#allocation9 + $0x1e4] ss:$16 sps:$4 sm:$0xff]  }
 0x4bc   :  { %v4879_v61 = vpop.eup %4878  ;;  %9389 = vst [vmem:[#allocation54_spill] sm:$0xff] %v7205_v62 }
 0x4bd   :  { %4882 = vrcp.f32 %v2498_v20  ;;  %v2499_v33 = vadd.f32 1.0, %v4879_v61  ;;  %2749 = vmatpush1.bf16.msra.mxu0 %v7187_v22  ;;  %2790 = vmatpush1.bf16.msra.mxu1 %v7190_v36  ;;  %v7202_v61 = vld [vmem:[#allocation9 + $0x8] ss:$16 sps:$4 sm:$0xff]   ;;  %v7211_v20 = vld [vmem:[#allocation9 + $0x1e0] ss:$16 sps:$4 sm:$0xff]  }
 0x4be   :  { %4884 = vtanh.f32 %v2485_v0  ;;  %2750 = vmatprep.subr.bf16.mxu0 %v7193_v52  ;;  %2791 = vmatprep.subr.bf16.mxu1 %v7196_v23  ;;  %9388 = vst [vmem:[#allocation53_spill] sm:$0xff] %v7202_v61  ;;  %v7208_v0 = vld [vmem:[#allocation9 + $0x1ec] ss:$16 sps:$4 sm:$0xff]   ;;  %9391 = vst [vmem:[#allocation56_spill] sm:$0xff] %v7211_v20  ;;  %v7223_v23 = vld [vmem:[#allocation9 + $0x1c0] ss:$16 sps:$4 sm:$0xff]  }
 0x4bf   :  { %4886 = vrcp.f32 %v2499_v33  ;;  %9390 = vst [vmem:[#allocation55_spill] sm:$0xff] %v7208_v0  ;;  %v7214_v33 = vld [vmem:[#allocation9 + $0x1e8] ss:$16 sps:$4 sm:$0xff]   ;;  %9395 = vst [vmem:[#allocation60_spill] sm:$0xff] %v7223_v23  ;;  %v7229_v52 = vld [vmem:[#allocation9 + $0x1a4] ss:$16 sps:$4 sm:$0xff]  }
 0x4c0   :  { %9392 = vst [vmem:[#allocation57_spill] sm:$0xff] %v7214_v33  ;;  %9397 = vst [vmem:[#allocation62_spill] sm:$0xff] %v7229_v52 }
 0x4c1   :  { %2751 = vmatpush1.bf16.msra.mxu0 %v7199_v38  ;;  %2792 = vmatpush1.bf16.msra.mxu1 %v7202_v61  ;;  %v7217_v38 = vld [vmem:[#allocation9 + $0x1c4] ss:$16 sps:$4 sm:$0xff]   ;;  %v7220_v61 = vld [vmem:[#allocation9 + $0x1cc] ss:$16 sps:$4 sm:$0xff]  }
 0x4c2   :  { %2752 = vmatprep.subr.bf16.mxu0 %v7205_v62  ;;  %2793 = vmatprep.subr.bf16.mxu1 %v7208_v0  ;;  %9393 = vst [vmem:[#allocation58_spill] sm:$0xff] %v7217_v38  ;;  %9394 = vst [vmem:[#allocation59_spill] sm:$0xff] %v7220_v61  ;;  %v4881_v62 = vpop.eup %4880  ;;  %v7226_v0 = vld [vmem:[#allocation9 + $0x1c8] ss:$16 sps:$4 sm:$0xff]  }
 0x4c3   :  { %9396 = vst [vmem:[#allocation61_spill] sm:$0xff] %v7226_v0  ;;  %v2500_v36 = vadd.f32 1.0, %v4881_v62 }
 0x4c5   :  { %2753 = vmatpush2.bf16.msra.mxu0 %v7211_v20  ;;  %2794 = vmatpush2.bf16.msra.mxu1 %v7214_v33  ;;  %v7232_v33 = vld [vmem:[#allocation9 + $0x1ac] ss:$16 sps:$4 sm:$0xff]   ;;  %4888 = vrcp.f32 %v2500_v36  ;;  %v7269_v36 = vld [vmem:[#allocation9 + $0x144] ss:$16 sps:$4 sm:$0xff]  }
 0x4c6   :  { %2754 = vmatprep.subr.bf16.mxu0 %v7217_v38  ;;  %2795 = vmatprep.subr.bf16.mxu1 %v7220_v61  ;;  %9398 = vst [vmem:[#allocation63_spill] sm:$0xff] %v7232_v33  ;;  %9410 = vst [vmem:[#allocation75_spill] sm:$0xff] %v7269_v36 }
 0x4c9   :  { %2755 = vmatpush2.bf16.msra.mxu0 %v7223_v23  ;;  %2796 = vmatpush2.bf16.msra.mxu1 %v7226_v0  ;;  %v7236_v23 = vld [vmem:[#allocation9 + $0x1a0] ss:$16 sps:$4 sm:$0xff]   ;;  %v7239_v0 = vld [vmem:[#allocation9 + $0x1a8] ss:$16 sps:$4 sm:$0xff]  }
 0x4ca   :  { %v4883_v20 = vpop.eup %4882  ;;  %2756 = vmatprep.subr.bf16.mxu0 %v7229_v52  ;;  %2797 = vmatprep.subr.bf16.mxu1 %v7232_v33  ;;  %9399 = vst [vmem:[#allocation64_spill] sm:$0xff] %v7236_v23  ;;  %9400 = vst [vmem:[#allocation65_spill] sm:$0xff] %v7239_v0  ;;  %v7245_v52 = vld [vmem:[#allocation9 + $0x18c] ss:$16 sps:$4 sm:$0xff]  }
 0x4cb   :  { %v4885_v38 = vpop.eup %4884  ;;  %9402 = vst [vmem:[#allocation67_spill] sm:$0xff] %v7245_v52 }
 0x4cc   :  { %v4887_v61 = vpop.eup %4886  ;;  %v2509_v7 = vmul.f32 %v4885_v38, %v4883_v20  ;;  %v7253_v38 = vld [vmem:[#allocation9 + $0x188] ss:$16 sps:$4 sm:$0xff]   ;;  %v7260_v20 = vld [vmem:[#allocation9 + $0x16c] ss:$16 sps:$4 sm:$0xff]  }
 0x4cd   :  { %v2508_v22 = vmul.f32 %v4887_v61, %v6914_v11  ;;  %2757 = vmatpush2.bf16.msra.mxu0 %v7236_v23  ;;  %2798 = vmatpush2.bf16.msra.mxu1 %v7239_v0  ;;  %v7250_v11 = vld [vmem:[#allocation9 + $0x180] ss:$16 sps:$4 sm:$0xff]   ;;  %9405 = vst [vmem:[#allocation70_spill] sm:$0xff] %v7253_v38  ;;  %v7257_v61 = vld [vmem:[#allocation9 + $0x164] ss:$16 sps:$4 sm:$0xff]   ;;  %9407 = vst [vmem:[#allocation72_spill] sm:$0xff] %v7260_v20 }
 0x4ce   :  { %2758 = vmatprep.subr.bf16.mxu0 %v7242_v2  ;;  %2799 = vmatprep.subr.bf16.mxu1 %v7245_v52  ;;  %9404 = vst [vmem:[#allocation69_spill] sm:$0xff] %v7250_v11  ;;  %9406 = vst [vmem:[#allocation71_spill] sm:$0xff] %v7257_v61  ;;  %v7293_v52 = vld [vmem:[#allocation9 + $0x104] ss:$16 sps:$4 sm:$0xff]   ;;  %v7302_v2 = vld [vmem:[#allocation9 + $0x108] ss:$16 sps:$4 sm:$0xff]  }
 0x4cf   :  { %v7248_v62 = vadd.f32 %v2509_v7, %v2508_v22  ;;  %v7263_v22 = vld [vmem:[#allocation9 + $0x160] ss:$16 sps:$4 sm:$0xff]   ;;  %v7266_v7 = vld [vmem:[#allocation9 + $0x168] ss:$16 sps:$4 sm:$0xff]   ;;  %9418 = vst [vmem:[#allocation87_spill] sm:$0xff] %v7293_v52  ;;  %9421 = vst [vmem:[#allocation80_spill] sm:$0xff] %v7302_v2 }
 0x4d0   :  { %9408 = vst [vmem:[#allocation73_spill] sm:$0xff] %v7263_v22  ;;  %9409 = vst [vmem:[#allocation74_spill] sm:$0xff] %v7266_v7 }
 0x4d1   :  { %9403 = vst [vmem:[#allocation68_spill] sm:$0xff] %v7248_v62  ;;  %2759 = vmatpush2.bf16.msra.mxu0 %v7250_v11  ;;  %2800 = vmatpush2.bf16.msra.mxu1 %v7253_v38  ;;  %4890 = vtanh.f32 %v7248_v62  ;;  %v7272_v38 = vld [vmem:[#allocation9 + $0x14c] ss:$16 sps:$4 sm:$0xff]   ;;  %v7287_v11 = vld [vmem:[#allocation9 + $0x120] ss:$16 sps:$4 sm:$0xff]  }
 0x4d2   :  { %2760 = vmatprep.subr.bf16.mxu0 %v7257_v61  ;;  %2801 = vmatprep.subr.bf16.mxu1 %v7260_v20  ;;  %9411 = vst [vmem:[#allocation76_spill] sm:$0xff] %v7272_v38  ;;  %v7275_v61 = vld [vmem:[#allocation9 + $0x140] ss:$16 sps:$4 sm:$0xff]   ;;  %v7278_v20 = vld [vmem:[#allocation9 + $0x148] ss:$16 sps:$4 sm:$0xff]   ;;  %9416 = vst [vmem:[#allocation85_spill] sm:$0xff] %v7287_v11 }
 0x4d3   :  { %9412 = vst [vmem:[#allocation77_spill] sm:$0xff] %v7275_v61  ;;  %9413 = vst [vmem:[#allocation78_spill] sm:$0xff] %v7278_v20 }
 0x4d5   :  { %2761 = vmatpush2.bf16.msra.mxu0 %v7263_v22  ;;  %2802 = vmatpush2.bf16.msra.mxu1 %v7266_v7  ;;  %v7281_v22 = vld [vmem:[#allocation9 + $0x124] ss:$16 sps:$4 sm:$0xff]   ;;  %v7284_v7 = vld [vmem:[#allocation9 + $0x12c] ss:$16 sps:$4 sm:$0xff]  }
 0x4d6   :  { %2762 = vmatprep.subr.bf16.mxu0 %v7269_v36  ;;  %2803 = vmatprep.subr.bf16.mxu1 %v7272_v38  ;;  %9414 = vst [vmem:[#allocation79_spill] sm:$0xff] %v7281_v22  ;;  %9415 = vst [vmem:[#allocation84_spill] sm:$0xff] %v7284_v7  ;;  %v4889_v36 = vpop.eup %4888  ;;  %v7290_v38 = vld [vmem:[#allocation9 + $0x128] ss:$16 sps:$4 sm:$0xff]  }
 0x4d7   :  { %9417 = vst [vmem:[#allocation86_spill] sm:$0xff] %v7290_v38 }
 0x4d9   :  { %2763 = vmatpush2.bf16.msra.mxu0 %v7275_v61  ;;  %2804 = vmatpush2.bf16.msra.mxu1 %v7278_v20  ;;  %v7296_v20 = vld [vmem:[#allocation9 + $0x10c] ss:$16 sps:$4 sm:$0xff]  }
 0x4da   :  { %2764 = vmatprep.subr.bf16.mxu0 %v7281_v22  ;;  %2805 = vmatprep.subr.bf16.mxu1 %v7284_v7  ;;  %9419 = vst [vmem:[#allocation88_spill] sm:$0xff] %v7296_v20  ;;  %v7299_v7 = vld [vmem:[#allocation9 + $0x100] ss:$16 sps:$4 sm:$0xff]  }
 0x4db   :  { %9420 = vst [vmem:[#allocation89_spill] sm:$0xff] %v7299_v7 }
 0x4dd   :  { %2765 = vmatpush2.bf16.msra.mxu0 %v7287_v11  ;;  %2806 = vmatpush2.bf16.msra.mxu1 %v7290_v38 }
 0x4de   :  { %v4891_v61 = vpop.eup %4890  ;;  %2766 = vmatprep.subr.bf16.mxu0 %v7293_v52  ;;  %2807 = vmatprep.subr.bf16.mxu1 %v7296_v20 }
 0x4df   :  { %v2512_v22 = vmul.f32 %v4891_v61, %v4889_v36  ;;  %v7339_v61 = vld [vmem:[#allocation6 + $0x80] ss:$16 sps:$4 sm:$0xff]   ;;  %v7345_v36 = vld [vmem:[#allocation6 + $0x64] ss:$16 sps:$4 sm:$0xff]  }
 0x4e0   :  { %9430 = vst [vmem:[#allocation98_spill] sm:$0xff] %v7339_v61  ;;  %9432 = vst [vmem:[#allocation100_spill] sm:$0xff] %v7345_v36 }
 0x4e1   :  { %2767 = vmatpush2.bf16.msra.mxu0 %v7299_v7  ;;  %2808 = vmatpush2.bf16.msra.mxu1 %v7302_v2  ;;  %v2735_v11 = vpack.c.bf16 %v2512_v22, %v2512_v22  ;;  %v7342_v22 = vld [vmem:[#allocation6 + $0x88] ss:$16 sps:$4 sm:$0xff]  }
 0x4e2   :  { %2847 = vmatprep.subr.bf16.mxu0 %v6935_v29  ;;  %2888 = vmatprep.subr.bf16.mxu1 %v6938_v24  ;;  %v7315_v29 = vld [vmem:[#allocation6 + $0xc0] ss:$16 sps:$4 sm:$0xff]   ;;  %v7318_v24 = vld [vmem:[#allocation6 + $0xc8] ss:$16 sps:$4 sm:$0xff]   ;;  %9431 = vst [vmem:[#allocation99_spill] sm:$0xff] %v7342_v22 }
 0x4e3   :  { %2768 = vmatprep.mubr.bf16.mxu0 %v2735_v11  ;;  %2809 = vmatprep.mubr.bf16.mxu1 %v2735_v11  ;;  %9422 = vst [vmem:[#allocation90_spill] sm:$0xff] %v7315_v29  ;;  %9423 = vst [vmem:[#allocation91_spill] sm:$0xff] %v7318_v24  ;;  %v7336_v11 = vld [vmem:[#allocation6 + $0x8c] ss:$16 sps:$4 sm:$0xff]  }
 0x4e4   :  { %2769 = vmatmul.mubr.bf16.vlgmr.msra.gmra.mxu0 %v7105_v19  ;;  %2810 = vmatmul.mubr.bf16.vlgmr.msra.gmra.mxu1 %v7105_v19  ;;  %v7321_v19 = vld [vmem:[#allocation6 + $0xa4] ss:$16 sps:$4 sm:$0xff]   ;;  %9429 = vst [vmem:[#allocation97_spill] sm:$0xff] %v7336_v11 }
 0x4e5   :  { %2848 = vmatpush1.bf16.msra.mxu0 %v6943_v16  ;;  %2889 = vmatpush1.bf16.msra.mxu1 %v6946_v12  ;;  %9424 = vst [vmem:[#allocation92_spill] sm:$0xff] %v7321_v19  ;;  %v7324_v16 = vld [vmem:[#allocation6 + $0xac] ss:$16 sps:$4 sm:$0xff]   ;;  %v7327_v12 = vld [vmem:[#allocation6 + $0xa0] ss:$16 sps:$4 sm:$0xff]  }
 0x4e6   :  { %2849 = vmatprep.subr.bf16.mxu0 %v6949_v50  ;;  %2890 = vmatprep.subr.bf16.mxu1 %v6952_v51  ;;  %9425 = vst [vmem:[#allocation93_spill] sm:$0xff] %v7324_v16  ;;  %9426 = vst [vmem:[#allocation94_spill] sm:$0xff] %v7327_v12  ;;  %v7330_v50 = vld [vmem:[#allocation6 + $0xa8] ss:$16 sps:$4 sm:$0xff]   ;;  %v7333_v51 = vld [vmem:[#allocation6 + $0x84] ss:$16 sps:$4 sm:$0xff]  }
 0x4e7   :  { %2879 = vmatprep.mubr.bf16.mxu0 %v9311_v18  ;;  %2920 = vmatprep.mubr.bf16.mxu1 %v9311_v18  ;;  %9427 = vst [vmem:[#allocation95_spill] sm:$0xff] %v7330_v50  ;;  %9428 = vst [vmem:[#allocation96_spill] sm:$0xff] %v7333_v51 }
 0x4e9   :  { %2850 = vmatpush1.bf16.msra.mxu0 %v7315_v29  ;;  %2891 = vmatpush1.bf16.msra.mxu1 %v7318_v24 }
 0x4ea   :  { %2851 = vmatprep.subr.bf16.mxu0 %v7321_v19  ;;  %2892 = vmatprep.subr.bf16.mxu1 %v7324_v16  ;;  %v9450_v16 = vld [vmem:[#allocation23_spill] sm:$0xff] }
 0x4ed   :  { %2852 = vmatpush1.bf16.msra.mxu0 %v7327_v12  ;;  %2893 = vmatpush1.bf16.msra.mxu1 %v7330_v50  ;;  %v7348_v50 = vld [vmem:[#allocation6 + $0x6c] ss:$16 sps:$4 sm:$0xff]  }
 0x4ee   :  { %2853 = vmatprep.subr.bf16.mxu0 %v7333_v51  ;;  %2894 = vmatprep.subr.bf16.mxu1 %v7336_v11  ;;  %9433 = vst [vmem:[#allocation101_spill] sm:$0xff] %v7348_v50  ;;  %v7351_v51 = vld [vmem:[#allocation6 + $0x60] ss:$16 sps:$4 sm:$0xff]   ;;  %v7354_v11 = vld [vmem:[#allocation6 + $0x68] ss:$16 sps:$4 sm:$0xff]  }
 0x4ef   :  { %9434 = vst [vmem:[#allocation102_spill] sm:$0xff] %v7351_v51  ;;  %9435 = vst [vmem:[#allocation103_spill] sm:$0xff] %v7354_v11 }
 0x4f1   :  { %2854 = vmatpush1.bf16.msra.mxu0 %v7339_v61  ;;  %2895 = vmatpush1.bf16.msra.mxu1 %v7342_v22  ;;  %v7357_v61 = vld [vmem:[#allocation6 + $0x44] ss:$16 sps:$4 sm:$0xff]   ;;  %v7360_v22 = vld [vmem:[#allocation6 + $0x4c] ss:$16 sps:$4 sm:$0xff]  }
 0x4f2   :  { %2855 = vmatprep.subr.bf16.mxu0 %v7345_v36  ;;  %2896 = vmatprep.subr.bf16.mxu1 %v7348_v50  ;;  %9436 = vst [vmem:[#allocation104_spill] sm:$0xff] %v7357_v61  ;;  %9437 = vst [vmem:[#allocation105_spill] sm:$0xff] %v7360_v22  ;;  %v7363_v36 = vld [vmem:[#allocation6 + $0x40] ss:$16 sps:$4 sm:$0xff]   ;;  %v7366_v50 = vld [vmem:[#allocation6 + $0x48] ss:$16 sps:$4 sm:$0xff]  }
 0x4f3   :  { %9438 = vst [vmem:[#allocation106_spill] sm:$0xff] %v7363_v36  ;;  %9439 = vst [vmem:[#allocation107_spill] sm:$0xff] %v7366_v50 }
 0x4f5   :  { %2856 = vmatpush1.bf16.msra.mxu0 %v7351_v51  ;;  %2897 = vmatpush1.bf16.msra.mxu1 %v7354_v11  ;;  %v7369_v51 = vld [vmem:[#allocation6 + $0x24] ss:$16 sps:$4 sm:$0xff]   ;;  %v7372_v11 = vld [vmem:[#allocation6 + $0x2c] ss:$16 sps:$4 sm:$0xff]  }
 0x4f6   :  { %2857 = vmatprep.subr.bf16.mxu0 %v7357_v61  ;;  %2898 = vmatprep.subr.bf16.mxu1 %v7360_v22  ;;  %9440 = vst [vmem:[#allocation108_spill] sm:$0xff] %v7369_v51  ;;  %9441 = vst [vmem:[#allocation109_spill] sm:$0xff] %v7372_v11  ;;  %v7375_v61 = vld [vmem:[#allocation6 + $0x20] ss:$16 sps:$4 sm:$0xff]   ;;  %v7378_v22 = vld [vmem:[#allocation6 + $0x28] ss:$16 sps:$4 sm:$0xff]  }
 0x4f7   :  { %9442 = vst [vmem:[#allocation110_spill] sm:$0xff] %v7375_v61  ;;  %9443 = vst [vmem:[#allocation111_spill] sm:$0xff] %v7378_v22 }
 0x4f9   :  { %2858 = vmatpush1.bf16.msra.mxu0 %v7363_v36  ;;  %2899 = vmatpush1.bf16.msra.mxu1 %v7366_v50  ;;  %v7381_v36 = vld [vmem:[#allocation6 + $0x4] ss:$16 sps:$4 sm:$0xff]   ;;  %v7384_v50 = vld [vmem:[#allocation6 + $0xc] ss:$16 sps:$4 sm:$0xff]  }
 0x4fa   :  { %2859 = vmatprep.subr.bf16.mxu0 %v7369_v51  ;;  %2900 = vmatprep.subr.bf16.mxu1 %v7372_v11  ;;  %9444 = vst [vmem:[#allocation112_spill] sm:$0xff] %v7381_v36  ;;  %9445 = vst [vmem:[#allocation113_spill] sm:$0xff] %v7384_v50  ;;  %v7387_v51 = vld [vmem:[#allocation6] ss:$16 sps:$4 sm:$0xff]   ;;  %v7390_v11 = vld [vmem:[#allocation6 + $0x8] ss:$16 sps:$4 sm:$0xff]  }
 0x4fb   :  { %9446 = vst [vmem:[#allocation114_spill] sm:$0xff] %v7387_v51  ;;  %9447 = vst [vmem:[#allocation115_spill] sm:$0xff] %v7390_v11 }
 0x4fd   :  { %2860 = vmatpush1.bf16.msra.mxu0 %v7375_v61  ;;  %2901 = vmatpush1.bf16.msra.mxu1 %v7378_v22  ;;  %v7393_v61 = vld [vmem:[#allocation8 + $0xe4] ss:$16 sps:$4 sm:$0xff]   ;;  %v7396_v22 = vld [vmem:[#allocation8 + $0xec] ss:$16 sps:$4 sm:$0xff]  }
 0x4fe   :  { %2861 = vmatprep.subr.bf16.mxu0 %v7381_v36  ;;  %2902 = vmatprep.subr.bf16.mxu1 %v7384_v50  ;;  %9448 = vst [vmem:[#allocation116_spill] sm:$0xff] %v7393_v61  ;;  %9449 = vst [vmem:[#allocation19_spill] sm:$0xff] %v7396_v22 }
 0x501   :  { %2862 = vmatpush1.bf16.msra.mxu0 %v7387_v51  ;;  %2903 = vmatpush1.bf16.msra.mxu1 %v7390_v11  ;;  %v9451_v51 = vld [vmem:[#allocation25_spill] sm:$0xff] }
 0x502   :  { %2958 = vmatprep.subr.bf16.mxu0 %v7393_v61  ;;  %2999 = vmatprep.subr.bf16.mxu1 %v7396_v22  ;;  %v9452_v61 = vld [vmem:[#allocation24_spill] sm:$0xff]  ;;  %v9453_v22 = vld [vmem:[#allocation26_spill] sm:$0xff] }
 0x521   :  { %v2552_v36 = vpop.f32.mrf.mxu0  ;;  %v2593_v12 = vpop.f32.mrf.mxu1 }
 0x522   :  { %v2600_v50 = vadd.f32 %v2552_v36, %v9450_v16  ;;  %v2602_v38 = vadd.f32 %v2593_v12, %v9452_v61  ;;  %v7426_v61 = vld [vmem:[#allocation8 + $0xc8] ss:$16 sps:$4 sm:$0xff]   ;;  %v7432_v36 = vld [vmem:[#allocation8 + $0xac] ss:$16 sps:$4 sm:$0xff]  }
 0x523   :  { %v2554_v19 = vpop.f32.mrf.mxu0  ;;  %v2595_v24 = vpop.f32.mrf.mxu1  ;;  %9455 = vst [vmem:[#allocation20_spill] sm:$0xff] %v7432_v36 }
 0x524   :  { %v4402_v29 = vmul.f32 -1.442695, %v2600_v50  ;;  %v2601_v18 = vadd.f32 %v2554_v19, %v9451_v51  ;;  %v4404_v0 = vmul.f32 -1.442695, %v2602_v38  ;;  %v2603_v23 = vadd.f32 %v2595_v24, %v9453_v22  ;;  %v7414_v24 = vld [vmem:[#allocation8 + $0xe8] ss:$16 sps:$4 sm:$0xff]  }
 0x525   :  { %v2556_v2 = vpop.f32.mrf.mxu0  ;;  %v2597_v7 = vpop.f32.mrf.mxu1  ;;  %v7420_v51 = vld [vmem:[#allocation8 + $0xcc] ss:$16 sps:$4 sm:$0xff]   ;;  %v7429_v22 = vld [vmem:[#allocation8 + $0xa4] ss:$16 sps:$4 sm:$0xff]  }
 0x526   :  { %4892 = vpow2.f32 %v4402_v29  ;;  %v4403_v11 = vmul.f32 -1.442695, %v2601_v18  ;;  %9454 = vst [vmem:[#allocation21_spill] sm:$0xff] %v7429_v22 }
 0x527   :  { %v2557_v20 = vpop.f32.mrf.mxu0  ;;  %v2598_v52 = vpop.f32.mrf.mxu1 }
 0x528   :  { %4894 = vpow2.f32 %v4403_v11  ;;  %v7423_v11 = vld [vmem:[#allocation8 + $0xc0] ss:$16 sps:$4 sm:$0xff]  }
 0x529   :  { %4896 = vpow2.f32 %v4404_v0 }
 0x52a   :  { %4898 = vtanh.f32 %v2603_v23 }
 0x533   :  { %v4893_v62 = vpop.eup %4892 }
 0x534   :  { %v2613_v33 = vadd.f32 1.0, %v4893_v62 }
 0x535   :  { %v4895_v16 = vpop.eup %4894 }
 0x536   :  { %4900 = vrcp.f32 %v2613_v33  ;;  %v2614_v50 = vadd.f32 1.0, %v4895_v16  ;;  %v4897_v2 = vpop.eup %4896  ;;  %v7411_v33 = vld [vmem:[#allocation8 + $0xe0] ss:$16 sps:$4 sm:$0xff]  }
 0x537   :  { %v4899_v7 = vpop.eup %4898  ;;  %v2615_v52 = vadd.f32 1.0, %v4897_v2 }
 0x538   :  { %4902 = vrcp.f32 %v2614_v50 }
 0x539   :  { %4904 = vrcp.f32 %v2615_v52  ;;  %v7442_v52 = vld [vmem:[#allocation8 + $0x84] ss:$16 sps:$4 sm:$0xff]  }
 0x53a   :  { %9458 = vst [vmem:[#allocation17_spill] sm:$0xff] %v7442_v52 }
 0x543   :  { %v4901_v29 = vpop.eup %4900 }
 0x544   :  { %v2624_v18 = vmul.f32 %v4901_v29, %v4899_v7  ;;  %v7436_v7 = vld [vmem:[#allocation8 + $0xa0] ss:$16 sps:$4 sm:$0xff]   ;;  %v7439_v29 = vld [vmem:[#allocation8 + $0xa8] ss:$16 sps:$4 sm:$0xff]  }
 0x545   :  { %v4903_v20 = vpop.eup %4902  ;;  %9456 = vst [vmem:[#allocation22_spill] sm:$0xff] %v7436_v7  ;;  %9457 = vst [vmem:[#allocation15_spill] sm:$0xff] %v7439_v29 }
 0x546   :  { %v2623_v19 = vmul.f32 %v4903_v20, %v6990_v14  ;;  %v4905_v62 = vpop.eup %4904  ;;  %v7417_v14 = vld [vmem:[#allocation8 + $0xc4] ss:$16 sps:$4 sm:$0xff]  }
 0x548   :  { %v7404_v12 = vadd.f32 %v2624_v18, %v2623_v19  ;;  %v7445_v19 = vld [vmem:[#allocation8 + $0x8c] ss:$16 sps:$4 sm:$0xff]  }
 0x54a   :  { %4906 = vtanh.f32 %v7404_v12 }
 0x557   :  { %v4907_v0 = vpop.eup %4906 }
 0x558   :  { %v2627_v38 = vmul.f32 %v4907_v0, %v4905_v62 }
 0x55a   :  { %v7407_v23 = vpack.c.bf16 %v2627_v38, %v2627_v38 }
 0x55c   :  { %2880 = vmatmul.mubr.bf16.vlgmr.msra.gmra.mxu0 %v7407_v23  ;;  %2921 = vmatmul.mubr.bf16.vlgmr.msra.gmra.mxu1 %v7407_v23 }
 0x55d   :  { %2959 = vmatpush1.bf16.msra.mxu0 %v7411_v33  ;;  %3000 = vmatpush1.bf16.msra.mxu1 %v7414_v24 }
 0x55e   :  { %2960 = vmatprep.subr.bf16.mxu0 %v7417_v14  ;;  %3001 = vmatprep.subr.bf16.mxu1 %v7420_v51 }
 0x561   :  { %2961 = vmatpush1.bf16.msra.mxu0 %v7423_v11  ;;  %3002 = vmatpush1.bf16.msra.mxu1 %v7426_v61 }
 0x562   :  { %2962 = vmatprep.subr.bf16.mxu0 %v7429_v22  ;;  %3003 = vmatprep.subr.bf16.mxu1 %v7432_v36  ;;  %v7455_v22 = vld [vmem:[#allocation8 + $0x64] ss:$16 sps:$4 sm:$0xff]  }
 0x564   :  { %v2663_v16 = vpop.f32.mrf.mxu0  ;;  %v2704_v50 = vpop.f32.mrf.mxu1 }
 0x565   :  { %v2664_v2 = vadd.f32 %v2663_v16, %v6299_v17  ;;  %2963 = vmatpush1.bf16.msra.mxu0 %v7436_v7  ;;  %3004 = vmatpush1.bf16.msra.mxu1 %v7439_v29  ;;  %v7449_v7 = vld [vmem:[#allocation8 + $0x80] ss:$16 sps:$4 sm:$0xff]   ;;  %v7452_v29 = vld [vmem:[#allocation8 + $0x88] ss:$16 sps:$4 sm:$0xff]  }
 0x566   :  { %v2665_v18 = vpop.f32.mrf.mxu0  ;;  %v2706_v20 = vpop.f32.mrf.mxu1  ;;  %2964 = vmatprep.subr.bf16.mxu0 %v7442_v52  ;;  %3005 = vmatprep.subr.bf16.mxu1 %v7445_v19 }
 0x567   :  { %v4405_v62 = vmul.f32 -1.442695, %v2664_v2  ;;  %v2666_v0 = vadd.f32 %v2665_v18, %v9346_v58  ;;  %v7458_v2 = vld [vmem:[#allocation8 + $0x6c] ss:$16 sps:$4 sm:$0xff]   ;;  %v7461_v18 = vld [vmem:[#allocation8 + $0x60] ss:$16 sps:$4 sm:$0xff]  }
 0x568   :  { %v2667_v38 = vpop.f32.mrf.mxu0  ;;  %v2708_v16 = vpop.f32.mrf.mxu1  ;;  %9459 = vst [vmem:[#allocation16_spill] sm:$0xff] %v7461_v18 }
 0x569   :  { %4908 = vpow2.f32 %v4405_v62  ;;  %v4406_v17 = vmul.f32 -1.442695, %v2666_v0  ;;  %2965 = vmatpush1.bf16.msra.mxu0 %v7449_v7  ;;  %3006 = vmatpush1.bf16.msra.mxu1 %v7452_v29  ;;  %v7464_v62 = vld [vmem:[#allocation8 + $0x68] ss:$16 sps:$4 sm:$0xff]   ;;  %v7467_v0 = vld [vmem:[#allocation8 + $0x44] ss:$16 sps:$4 sm:$0xff]  }
 0x56a   :  { %v2668_v52 = vpop.f32.mrf.mxu0  ;;  %v2709_v36 = vpop.f32.mrf.mxu1  ;;  %2966 = vmatprep.subr.bf16.mxu0 %v7455_v22  ;;  %3007 = vmatprep.subr.bf16.mxu1 %v7458_v2  ;;  %9460 = vst [vmem:[#allocation18_spill] sm:$0xff] %v7464_v62  ;;  %9461 = vst [vmem:[#allocation117_spill] sm:$0xff] %v7467_v0  ;;  %v7474_v38 = vld [vmem:[#allocation8 + $0x40] ss:$16 sps:$4 sm:$0xff]   ;;  %v7480_v16 = vld [vmem:[#allocation8 + $0x24] ss:$16 sps:$4 sm:$0xff]  }
 0x56b   :  { %4910 = vpow2.f32 %v4406_v17  ;;  %v7470_v36 = vld [vmem:[#allocation8 + $0x4c] ss:$16 sps:$4 sm:$0xff]   ;;  %v2705_v52 = vadd.f32 %v2704_v50, %v9354_v6  ;;  %9463 = vst [vmem:[#allocation119_spill] sm:$0xff] %v7474_v38  ;;  %v7477_v17 = vld [vmem:[#allocation8 + $0x48] ss:$16 sps:$4 sm:$0xff]   ;;  %9465 = vst [vmem:[#allocation121_spill] sm:$0xff] %v7480_v16 }
 0x56c   :  { %9462 = vst [vmem:[#allocation118_spill] sm:$0xff] %v7470_v36  ;;  %9464 = vst [vmem:[#allocation120_spill] sm:$0xff] %v7477_v17  ;;  %v7489_v50 = vld [vmem:[#allocation8 + $0x28] ss:$16 sps:$4 sm:$0xff]   ;;  %v7493_v6 = vld [vmem:[#allocation8 + $0x4] ss:$16 sps:$4 sm:$0xff]  }
 0x56d   :  { %2967 = vmatpush1.bf16.msra.mxu0 %v7461_v18  ;;  %3008 = vmatpush1.bf16.msra.mxu1 %v7464_v62  ;;  %v7483_v62 = vld [vmem:[#allocation8 + $0x2c] ss:$16 sps:$4 sm:$0xff]   ;;  %9468 = vst [vmem:[#allocation124_spill] sm:$0xff] %v7489_v50  ;;  %v7499_v18 = vld [vmem:[#allocation8] ss:$16 sps:$4 sm:$0xff]  }
 0x56e   :  { %2968 = vmatprep.subr.bf16.mxu0 %v7467_v0  ;;  %3009 = vmatprep.subr.bf16.mxu1 %v7470_v36  ;;  %9466 = vst [vmem:[#allocation122_spill] sm:$0xff] %v7483_v62  ;;  %v4407_v0 = vmul.f32 -1.442695, %v2705_v52  ;;  %v7486_v36 = vld [vmem:[#allocation8 + $0x20] ss:$16 sps:$4 sm:$0xff]   ;;  %9469 = vst [vmem:[#allocation125_spill] sm:$0xff] %v7499_v18 }
 0x56f   :  { %9467 = vst [vmem:[#allocation123_spill] sm:$0xff] %v7486_v36 }
 0x570   :  { %4912 = vpow2.f32 %v4407_v0  ;;  %v7511_v0 = vld [vmem:[#allocation8 + $0x1e0] ss:$16 sps:$4 sm:$0xff]  }
 0x571   :  { %2969 = vmatpush1.bf16.msra.mxu0 %v7474_v38  ;;  %3010 = vmatpush1.bf16.msra.mxu1 %v7477_v17  ;;  %v2707_v17 = vadd.f32 %v2706_v20, %v6327_v48  ;;  %v7505_v20 = vld [vmem:[#allocation8 + $0x1e4] ss:$16 sps:$4 sm:$0xff]   ;;  %v7508_v48 = vld [vmem:[#allocation8 + $0x1ec] ss:$16 sps:$4 sm:$0xff]   ;;  %9473 = vst [vmem:[#allocation129_spill] sm:$0xff] %v7511_v0 }
 0x572   :  { %2970 = vmatprep.subr.bf16.mxu0 %v7480_v16  ;;  %3011 = vmatprep.subr.bf16.mxu1 %v7483_v62  ;;  %v7496_v16 = vld [vmem:[#allocation8 + $0xc] ss:$16 sps:$4 sm:$0xff]   ;;  %9471 = vst [vmem:[#allocation127_spill] sm:$0xff] %v7505_v20  ;;  %9472 = vst [vmem:[#allocation128_spill] sm:$0xff] %v7508_v48 }
 0x575   :  { %2971 = vmatpush1.bf16.msra.mxu0 %v7486_v36  ;;  %3012 = vmatpush1.bf16.msra.mxu1 %v7489_v50  ;;  %v7502_v50 = vld [vmem:[#allocation8 + $0x8] ss:$16 sps:$4 sm:$0xff]  }
 0x576   :  { %v4909_v38 = vpop.eup %4908  ;;  %2972 = vmatprep.subr.bf16.mxu0 %v7493_v6  ;;  %3013 = vmatprep.subr.bf16.mxu1 %v7496_v16  ;;  %9470 = vst [vmem:[#allocation126_spill] sm:$0xff] %v7502_v50 }
 0x577   :  { %v2720_v52 = vadd.f32 1.0, %v4909_v38  ;;  %v7517_v38 = vld [vmem:[#allocation8 + $0x1c4] ss:$16 sps:$4 sm:$0xff]  }
 0x578   :  { %v4911_v62 = vpop.eup %4910  ;;  %9475 = vst [vmem:[#allocation131_spill] sm:$0xff] %v7517_v38 }
 0x579   :  { %4914 = vrcp.f32 %v2720_v52  ;;  %v2721_v36 = vadd.f32 1.0, %v4911_v62  ;;  %2973 = vmatpush1.bf16.msra.mxu0 %v7499_v18  ;;  %3014 = vmatpush1.bf16.msra.mxu1 %v7502_v50  ;;  %v7514_v62 = vld [vmem:[#allocation8 + $0x1e8] ss:$16 sps:$4 sm:$0xff]   ;;  %v7523_v52 = vld [vmem:[#allocation8 + $0x1c0] ss:$16 sps:$4 sm:$0xff]  }
 0x57a   :  { %4916 = vtanh.f32 %v2707_v17  ;;  %2974 = vmatprep.subr.bf16.mxu0 %v7505_v20  ;;  %3015 = vmatprep.subr.bf16.mxu1 %v7508_v48  ;;  %9474 = vst [vmem:[#allocation130_spill] sm:$0xff] %v7514_v62  ;;  %v7520_v17 = vld [vmem:[#allocation8 + $0x1cc] ss:$16 sps:$4 sm:$0xff]   ;;  %9477 = vst [vmem:[#allocation133_spill] sm:$0xff] %v7523_v52  ;;  %v7537_v48 = vld [vmem:[#allocation8 + $0x184] ss:$16 sps:$4 sm:$0xff]  }
 0x57b   :  { %4918 = vrcp.f32 %v2721_v36  ;;  %9476 = vst [vmem:[#allocation132_spill] sm:$0xff] %v7520_v17  ;;  %v7526_v36 = vld [vmem:[#allocation8 + $0x1c8] ss:$16 sps:$4 sm:$0xff]   ;;  %9481 = vst [vmem:[#allocation137_spill] sm:$0xff] %v7537_v48  ;;  %v7550_v18 = vld [vmem:[#allocation8 + $0x164] ss:$16 sps:$4 sm:$0xff]  }
 0x57c   :  { %9478 = vst [vmem:[#allocation134_spill] sm:$0xff] %v7526_v36 }
 0x57d   :  { %2975 = vmatpush2.bf16.msra.mxu0 %v7511_v0  ;;  %3016 = vmatpush2.bf16.msra.mxu1 %v7514_v62  ;;  %v4913_v62 = vpop.eup %4912  ;;  %v7531_v0 = vld [vmem:[#allocation8 + $0x1a0] ss:$16 sps:$4 sm:$0xff]  }
 0x57e   :  { %2976 = vmatprep.subr.bf16.mxu0 %v7517_v38  ;;  %3017 = vmatprep.subr.bf16.mxu1 %v7520_v17  ;;  %9479 = vst [vmem:[#allocation135_spill] sm:$0xff] %v7531_v0  ;;  %v7534_v38 = vld [vmem:[#allocation8 + $0x1a8] ss:$16 sps:$4 sm:$0xff]  }
 0x57f   :  { %9480 = vst [vmem:[#allocation136_spill] sm:$0xff] %v7534_v38 }
 0x581   :  { %2977 = vmatpush2.bf16.msra.mxu0 %v7523_v52  ;;  %3018 = vmatpush2.bf16.msra.mxu1 %v7526_v36  ;;  %v7540_v52 = vld [vmem:[#allocation8 + $0x18c] ss:$16 sps:$4 sm:$0xff]   ;;  %v2722_v36 = vadd.f32 1.0, %v4913_v62 }
 0x582   :  { %2978 = vmatprep.subr.bf16.mxu0 %v7039_v60  ;;  %3019 = vmatprep.subr.bf16.mxu1 %v7042_v9 }
 0x583   :  { %4920 = vrcp.f32 %v2722_v36  ;;  %v9496_v36 = vld [vmem:[#allocation53_spill] sm:$0xff] }
 0x585   :  { %2979 = vmatpush2.bf16.msra.mxu0 %v7531_v0  ;;  %3020 = vmatpush2.bf16.msra.mxu1 %v7534_v38  ;;  %v7544_v0 = vld [vmem:[#allocation8 + $0x180] ss:$16 sps:$4 sm:$0xff]   ;;  %v7547_v38 = vld [vmem:[#allocation8 + $0x188] ss:$16 sps:$4 sm:$0xff]  }
 0x586   :  { %v4915_v17 = vpop.eup %4914  ;;  %2980 = vmatprep.subr.bf16.mxu0 %v7537_v48  ;;  %3021 = vmatprep.subr.bf16.mxu1 %v7540_v52  ;;  %v7553_v48 = vld [vmem:[#allocation8 + $0x16c] ss:$16 sps:$4 sm:$0xff]  }
 0x587   :  { %v4917_v60 = vpop.eup %4916 }
 0x588   :  { %v4919_v9 = vpop.eup %4918  ;;  %v2731_v50 = vmul.f32 %v4917_v60, %v4915_v17  ;;  %v9495_v17 = vld [vmem:[#allocation52_spill] sm:$0xff]  ;;  %v9497_v60 = vld [vmem:[#allocation54_spill] sm:$0xff] }
 0x589   :  { %v2730_v20 = vmul.f32 %v4919_v9, %v7052_v30  ;;  %2981 = vmatpush2.bf16.msra.mxu0 %v7544_v0  ;;  %3022 = vmatpush2.bf16.msra.mxu1 %v7547_v38  ;;  %v9498_v9 = vld [vmem:[#allocation55_spill] sm:$0xff] }
 0x58a   :  { %2982 = vmatprep.subr.bf16.mxu0 %v7550_v18  ;;  %3023 = vmatprep.subr.bf16.mxu1 %v7553_v48 }
 0x58b   :  { %v7556_v62 = vadd.f32 %v2731_v50, %v2730_v20  ;;  %v9493_v50 = vld [vmem:[#allocation50_spill] sm:$0xff]  ;;  %v9494_v20 = vld [vmem:[#allocation51_spill] sm:$0xff] }
 0x58d   :  { %4922 = vtanh.f32 %v7556_v62  ;;  %2983 = vmatpush2.bf16.msra.mxu0 %v7057_v43  ;;  %3024 = vmatpush2.bf16.msra.mxu1 %v7060_v26 }
 0x58e   :  { %2984 = vmatprep.subr.bf16.mxu0 %v7063_v21  ;;  %3025 = vmatprep.subr.bf16.mxu1 %v7066_v25 }
 0x590   :  { %v4921_v30 = vpop.eup %4920 }
 0x591   :  { %2985 = vmatpush2.bf16.msra.mxu0 %v7069_v15  ;;  %3026 = vmatpush2.bf16.msra.mxu1 %v7072_v37 }
 0x592   :  { %2986 = vmatprep.subr.bf16.mxu0 %v7075_v44  ;;  %3027 = vmatprep.subr.bf16.mxu1 %v7078_v45 }
 0x595   :  { %2987 = vmatpush2.bf16.msra.mxu0 %v7081_v5  ;;  %3028 = vmatpush2.bf16.msra.mxu1 %v7084_v8 }
 0x596   :  { %2988 = vmatprep.subr.bf16.mxu0 %v7087_v31  ;;  %3029 = vmatprep.subr.bf16.mxu1 %v7090_v1 }
 0x599   :  { %2989 = vmatpush2.bf16.msra.mxu0 %v7093_v10  ;;  %3030 = vmatpush2.bf16.msra.mxu1 %v7096_v47 }
 0x59a   :  { %v4923_v43 = vpop.eup %4922  ;;  %3065 = vmatprep.subr.bf16.mxu0 %v7099_v28  ;;  %3106 = vmatprep.subr.bf16.mxu1 %v7102_v46 }
 0x59b   :  { %v2734_v26 = vmul.f32 %v4923_v43, %v4921_v30  ;;  %v9499_v30 = vld [vmem:[#allocation56_spill] sm:$0xff]  ;;  %v9500_v43 = vld [vmem:[#allocation57_spill] sm:$0xff] }
 0x59d   :  { %v7575_v21 = vpack.c.bf16 %v2734_v26, %v2734_v26  ;;  %v9501_v26 = vld [vmem:[#allocation58_spill] sm:$0xff] }
 0x59f   :  { %2990 = vmatprep.mubr.bf16.mxu0 %v7575_v21  ;;  %3031 = vmatprep.mubr.bf16.mxu1 %v7575_v21 }
 0x5a0   :  { %2991 = vmatmul.mubr.bf16.vlgmr.msra.gmra.mxu0 %v7407_v23  ;;  %3032 = vmatmul.mubr.bf16.vlgmr.msra.gmra.mxu1 %v7407_v23  ;;  %v9492_v23 = vld [vmem:[#allocation49_spill] sm:$0xff] }
 0x5a1   :  { %3066 = vmatpush1.bf16.msra.mxu0 %v7111_v40  ;;  %3107 = vmatpush1.bf16.msra.mxu1 %v7114_v27  ;;  %v9482_v40 = vld [vmem:[#allocation41_spill] sm:$0xff]  ;;  %v9483_v27 = vld [vmem:[#allocation14_spill] sm:$0xff] }
 0x5a2   :  { %3067 = vmatprep.subr.bf16.mxu0 %v7117_v32  ;;  %3108 = vmatprep.subr.bf16.mxu1 %v7120_v39  ;;  %v9484_v32 = vld [vmem:[#allocation42_spill] sm:$0xff]  ;;  %v9485_v39 = vld [vmem:[#allocation43_spill] sm:$0xff] }
 0x5a4   :  { %v2770_v25 = vpop.f32.mrf.mxu0  ;;  %v2811_v15 = vpop.f32.mrf.mxu1 }
 0x5a5   :  { %v2771_v37 = vadd.f32 %v2770_v25, %v6857_v34  ;;  %3068 = vmatpush1.bf16.msra.mxu0 %v7124_v54  ;;  %3109 = vmatpush1.bf16.msra.mxu1 %v7127_v49  ;;  %v2812_v46 = vadd.f32 %v2811_v15, %v6875_v59  ;;  %v9486_v49 = vld [vmem:[#allocation44_spill] sm:$0xff]  ;;  %v9502_v25 = vld [vmem:[#allocation59_spill] sm:$0xff] }
 0x5a6   :  { %v2772_v44 = vpop.f32.mrf.mxu0  ;;  %v2813_v45 = vpop.f32.mrf.mxu1  ;;  %3069 = vmatprep.subr.bf16.mxu0 %v7130_v53  ;;  %3110 = vmatprep.subr.bf16.mxu1 %v7133_v57  ;;  %v9487_v53 = vld [vmem:[#allocation45_spill] sm:$0xff] }
 0x5a7   :  { %v4408_v5 = vmul.f32 -1.442695, %v2771_v37  ;;  %v2773_v8 = vadd.f32 %v2772_v44, %v6862_v35  ;;  %v4410_v54 = vmul.f32 -1.442695, %v2812_v46  ;;  %v9503_v37 = vld [vmem:[#allocation60_spill] sm:$0xff]  ;;  %v9504_v44 = vld [vmem:[#allocation61_spill] sm:$0xff] }
 0x5a8   :  { %v2774_v31 = vpop.f32.mrf.mxu0  ;;  %v2815_v1 = vpop.f32.mrf.mxu1 }
 0x5a9   :  { %4924 = vpow2.f32 %v4408_v5  ;;  %v4409_v10 = vmul.f32 -1.442695, %v2773_v8  ;;  %3070 = vmatpush1.bf16.msra.mxu0 %v7137_v63  ;;  %3111 = vmatpush1.bf16.msra.mxu1 %v7140_v13  ;;  %v9488_v63 = vld [vmem:[#allocation40_spill] sm:$0xff]  ;;  %v9505_v5 = vld [vmem:[#allocation62_spill] sm:$0xff]  ;;  %v9506_v8 = vld [vmem:[#allocation63_spill] sm:$0xff] }
 0x5aa   :  { %v2775_v47 = vpop.f32.mrf.mxu0  ;;  %v2816_v28 = vpop.f32.mrf.mxu1  ;;  %3071 = vmatprep.subr.bf16.mxu0 %v7143_v3  ;;  %3112 = vmatprep.subr.bf16.mxu1 %v7146_v4  ;;  %v2814_v13 = vadd.f32 %v2813_v45, %v9488_v63  ;;  %v9489_v3 = vld [vmem:[#allocation46_spill] sm:$0xff]  ;;  %v9490_v4 = vld [vmem:[#allocation47_spill] sm:$0xff] }
 0x5ab   :  { %4926 = vpow2.f32 %v4409_v10  ;;  %v9507_v47 = vld [vmem:[#allocation68_spill] sm:$0xff] }
 0x5ac   :  { %4928 = vpow2.f32 %v4410_v54 }
 0x5ad   :  { %3072 = vmatpush1.bf16.msra.mxu0 %v7149_v41  ;;  %3113 = vmatpush1.bf16.msra.mxu1 %v7152_v42 }
 0x5ae   :  { %3073 = vmatprep.subr.bf16.mxu0 %v7155_v55  ;;  %3114 = vmatprep.subr.bf16.mxu1 %v7158_v56  ;;  %v9491_v56 = vld [vmem:[#allocation48_spill] sm:$0xff] }
 0x5b1   :  { %3074 = vmatpush1.bf16.msra.mxu0 %v9482_v40  ;;  %3115 = vmatpush1.bf16.msra.mxu1 %v9483_v27  ;;  %v9508_v40 = vld [vmem:[#allocation64_spill] sm:$0xff]  ;;  %v9509_v27 = vld [vmem:[#allocation65_spill] sm:$0xff] }
 0x5b2   :  { %3075 = vmatprep.subr.bf16.mxu0 %v9484_v32  ;;  %3116 = vmatprep.subr.bf16.mxu1 %v9485_v39  ;;  %v9510_v32 = vld [vmem:[#allocation66_spill] sm:$0xff]  ;;  %v9511_v39 = vld [vmem:[#allocation67_spill] sm:$0xff] }
 0x5b5   :  { %3076 = vmatpush1.bf16.msra.mxu0 %v9486_v49  ;;  %3117 = vmatpush1.bf16.msra.mxu1 %v9487_v53  ;;  %v9512_v49 = vld [vmem:[#allocation69_spill] sm:$0xff]  ;;  %v9513_v53 = vld [vmem:[#allocation70_spill] sm:$0xff] }
 0x5b6   :  { %v4925_v57 = vpop.eup %4924  ;;  %3077 = vmatprep.subr.bf16.mxu0 %v9489_v3  ;;  %3118 = vmatprep.subr.bf16.mxu1 %v9490_v4  ;;  %v9516_v3 = vld [vmem:[#allocation73_spill] sm:$0xff]  ;;  %v9517_v4 = vld [vmem:[#allocation74_spill] sm:$0xff] }
 0x5b7   :  { %v2827_v41 = vadd.f32 1.0, %v4925_v57  ;;  %v9514_v57 = vld [vmem:[#allocation71_spill] sm:$0xff] }
 0x5b8   :  { %v4927_v42 = vpop.eup %4926 }
 0x5b9   :  { %4930 = vrcp.f32 %v2827_v41  ;;  %v2828_v55 = vadd.f32 1.0, %v4927_v42  ;;  %3078 = vmatpush1.bf16.msra.mxu0 %v9491_v56  ;;  %3119 = vmatpush1.bf16.msra.mxu1 %v9492_v23  ;;  %v4929_v15 = vpop.eup %4928  ;;  %v9518_v41 = vld [vmem:[#allocation75_spill] sm:$0xff]  ;;  %v9519_v42 = vld [vmem:[#allocation76_spill] sm:$0xff]  ;;  %v9521_v56 = vld [vmem:[#allocation78_spill] sm:$0xff] }
 0x5ba   :  { %4932 = vtanh.f32 %v2814_v13  ;;  %3079 = vmatprep.subr.bf16.mxu0 %v9493_v50  ;;  %3120 = vmatprep.subr.bf16.mxu1 %v9494_v20  ;;  %v2829_v10 = vadd.f32 1.0, %v4929_v15  ;;  %v9515_v13 = vld [vmem:[#allocation72_spill] sm:$0xff]  ;;  %v9522_v23 = vld [vmem:[#allocation79_spill] sm:$0xff] }
 0x5bb   :  { %4934 = vrcp.f32 %v2828_v55  ;;  %v9520_v55 = vld [vmem:[#allocation77_spill] sm:$0xff]  ;;  %v9523_v50 = vld [vmem:[#allocation84_spill] sm:$0xff] }
 0x5bc   :  { %4936 = vrcp.f32 %v2829_v10  ;;  %v9532_v10 = vld [vmem:[#allocation91_spill] sm:$0xff] }
 0x5bd   :  { %3080 = vmatpush1.bf16.msra.mxu0 %v9495_v17  ;;  %3121 = vmatpush1.bf16.msra.mxu1 %v9496_v36  ;;  %v9524_v17 = vld [vmem:[#allocation85_spill] sm:$0xff]  ;;  %v9525_v36 = vld [vmem:[#allocation86_spill] sm:$0xff] }
 0x5be   :  { %3081 = vmatprep.subr.bf16.mxu0 %v9497_v60  ;;  %3122 = vmatprep.subr.bf16.mxu1 %v9498_v9  ;;  %v9526_v9 = vld [vmem:[#allocation87_spill] sm:$0xff] }
 0x5c1   :  { %3082 = vmatpush2.bf16.msra.mxu0 %v9499_v30  ;;  %3123 = vmatpush2.bf16.msra.mxu1 %v9500_v43  ;;  %v9527_v30 = vld [vmem:[#allocation88_spill] sm:$0xff] }
 0x5c2   :  { %3083 = vmatprep.subr.bf16.mxu0 %v9501_v26  ;;  %3124 = vmatprep.subr.bf16.mxu1 %v9502_v25  ;;  %v9528_v26 = vld [vmem:[#allocation89_spill] sm:$0xff]  ;;  %v9529_v25 = vld [vmem:[#allocation80_spill] sm:$0xff] }
 0x5c5   :  { %3084 = vmatpush2.bf16.msra.mxu0 %v9503_v37  ;;  %3125 = vmatpush2.bf16.msra.mxu1 %v9504_v44  ;;  %v7651_v37 = vld [vmem:[#allocation6 + $0xe4] ss:$16 sps:$4 sm:$0xff]   ;;  %v7654_v44 = vld [vmem:[#allocation6 + $0xec] ss:$16 sps:$4 sm:$0xff]  }
 0x5c6   :  { %v4931_v45 = vpop.eup %4930  ;;  %3085 = vmatprep.subr.bf16.mxu0 %v9505_v5  ;;  %3126 = vmatprep.subr.bf16.mxu1 %v9506_v8  ;;  %v7662_v5 = vld [vmem:[#allocation6 + $0xe8] ss:$16 sps:$4 sm:$0xff]   ;;  %v7665_v8 = vld [vmem:[#allocation6 + $0xc4] ss:$16 sps:$4 sm:$0xff]  }
 0x5c7   :  { %v4933_v31 = vpop.eup %4932 }
 0x5c8   :  { %v4935_v1 = vpop.eup %4934  ;;  %v2838_v46 = vmul.f32 %v4933_v31, %v4931_v45  ;;  %v7659_v45 = vld [vmem:[#allocation6 + $0xe0] ss:$16 sps:$4 sm:$0xff]   ;;  %v7668_v31 = vld [vmem:[#allocation6 + $0xcc] ss:$16 sps:$4 sm:$0xff]  }
 0x5c9   :  { %v2837_v28 = vmul.f32 %v4935_v1, %v9507_v47  ;;  %3086 = vmatpush2.bf16.msra.mxu0 %v9508_v40  ;;  %3127 = vmatpush2.bf16.msra.mxu1 %v9509_v27  ;;  %v4937_v20 = vpop.eup %4936  ;;  %v9530_v1 = vmov 0   ;;  %v9533_v47 = vld [vmem:[#allocation92_spill] sm:$0xff]  ;;  %v9536_v40 = vld [vmem:[#allocation95_spill] sm:$0xff] }
 0x5ca   :  { %3087 = vmatprep.subr.bf16.mxu0 %v9510_v32  ;;  %3128 = vmatprep.subr.bf16.mxu1 %v9511_v39  ;;  %v9537_v27 = vld [vmem:[#allocation96_spill] sm:$0xff]  ;;  %v9538_v32 = vld [vmem:[#allocation97_spill] sm:$0xff]  ;;  %v9539_v39 = vld [vmem:[#allocation98_spill] sm:$0xff] }
 0x5cb   :  { %v7630_v54 = vadd.f32 %v2838_v46, %v2837_v28  ;;  %v9534_v28 = vld [vmem:[#allocation93_spill] sm:$0xff]  ;;  %v9535_v46 = vld [vmem:[#allocation94_spill] sm:$0xff] }
 0x5cd   :  { %3088 = vmatpush2.bf16.msra.mxu0 %v9512_v49  ;;  %3129 = vmatpush2.bf16.msra.mxu1 %v9513_v53  ;;  %4938 = vtanh.f32 %v7630_v54  ;;  %v9540_v49 = vld [vmem:[#allocation99_spill] sm:$0xff]  ;;  %v9541_v53 = vld [vmem:[#allocation100_spill] sm:$0xff] }
 0x5ce   :  { %3089 = vmatprep.subr.bf16.mxu0 %v9514_v57  ;;  %3130 = vmatprep.subr.bf16.mxu1 %v9515_v13  ;;  %v9542_v57 = vld [vmem:[#allocation101_spill] sm:$0xff]  ;;  %v9543_v13 = vld [vmem:[#allocation102_spill] sm:$0xff] }
 0x5d1   :  { %3090 = vmatpush2.bf16.msra.mxu0 %v9516_v3  ;;  %3131 = vmatpush2.bf16.msra.mxu1 %v9517_v4  ;;  %v9544_v3 = vld [vmem:[#allocation103_spill] sm:$0xff]  ;;  %v9545_v4 = vld [vmem:[#allocation104_spill] sm:$0xff] }
 0x5d2   :  { %3091 = vmatprep.subr.bf16.mxu0 %v9518_v41  ;;  %3132 = vmatprep.subr.bf16.mxu1 %v9519_v42  ;;  %v9546_v41 = vld [vmem:[#allocation105_spill] sm:$0xff]  ;;  %v9547_v42 = vld [vmem:[#allocation106_spill] sm:$0xff] }
 0x5d5   :  { %3092 = vmatpush2.bf16.msra.mxu0 %v9520_v55  ;;  %3133 = vmatpush2.bf16.msra.mxu1 %v9521_v56  ;;  %v9548_v55 = vld [vmem:[#allocation107_spill] sm:$0xff]  ;;  %v9549_v56 = vld [vmem:[#allocation108_spill] sm:$0xff] }
 0x5d6   :  { %3093 = vmatprep.subr.bf16.mxu0 %v9522_v23  ;;  %3134 = vmatprep.subr.bf16.mxu1 %v9523_v50  ;;  %v9550_v23 = vld [vmem:[#allocation109_spill] sm:$0xff]  ;;  %v9551_v50 = vld [vmem:[#allocation110_spill] sm:$0xff] }
 0x5d9   :  { %3094 = vmatpush2.bf16.msra.mxu0 %v9524_v17  ;;  %3135 = vmatpush2.bf16.msra.mxu1 %v9525_v36  ;;  %v9553_v17 = vld [vmem:[#allocation112_spill] sm:$0xff]  ;;  %v9554_v36 = vld [vmem:[#allocation113_spill] sm:$0xff] }
 0x5da   :  { %v4939_v60 = vpop.eup %4938  ;;  %3095 = vmatprep.subr.bf16.mxu0 %v9526_v9  ;;  %3136 = vmatprep.subr.bf16.mxu1 %v9527_v30  ;;  %v9556_v9 = vld [vmem:[#allocation115_spill] sm:$0xff]  ;;  %v9557_v30 = vld [vmem:[#allocation116_spill] sm:$0xff] }
 0x5db   :  { %v2841_v43 = vmul.f32 %v4939_v60, %v4937_v20  ;;  %v9552_v20 = vld [vmem:[#allocation111_spill] sm:$0xff]  ;;  %v9555_v60 = vld [vmem:[#allocation114_spill] sm:$0xff] }
 0x5dd   :  { %3096 = vmatpush2.bf16.msra.mxu0 %v9528_v26  ;;  %3137 = vmatpush2.bf16.msra.mxu1 %v9529_v25  ;;  %v3064_v15 = vpack.c.bf16 %v2841_v43, %v2841_v43  ;;  %v9558_v43 = vld [vmem:[#allocation19_spill] sm:$0xff] }
 0x5de   :  { %3176 = vmatprep.subr.bf16.mxu0 %v7651_v37  ;;  %3217 = vmatprep.subr.bf16.mxu1 %v7654_v44 }
 0x5df   :  { %3097 = vmatprep.mubr.bf16.mxu0 %v3064_v15  ;;  %3138 = vmatprep.mubr.bf16.mxu1 %v3064_v15  ;;  %v9559_v15 = vld [vmem:[#allocation27_spill] sm:$0xff] }
 0x5e0   :  { %3098 = vmatmul.mubr.bf16.vlgmr.msra.gmra.mxu0 %v7575_v21  ;;  %3139 = vmatmul.mubr.bf16.vlgmr.msra.gmra.mxu1 %v7575_v21  ;;  %v9531_v21 = vld [vmem:[#allocation90_spill] sm:$0xff] }
 0x5e1   :  { %3177 = vmatpush1.bf16.msra.mxu0 %v7659_v45  ;;  %3218 = vmatpush1.bf16.msra.mxu1 %v7662_v5 }
 0x5e2   :  { %3178 = vmatprep.subr.bf16.mxu0 %v7665_v8  ;;  %3219 = vmatprep.subr.bf16.mxu1 %v7668_v31 }
 0x5e3   :  { %3208 = vmatprep.mubr.bf16.mxu0 %v9530_v1  ;;  %3249 = vmatprep.mubr.bf16.mxu1 %v9530_v1 }
 0x5e5   :  { %3179 = vmatpush1.bf16.msra.mxu0 %v9531_v21  ;;  %3220 = vmatpush1.bf16.msra.mxu1 %v9532_v10 }
 0x5e6   :  { %3180 = vmatprep.subr.bf16.mxu0 %v9533_v47  ;;  %3221 = vmatprep.subr.bf16.mxu1 %v9534_v28 }
 0x5e9   :  { %3181 = vmatpush1.bf16.msra.mxu0 %v9535_v46  ;;  %3222 = vmatpush1.bf16.msra.mxu1 %v9536_v40  ;;  %v9560_v46 = vld [vmem:[#allocation29_spill] sm:$0xff] }
 0x5ea   :  { %3182 = vmatprep.subr.bf16.mxu0 %v9537_v27  ;;  %3223 = vmatprep.subr.bf16.mxu1 %v9538_v32 }
 0x5ed   :  { %3183 = vmatpush1.bf16.msra.mxu0 %v9539_v39  ;;  %3224 = vmatpush1.bf16.msra.mxu1 %v9540_v49 }
 0x5ee   :  { %3184 = vmatprep.subr.bf16.mxu0 %v9541_v53  ;;  %3225 = vmatprep.subr.bf16.mxu1 %v9542_v57  ;;  %v9561_v57 = vld [vmem:[#allocation28_spill] sm:$0xff] }
 0x5f1   :  { %3185 = vmatpush1.bf16.msra.mxu0 %v9543_v13  ;;  %3226 = vmatpush1.bf16.msra.mxu1 %v9544_v3 }
 0x5f2   :  { %3186 = vmatprep.subr.bf16.mxu0 %v9545_v4  ;;  %3227 = vmatprep.subr.bf16.mxu1 %v9546_v41  ;;  %v9562_v4 = vld [vmem:[#allocation30_spill] sm:$0xff] }
 0x5f5   :  { %3187 = vmatpush1.bf16.msra.mxu0 %v9547_v42  ;;  %3228 = vmatpush1.bf16.msra.mxu1 %v9548_v55 }
 0x5f6   :  { %3188 = vmatprep.subr.bf16.mxu0 %v9549_v56  ;;  %3229 = vmatprep.subr.bf16.mxu1 %v9550_v23 }
 0x5f9   :  { %3189 = vmatpush1.bf16.msra.mxu0 %v9551_v50  ;;  %3230 = vmatpush1.bf16.msra.mxu1 %v9552_v20 }
 0x5fa   :  { %3190 = vmatprep.subr.bf16.mxu0 %v9553_v17  ;;  %3231 = vmatprep.subr.bf16.mxu1 %v9554_v36 }
 0x5fd   :  { %3191 = vmatpush1.bf16.msra.mxu0 %v9555_v60  ;;  %3232 = vmatpush1.bf16.msra.mxu1 %v9556_v9 }
 0x5fe   :  { %3287 = vmatprep.subr.bf16.mxu0 %v9557_v30  ;;  %3328 = vmatprep.subr.bf16.mxu1 %v9558_v43 }
 0x61c   :  { %v2881_v26 = vpop.f32.mrf.mxu0  ;;  %v2922_v25 = vpop.f32.mrf.mxu1 }
 0x61d   :  { %v2929_v21 = vadd.f32 %v2881_v26, %v9559_v15  ;;  %v2931_v13 = vadd.f32 %v2922_v25, %v9561_v57 }
 0x61e   :  { %v2883_v10 = vpop.f32.mrf.mxu0  ;;  %v2924_v47 = vpop.f32.mrf.mxu1 }
 0x61f   :  { %v4411_v28 = vmul.f32 -1.442695, %v2929_v21  ;;  %v2930_v40 = vadd.f32 %v2883_v10, %v9560_v46  ;;  %v4413_v3 = vmul.f32 -1.442695, %v2931_v13  ;;  %v2932_v41 = vadd.f32 %v2924_v47, %v9562_v4  ;;  %v9564_v10 = vld [vmem:[#allocation20_spill] sm:$0xff]  ;;  %v9565_v46 = vld [vmem:[#allocation22_spill] sm:$0xff] }
 0x620   :  { %v2885_v27 = vpop.f32.mrf.mxu0  ;;  %v2926_v32 = vpop.f32.mrf.mxu1  ;;  %v9570_v13 = vld [vmem:[#allocation18_spill] sm:$0xff] }
 0x621   :  { %4940 = vpow2.f32 %v4411_v28  ;;  %v4412_v39 = vmul.f32 -1.442695, %v2930_v40  ;;  %v9566_v40 = vld [vmem:[#allocation15_spill] sm:$0xff]  ;;  %v9568_v27 = vld [vmem:[#allocation17_spill] sm:$0xff]  ;;  %v9572_v4 = vld [vmem:[#allocation118_spill] sm:$0xff] }
 0x622   :  { %v2886_v49 = vpop.f32.mrf.mxu0  ;;  %v2927_v53 = vpop.f32.mrf.mxu1 }
 0x623   :  { %4942 = vpow2.f32 %v4412_v39 }
 0x624   :  { %4944 = vpow2.f32 %v4413_v3  ;;  %v9571_v3 = vld [vmem:[#allocation117_spill] sm:$0xff] }
 0x625   :  { %4946 = vtanh.f32 %v2932_v41 }
 0x62e   :  { %v4941_v42 = vpop.eup %4940 }
 0x62f   :  { %v2942_v55 = vadd.f32 1.0, %v4941_v42  ;;  %v9575_v42 = vld [vmem:[#allocation120_spill] sm:$0xff] }
 0x630   :  { %v4943_v56 = vpop.eup %4942 }
 0x631   :  { %4948 = vrcp.f32 %v2942_v55  ;;  %v2943_v23 = vadd.f32 1.0, %v4943_v56  ;;  %v4945_v50 = vpop.eup %4944  ;;  %v9578_v56 = vld [vmem:[#allocation123_spill] sm:$0xff] }
 0x632   :  { %v4947_v20 = vpop.eup %4946  ;;  %v2944_v9 = vadd.f32 1.0, %v4945_v50 }
 0x633   :  { %4950 = vrcp.f32 %v2943_v23  ;;  %v9579_v23 = vld [vmem:[#allocation124_spill] sm:$0xff] }
 0x634   :  { %4952 = vrcp.f32 %v2944_v9  ;;  %v9581_v9 = vld [vmem:[#allocation125_spill] sm:$0xff] }
 0x63e   :  { %v4949_v17 = vpop.eup %4948 }
 0x63f   :  { %v2953_v36 = vmul.f32 %v4949_v17, %v4947_v20  ;;  %v9580_v20 = vld [vmem:[#allocation39_spill] sm:$0xff] }
 0x640   :  { %v4951_v60 = vpop.eup %4950 }
 0x641   :  { %v2952_v30 = vmul.f32 %v4951_v60, %v7404_v12  ;;  %v4953_v26 = vpop.eup %4952  ;;  %v9563_v12 = vld [vmem:[#allocation21_spill] sm:$0xff] }
 0x643   :  { %v7706_v43 = vadd.f32 %v2953_v36, %v2952_v30  ;;  %v9582_v30 = vld [vmem:[#allocation126_spill] sm:$0xff] }
 0x645   :  { %4954 = vtanh.f32 %v7706_v43 }
 0x652   :  { %v4955_v25 = vpop.eup %4954 }
 0x653   :  { %v2956_v15 = vmul.f32 %v4955_v25, %v4953_v26  ;;  %v9583_v25 = vld [vmem:[#allocation127_spill] sm:$0xff] }
 0x655   :  { %v7709_v21 = vpack.c.bf16 %v2956_v15, %v2956_v15  ;;  %v9584_v15 = vld [vmem:[#allocation128_spill] sm:$0xff] }
 0x657   :  { %3209 = vmatmul.mubr.bf16.vlgmr.msra.gmra.mxu0 %v7709_v21  ;;  %3250 = vmatmul.mubr.bf16.vlgmr.msra.gmra.mxu1 %v7709_v21 }
 0x658   :  { %3288 = vmatpush1.bf16.msra.mxu0 %v7411_v33  ;;  %3329 = vmatpush1.bf16.msra.mxu1 %v7414_v24  ;;  %v9567_v33 = vld [vmem:[#allocation81_spill] sm:$0xff] }
 0x659   :  { %3289 = vmatprep.subr.bf16.mxu0 %v7417_v14  ;;  %3330 = vmatprep.subr.bf16.mxu1 %v7420_v51 }
 0x65c   :  { %3290 = vmatpush1.bf16.msra.mxu0 %v7423_v11  ;;  %3331 = vmatpush1.bf16.msra.mxu1 %v7426_v61 }
 0x65d   :  { %3291 = vmatprep.subr.bf16.mxu0 %v9563_v12  ;;  %3332 = vmatprep.subr.bf16.mxu1 %v9564_v10  ;;  %v9587_v12 = vld [vmem:[#allocation131_spill] sm:$0xff]  ;;  %v9588_v10 = vld [vmem:[#allocation132_spill] sm:$0xff] }
 0x660   :  { %v2992_v47 = vpop.f32.mrf.mxu0  ;;  %v3033_v28 = vpop.f32.mrf.mxu1  ;;  %3292 = vmatpush1.bf16.msra.mxu0 %v9565_v46  ;;  %3333 = vmatpush1.bf16.msra.mxu1 %v9566_v40  ;;  %v7755_v46 = vld [vmem:[#allocation8 + $0x1a4] ss:$16 sps:$4 sm:$0xff]   ;;  %v7758_v40 = vld [vmem:[#allocation8 + $0x1ac] ss:$16 sps:$4 sm:$0xff]  }
 0x661   :  { %v2993_v24 = vadd.f32 %v2992_v47, %v9567_v33  ;;  %3293 = vmatprep.subr.bf16.mxu0 %v9568_v27  ;;  %3334 = vmatprep.subr.bf16.mxu1 %v7445_v19  ;;  %v9569_v19 = vld [vmem:[#allocation16_spill] sm:$0xff]  ;;  %v9589_v47 = vld [vmem:[#allocation133_spill] sm:$0xff]  ;;  %9591 = vst [vmem:[#allocation138_spill] sm:$0xff] %v7755_v46  ;;  %9592 = vst [vmem:[#allocation139_spill] sm:$0xff] %v7758_v40 }
 0x662   :  { %v2994_v14 = vpop.f32.mrf.mxu0  ;;  %v3035_v51 = vpop.f32.mrf.mxu1  ;;  %v9594_v27 = vld [vmem:[#allocation136_spill] sm:$0xff] }
 0x663   :  { %v4414_v11 = vmul.f32 -1.442695, %v2993_v24  ;;  %v2995_v61 = vadd.f32 %v2994_v14, %v9346_v58  ;;  %v3036_v17 = vadd.f32 %v3035_v51, %v9580_v20  ;;  %v9593_v24 = vld [vmem:[#allocation135_spill] sm:$0xff]  ;;  %v9595_v51 = vld [vmem:[#allocation137_spill] sm:$0xff] }
 0x664   :  { %v2996_v32 = vpop.f32.mrf.mxu0  ;;  %v3037_v39 = vpop.f32.mrf.mxu1  ;;  %3294 = vmatpush1.bf16.msra.mxu0 %v7449_v7  ;;  %3335 = vmatpush1.bf16.msra.mxu1 %v7452_v29  ;;  %v9573_v7 = vld [vmem:[#allocation83_spill] sm:$0xff] }
 0x665   :  { %4956 = vpow2.f32 %v4414_v11  ;;  %v4415_v49 = vmul.f32 -1.442695, %v2995_v61  ;;  %3295 = vmatprep.subr.bf16.mxu0 %v7455_v22  ;;  %3336 = vmatprep.subr.bf16.mxu1 %v7458_v2  ;;  %v3034_v41 = vadd.f32 %v3033_v28, %v9573_v7  ;;  %v9574_v29 = vld [vmem:[#allocation119_spill] sm:$0xff]  ;;  %v9576_v22 = vld [vmem:[#allocation121_spill] sm:$0xff]  ;;  %v9577_v2 = vld [vmem:[#allocation122_spill] sm:$0xff] }
 0x666   :  { %v2997_v53 = vpop.f32.mrf.mxu0  ;;  %v3038_v57 = vpop.f32.mrf.mxu1  ;;  %v9590_v28 = vld [vmem:[#allocation134_spill] sm:$0xff] }
 0x667   :  { %4958 = vpow2.f32 %v4415_v49  ;;  %v4416_v55 = vmul.f32 -1.442695, %v3034_v41  ;;  %v7803_v41 = vld [vmem:[#allocation8 + $0x104] ss:$16 sps:$4 sm:$0xff]  }
 0x668   :  { %3296 = vmatpush1.bf16.msra.mxu0 %v9569_v19  ;;  %3337 = vmatpush1.bf16.msra.mxu1 %v9570_v13  ;;  %v7772_v19 = vld [vmem:[#allocation8 + $0x160] ss:$16 sps:$4 sm:$0xff]   ;;  %v7794_v13 = vld [vmem:[#allocation8 + $0x12c] ss:$16 sps:$4 sm:$0xff]  }
 0x669   :  { %3297 = vmatprep.subr.bf16.mxu0 %v9571_v3  ;;  %3338 = vmatprep.subr.bf16.mxu1 %v9572_v4  ;;  %4960 = vpow2.f32 %v4416_v55  ;;  %v7797_v3 = vld [vmem:[#allocation8 + $0x120] ss:$16 sps:$4 sm:$0xff]   ;;  %v7800_v4 = vld [vmem:[#allocation8 + $0x128] ss:$16 sps:$4 sm:$0xff]   ;;  %v7815_v55 = vld [vmem:[#allocation9 + $0xe4] ss:$16 sps:$4 sm:$0xff]  }
 0x66c   :  { %3298 = vmatpush1.bf16.msra.mxu0 %v9574_v29  ;;  %3339 = vmatpush1.bf16.msra.mxu1 %v9575_v42  ;;  %v7806_v29 = vld [vmem:[#allocation8 + $0x10c] ss:$16 sps:$4 sm:$0xff]   ;;  %v7809_v42 = vld [vmem:[#allocation8 + $0x100] ss:$16 sps:$4 sm:$0xff]  }
 0x66d   :  { %3299 = vmatprep.subr.bf16.mxu0 %v9576_v22  ;;  %3340 = vmatprep.subr.bf16.mxu1 %v9577_v2  ;;  %v7812_v22 = vld [vmem:[#allocation8 + $0x108] ss:$16 sps:$4 sm:$0xff]  }
 0x670   :  { %3300 = vmatpush1.bf16.msra.mxu0 %v9578_v56  ;;  %3341 = vmatpush1.bf16.msra.mxu1 %v9579_v23  ;;  %v7818_v56 = vld [vmem:[#allocation9 + $0xec] ss:$16 sps:$4 sm:$0xff]  }
 0x671   :  { %3301 = vmatprep.subr.bf16.mxu0 %v7493_v6  ;;  %3342 = vmatprep.subr.bf16.mxu1 %v7496_v16  ;;  %v9585_v6 = vld [vmem:[#allocation129_spill] sm:$0xff]  ;;  %v9586_v16 = vld [vmem:[#allocation130_spill] sm:$0xff] }
 0x672   :  { %v4957_v50 = vpop.eup %4956 }
 0x673   :  { %v3049_v36 = vadd.f32 1.0, %v4957_v50 }
 0x674   :  { %v4959_v60 = vpop.eup %4958  ;;  %3302 = vmatpush1.bf16.msra.mxu0 %v9581_v9  ;;  %3343 = vmatpush1.bf16.msra.mxu1 %v9582_v30  ;;  %v7833_v9 = vld [vmem:[#allocation9 + $0xc4] ss:$16 sps:$4 sm:$0xff]   ;;  %v7836_v30 = vld [vmem:[#allocation9 + $0xcc] ss:$16 sps:$4 sm:$0xff]  }
 0x675   :  { %4962 = vrcp.f32 %v3049_v36  ;;  %v3050_v26 = vadd.f32 1.0, %v4959_v60  ;;  %3303 = vmatprep.subr.bf16.mxu0 %v9583_v25  ;;  %3344 = vmatprep.subr.bf16.mxu1 %v9584_v15  ;;  %v7827_v36 = vld [vmem:[#allocation9 + $0xe0] ss:$16 sps:$4 sm:$0xff]   ;;  %v7830_v60 = vld [vmem:[#allocation9 + $0xe8] ss:$16 sps:$4 sm:$0xff]  }
 0x676   :  { %4964 = vtanh.f32 %v3036_v17  ;;  %v4961_v14 = vpop.eup %4960  ;;  %v7840_v15 = vld [vmem:[#allocation9 + $0xc0] ss:$16 sps:$4 sm:$0xff]  }
 0x677   :  { %4966 = vrcp.f32 %v3050_v26  ;;  %v3051_v39 = vadd.f32 1.0, %v4961_v14 }
 0x678   :  { %3304 = vmatpush2.bf16.msra.mxu0 %v9585_v6  ;;  %3345 = vmatpush2.bf16.msra.mxu1 %v9586_v16  ;;  %v7843_v6 = vld [vmem:[#allocation9 + $0xc8] ss:$16 sps:$4 sm:$0xff]  }
 0x679   :  { %3305 = vmatprep.subr.bf16.mxu0 %v9587_v12  ;;  %3346 = vmatprep.subr.bf16.mxu1 %v9588_v10  ;;  %4968 = vrcp.f32 %v3051_v39  ;;  %v7846_v10 = vld [vmem:[#allocation9 + $0xa4] ss:$16 sps:$4 sm:$0xff]  }
 0x67c   :  { %3306 = vmatpush2.bf16.msra.mxu0 %v9589_v47  ;;  %3347 = vmatpush2.bf16.msra.mxu1 %v9590_v28  ;;  %v7849_v47 = vld [vmem:[#allocation9 + $0xac] ss:$16 sps:$4 sm:$0xff]  }
 0x67d   :  { %3307 = vmatprep.subr.bf16.mxu0 %v7755_v46  ;;  %3348 = vmatprep.subr.bf16.mxu1 %v7758_v40 }
 0x680   :  { %3308 = vmatpush2.bf16.msra.mxu0 %v9593_v24  ;;  %3349 = vmatpush2.bf16.msra.mxu1 %v9594_v27 }
 0x681   :  { %3309 = vmatprep.subr.bf16.mxu0 %v9595_v51  ;;  %3350 = vmatprep.subr.bf16.mxu1 %v7540_v52  ;;  %v7775_v52 = vld [vmem:[#allocation8 + $0x168] ss:$16 sps:$4 sm:$0xff]  }
 0x682   :  { %v4963_v11 = vpop.eup %4962 }
 0x683   :  { %v4965_v61 = vpop.eup %4964 }
 0x684   :  { %v4967_v32 = vpop.eup %4966  ;;  %3310 = vmatpush2.bf16.msra.mxu0 %v7544_v0  ;;  %3351 = vmatpush2.bf16.msra.mxu1 %v7547_v38  ;;  %v3060_v53 = vmul.f32 %v4965_v61, %v4963_v11  ;;  %v7779_v0 = vld [vmem:[#allocation8 + $0x144] ss:$16 sps:$4 sm:$0xff]   ;;  %v7788_v38 = vld [vmem:[#allocation8 + $0x148] ss:$16 sps:$4 sm:$0xff]   ;;  %v7853_v11 = vld [vmem:[#allocation9 + $0xa0] ss:$16 sps:$4 sm:$0xff]  }
 0x685   :  { %v3059_v49 = vmul.f32 %v4967_v32, %v7556_v62  ;;  %3311 = vmatprep.subr.bf16.mxu0 %v7550_v18  ;;  %3352 = vmatprep.subr.bf16.mxu1 %v7553_v48  ;;  %v7782_v18 = vld [vmem:[#allocation8 + $0x14c] ss:$16 sps:$4 sm:$0xff]   ;;  %v7785_v48 = vld [vmem:[#allocation8 + $0x140] ss:$16 sps:$4 sm:$0xff]   ;;  %v7791_v62 = vld [vmem:[#allocation8 + $0x124] ss:$16 sps:$4 sm:$0xff]  }
 0x686   :  { %v4969_v2 = vpop.eup %4968  ;;  %v7856_v61 = vld [vmem:[#allocation9 + $0xa8] ss:$16 sps:$4 sm:$0xff]  }
 0x687   :  { %v7770_v57 = vadd.f32 %v3060_v53, %v3059_v49  ;;  %v7859_v49 = vld [vmem:[#allocation9 + $0x84] ss:$16 sps:$4 sm:$0xff]   ;;  %v7862_v53 = vld [vmem:[#allocation9 + $0x8c] ss:$16 sps:$4 sm:$0xff]  }
 0x688   :  { %3312 = vmatpush2.bf16.msra.mxu0 %v7772_v19  ;;  %3353 = vmatpush2.bf16.msra.mxu1 %v7775_v52 }
 0x689   :  { %4970 = vtanh.f32 %v7770_v57  ;;  %3313 = vmatprep.subr.bf16.mxu0 %v7779_v0  ;;  %3354 = vmatprep.subr.bf16.mxu1 %v7782_v18 }
 0x68c   :  { %3314 = vmatpush2.bf16.msra.mxu0 %v7785_v48  ;;  %3355 = vmatpush2.bf16.msra.mxu1 %v7788_v38 }
 0x68d   :  { %3315 = vmatprep.subr.bf16.mxu0 %v7791_v62  ;;  %3356 = vmatprep.subr.bf16.mxu1 %v7794_v13 }
 0x690   :  { %3316 = vmatpush2.bf16.msra.mxu0 %v7797_v3  ;;  %3357 = vmatpush2.bf16.msra.mxu1 %v7800_v4 }
 0x691   :  { %3317 = vmatprep.subr.bf16.mxu0 %v7803_v41  ;;  %3358 = vmatprep.subr.bf16.mxu1 %v7806_v29 }
 0x694   :  { %3318 = vmatpush2.bf16.msra.mxu0 %v7809_v42  ;;  %3359 = vmatpush2.bf16.msra.mxu1 %v7812_v22 }
 0x695   :  { %3394 = vmatprep.subr.bf16.mxu0 %v7815_v55  ;;  %3435 = vmatprep.subr.bf16.mxu1 %v7818_v56 }
 0x696   :  { %v4971_v23 = vpop.eup %4970 }
 0x697   :  { %v3063_v50 = vmul.f32 %v4971_v23, %v4969_v2  ;;  %v7865_v2 = vld [vmem:[#allocation9 + $0x80] ss:$16 sps:$4 sm:$0xff]   ;;  %v7868_v23 = vld [vmem:[#allocation9 + $0x88] ss:$16 sps:$4 sm:$0xff]  }
 0x699   :  { %v7821_v17 = vpack.c.bf16 %v3063_v50, %v3063_v50  ;;  %v7871_v50 = vld [vmem:[#allocation9 + $0x64] ss:$16 sps:$4 sm:$0xff]  }
 0x69b   :  { %3319 = vmatprep.mubr.bf16.mxu0 %v7821_v17  ;;  %3360 = vmatprep.mubr.bf16.mxu1 %v7821_v17 }
 0x69c   :  { %3320 = vmatmul.mubr.bf16.vlgmr.msra.gmra.mxu0 %v7709_v21  ;;  %3361 = vmatmul.mubr.bf16.vlgmr.msra.gmra.mxu1 %v7709_v21 }
 0x69d   :  { %3395 = vmatpush1.bf16.msra.mxu0 %v7827_v36  ;;  %3436 = vmatpush1.bf16.msra.mxu1 %v7830_v60 }
 0x69e   :  { %3396 = vmatprep.subr.bf16.mxu0 %v7833_v9  ;;  %3437 = vmatprep.subr.bf16.mxu1 %v7836_v30 }
 0x6a0   :  { %v3099_v26 = vpop.f32.mrf.mxu0  ;;  %v3140_v25 = vpop.f32.mrf.mxu1 }
 0x6a1   :  { %v3100_v21 = vadd.f32 %v3099_v26, %v6857_v34  ;;  %3397 = vmatpush1.bf16.msra.mxu0 %v7840_v15  ;;  %3438 = vmatpush1.bf16.msra.mxu1 %v7843_v6  ;;  %v7874_v26 = vld [vmem:[#allocation9 + $0x6c] ss:$16 sps:$4 sm:$0xff]  }
 0x6a2   :  { %v3101_v16 = vpop.f32.mrf.mxu0  ;;  %v3142_v12 = vpop.f32.mrf.mxu1  ;;  %3398 = vmatprep.subr.bf16.mxu0 %v7846_v10  ;;  %3439 = vmatprep.subr.bf16.mxu1 %v7849_v47 }
 0x6a3   :  { %v4417_v28 = vmul.f32 -1.442695, %v3100_v21  ;;  %v3102_v24 = vadd.f32 %v3101_v16, %v6862_v35  ;;  %v3141_v21 = vadd.f32 %v3140_v25, %v6875_v59  ;;  %v7878_v16 = vld [vmem:[#allocation9 + $0x60] ss:$16 sps:$4 sm:$0xff]   ;;  %v7893_v25 = vld [vmem:[#allocation9 + $0x48] ss:$16 sps:$4 sm:$0xff]  }
 0x6a4   :  { %v3103_v27 = vpop.f32.mrf.mxu0  ;;  %v3144_v14 = vpop.f32.mrf.mxu1  ;;  %9596 = vst [vmem:[#allocation140_spill] sm:$0xff] %v7878_v16  ;;  %9601 = vst [vmem:[#allocation26_spill] sm:$0xff] %v7893_v25 }
 0x6a5   :  { %4972 = vpow2.f32 %v4417_v28  ;;  %v4418_v51 = vmul.f32 -1.442695, %v3102_v24  ;;  %3399 = vmatpush1.bf16.msra.mxu0 %v7853_v11  ;;  %3440 = vmatpush1.bf16.msra.mxu1 %v7856_v61  ;;  %v7881_v28 = vld [vmem:[#allocation9 + $0x68] ss:$16 sps:$4 sm:$0xff]   ;;  %v7884_v24 = vld [vmem:[#allocation9 + $0x44] ss:$16 sps:$4 sm:$0xff]  }
 0x6a6   :  { %v3104_v32 = vpop.f32.mrf.mxu0  ;;  %v3145_v39 = vpop.f32.mrf.mxu1  ;;  %3400 = vmatprep.subr.bf16.mxu0 %v7859_v49  ;;  %3441 = vmatprep.subr.bf16.mxu1 %v7862_v53  ;;  %9597 = vst [vmem:[#allocation141_spill] sm:$0xff] %v7881_v28  ;;  %9598 = vst [vmem:[#allocation23_spill] sm:$0xff] %v7884_v24  ;;  %v7887_v27 = vld [vmem:[#allocation9 + $0x4c] ss:$16 sps:$4 sm:$0xff]   ;;  %v4419_v14 = vmul.f32 -1.442695, %v3141_v21 }
 0x6a7   :  { %4974 = vpow2.f32 %v4418_v51  ;;  %9599 = vst [vmem:[#allocation25_spill] sm:$0xff] %v7887_v27  ;;  %v7890_v51 = vld [vmem:[#allocation9 + $0x40] ss:$16 sps:$4 sm:$0xff]   ;;  %v3143_v39 = vadd.f32 %v3142_v12, %v9488_v63  ;;  %v7909_v12 = vld [vmem:[#allocation9 + $0x4] ss:$16 sps:$4 sm:$0xff]  }
 0x6a8   :  { %9600 = vst [vmem:[#allocation24_spill] sm:$0xff] %v7890_v51  ;;  %4976 = vpow2.f32 %v4419_v14  ;;  %9606 = vst [vmem:[#allocation44_spill] sm:$0xff] %v7909_v12  ;;  %v7915_v14 = vld [vmem:[#allocation9] ss:$16 sps:$4 sm:$0xff]   ;;  %v7958_v63 = vld [vmem:[#allocation9 + $0x184] ss:$16 sps:$4 sm:$0xff]  }
 0x6a9   :  { %3401 = vmatpush1.bf16.msra.mxu0 %v7865_v2  ;;  %3442 = vmatpush1.bf16.msra.mxu1 %v7868_v23  ;;  %9608 = vst [vmem:[#allocation46_spill] sm:$0xff] %v7915_v14  ;;  %9622 = vst [vmem:[#allocation60_spill] sm:$0xff] %v7958_v63 }
 0x6aa   :  { %3402 = vmatprep.subr.bf16.mxu0 %v7871_v50  ;;  %3443 = vmatprep.subr.bf16.mxu1 %v7874_v26 }
 0x6ad   :  { %3403 = vmatpush1.bf16.msra.mxu0 %v7878_v16  ;;  %3444 = vmatpush1.bf16.msra.mxu1 %v7881_v28  ;;  %v7897_v28 = vld [vmem:[#allocation9 + $0x24] ss:$16 sps:$4 sm:$0xff]   ;;  %v7903_v16 = vld [vmem:[#allocation9 + $0x20] ss:$16 sps:$4 sm:$0xff]  }
 0x6ae   :  { %3404 = vmatprep.subr.bf16.mxu0 %v7884_v24  ;;  %3445 = vmatprep.subr.bf16.mxu1 %v7887_v27  ;;  %9602 = vst [vmem:[#allocation41_spill] sm:$0xff] %v7897_v28  ;;  %v7900_v24 = vld [vmem:[#allocation9 + $0x2c] ss:$16 sps:$4 sm:$0xff]   ;;  %9604 = vst [vmem:[#allocation42_spill] sm:$0xff] %v7903_v16 }
 0x6af   :  { %9603 = vst [vmem:[#allocation14_spill] sm:$0xff] %v7900_v24 }
 0x6b1   :  { %3405 = vmatpush1.bf16.msra.mxu0 %v7890_v51  ;;  %3446 = vmatpush1.bf16.msra.mxu1 %v7893_v25  ;;  %v7906_v25 = vld [vmem:[#allocation9 + $0x28] ss:$16 sps:$4 sm:$0xff]  }
 0x6b2   :  { %v4973_v32 = vpop.eup %4972  ;;  %3406 = vmatprep.subr.bf16.mxu0 %v7897_v28  ;;  %3447 = vmatprep.subr.bf16.mxu1 %v7900_v24  ;;  %9605 = vst [vmem:[#allocation43_spill] sm:$0xff] %v7906_v25  ;;  %v7912_v28 = vld [vmem:[#allocation9 + $0xc] ss:$16 sps:$4 sm:$0xff]  }
 0x6b3   :  { %v3156_v21 = vadd.f32 1.0, %v4973_v32  ;;  %9607 = vst [vmem:[#allocation45_spill] sm:$0xff] %v7912_v28  ;;  %v7921_v32 = vld [vmem:[#allocation9 + $0x1e4] ss:$16 sps:$4 sm:$0xff]  }
 0x6b4   :  { %v4975_v27 = vpop.eup %4974  ;;  %9610 = vst [vmem:[#allocation48_spill] sm:$0xff] %v7921_v32 }
 0x6b5   :  { %4978 = vrcp.f32 %v3156_v21  ;;  %v3157_v51 = vadd.f32 1.0, %v4975_v27  ;;  %3407 = vmatpush1.bf16.msra.mxu0 %v7903_v16  ;;  %3448 = vmatpush1.bf16.msra.mxu1 %v7906_v25  ;;  %v7918_v27 = vld [vmem:[#allocation9 + $0x8] ss:$16 sps:$4 sm:$0xff]   ;;  %v7927_v21 = vld [vmem:[#allocation9 + $0x1e0] ss:$16 sps:$4 sm:$0xff]  }
 0x6b6   :  { %4980 = vtanh.f32 %v3143_v39  ;;  %3408 = vmatprep.subr.bf16.mxu0 %v7909_v12  ;;  %3449 = vmatprep.subr.bf16.mxu1 %v7912_v28  ;;  %9609 = vst [vmem:[#allocation47_spill] sm:$0xff] %v7918_v27  ;;  %v7924_v39 = vld [vmem:[#allocation9 + $0x1ec] ss:$16 sps:$4 sm:$0xff]   ;;  %9612 = vst [vmem:[#allocation50_spill] sm:$0xff] %v7927_v21  ;;  %v7939_v28 = vld [vmem:[#allocation9 + $0x1c0] ss:$16 sps:$4 sm:$0xff]  }
 0x6b7   :  { %4982 = vrcp.f32 %v3157_v51  ;;  %9611 = vst [vmem:[#allocation49_spill] sm:$0xff] %v7924_v39  ;;  %v7930_v51 = vld [vmem:[#allocation9 + $0x1e8] ss:$16 sps:$4 sm:$0xff]   ;;  %9616 = vst [vmem:[#allocation54_spill] sm:$0xff] %v7939_v28  ;;  %v7945_v12 = vld [vmem:[#allocation9 + $0x1a4] ss:$16 sps:$4 sm:$0xff]  }
 0x6b8   :  { %9613 = vst [vmem:[#allocation51_spill] sm:$0xff] %v7930_v51  ;;  %9618 = vst [vmem:[#allocation56_spill] sm:$0xff] %v7945_v12 }
 0x6b9   :  { %3409 = vmatpush1.bf16.msra.mxu0 %v7915_v14  ;;  %3450 = vmatpush1.bf16.msra.mxu1 %v7918_v27  ;;  %v7933_v14 = vld [vmem:[#allocation9 + $0x1c4] ss:$16 sps:$4 sm:$0xff]   ;;  %v7936_v27 = vld [vmem:[#allocation9 + $0x1cc] ss:$16 sps:$4 sm:$0xff]  }
 0x6ba   :  { %3410 = vmatprep.subr.bf16.mxu0 %v7921_v32  ;;  %3451 = vmatprep.subr.bf16.mxu1 %v7924_v39  ;;  %9614 = vst [vmem:[#allocation52_spill] sm:$0xff] %v7933_v14  ;;  %9615 = vst [vmem:[#allocation53_spill] sm:$0xff] %v7936_v27  ;;  %v4977_v32 = vpop.eup %4976  ;;  %v7942_v39 = vld [vmem:[#allocation9 + $0x1c8] ss:$16 sps:$4 sm:$0xff]  }
 0x6bb   :  { %9617 = vst [vmem:[#allocation55_spill] sm:$0xff] %v7942_v39  ;;  %v3158_v25 = vadd.f32 1.0, %v4977_v32 }
 0x6bd   :  { %3411 = vmatpush2.bf16.msra.mxu0 %v7927_v21  ;;  %3452 = vmatpush2.bf16.msra.mxu1 %v7930_v51  ;;  %v7948_v51 = vld [vmem:[#allocation9 + $0x1ac] ss:$16 sps:$4 sm:$0xff]   ;;  %4984 = vrcp.f32 %v3158_v25  ;;  %v7985_v25 = vld [vmem:[#allocation9 + $0x144] ss:$16 sps:$4 sm:$0xff]  }
 0x6be   :  { %3412 = vmatprep.subr.bf16.mxu0 %v7933_v14  ;;  %3453 = vmatprep.subr.bf16.mxu1 %v7936_v27  ;;  %9619 = vst [vmem:[#allocation57_spill] sm:$0xff] %v7948_v51  ;;  %9631 = vst [vmem:[#allocation69_spill] sm:$0xff] %v7985_v25 }
 0x6c1   :  { %3413 = vmatpush2.bf16.msra.mxu0 %v7939_v28  ;;  %3454 = vmatpush2.bf16.msra.mxu1 %v7942_v39  ;;  %v7952_v28 = vld [vmem:[#allocation9 + $0x1a0] ss:$16 sps:$4 sm:$0xff]   ;;  %v7955_v39 = vld [vmem:[#allocation9 + $0x1a8] ss:$16 sps:$4 sm:$0xff]  }
 0x6c2   :  { %v4979_v21 = vpop.eup %4978  ;;  %3414 = vmatprep.subr.bf16.mxu0 %v7945_v12  ;;  %3455 = vmatprep.subr.bf16.mxu1 %v7948_v51  ;;  %9620 = vst [vmem:[#allocation58_spill] sm:$0xff] %v7952_v28  ;;  %9621 = vst [vmem:[#allocation59_spill] sm:$0xff] %v7955_v39  ;;  %v7961_v12 = vld [vmem:[#allocation9 + $0x18c] ss:$16 sps:$4 sm:$0xff]  }
 0x6c3   :  { %v4981_v14 = vpop.eup %4980  ;;  %9623 = vst [vmem:[#allocation61_spill] sm:$0xff] %v7961_v12 }
 0x6c4   :  { %v4983_v27 = vpop.eup %4982  ;;  %v3167_v24 = vmul.f32 %v4981_v14, %v4979_v21  ;;  %v7969_v14 = vld [vmem:[#allocation9 + $0x188] ss:$16 sps:$4 sm:$0xff]   ;;  %v7976_v21 = vld [vmem:[#allocation9 + $0x16c] ss:$16 sps:$4 sm:$0xff]  }
 0x6c5   :  { %v3166_v16 = vmul.f32 %v4983_v27, %v7630_v54  ;;  %3415 = vmatpush2.bf16.msra.mxu0 %v7952_v28  ;;  %3456 = vmatpush2.bf16.msra.mxu1 %v7955_v39  ;;  %v7966_v54 = vld [vmem:[#allocation9 + $0x180] ss:$16 sps:$4 sm:$0xff]   ;;  %9626 = vst [vmem:[#allocation68_spill] sm:$0xff] %v7969_v14  ;;  %v7973_v27 = vld [vmem:[#allocation9 + $0x164] ss:$16 sps:$4 sm:$0xff]   ;;  %9628 = vst [vmem:[#allocation65_spill] sm:$0xff] %v7976_v21 }
 0x6c6   :  { %3416 = vmatprep.subr.bf16.mxu0 %v7958_v63  ;;  %3457 = vmatprep.subr.bf16.mxu1 %v7961_v12  ;;  %9625 = vst [vmem:[#allocation63_spill] sm:$0xff] %v7966_v54  ;;  %9627 = vst [vmem:[#allocation64_spill] sm:$0xff] %v7973_v27  ;;  %v8009_v12 = vld [vmem:[#allocation9 + $0x104] ss:$16 sps:$4 sm:$0xff]   ;;  %v8018_v63 = vld [vmem:[#allocation9 + $0x108] ss:$16 sps:$4 sm:$0xff]  }
 0x6c7   :  { %v7964_v32 = vadd.f32 %v3167_v24, %v3166_v16  ;;  %v7979_v16 = vld [vmem:[#allocation9 + $0x160] ss:$16 sps:$4 sm:$0xff]   ;;  %v7982_v24 = vld [vmem:[#allocation9 + $0x168] ss:$16 sps:$4 sm:$0xff]   ;;  %9639 = vst [vmem:[#allocation77_spill] sm:$0xff] %v8009_v12  ;;  %9642 = vst [vmem:[#allocation84_spill] sm:$0xff] %v8018_v63 }
 0x6c8   :  { %9629 = vst [vmem:[#allocation66_spill] sm:$0xff] %v7979_v16  ;;  %9630 = vst [vmem:[#allocation67_spill] sm:$0xff] %v7982_v24 }
 0x6c9   :  { %9624 = vst [vmem:[#allocation62_spill] sm:$0xff] %v7964_v32  ;;  %3417 = vmatpush2.bf16.msra.mxu0 %v7966_v54  ;;  %3458 = vmatpush2.bf16.msra.mxu1 %v7969_v14  ;;  %4986 = vtanh.f32 %v7964_v32  ;;  %v7988_v14 = vld [vmem:[#allocation9 + $0x14c] ss:$16 sps:$4 sm:$0xff]   ;;  %v8003_v54 = vld [vmem:[#allocation9 + $0x120] ss:$16 sps:$4 sm:$0xff]  }
 0x6ca   :  { %3418 = vmatprep.subr.bf16.mxu0 %v7973_v27  ;;  %3459 = vmatprep.subr.bf16.mxu1 %v7976_v21  ;;  %9632 = vst [vmem:[#allocation70_spill] sm:$0xff] %v7988_v14  ;;  %v7991_v27 = vld [vmem:[#allocation9 + $0x140] ss:$16 sps:$4 sm:$0xff]   ;;  %v7994_v21 = vld [vmem:[#allocation9 + $0x148] ss:$16 sps:$4 sm:$0xff]   ;;  %9637 = vst [vmem:[#allocation75_spill] sm:$0xff] %v8003_v54 }
 0x6cb   :  { %9633 = vst [vmem:[#allocation71_spill] sm:$0xff] %v7991_v27  ;;  %9634 = vst [vmem:[#allocation72_spill] sm:$0xff] %v7994_v21 }
 0x6cd   :  { %3419 = vmatpush2.bf16.msra.mxu0 %v7979_v16  ;;  %3460 = vmatpush2.bf16.msra.mxu1 %v7982_v24  ;;  %v7997_v16 = vld [vmem:[#allocation9 + $0x124] ss:$16 sps:$4 sm:$0xff]   ;;  %v8000_v24 = vld [vmem:[#allocation9 + $0x12c] ss:$16 sps:$4 sm:$0xff]  }
 0x6ce   :  { %3420 = vmatprep.subr.bf16.mxu0 %v7985_v25  ;;  %3461 = vmatprep.subr.bf16.mxu1 %v7988_v14  ;;  %9635 = vst [vmem:[#allocation73_spill] sm:$0xff] %v7997_v16  ;;  %9636 = vst [vmem:[#allocation74_spill] sm:$0xff] %v8000_v24  ;;  %v4985_v25 = vpop.eup %4984  ;;  %v8006_v14 = vld [vmem:[#allocation9 + $0x128] ss:$16 sps:$4 sm:$0xff]  }
 0x6cf   :  { %9638 = vst [vmem:[#allocation76_spill] sm:$0xff] %v8006_v14 }
 0x6d1   :  { %3421 = vmatpush2.bf16.msra.mxu0 %v7991_v27  ;;  %3462 = vmatpush2.bf16.msra.mxu1 %v7994_v21  ;;  %v8012_v21 = vld [vmem:[#allocation9 + $0x10c] ss:$16 sps:$4 sm:$0xff]  }
 0x6d2   :  { %3422 = vmatprep.subr.bf16.mxu0 %v7997_v16  ;;  %3463 = vmatprep.subr.bf16.mxu1 %v8000_v24  ;;  %9640 = vst [vmem:[#allocation78_spill] sm:$0xff] %v8012_v21  ;;  %v8015_v24 = vld [vmem:[#allocation9 + $0x100] ss:$16 sps:$4 sm:$0xff]  }
 0x6d3   :  { %9641 = vst [vmem:[#allocation79_spill] sm:$0xff] %v8015_v24 }
 0x6d5   :  { %3423 = vmatpush2.bf16.msra.mxu0 %v8003_v54  ;;  %3464 = vmatpush2.bf16.msra.mxu1 %v8006_v14 }
 0x6d6   :  { %v4987_v27 = vpop.eup %4986  ;;  %3424 = vmatprep.subr.bf16.mxu0 %v8009_v12  ;;  %3465 = vmatprep.subr.bf16.mxu1 %v8012_v21 }
 0x6d7   :  { %v3170_v16 = vmul.f32 %v4987_v27, %v4985_v25  ;;  %v5461_v27 = vld [vmem:[#allocation6 + $0xac] ss:$16 sps:$4 sm:$0xff]  }
 0x6d8   :  { %v5469_v25 = vld [vmem:[#allocation6 + $0x6c] ss:$16 sps:$4 sm:$0xff]  }
 0x6d9   :  { %3425 = vmatpush2.bf16.msra.mxu0 %v8015_v24  ;;  %3466 = vmatpush2.bf16.msra.mxu1 %v8018_v63  ;;  %v3393_v54 = vpack.c.bf16 %v3170_v16, %v3170_v16  ;;  %v5467_v16 = vld [vmem:[#allocation6 + $0x88] ss:$16 sps:$4 sm:$0xff]  }
 0x6da   :  { %3505 = vmatprep.subr.bf16.mxu0 %v7651_v37  ;;  %3546 = vmatprep.subr.bf16.mxu1 %v7654_v44  ;;  %v5458_v37 = vld [vmem:[#allocation6 + $0xc0] ss:$16 sps:$4 sm:$0xff]   ;;  %v5459_v44 = vld [vmem:[#allocation6 + $0xc8] ss:$16 sps:$4 sm:$0xff]  }
 0x6db   :  { %3426 = vmatprep.mubr.bf16.mxu0 %v3393_v54  ;;  %3467 = vmatprep.mubr.bf16.mxu1 %v3393_v54  ;;  %v5460_v54 = vld [vmem:[#allocation6 + $0xa4] ss:$16 sps:$4 sm:$0xff]  }
 0x6dc   :  { %3427 = vmatmul.mubr.bf16.vlgmr.msra.gmra.mxu0 %v7821_v17  ;;  %3468 = vmatmul.mubr.bf16.vlgmr.msra.gmra.mxu1 %v7821_v17  ;;  %v5462_v17 = vld [vmem:[#allocation6 + $0xa0] ss:$16 sps:$4 sm:$0xff]  }
 0x6dd   :  { %3506 = vmatpush1.bf16.msra.mxu0 %v7659_v45  ;;  %3547 = vmatpush1.bf16.msra.mxu1 %v7662_v5  ;;  %v5463_v45 = vld [vmem:[#allocation6 + $0xa8] ss:$16 sps:$4 sm:$0xff]   ;;  %v5464_v5 = vld [vmem:[#allocation6 + $0x84] ss:$16 sps:$4 sm:$0xff]  }
 0x6de   :  { %3507 = vmatprep.subr.bf16.mxu0 %v7665_v8  ;;  %3548 = vmatprep.subr.bf16.mxu1 %v7668_v31  ;;  %v5465_v8 = vld [vmem:[#allocation6 + $0x8c] ss:$16 sps:$4 sm:$0xff]   ;;  %v5466_v31 = vld [vmem:[#allocation6 + $0x80] ss:$16 sps:$4 sm:$0xff]  }
 0x6df   :  { %3537 = vmatprep.mubr.bf16.mxu0 %v9530_v1  ;;  %3578 = vmatprep.mubr.bf16.mxu1 %v9530_v1  ;;  %v5468_v1 = vld [vmem:[#allocation6 + $0x64] ss:$16 sps:$4 sm:$0xff]  }
 0x6e1   :  { %3508 = vmatpush1.bf16.msra.mxu0 %v5458_v37  ;;  %3549 = vmatpush1.bf16.msra.mxu1 %v5459_v44  ;;  %v5470_v37 = vld [vmem:[#allocation6 + $0x60] ss:$16 sps:$4 sm:$0xff]   ;;  %v5471_v44 = vld [vmem:[#allocation6 + $0x68] ss:$16 sps:$4 sm:$0xff]  }
 0x6e2   :  { %3509 = vmatprep.subr.bf16.mxu0 %v5460_v54  ;;  %3550 = vmatprep.subr.bf16.mxu1 %v5461_v27  ;;  %v5472_v54 = vld [vmem:[#allocation6 + $0x44] ss:$16 sps:$4 sm:$0xff]   ;;  %v5473_v27 = vld [vmem:[#allocation6 + $0x4c] ss:$16 sps:$4 sm:$0xff]  }
 0x6e5   :  { %3510 = vmatpush1.bf16.msra.mxu0 %v5462_v17  ;;  %3551 = vmatpush1.bf16.msra.mxu1 %v5463_v45  ;;  %v5474_v17 = vld [vmem:[#allocation6 + $0x40] ss:$16 sps:$4 sm:$0xff]   ;;  %v5475_v45 = vld [vmem:[#allocation6 + $0x48] ss:$16 sps:$4 sm:$0xff]  }
 0x6e6   :  { %3511 = vmatprep.subr.bf16.mxu0 %v5464_v5  ;;  %3552 = vmatprep.subr.bf16.mxu1 %v5465_v8  ;;  %v5476_v5 = vld [vmem:[#allocation6 + $0x24] ss:$16 sps:$4 sm:$0xff]   ;;  %v5477_v8 = vld [vmem:[#allocation6 + $0x2c] ss:$16 sps:$4 sm:$0xff]  }
 0x6e9   :  { %3512 = vmatpush1.bf16.msra.mxu0 %v5466_v31  ;;  %3553 = vmatpush1.bf16.msra.mxu1 %v5467_v16  ;;  %v5478_v31 = vld [vmem:[#allocation6 + $0x20] ss:$16 sps:$4 sm:$0xff]   ;;  %v5479_v16 = vld [vmem:[#allocation6 + $0x28] ss:$16 sps:$4 sm:$0xff]  }
 0x6ea   :  { %3513 = vmatprep.subr.bf16.mxu0 %v5468_v1  ;;  %3554 = vmatprep.subr.bf16.mxu1 %v5469_v25  ;;  %v5480_v1 = vld [vmem:[#allocation6 + $0x4] ss:$16 sps:$4 sm:$0xff]   ;;  %v5481_v25 = vld [vmem:[#allocation6 + $0xc] ss:$16 sps:$4 sm:$0xff]  }
 0x6ed   :  { %3514 = vmatpush1.bf16.msra.mxu0 %v5470_v37  ;;  %3555 = vmatpush1.bf16.msra.mxu1 %v5471_v44  ;;  %v5482_v37 = vld [vmem:[#allocation6] ss:$16 sps:$4 sm:$0xff]   ;;  %v5483_v44 = vld [vmem:[#allocation6 + $0x8] ss:$16 sps:$4 sm:$0xff]  }
 0x6ee   :  { %3515 = vmatprep.subr.bf16.mxu0 %v5472_v54  ;;  %3556 = vmatprep.subr.bf16.mxu1 %v5473_v27  ;;  %v8031_v54 = vld [vmem:[#allocation8 + $0xe4] ss:$16 sps:$4 sm:$0xff]   ;;  %v8034_v27 = vld [vmem:[#allocation8 + $0xec] ss:$16 sps:$4 sm:$0xff]  }
 0x6ef   :  { %9643 = vst [vmem:[#allocation85_spill] sm:$0xff] %v8031_v54  ;;  %9644 = vst [vmem:[#allocation86_spill] sm:$0xff] %v8034_v27 }
 0x6f1   :  { %3516 = vmatpush1.bf16.msra.mxu0 %v5474_v17  ;;  %3557 = vmatpush1.bf16.msra.mxu1 %v5475_v45 }
 0x6f2   :  { %3517 = vmatprep.subr.bf16.mxu0 %v5476_v5  ;;  %3558 = vmatprep.subr.bf16.mxu1 %v5477_v8  ;;  %v9645_v5 = vld [vmem:[#allocation31_spill] sm:$0xff] }
 0x6f5   :  { %3518 = vmatpush1.bf16.msra.mxu0 %v5478_v31  ;;  %3559 = vmatpush1.bf16.msra.mxu1 %v5479_v16 }
 0x6f6   :  { %3519 = vmatprep.subr.bf16.mxu0 %v5480_v1  ;;  %3560 = vmatprep.subr.bf16.mxu1 %v5481_v25  ;;  %v9646_v25 = vld [vmem:[#allocation33_spill] sm:$0xff] }
 0x6f9   :  { %3520 = vmatpush1.bf16.msra.mxu0 %v5482_v37  ;;  %3561 = vmatpush1.bf16.msra.mxu1 %v5483_v44 }
 0x6fa   :  { %3616 = vmatprep.subr.bf16.mxu0 %v8031_v54  ;;  %3657 = vmatprep.subr.bf16.mxu1 %v8034_v27  ;;  %v9647_v54 = vld [vmem:[#allocation32_spill] sm:$0xff]  ;;  %v9648_v27 = vld [vmem:[#allocation34_spill] sm:$0xff] }
 0x717   :  { %v3210_v17 = vpop.f32.mrf.mxu0  ;;  %v3251_v45 = vpop.f32.mrf.mxu1 }
 0x718   :  { %v3258_v8 = vadd.f32 %v3210_v17, %v9645_v5  ;;  %v3260_v14 = vadd.f32 %v3251_v45, %v9647_v54  ;;  %v8058_v45 = vld [vmem:[#allocation8 + $0xcc] ss:$16 sps:$4 sm:$0xff]  }
 0x719   :  { %v3212_v31 = vpop.f32.mrf.mxu0  ;;  %v3253_v16 = vpop.f32.mrf.mxu1 }
 0x71a   :  { %v4420_v1 = vmul.f32 -1.442695, %v3258_v8  ;;  %v3259_v63 = vadd.f32 %v3212_v31, %v9646_v25  ;;  %v4422_v39 = vmul.f32 -1.442695, %v3260_v14  ;;  %v3261_v28 = vadd.f32 %v3253_v16, %v9648_v27  ;;  %v8052_v27 = vld [vmem:[#allocation8 + $0xe8] ss:$16 sps:$4 sm:$0xff]  }
 0x71b   :  { %v3214_v37 = vpop.f32.mrf.mxu0  ;;  %v3255_v24 = vpop.f32.mrf.mxu1  ;;  %v8061_v16 = vld [vmem:[#allocation8 + $0xc0] ss:$16 sps:$4 sm:$0xff]   ;;  %v8064_v25 = vld [vmem:[#allocation8 + $0xc8] ss:$16 sps:$4 sm:$0xff]  }
 0x71c   :  { %4988 = vpow2.f32 %v4420_v1  ;;  %v4421_v44 = vmul.f32 -1.442695, %v3259_v63  ;;  %v8067_v37 = vld [vmem:[#allocation8 + $0xa4] ss:$16 sps:$4 sm:$0xff]  }
 0x71d   :  { %v3215_v21 = vpop.f32.mrf.mxu0  ;;  %v3256_v12 = vpop.f32.mrf.mxu1 }
 0x71e   :  { %4990 = vpow2.f32 %v4421_v44  ;;  %v8070_v44 = vld [vmem:[#allocation8 + $0xac] ss:$16 sps:$4 sm:$0xff]  }
 0x71f   :  { %4992 = vpow2.f32 %v4422_v39 }
 0x720   :  { %4994 = vtanh.f32 %v3261_v28 }
 0x729   :  { %v4989_v32 = vpop.eup %4988 }
 0x72a   :  { %v3271_v51 = vadd.f32 1.0, %v4989_v32 }
 0x72b   :  { %v4991_v17 = vpop.eup %4990 }
 0x72c   :  { %4996 = vrcp.f32 %v3271_v51  ;;  %v3272_v5 = vadd.f32 1.0, %v4991_v17  ;;  %v4993_v8 = vpop.eup %4992  ;;  %v8049_v51 = vld [vmem:[#allocation8 + $0xe0] ss:$16 sps:$4 sm:$0xff]  }
 0x72d   :  { %v4995_v24 = vpop.eup %4994  ;;  %v3273_v12 = vadd.f32 1.0, %v4993_v8  ;;  %v8073_v17 = vld [vmem:[#allocation8 + $0xa0] ss:$16 sps:$4 sm:$0xff]  }
 0x72e   :  { %4998 = vrcp.f32 %v3272_v5  ;;  %9650 = vst [vmem:[#allocation88_spill] sm:$0xff] %v8073_v17  ;;  %v8076_v5 = vld [vmem:[#allocation8 + $0xa8] ss:$16 sps:$4 sm:$0xff]  }
 0x72f   :  { %5000 = vrcp.f32 %v3273_v12  ;;  %9651 = vst [vmem:[#allocation89_spill] sm:$0xff] %v8076_v5 }
 0x739   :  { %v4997_v31 = vpop.eup %4996 }
 0x73a   :  { %v3282_v63 = vmul.f32 %v4997_v31, %v4995_v24  ;;  %v8079_v31 = vld [vmem:[#allocation8 + $0x84] ss:$16 sps:$4 sm:$0xff]  }
 0x73b   :  { %v4999_v21 = vpop.eup %4998  ;;  %9652 = vst [vmem:[#allocation80_spill] sm:$0xff] %v8079_v31 }
 0x73c   :  { %v3281_v1 = vmul.f32 %v4999_v21, %v7706_v43  ;;  %v5001_v32 = vpop.eup %5000  ;;  %v8055_v43 = vld [vmem:[#allocation8 + $0xc4] ss:$16 sps:$4 sm:$0xff]  }
 0x73e   :  { %v8042_v54 = vadd.f32 %v3282_v63, %v3281_v1  ;;  %v8082_v63 = vld [vmem:[#allocation8 + $0x8c] ss:$16 sps:$4 sm:$0xff]  }
 0x740   :  { %9649 = vst [vmem:[#allocation87_spill] sm:$0xff] %v8042_v54  ;;  %5002 = vtanh.f32 %v8042_v54  ;;  %v8090_v54 = vld [vmem:[#allocation8 + $0x88] ss:$16 sps:$4 sm:$0xff]  }
 0x741   :  { %9653 = vst [vmem:[#allocation90_spill] sm:$0xff] %v8090_v54 }
 0x74d   :  { %v5003_v39 = vpop.eup %5002 }
 0x74e   :  { %v3285_v14 = vmul.f32 %v5003_v39, %v5001_v32 }
 0x750   :  { %v8045_v28 = vpack.c.bf16 %v3285_v14, %v3285_v14  ;;  %v8087_v14 = vld [vmem:[#allocation8 + $0x80] ss:$16 sps:$4 sm:$0xff]  }
 0x752   :  { %3538 = vmatmul.mubr.bf16.vlgmr.msra.gmra.mxu0 %v8045_v28  ;;  %3579 = vmatmul.mubr.bf16.vlgmr.msra.gmra.mxu1 %v8045_v28 }
 0x753   :  { %3617 = vmatpush1.bf16.msra.mxu0 %v8049_v51  ;;  %3658 = vmatpush1.bf16.msra.mxu1 %v8052_v27 }
 0x754   :  { %3618 = vmatprep.subr.bf16.mxu0 %v8055_v43  ;;  %3659 = vmatprep.subr.bf16.mxu1 %v8058_v45 }
 0x757   :  { %3619 = vmatpush1.bf16.msra.mxu0 %v8061_v16  ;;  %3660 = vmatpush1.bf16.msra.mxu1 %v8064_v25 }
 0x758   :  { %3620 = vmatprep.subr.bf16.mxu0 %v8067_v37  ;;  %3661 = vmatprep.subr.bf16.mxu1 %v8070_v44 }
 0x75b   :  { %3621 = vmatpush1.bf16.msra.mxu0 %v8073_v17  ;;  %3662 = vmatpush1.bf16.msra.mxu1 %v8076_v5  ;;  %v8093_v17 = vld [vmem:[#allocation8 + $0x64] ss:$16 sps:$4 sm:$0xff]  }
 0x75c   :  { %v3321_v8 = vpop.f32.mrf.mxu0  ;;  %v3362_v24 = vpop.f32.mrf.mxu1  ;;  %3622 = vmatprep.subr.bf16.mxu0 %v8079_v31  ;;  %3663 = vmatprep.subr.bf16.mxu1 %v8082_v63 }
 0x75d   :  { %v3322_v21 = vadd.f32 %v3321_v8, %v9567_v33  ;;  %v8096_v8 = vld [vmem:[#allocation8 + $0x6c] ss:$16 sps:$4 sm:$0xff]   ;;  %v8099_v33 = vld [vmem:[#allocation8 + $0x60] ss:$16 sps:$4 sm:$0xff]  }
 0x75e   :  { %v3323_v12 = vpop.f32.mrf.mxu0  ;;  %v3364_v1 = vpop.f32.mrf.mxu1 }
 0x75f   :  { %v4423_v32 = vmul.f32 -1.442695, %v3322_v21  ;;  %v3324_v39 = vadd.f32 %v3323_v12, %v9346_v58  ;;  %3623 = vmatpush1.bf16.msra.mxu0 %v8087_v14  ;;  %3664 = vmatpush1.bf16.msra.mxu1 %v8090_v54  ;;  %v8102_v54 = vld [vmem:[#allocation8 + $0x68] ss:$16 sps:$4 sm:$0xff]  }
 0x760   :  { %v3325_v31 = vpop.f32.mrf.mxu0  ;;  %v3366_v5 = vpop.f32.mrf.mxu1  ;;  %3624 = vmatprep.subr.bf16.mxu0 %v8093_v17  ;;  %3665 = vmatprep.subr.bf16.mxu1 %v8096_v8  ;;  %9654 = vst [vmem:[#allocation91_spill] sm:$0xff] %v8102_v54 }
 0x761   :  { %5004 = vpow2.f32 %v4423_v32  ;;  %v4424_v21 = vmul.f32 -1.442695, %v3324_v39  ;;  %v8105_v5 = vld [vmem:[#allocation8 + $0x44] ss:$16 sps:$4 sm:$0xff]   ;;  %v8108_v31 = vld [vmem:[#allocation8 + $0x4c] ss:$16 sps:$4 sm:$0xff]   ;;  %v3363_v39 = vadd.f32 %v3362_v24, %v9573_v7 }
 0x762   :  { %v3326_v12 = vpop.f32.mrf.mxu0  ;;  %v3367_v58 = vpop.f32.mrf.mxu1  ;;  %9655 = vst [vmem:[#allocation92_spill] sm:$0xff] %v8105_v5  ;;  %9656 = vst [vmem:[#allocation93_spill] sm:$0xff] %v8108_v31  ;;  %v8111_v32 = vld [vmem:[#allocation8 + $0x40] ss:$16 sps:$4 sm:$0xff]   ;;  %v8133_v24 = vld [vmem:[#allocation8 + $0xc] ss:$16 sps:$4 sm:$0xff]  }
 0x763   :  { %5006 = vpow2.f32 %v4424_v21  ;;  %3625 = vmatpush1.bf16.msra.mxu0 %v8099_v33  ;;  %3666 = vmatpush1.bf16.msra.mxu1 %v8102_v54  ;;  %9657 = vst [vmem:[#allocation94_spill] sm:$0xff] %v8111_v32  ;;  %v8114_v58 = vld [vmem:[#allocation8 + $0x48] ss:$16 sps:$4 sm:$0xff]   ;;  %v8118_v21 = vld [vmem:[#allocation8 + $0x24] ss:$16 sps:$4 sm:$0xff]  }
 0x764   :  { %3626 = vmatprep.subr.bf16.mxu0 %v8105_v5  ;;  %3667 = vmatprep.subr.bf16.mxu1 %v8108_v31  ;;  %9658 = vst [vmem:[#allocation95_spill] sm:$0xff] %v8114_v58  ;;  %9659 = vst [vmem:[#allocation96_spill] sm:$0xff] %v8118_v21  ;;  %v8121_v12 = vld [vmem:[#allocation8 + $0x2c] ss:$16 sps:$4 sm:$0xff]   ;;  %v8124_v5 = vld [vmem:[#allocation8 + $0x20] ss:$16 sps:$4 sm:$0xff]  }
 0x765   :  { %9660 = vst [vmem:[#allocation97_spill] sm:$0xff] %v8121_v12  ;;  %9661 = vst [vmem:[#allocation98_spill] sm:$0xff] %v8124_v5  ;;  %v8127_v31 = vld [vmem:[#allocation8 + $0x28] ss:$16 sps:$4 sm:$0xff]   ;;  %v8137_v54 = vld [vmem:[#allocation8] ss:$16 sps:$4 sm:$0xff]  }
 0x766   :  { %9662 = vst [vmem:[#allocation99_spill] sm:$0xff] %v8127_v31 }
 0x767   :  { %3627 = vmatpush1.bf16.msra.mxu0 %v8111_v32  ;;  %3668 = vmatpush1.bf16.msra.mxu1 %v8114_v58  ;;  %v4425_v32 = vmul.f32 -1.442695, %v3363_v39  ;;  %v8130_v58 = vld [vmem:[#allocation8 + $0x4] ss:$16 sps:$4 sm:$0xff]  }
 0x768   :  { %3628 = vmatprep.subr.bf16.mxu0 %v8118_v21  ;;  %3669 = vmatprep.subr.bf16.mxu1 %v8121_v12  ;;  %9663 = vst [vmem:[#allocation100_spill] sm:$0xff] %v8130_v58  ;;  %v3365_v12 = vadd.f32 %v3364_v1, %v9580_v20  ;;  %v8149_v1 = vld [vmem:[#allocation8 + $0x1e0] ss:$16 sps:$4 sm:$0xff]   ;;  %v8152_v20 = vld [vmem:[#allocation8 + $0x1e8] ss:$16 sps:$4 sm:$0xff]  }
 0x769   :  { %5008 = vpow2.f32 %v4425_v32  ;;  %9667 = vst [vmem:[#allocation104_spill] sm:$0xff] %v8149_v1  ;;  %9668 = vst [vmem:[#allocation105_spill] sm:$0xff] %v8152_v20  ;;  %v8155_v32 = vld [vmem:[#allocation8 + $0x1c4] ss:$16 sps:$4 sm:$0xff]  }
 0x76a   :  { %9669 = vst [vmem:[#allocation106_spill] sm:$0xff] %v8155_v32 }
 0x76b   :  { %3629 = vmatpush1.bf16.msra.mxu0 %v8124_v5  ;;  %3670 = vmatpush1.bf16.msra.mxu1 %v8127_v31  ;;  %v8140_v5 = vld [vmem:[#allocation8 + $0x8] ss:$16 sps:$4 sm:$0xff]   ;;  %v8143_v31 = vld [vmem:[#allocation8 + $0x1e4] ss:$16 sps:$4 sm:$0xff]  }
 0x76c   :  { %3630 = vmatprep.subr.bf16.mxu0 %v8130_v58  ;;  %3671 = vmatprep.subr.bf16.mxu1 %v8133_v24  ;;  %9664 = vst [vmem:[#allocation101_spill] sm:$0xff] %v8140_v5  ;;  %9665 = vst [vmem:[#allocation102_spill] sm:$0xff] %v8143_v31  ;;  %v8146_v58 = vld [vmem:[#allocation8 + $0x1ec] ss:$16 sps:$4 sm:$0xff]  }
 0x76d   :  { %9666 = vst [vmem:[#allocation103_spill] sm:$0xff] %v8146_v58 }
 0x76e   :  { %v5005_v7 = vpop.eup %5004 }
 0x76f   :  { %v3378_v21 = vadd.f32 1.0, %v5005_v7  ;;  %3631 = vmatpush1.bf16.msra.mxu0 %v8137_v54  ;;  %3672 = vmatpush1.bf16.msra.mxu1 %v8140_v5 }
 0x770   :  { %v5007_v39 = vpop.eup %5006  ;;  %3632 = vmatprep.subr.bf16.mxu0 %v8143_v31  ;;  %3673 = vmatprep.subr.bf16.mxu1 %v8146_v58  ;;  %v8158_v31 = vld [vmem:[#allocation8 + $0x1cc] ss:$16 sps:$4 sm:$0xff]  }
 0x771   :  { %5010 = vrcp.f32 %v3378_v21  ;;  %v3379_v7 = vadd.f32 1.0, %v5007_v39  ;;  %9670 = vst [vmem:[#allocation107_spill] sm:$0xff] %v8158_v31  ;;  %v8161_v21 = vld [vmem:[#allocation8 + $0x1c0] ss:$16 sps:$4 sm:$0xff]  }
 0x772   :  { %5012 = vtanh.f32 %v3365_v12  ;;  %9671 = vst [vmem:[#allocation108_spill] sm:$0xff] %v8161_v21  ;;  %v8164_v12 = vld [vmem:[#allocation8 + $0x1c8] ss:$16 sps:$4 sm:$0xff]   ;;  %v8169_v39 = vld [vmem:[#allocation8 + $0x1a0] ss:$16 sps:$4 sm:$0xff]  }
 0x773   :  { %5014 = vrcp.f32 %v3379_v7  ;;  %3633 = vmatpush2.bf16.msra.mxu0 %v8149_v1  ;;  %3674 = vmatpush2.bf16.msra.mxu1 %v8152_v20  ;;  %9672 = vst [vmem:[#allocation109_spill] sm:$0xff] %v8164_v12  ;;  %9673 = vst [vmem:[#allocation110_spill] sm:$0xff] %v8169_v39  ;;  %v8172_v7 = vld [vmem:[#allocation8 + $0x1a8] ss:$16 sps:$4 sm:$0xff]   ;;  %v8187_v1 = vld [vmem:[#allocation8 + $0x164] ss:$16 sps:$4 sm:$0xff]  }
 0x774   :  { %3634 = vmatprep.subr.bf16.mxu0 %v8155_v32  ;;  %3675 = vmatprep.subr.bf16.mxu1 %v8158_v31  ;;  %9674 = vst [vmem:[#allocation111_spill] sm:$0xff] %v8172_v7  ;;  %v8175_v31 = vld [vmem:[#allocation8 + $0x184] ss:$16 sps:$4 sm:$0xff]  }
 0x775   :  { %9675 = vst [vmem:[#allocation112_spill] sm:$0xff] %v8175_v31 }
 0x777   :  { %3635 = vmatpush2.bf16.msra.mxu0 %v8161_v21  ;;  %3676 = vmatpush2.bf16.msra.mxu1 %v8164_v12  ;;  %v8178_v21 = vld [vmem:[#allocation8 + $0x18c] ss:$16 sps:$4 sm:$0xff]   ;;  %v5009_v12 = vpop.eup %5008 }
 0x778   :  { %3636 = vmatprep.subr.bf16.mxu0 %v7755_v46  ;;  %3677 = vmatprep.subr.bf16.mxu1 %v7758_v40  ;;  %9676 = vst [vmem:[#allocation113_spill] sm:$0xff] %v8178_v21  ;;  %v8181_v40 = vld [vmem:[#allocation8 + $0x180] ss:$16 sps:$4 sm:$0xff]   ;;  %v3380_v20 = vadd.f32 1.0, %v5009_v12 }
 0x77a   :  { %5016 = vrcp.f32 %v3380_v20 }
 0x77b   :  { %3637 = vmatpush2.bf16.msra.mxu0 %v8169_v39  ;;  %3678 = vmatpush2.bf16.msra.mxu1 %v8172_v7  ;;  %v8184_v39 = vld [vmem:[#allocation8 + $0x188] ss:$16 sps:$4 sm:$0xff]  }
 0x77c   :  { %3638 = vmatprep.subr.bf16.mxu0 %v8175_v31  ;;  %3679 = vmatprep.subr.bf16.mxu1 %v8178_v21  ;;  %v8190_v31 = vld [vmem:[#allocation8 + $0x16c] ss:$16 sps:$4 sm:$0xff]  }
 0x77e   :  { %v5011_v46 = vpop.eup %5010 }
 0x77f   :  { %v5013_v32 = vpop.eup %5012  ;;  %3639 = vmatpush2.bf16.msra.mxu0 %v8181_v40  ;;  %3680 = vmatpush2.bf16.msra.mxu1 %v8184_v39 }
 0x780   :  { %v5015_v7 = vpop.eup %5014  ;;  %3640 = vmatprep.subr.bf16.mxu0 %v8187_v1  ;;  %3681 = vmatprep.subr.bf16.mxu1 %v8190_v31  ;;  %v3389_v58 = vmul.f32 %v5013_v32, %v5011_v46 }
 0x781   :  { %v3388_v21 = vmul.f32 %v5015_v7, %v7770_v57 }
 0x783   :  { %v8194_v5 = vadd.f32 %v3389_v58, %v3388_v21  ;;  %3641 = vmatpush2.bf16.msra.mxu0 %v7772_v19  ;;  %3682 = vmatpush2.bf16.msra.mxu1 %v7775_v52 }
 0x784   :  { %3642 = vmatprep.subr.bf16.mxu0 %v7779_v0  ;;  %3683 = vmatprep.subr.bf16.mxu1 %v7782_v18 }
 0x785   :  { %5018 = vtanh.f32 %v8194_v5 }
 0x787   :  { %3643 = vmatpush2.bf16.msra.mxu0 %v7785_v48  ;;  %3684 = vmatpush2.bf16.msra.mxu1 %v7788_v38  ;;  %v5017_v20 = vpop.eup %5016 }
 0x788   :  { %3644 = vmatprep.subr.bf16.mxu0 %v7791_v62  ;;  %3685 = vmatprep.subr.bf16.mxu1 %v7794_v13 }
 0x78b   :  { %3645 = vmatpush2.bf16.msra.mxu0 %v7797_v3  ;;  %3686 = vmatpush2.bf16.msra.mxu1 %v7800_v4 }
 0x78c   :  { %3646 = vmatprep.subr.bf16.mxu0 %v7803_v41  ;;  %3687 = vmatprep.subr.bf16.mxu1 %v7806_v29 }
 0x78f   :  { %3647 = vmatpush2.bf16.msra.mxu0 %v7809_v42  ;;  %3688 = vmatpush2.bf16.msra.mxu1 %v7812_v22 }
 0x790   :  { %3723 = vmatprep.subr.bf16.mxu0 %v7815_v55  ;;  %3764 = vmatprep.subr.bf16.mxu1 %v7818_v56 }
 0x792   :  { %v5019_v46 = vpop.eup %5018 }
 0x793   :  { %v3392_v57 = vmul.f32 %v5019_v46, %v5017_v20 }
 0x795   :  { %v8213_v58 = vpack.c.bf16 %v3392_v57, %v3392_v57  ;;  %v9683_v57 = vld [vmem:[#allocation40_spill] sm:$0xff] }
 0x797   :  { %3648 = vmatprep.mubr.bf16.mxu0 %v8213_v58  ;;  %3689 = vmatprep.mubr.bf16.mxu1 %v8213_v58 }
 0x798   :  { %3649 = vmatmul.mubr.bf16.vlgmr.msra.gmra.mxu0 %v8045_v28  ;;  %3690 = vmatmul.mubr.bf16.vlgmr.msra.gmra.mxu1 %v8045_v28 }
 0x799   :  { %3724 = vmatpush1.bf16.msra.mxu0 %v7827_v36  ;;  %3765 = vmatpush1.bf16.msra.mxu1 %v7830_v60 }
 0x79a   :  { %3725 = vmatprep.subr.bf16.mxu0 %v7833_v9  ;;  %3766 = vmatprep.subr.bf16.mxu1 %v7836_v30 }
 0x79c   :  { %v3428_v32 = vpop.f32.mrf.mxu0  ;;  %v3469_v21 = vpop.f32.mrf.mxu1 }
 0x79d   :  { %v3429_v12 = vadd.f32 %v3428_v32, %v6857_v34  ;;  %3726 = vmatpush1.bf16.msra.mxu0 %v7840_v15  ;;  %3767 = vmatpush1.bf16.msra.mxu1 %v7843_v6  ;;  %v3470_v6 = vadd.f32 %v3469_v21, %v6875_v59  ;;  %v9684_v32 = vld [vmem:[#allocation41_spill] sm:$0xff] }
 0x79e   :  { %v3430_v7 = vpop.f32.mrf.mxu0  ;;  %v3471_v20 = vpop.f32.mrf.mxu1  ;;  %3727 = vmatprep.subr.bf16.mxu0 %v7846_v10  ;;  %3768 = vmatprep.subr.bf16.mxu1 %v7849_v47  ;;  %v9677_v10 = vld [vmem:[#allocation140_spill] sm:$0xff]  ;;  %v9678_v47 = vld [vmem:[#allocation141_spill] sm:$0xff] }
 0x79f   :  { %v4426_v36 = vmul.f32 -1.442695, %v3429_v12  ;;  %v3431_v60 = vadd.f32 %v3430_v7, %v6862_v35 }
 0x7a0   :  { %v3432_v9 = vpop.f32.mrf.mxu0  ;;  %v3473_v28 = vpop.f32.mrf.mxu1 }
 0x7a1   :  { %5020 = vpow2.f32 %v4426_v36  ;;  %v4427_v30 = vmul.f32 -1.442695, %v3431_v60  ;;  %3728 = vmatpush1.bf16.msra.mxu0 %v7853_v11  ;;  %3769 = vmatpush1.bf16.msra.mxu1 %v7856_v61  ;;  %v9679_v11 = vld [vmem:[#allocation23_spill] sm:$0xff]  ;;  %v9680_v61 = vld [vmem:[#allocation25_spill] sm:$0xff]  ;;  %v9686_v36 = vld [vmem:[#allocation42_spill] sm:$0xff] }
 0x7a2   :  { %v3433_v15 = vpop.f32.mrf.mxu0  ;;  %v3474_v46 = vpop.f32.mrf.mxu1  ;;  %3729 = vmatprep.subr.bf16.mxu0 %v7859_v49  ;;  %3770 = vmatprep.subr.bf16.mxu1 %v7862_v53  ;;  %v4428_v49 = vmul.f32 -1.442695, %v3470_v6  ;;  %v9681_v53 = vld [vmem:[#allocation24_spill] sm:$0xff]  ;;  %v9687_v60 = vld [vmem:[#allocation43_spill] sm:$0xff]  ;;  %v9689_v28 = vld [vmem:[#allocation45_spill] sm:$0xff] }
 0x7a3   :  { %5022 = vpow2.f32 %v4427_v30  ;;  %v9688_v9 = vld [vmem:[#allocation44_spill] sm:$0xff]  ;;  %v9691_v30 = vld [vmem:[#allocation47_spill] sm:$0xff]  ;;  %v9693_v46 = vld [vmem:[#allocation49_spill] sm:$0xff] }
 0x7a4   :  { %5024 = vpow2.f32 %v4428_v49  ;;  %v9692_v15 = vld [vmem:[#allocation48_spill] sm:$0xff]  ;;  %v9694_v6 = vld [vmem:[#allocation50_spill] sm:$0xff] }
 0x7a5   :  { %3730 = vmatpush1.bf16.msra.mxu0 %v7865_v2  ;;  %3771 = vmatpush1.bf16.msra.mxu1 %v7868_v23  ;;  %v9682_v2 = vld [vmem:[#allocation26_spill] sm:$0xff] }
 0x7a6   :  { %3731 = vmatprep.subr.bf16.mxu0 %v7871_v50  ;;  %3772 = vmatprep.subr.bf16.mxu1 %v7874_v26  ;;  %v3472_v50 = vadd.f32 %v3471_v20, %v9683_v57  ;;  %v9685_v26 = vld [vmem:[#allocation14_spill] sm:$0xff] }
 0x7a7   :  { %v9690_v20 = vld [vmem:[#allocation46_spill] sm:$0xff] }
 0x7a8   :  { %v9698_v49 = vld [vmem:[#allocation54_spill] sm:$0xff] }
 0x7a9   :  { %3732 = vmatpush1.bf16.msra.mxu0 %v9677_v10  ;;  %3773 = vmatpush1.bf16.msra.mxu1 %v9678_v47  ;;  %v9695_v10 = vld [vmem:[#allocation51_spill] sm:$0xff]  ;;  %v9696_v47 = vld [vmem:[#allocation52_spill] sm:$0xff] }
 0x7aa   :  { %3733 = vmatprep.subr.bf16.mxu0 %v9679_v11  ;;  %3774 = vmatprep.subr.bf16.mxu1 %v9680_v61  ;;  %v9697_v11 = vld [vmem:[#allocation53_spill] sm:$0xff] }
 0x7ad   :  { %3734 = vmatpush1.bf16.msra.mxu0 %v9681_v53  ;;  %3775 = vmatpush1.bf16.msra.mxu1 %v9682_v2  ;;  %v9699_v53 = vld [vmem:[#allocation55_spill] sm:$0xff] }
 0x7ae   :  { %v5021_v23 = vpop.eup %5020  ;;  %3735 = vmatprep.subr.bf16.mxu0 %v9684_v32  ;;  %3776 = vmatprep.subr.bf16.mxu1 %v9685_v26 }
 0x7af   :  { %v3485_v21 = vadd.f32 1.0, %v5021_v23  ;;  %v9700_v23 = vld [vmem:[#allocation56_spill] sm:$0xff] }
 0x7b0   :  { %v5023_v12 = vpop.eup %5022 }
 0x7b1   :  { %5026 = vrcp.f32 %v3485_v21  ;;  %v3486_v7 = vadd.f32 1.0, %v5023_v12  ;;  %3736 = vmatpush1.bf16.msra.mxu0 %v9686_v36  ;;  %3777 = vmatpush1.bf16.msra.mxu1 %v9687_v60  ;;  %v5025_v61 = vpop.eup %5024  ;;  %v9702_v12 = vld [vmem:[#allocation62_spill] sm:$0xff] }
 0x7b2   :  { %5028 = vtanh.f32 %v3472_v50  ;;  %3737 = vmatprep.subr.bf16.mxu0 %v9688_v9  ;;  %3778 = vmatprep.subr.bf16.mxu1 %v9689_v28  ;;  %v9701_v50 = vld [vmem:[#allocation57_spill] sm:$0xff]  ;;  %v3487_v21 = vadd.f32 1.0, %v5025_v61  ;;  %v9703_v60 = vld [vmem:[#allocation58_spill] sm:$0xff]  ;;  %v9704_v9 = vld [vmem:[#allocation59_spill] sm:$0xff] }
 0x7b3   :  { %5030 = vrcp.f32 %v3486_v7  ;;  %v9705_v28 = vld [vmem:[#allocation60_spill] sm:$0xff]  ;;  %v9713_v61 = vld [vmem:[#allocation69_spill] sm:$0xff] }
 0x7b4   :  { %5032 = vrcp.f32 %v3487_v21  ;;  %v9720_v21 = vld [vmem:[#allocation76_spill] sm:$0xff] }
 0x7b5   :  { %3738 = vmatpush1.bf16.msra.mxu0 %v9690_v20  ;;  %3779 = vmatpush1.bf16.msra.mxu1 %v9691_v30  ;;  %v9706_v20 = vld [vmem:[#allocation61_spill] sm:$0xff] }
 0x7b6   :  { %3739 = vmatprep.subr.bf16.mxu0 %v9692_v15  ;;  %3780 = vmatprep.subr.bf16.mxu1 %v9693_v46  ;;  %v9707_v15 = vld [vmem:[#allocation63_spill] sm:$0xff]  ;;  %v9708_v46 = vld [vmem:[#allocation68_spill] sm:$0xff] }
 0x7b9   :  { %3740 = vmatpush2.bf16.msra.mxu0 %v9694_v6  ;;  %3781 = vmatpush2.bf16.msra.mxu1 %v9695_v10  ;;  %v9709_v6 = vld [vmem:[#allocation64_spill] sm:$0xff]  ;;  %v9710_v10 = vld [vmem:[#allocation65_spill] sm:$0xff] }
 0x7ba   :  { %3741 = vmatprep.subr.bf16.mxu0 %v9696_v47  ;;  %3782 = vmatprep.subr.bf16.mxu1 %v9697_v11  ;;  %v9711_v47 = vld [vmem:[#allocation66_spill] sm:$0xff]  ;;  %v9712_v11 = vld [vmem:[#allocation67_spill] sm:$0xff] }
 0x7bd   :  { %3742 = vmatpush2.bf16.msra.mxu0 %v9698_v49  ;;  %3783 = vmatpush2.bf16.msra.mxu1 %v9699_v53  ;;  %v9714_v49 = vld [vmem:[#allocation70_spill] sm:$0xff]  ;;  %v9715_v53 = vld [vmem:[#allocation71_spill] sm:$0xff] }
 0x7be   :  { %v5027_v2 = vpop.eup %5026  ;;  %3743 = vmatprep.subr.bf16.mxu0 %v9700_v23  ;;  %3784 = vmatprep.subr.bf16.mxu1 %v9701_v50  ;;  %v9717_v23 = vld [vmem:[#allocation73_spill] sm:$0xff]  ;;  %v9718_v50 = vld [vmem:[#allocation74_spill] sm:$0xff] }
 0x7bf   :  { %v5029_v32 = vpop.eup %5028 }
 0x7c0   :  { %v5031_v26 = vpop.eup %5030  ;;  %v3496_v36 = vmul.f32 %v5029_v32, %v5027_v2  ;;  %v9716_v2 = vld [vmem:[#allocation72_spill] sm:$0xff] }
 0x7c1   :  { %v3495_v7 = vmul.f32 %v5031_v26, %v9702_v12  ;;  %3744 = vmatpush2.bf16.msra.mxu0 %v9703_v60  ;;  %3785 = vmatpush2.bf16.msra.mxu1 %v9704_v9  ;;  %v5033_v32 = vpop.eup %5032  ;;  %v9719_v26 = vld [vmem:[#allocation75_spill] sm:$0xff] }
 0x7c2   :  { %3745 = vmatprep.subr.bf16.mxu0 %v9705_v28  ;;  %3786 = vmatprep.subr.bf16.mxu1 %v9706_v20  ;;  %v9723_v9 = vld [vmem:[#allocation79_spill] sm:$0xff]  ;;  %v9724_v28 = vld [vmem:[#allocation84_spill] sm:$0xff] }
 0x7c3   :  { %v8268_v30 = vadd.f32 %v3496_v36, %v3495_v7  ;;  %v9721_v7 = vld [vmem:[#allocation77_spill] sm:$0xff]  ;;  %v9722_v36 = vld [vmem:[#allocation78_spill] sm:$0xff] }
 0x7c5   :  { %3746 = vmatpush2.bf16.msra.mxu0 %v9707_v15  ;;  %3787 = vmatpush2.bf16.msra.mxu1 %v9708_v46  ;;  %5034 = vtanh.f32 %v8268_v30  ;;  %v9725_v15 = vld [vmem:[#allocation85_spill] sm:$0xff]  ;;  %v9726_v46 = vld [vmem:[#allocation86_spill] sm:$0xff] }
 0x7c6   :  { %3747 = vmatprep.subr.bf16.mxu0 %v9709_v6  ;;  %3788 = vmatprep.subr.bf16.mxu1 %v9710_v10  ;;  %v9727_v6 = vld [vmem:[#allocation88_spill] sm:$0xff]  ;;  %v9728_v10 = vld [vmem:[#allocation89_spill] sm:$0xff] }
 0x7c9   :  { %3748 = vmatpush2.bf16.msra.mxu0 %v9711_v47  ;;  %3789 = vmatpush2.bf16.msra.mxu1 %v9712_v11  ;;  %v9743_v47 = vld [vmem:[#allocation103_spill] sm:$0xff]  ;;  %v9744_v11 = vld [vmem:[#allocation104_spill] sm:$0xff] }
 0x7ca   :  { %3749 = vmatprep.subr.bf16.mxu0 %v9713_v61  ;;  %3790 = vmatprep.subr.bf16.mxu1 %v9714_v49  ;;  %v9745_v61 = vld [vmem:[#allocation105_spill] sm:$0xff]  ;;  %v9746_v49 = vld [vmem:[#allocation106_spill] sm:$0xff] }
 0x7cd   :  { %3750 = vmatpush2.bf16.msra.mxu0 %v9715_v53  ;;  %3791 = vmatpush2.bf16.msra.mxu1 %v9716_v2  ;;  %v9747_v53 = vld [vmem:[#allocation107_spill] sm:$0xff]  ;;  %v9748_v2 = vld [vmem:[#allocation108_spill] sm:$0xff] }
 0x7ce   :  { %3751 = vmatprep.subr.bf16.mxu0 %v9717_v23  ;;  %3792 = vmatprep.subr.bf16.mxu1 %v9718_v50  ;;  %v9749_v23 = vld [vmem:[#allocation109_spill] sm:$0xff]  ;;  %v9752_v50 = vld [vmem:[#allocation110_spill] sm:$0xff] }
 0x7d1   :  { %3752 = vmatpush2.bf16.msra.mxu0 %v9719_v26  ;;  %3793 = vmatpush2.bf16.msra.mxu1 %v9720_v21  ;;  %v9754_v26 = vld [vmem:[#allocation112_spill] sm:$0xff]  ;;  %v9755_v21 = vld [vmem:[#allocation113_spill] sm:$0xff] }
 0x7d2   :  { %v5035_v12 = vpop.eup %5034  ;;  %3753 = vmatprep.subr.bf16.mxu0 %v9721_v7  ;;  %3794 = vmatprep.subr.bf16.mxu1 %v9722_v36 }
 0x7d3   :  { %v3499_v60 = vmul.f32 %v5035_v12, %v5033_v32  ;;  %v9753_v32 = vld [vmem:[#allocation111_spill] sm:$0xff] }
 0x7d5   :  { %3754 = vmatpush2.bf16.msra.mxu0 %v9723_v9  ;;  %3795 = vmatpush2.bf16.msra.mxu1 %v9724_v28  ;;  %v3722_v20 = vpack.c.bf16 %v3499_v60, %v3499_v60 }
 0x7d6   :  { %3831 = vmatprep.subr.bf16.mxu0 %v9725_v15  ;;  %3872 = vmatprep.subr.bf16.mxu1 %v9726_v46 }
 0x7d7   :  { %3755 = vmatprep.mubr.bf16.mxu0 %v3722_v20  ;;  %3796 = vmatprep.mubr.bf16.mxu1 %v3722_v20 }
 0x7d8   :  { %3756 = vmatmul.mubr.bf16.vlgmr.msra.gmra.mxu0 %v8213_v58  ;;  %3797 = vmatmul.mubr.bf16.vlgmr.msra.gmra.mxu1 %v8213_v58  ;;  %v9729_v58 = vld [vmem:[#allocation80_spill] sm:$0xff] }
 0x7d9   :  { %3832 = vmatpush1.bf16.msra.mxu0 %v8049_v51  ;;  %3873 = vmatpush1.bf16.msra.mxu1 %v8052_v27  ;;  %v9730_v51 = vld [vmem:[#allocation90_spill] sm:$0xff]  ;;  %v9731_v27 = vld [vmem:[#allocation91_spill] sm:$0xff] }
 0x7da   :  { %3833 = vmatprep.subr.bf16.mxu0 %v8055_v43  ;;  %3874 = vmatprep.subr.bf16.mxu1 %v8058_v45  ;;  %v9732_v43 = vld [vmem:[#allocation92_spill] sm:$0xff]  ;;  %v9733_v45 = vld [vmem:[#allocation93_spill] sm:$0xff] }
 0x7dd   :  { %3834 = vmatpush1.bf16.msra.mxu0 %v8061_v16  ;;  %3875 = vmatpush1.bf16.msra.mxu1 %v8064_v25  ;;  %v9734_v16 = vld [vmem:[#allocation94_spill] sm:$0xff]  ;;  %v9735_v25 = vld [vmem:[#allocation95_spill] sm:$0xff] }
 0x7de   :  { %3835 = vmatprep.subr.bf16.mxu0 %v8067_v37  ;;  %3876 = vmatprep.subr.bf16.mxu1 %v8070_v44  ;;  %v9736_v37 = vld [vmem:[#allocation96_spill] sm:$0xff]  ;;  %v9737_v44 = vld [vmem:[#allocation97_spill] sm:$0xff] }
 0x7e1   :  { %3836 = vmatpush1.bf16.msra.mxu0 %v9727_v6  ;;  %3877 = vmatpush1.bf16.msra.mxu1 %v9728_v10  ;;  %v9760_v6 = vld [vmem:[#allocation87_spill] sm:$0xff] }
 0x7e2   :  { %3837 = vmatprep.subr.bf16.mxu0 %v9729_v58  ;;  %3878 = vmatprep.subr.bf16.mxu1 %v8082_v63  ;;  %v9738_v63 = vld [vmem:[#allocation98_spill] sm:$0xff] }
 0x7e5   :  { %3838 = vmatpush1.bf16.msra.mxu0 %v8087_v14  ;;  %3879 = vmatpush1.bf16.msra.mxu1 %v9730_v51  ;;  %v9740_v14 = vld [vmem:[#allocation100_spill] sm:$0xff] }
 0x7e6   :  { %3839 = vmatprep.subr.bf16.mxu0 %v8093_v17  ;;  %3880 = vmatprep.subr.bf16.mxu1 %v8096_v8  ;;  %v9739_v17 = vld [vmem:[#allocation99_spill] sm:$0xff]  ;;  %v9742_v8 = vld [vmem:[#allocation102_spill] sm:$0xff] }
 0x7e9   :  { %3840 = vmatpush1.bf16.msra.mxu0 %v8099_v33  ;;  %3881 = vmatpush1.bf16.msra.mxu1 %v9731_v27  ;;  %v9741_v33 = vld [vmem:[#allocation101_spill] sm:$0xff] }
 0x7ea   :  { %3841 = vmatprep.subr.bf16.mxu0 %v9732_v43  ;;  %3882 = vmatprep.subr.bf16.mxu1 %v9733_v45 }
 0x7ed   :  { %3842 = vmatpush1.bf16.msra.mxu0 %v9734_v16  ;;  %3883 = vmatpush1.bf16.msra.mxu1 %v9735_v25  ;;  %v9761_v25 = vld [vmem:[#allocation81_spill] sm:$0xff] }
 0x7ee   :  { %3843 = vmatprep.subr.bf16.mxu0 %v9736_v37  ;;  %3884 = vmatprep.subr.bf16.mxu1 %v9737_v44 }
 0x7f1   :  { %3844 = vmatpush1.bf16.msra.mxu0 %v9738_v63  ;;  %3885 = vmatpush1.bf16.msra.mxu1 %v9739_v17 }
 0x7f2   :  { %3845 = vmatprep.subr.bf16.mxu0 %v9740_v14  ;;  %3886 = vmatprep.subr.bf16.mxu1 %v8133_v24  ;;  %v9750_v24 = vld [vmem:[#allocation138_spill] sm:$0xff] }
 0x7f3   :  { %v9762_v14 = vld [vmem:[#allocation82_spill] sm:$0xff] }
 0x7f5   :  { %3846 = vmatpush1.bf16.msra.mxu0 %v8137_v54  ;;  %3887 = vmatpush1.bf16.msra.mxu1 %v9741_v33  ;;  %v9751_v54 = vld [vmem:[#allocation139_spill] sm:$0xff] }
 0x7f6   :  { %3847 = vmatprep.subr.bf16.mxu0 %v9742_v8  ;;  %3888 = vmatprep.subr.bf16.mxu1 %v9743_v47 }
 0x7f9   :  { %3848 = vmatpush2.bf16.msra.mxu0 %v9744_v11  ;;  %3889 = vmatpush2.bf16.msra.mxu1 %v9745_v61 }
 0x7fa   :  { %3849 = vmatprep.subr.bf16.mxu0 %v9746_v49  ;;  %3890 = vmatprep.subr.bf16.mxu1 %v9747_v53  ;;  %v9763_v53 = vld [vmem:[#allocation83_spill] sm:$0xff] }
 0x7fd   :  { %3850 = vmatpush2.bf16.msra.mxu0 %v9748_v2  ;;  %3891 = vmatpush2.bf16.msra.mxu1 %v9749_v23 }
 0x7fe   :  { %3851 = vmatprep.subr.bf16.mxu0 %v9750_v24  ;;  %3892 = vmatprep.subr.bf16.mxu1 %v9751_v54  ;;  %v9764_v54 = vld [vmem:[#allocation39_spill] sm:$0xff] }
 0x801   :  { %3852 = vmatpush2.bf16.msra.mxu0 %v9752_v50  ;;  %3893 = vmatpush2.bf16.msra.mxu1 %v9753_v32 }
 0x802   :  { %3853 = vmatprep.subr.bf16.mxu0 %v9754_v26  ;;  %3894 = vmatprep.subr.bf16.mxu1 %v9755_v21 }
 0x805   :  { %3854 = vmatpush2.bf16.msra.mxu0 %v8181_v40  ;;  %3895 = vmatpush2.bf16.msra.mxu1 %v8184_v39 }
 0x806   :  { %3855 = vmatprep.subr.bf16.mxu0 %v8187_v1  ;;  %3896 = vmatprep.subr.bf16.mxu1 %v8190_v31 }
 0x809   :  { %3856 = vmatpush2.bf16.msra.mxu0 %v7772_v19  ;;  %3897 = vmatpush2.bf16.msra.mxu1 %v7775_v52  ;;  %v9756_v52 = vld [vmem:[#allocation35_spill] sm:$0xff] }
 0x80a   :  { %3857 = vmatprep.subr.bf16.mxu0 %v7779_v0  ;;  %3898 = vmatprep.subr.bf16.mxu1 %v7782_v18  ;;  %v9757_v18 = vld [vmem:[#allocation36_spill] sm:$0xff] }
 0x80d   :  { %3858 = vmatpush2.bf16.msra.mxu0 %v7785_v48  ;;  %3899 = vmatpush2.bf16.msra.mxu1 %v7788_v38 }
 0x80e   :  { %3859 = vmatprep.subr.bf16.mxu0 %v7791_v62  ;;  %3900 = vmatprep.subr.bf16.mxu1 %v7794_v13  ;;  %v9758_v62 = vld [vmem:[#allocation37_spill] sm:$0xff]  ;;  %v9759_v13 = vld [vmem:[#allocation38_spill] sm:$0xff] }
 0x811   :  { %3860 = vmatpush2.bf16.msra.mxu0 %v7797_v3  ;;  %3901 = vmatpush2.bf16.msra.mxu1 %v7800_v4 }
 0x812   :  { %v3539_v40 = vpop.f32.mrf.mxu0  ;;  %v3580_v19 = vpop.f32.mrf.mxu1  ;;  %3861 = vmatprep.subr.bf16.mxu0 %v7803_v41  ;;  %3902 = vmatprep.subr.bf16.mxu1 %v7806_v29 }
 0x813   :  { %v3587_v0 = vadd.f32 %v3539_v40, %v9756_v52  ;;  %v3589_v48 = vadd.f32 %v3580_v19, %v9757_v18 }
 0x814   :  { %v3541_v31 = vpop.f32.mrf.mxu0  ;;  %v3582_v38 = vpop.f32.mrf.mxu1 }
 0x815   :  { %v4429_v1 = vmul.f32 -1.442695, %v3587_v0  ;;  %v3588_v39 = vadd.f32 %v3541_v31, %v9758_v62  ;;  %v3590_v12 = vadd.f32 %v3582_v38, %v9759_v13  ;;  %3862 = vmatpush2.bf16.msra.mxu0 %v7809_v42  ;;  %3903 = vmatpush2.bf16.msra.mxu1 %v7812_v22  ;;  %v4431_v36 = vmul.f32 -1.442695, %v3589_v48 }
 0x816   :  { %v3543_v3 = vpop.f32.mrf.mxu0  ;;  %v3584_v4 = vpop.f32.mrf.mxu1  ;;  %3938 = vmatprep.subr.bf16.mxu0 %v7815_v55  ;;  %3979 = vmatprep.subr.bf16.mxu1 %v7818_v56 }
 0x817   :  { %5036 = vpow2.f32 %v4429_v1  ;;  %v4430_v41 = vmul.f32 -1.442695, %v3588_v39  ;;  %v8374_v3 = vld [vmem:[#allocation9 + $0xe0] ss:$16 sps:$4 sm:$0xff]   ;;  %v8380_v4 = vld [vmem:[#allocation9 + $0xc4] ss:$16 sps:$4 sm:$0xff]  }
 0x818   :  { %v3544_v29 = vpop.f32.mrf.mxu0  ;;  %v3585_v7 = vpop.f32.mrf.mxu1 }
 0x819   :  { %5038 = vpow2.f32 %v4430_v41  ;;  %v8383_v41 = vld [vmem:[#allocation9 + $0xcc] ss:$16 sps:$4 sm:$0xff]  }
 0x81a   :  { %5040 = vpow2.f32 %v4431_v36 }
 0x81b   :  { %5042 = vtanh.f32 %v3590_v12 }
 0x824   :  { %v5037_v60 = vpop.eup %5036 }
 0x825   :  { %v3600_v9 = vadd.f32 1.0, %v5037_v60  ;;  %v8387_v60 = vld [vmem:[#allocation9 + $0xc0] ss:$16 sps:$4 sm:$0xff]  }
 0x826   :  { %v5039_v28 = vpop.eup %5038 }
 0x827   :  { %5044 = vrcp.f32 %v3600_v9  ;;  %v3601_v42 = vadd.f32 1.0, %v5039_v28  ;;  %v5041_v22 = vpop.eup %5040  ;;  %v8390_v9 = vld [vmem:[#allocation9 + $0xc8] ss:$16 sps:$4 sm:$0xff]  }
 0x828   :  { %v5043_v20 = vpop.eup %5042  ;;  %v3602_v56 = vadd.f32 1.0, %v5041_v22  ;;  %v8393_v22 = vld [vmem:[#allocation9 + $0xa4] ss:$16 sps:$4 sm:$0xff]  }
 0x829   :  { %5046 = vrcp.f32 %v3601_v42 }
 0x82a   :  { %5048 = vrcp.f32 %v3602_v56 }
 0x834   :  { %v5045_v15 = vpop.eup %5044 }
 0x835   :  { %v3611_v55 = vmul.f32 %v5045_v15, %v5043_v20  ;;  %v8396_v20 = vld [vmem:[#allocation9 + $0xac] ss:$16 sps:$4 sm:$0xff]  }
 0x836   :  { %v5047_v46 = vpop.eup %5046 }
 0x837   :  { %v3610_v10 = vmul.f32 %v5047_v46, %v9760_v6  ;;  %v5049_v51 = vpop.eup %5048 }
 0x839   :  { %v3612_v58 = vadd.f32 %v3611_v55, %v3610_v10  ;;  %v8400_v10 = vld [vmem:[#allocation9 + $0xa0] ss:$16 sps:$4 sm:$0xff]  }
 0x83b   :  { %5050 = vtanh.f32 %v3612_v58  ;;  %v8403_v58 = vld [vmem:[#allocation9 + $0xa8] ss:$16 sps:$4 sm:$0xff]  }
 0x848   :  { %v5051_v27 = vpop.eup %5050 }
 0x849   :  { %v3614_v43 = vmul.f32 %v5051_v27, %v5049_v51 }
 0x84b   :  { %v3829_v12 = vpack.c.bf16 %v3614_v43, %v3614_v43  ;;  %v8406_v43 = vld [vmem:[#allocation9 + $0x84] ss:$16 sps:$4 sm:$0xff]  }
 0x858   :  { %v3650_v45 = vpop.f32.mrf.mxu0  ;;  %v3691_v16 = vpop.f32.mrf.mxu1 }
 0x859   :  { %v3651_v37 = vadd.f32 %v3650_v45, %v9761_v25  ;;  %v3692_v2 = vadd.f32 %v3691_v16, %v9763_v53  ;;  %v8409_v45 = vld [vmem:[#allocation9 + $0x8c] ss:$16 sps:$4 sm:$0xff]   ;;  %v8412_v16 = vld [vmem:[#allocation9 + $0x80] ss:$16 sps:$4 sm:$0xff]   ;;  %v8556_v53 = vld [vmem:[#allocation9 + $0x104] ss:$16 sps:$4 sm:$0xff]  }
 0x85a   :  { %v3652_v44 = vpop.f32.mrf.mxu0  ;;  %v3693_v63 = vpop.f32.mrf.mxu1 }
 0x85b   :  { %v4432_v17 = vmul.f32 -1.442695, %v3651_v37  ;;  %v3653_v33 = vadd.f32 %v3652_v44, %v9762_v14  ;;  %v4434_v23 = vmul.f32 -1.442695, %v3692_v2  ;;  %v3694_v50 = vadd.f32 %v3693_v63, %v9764_v54  ;;  %v8415_v37 = vld [vmem:[#allocation9 + $0x88] ss:$16 sps:$4 sm:$0xff]  }
 0x85c   :  { %v3654_v8 = vpop.f32.mrf.mxu0  ;;  %v3695_v47 = vpop.f32.mrf.mxu1  ;;  %v8418_v44 = vld [vmem:[#allocation9 + $0x64] ss:$16 sps:$4 sm:$0xff]   ;;  %v8421_v63 = vld [vmem:[#allocation9 + $0x6c] ss:$16 sps:$4 sm:$0xff]   ;;  %v8440_v2 = vld [vmem:[#allocation9 + $0x48] ss:$16 sps:$4 sm:$0xff]  }
 0x85d   :  { %5052 = vpow2.f32 %v4432_v17  ;;  %v4433_v11 = vmul.f32 -1.442695, %v3653_v33  ;;  %v8425_v33 = vld [vmem:[#allocation9 + $0x60] ss:$16 sps:$4 sm:$0xff]   ;;  %v8428_v8 = vld [vmem:[#allocation9 + $0x68] ss:$16 sps:$4 sm:$0xff]  }
 0x85e   :  { %v3655_v61 = vpop.f32.mrf.mxu0  ;;  %v3696_v49 = vpop.f32.mrf.mxu1  ;;  %v8431_v47 = vld [vmem:[#allocation9 + $0x44] ss:$16 sps:$4 sm:$0xff]   ;;  %v8559_v14 = vld [vmem:[#allocation9 + $0x10c] ss:$16 sps:$4 sm:$0xff]  }
 0x85f   :  { %5054 = vpow2.f32 %v4433_v11  ;;  %v8434_v11 = vld [vmem:[#allocation9 + $0x4c] ss:$16 sps:$4 sm:$0xff]   ;;  %v8437_v49 = vld [vmem:[#allocation9 + $0x40] ss:$16 sps:$4 sm:$0xff]  }
 0x860   :  { %5056 = vpow2.f32 %v4434_v23 }
 0x86a   :  { %v5053_v24 = vpop.eup %5052 }
 0x86b   :  { %v3707_v32 = vadd.f32 1.0, %v5053_v24 }
 0x86c   :  { %v5055_v26 = vpop.eup %5054 }
 0x86d   :  { %5058 = vrcp.f32 %v3707_v32  ;;  %v3708_v21 = vadd.f32 1.0, %v5055_v26  ;;  %v5057_v40 = vpop.eup %5056  ;;  %v8447_v32 = vld [vmem:[#allocation9 + $0x2c] ss:$16 sps:$4 sm:$0xff]  }
 0x86e   :  { %5060 = vtanh.f32 %v3694_v50  ;;  %v3709_v18 = vadd.f32 1.0, %v5057_v40  ;;  %v8444_v50 = vld [vmem:[#allocation9 + $0x24] ss:$16 sps:$4 sm:$0xff]  }
 0x86f   :  { %5062 = vrcp.f32 %v3708_v21 }
 0x870   :  { %5064 = vrcp.f32 %v3709_v18  ;;  %v8459_v18 = vld [vmem:[#allocation9 + $0xc] ss:$16 sps:$4 sm:$0xff]  }
 0x87a   :  { %v5059_v19 = vpop.eup %5058 }
 0x87b   :  { %v5061_v52 = vpop.eup %5060 }
 0x87c   :  { %v5063_v0 = vpop.eup %5062  ;;  %v3718_v31 = vmul.f32 %v5061_v52, %v5059_v19  ;;  %v8450_v19 = vld [vmem:[#allocation9 + $0x20] ss:$16 sps:$4 sm:$0xff]   ;;  %v8453_v52 = vld [vmem:[#allocation9 + $0x28] ss:$16 sps:$4 sm:$0xff]  }
 0x87d   :  { %v3717_v48 = vmul.f32 %v5063_v0, %v8194_v5  ;;  %v5065_v1 = vpop.eup %5064  ;;  %v8377_v5 = vld [vmem:[#allocation9 + $0xe8] ss:$16 sps:$4 sm:$0xff]   ;;  %v8456_v0 = vld [vmem:[#allocation9 + $0x4] ss:$16 sps:$4 sm:$0xff]  }
 0x87f   :  { %v8367_v38 = vadd.f32 %v3718_v31, %v3717_v48  ;;  %v8462_v48 = vld [vmem:[#allocation9] ss:$16 sps:$4 sm:$0xff]   ;;  %v8465_v31 = vld [vmem:[#allocation9 + $0x8] ss:$16 sps:$4 sm:$0xff]  }
 0x881   :  { %9765 = vst [vmem:[#allocation114_spill] sm:$0xff] %v8367_v38  ;;  %5066 = vtanh.f32 %v8367_v38  ;;  %v8553_v38 = vld [vmem:[#allocation9 + $0x128] ss:$16 sps:$4 sm:$0xff]  }
 0x882   :  { %9771 = vst [vmem:[#allocation28_spill] sm:$0xff] %v8553_v38 }
 0x88e   :  { %v5067_v62 = vpop.eup %5066 }
 0x88f   :  { %v3721_v39 = vmul.f32 %v5067_v62, %v5065_v1  ;;  %v8468_v1 = vld [vmem:[#allocation9 + $0x1e4] ss:$16 sps:$4 sm:$0xff]   ;;  %v8471_v62 = vld [vmem:[#allocation9 + $0x1ec] ss:$16 sps:$4 sm:$0xff]  }
 0x891   :  { %v8370_v13 = vpack.c.bf16 %v3721_v39, %v3721_v39  ;;  %v8474_v39 = vld [vmem:[#allocation9 + $0x1e0] ss:$16 sps:$4 sm:$0xff]  }
 0x893   :  { %3863 = vmatprep.mubr.bf16.mxu0 %v8370_v13  ;;  %3904 = vmatprep.mubr.bf16.mxu1 %v8370_v13 }
 0x894   :  { %3864 = vmatmul.mubr.bf16.vlgmr.msra.gmra.mxu0 %v3829_v12  ;;  %3905 = vmatmul.mubr.bf16.vlgmr.msra.gmra.mxu1 %v3829_v12  ;;  %v8477_v12 = vld [vmem:[#allocation9 + $0x1e8] ss:$16 sps:$4 sm:$0xff]  }
 0x895   :  { %3939 = vmatpush1.bf16.msra.mxu0 %v8374_v3  ;;  %3980 = vmatpush1.bf16.msra.mxu1 %v8377_v5 }
 0x896   :  { %3940 = vmatprep.subr.bf16.mxu0 %v8380_v4  ;;  %3981 = vmatprep.subr.bf16.mxu1 %v8383_v41 }
 0x898   :  { %v3757_v29 = vpop.f32.mrf.mxu0  ;;  %v3798_v7 = vpop.f32.mrf.mxu1 }
 0x899   :  { %v3758_v36 = vadd.f32 %v3757_v29, %v6857_v34  ;;  %3941 = vmatpush1.bf16.msra.mxu0 %v8387_v60  ;;  %3982 = vmatpush1.bf16.msra.mxu1 %v8390_v9  ;;  %v3799_v17 = vadd.f32 %v3798_v7, %v6875_v59  ;;  %v8480_v29 = vld [vmem:[#allocation9 + $0x1c4] ss:$16 sps:$4 sm:$0xff]   ;;  %v8483_v7 = vld [vmem:[#allocation9 + $0x1cc] ss:$16 sps:$4 sm:$0xff]   ;;  %v8550_v34 = vld [vmem:[#allocation9 + $0x120] ss:$16 sps:$4 sm:$0xff]  }
 0x89a   :  { %v3759_v28 = vpop.f32.mrf.mxu0  ;;  %v3800_v42 = vpop.f32.mrf.mxu1  ;;  %3942 = vmatprep.subr.bf16.mxu0 %v8393_v22  ;;  %3983 = vmatprep.subr.bf16.mxu1 %v8396_v20  ;;  %v8547_v59 = vld [vmem:[#allocation9 + $0x12c] ss:$16 sps:$4 sm:$0xff]   ;;  %9770 = vst [vmem:[#allocation29_spill] sm:$0xff] %v8550_v34 }
 0x89b   :  { %v4435_v15 = vmul.f32 -1.442695, %v3758_v36  ;;  %v3760_v55 = vadd.f32 %v3759_v28, %v6862_v35  ;;  %v4437_v61 = vmul.f32 -1.442695, %v3799_v17  ;;  %v3801_v24 = vadd.f32 %v3800_v42, %v9683_v57  ;;  %v8486_v28 = vld [vmem:[#allocation9 + $0x1c0] ss:$16 sps:$4 sm:$0xff]  }
 0x89c   :  { %v3761_v46 = vpop.f32.mrf.mxu0  ;;  %v3802_v56 = vpop.f32.mrf.mxu1  ;;  %v8489_v42 = vld [vmem:[#allocation9 + $0x1c8] ss:$16 sps:$4 sm:$0xff]   ;;  %v8544_v57 = vld [vmem:[#allocation9 + $0x124] ss:$16 sps:$4 sm:$0xff]   ;;  %9769 = vst [vmem:[#allocation27_spill] sm:$0xff] %v8547_v59 }
 0x89d   :  { %5068 = vpow2.f32 %v4435_v15  ;;  %v4436_v6 = vmul.f32 -1.442695, %v3760_v55  ;;  %3943 = vmatpush1.bf16.msra.mxu0 %v8400_v10  ;;  %3984 = vmatpush1.bf16.msra.mxu1 %v8403_v58  ;;  %v8492_v55 = vld [vmem:[#allocation9 + $0x1a4] ss:$16 sps:$4 sm:$0xff]   ;;  %v8495_v46 = vld [vmem:[#allocation9 + $0x1ac] ss:$16 sps:$4 sm:$0xff]  }
 0x89e   :  { %v3762_v51 = vpop.f32.mrf.mxu0  ;;  %v3803_v27 = vpop.f32.mrf.mxu1  ;;  %3944 = vmatprep.subr.bf16.mxu0 %v8406_v43  ;;  %3985 = vmatprep.subr.bf16.mxu1 %v8409_v45  ;;  %9768 = vst [vmem:[#allocation19_spill] sm:$0xff] %v8544_v57 }
 0x89f   :  { %5070 = vpow2.f32 %v4436_v6 }
 0x8a0   :  { %5072 = vpow2.f32 %v4437_v61  ;;  %v8499_v61 = vld [vmem:[#allocation9 + $0x1a0] ss:$16 sps:$4 sm:$0xff]  }
 0x8a1   :  { %3945 = vmatpush1.bf16.msra.mxu0 %v8412_v16  ;;  %3986 = vmatpush1.bf16.msra.mxu1 %v8415_v37 }
 0x8a2   :  { %3946 = vmatprep.subr.bf16.mxu0 %v8418_v44  ;;  %3987 = vmatprep.subr.bf16.mxu1 %v8421_v63 }
 0x8a5   :  { %3947 = vmatpush1.bf16.msra.mxu0 %v8425_v33  ;;  %3988 = vmatpush1.bf16.msra.mxu1 %v8428_v8 }
 0x8a6   :  { %3948 = vmatprep.subr.bf16.mxu0 %v8431_v47  ;;  %3989 = vmatprep.subr.bf16.mxu1 %v8434_v11 }
 0x8a9   :  { %3949 = vmatpush1.bf16.msra.mxu0 %v8437_v49  ;;  %3990 = vmatpush1.bf16.msra.mxu1 %v8440_v2 }
 0x8aa   :  { %v5069_v23 = vpop.eup %5068  ;;  %3950 = vmatprep.subr.bf16.mxu0 %v8444_v50  ;;  %3991 = vmatprep.subr.bf16.mxu1 %v8447_v32 }
 0x8ab   :  { %v3814_v26 = vadd.f32 1.0, %v5069_v23  ;;  %v8502_v23 = vld [vmem:[#allocation9 + $0x1a8] ss:$16 sps:$4 sm:$0xff]  }
 0x8ac   :  { %v5071_v21 = vpop.eup %5070 }
 0x8ad   :  { %5074 = vrcp.f32 %v3814_v26  ;;  %v3815_v40 = vadd.f32 1.0, %v5071_v21  ;;  %3951 = vmatpush1.bf16.msra.mxu0 %v8450_v19  ;;  %3992 = vmatpush1.bf16.msra.mxu1 %v8453_v52  ;;  %v5073_v36 = vpop.eup %5072  ;;  %v8508_v26 = vld [vmem:[#allocation9 + $0x18c] ss:$16 sps:$4 sm:$0xff]  }
 0x8ae   :  { %5076 = vtanh.f32 %v3801_v24  ;;  %3952 = vmatprep.subr.bf16.mxu0 %v8456_v0  ;;  %3993 = vmatprep.subr.bf16.mxu1 %v8459_v18  ;;  %v3816_v51 = vadd.f32 1.0, %v5073_v36  ;;  %v8505_v24 = vld [vmem:[#allocation9 + $0x184] ss:$16 sps:$4 sm:$0xff]  }
 0x8af   :  { %5078 = vrcp.f32 %v3815_v40  ;;  %v8516_v40 = vld [vmem:[#allocation9 + $0x188] ss:$16 sps:$4 sm:$0xff]   ;;  %v8520_v36 = vld [vmem:[#allocation9 + $0x164] ss:$16 sps:$4 sm:$0xff]  }
 0x8b0   :  { %5080 = vrcp.f32 %v3816_v51  ;;  %v8532_v51 = vld [vmem:[#allocation9 + $0x144] ss:$16 sps:$4 sm:$0xff]  }
 0x8b1   :  { %3953 = vmatpush1.bf16.msra.mxu0 %v8462_v48  ;;  %3994 = vmatpush1.bf16.msra.mxu1 %v8465_v31 }
 0x8b2   :  { %3954 = vmatprep.subr.bf16.mxu0 %v8468_v1  ;;  %3995 = vmatprep.subr.bf16.mxu1 %v8471_v62 }
 0x8b5   :  { %3955 = vmatpush2.bf16.msra.mxu0 %v8474_v39  ;;  %3996 = vmatpush2.bf16.msra.mxu1 %v8477_v12 }
 0x8b6   :  { %3956 = vmatprep.subr.bf16.mxu0 %v8480_v29  ;;  %3997 = vmatprep.subr.bf16.mxu1 %v8483_v7 }
 0x8b9   :  { %3957 = vmatpush2.bf16.msra.mxu0 %v8486_v28  ;;  %3998 = vmatpush2.bf16.msra.mxu1 %v8489_v42 }
 0x8ba   :  { %v5075_v15 = vpop.eup %5074  ;;  %3958 = vmatprep.subr.bf16.mxu0 %v8492_v55  ;;  %3999 = vmatprep.subr.bf16.mxu1 %v8495_v46 }
 0x8bb   :  { %v5077_v56 = vpop.eup %5076 }
 0x8bc   :  { %v5079_v6 = vpop.eup %5078  ;;  %v3825_v17 = vmul.f32 %v5077_v56, %v5075_v15  ;;  %v8523_v15 = vld [vmem:[#allocation9 + $0x16c] ss:$16 sps:$4 sm:$0xff]   ;;  %v8526_v56 = vld [vmem:[#allocation9 + $0x160] ss:$16 sps:$4 sm:$0xff]  }
 0x8bd   :  { %v3824_v27 = vmul.f32 %v5079_v6, %v8268_v30  ;;  %3959 = vmatpush2.bf16.msra.mxu0 %v8499_v61  ;;  %4000 = vmatpush2.bf16.msra.mxu1 %v8502_v23  ;;  %v8513_v30 = vld [vmem:[#allocation9 + $0x180] ss:$16 sps:$4 sm:$0xff]   ;;  %v8529_v6 = vld [vmem:[#allocation9 + $0x168] ss:$16 sps:$4 sm:$0xff]   ;;  %v5081_v35 = vpop.eup %5080 }
 0x8be   :  { %3960 = vmatprep.subr.bf16.mxu0 %v8505_v24  ;;  %4001 = vmatprep.subr.bf16.mxu1 %v8508_v26 }
 0x8bf   :  { %v8511_v21 = vadd.f32 %v3825_v17, %v3824_v27  ;;  %v8535_v27 = vld [vmem:[#allocation9 + $0x14c] ss:$16 sps:$4 sm:$0xff]   ;;  %v8538_v17 = vld [vmem:[#allocation9 + $0x140] ss:$16 sps:$4 sm:$0xff]  }
 0x8c1   :  { %9766 = vst [vmem:[#allocation115_spill] sm:$0xff] %v8511_v21  ;;  %3961 = vmatpush2.bf16.msra.mxu0 %v8513_v30  ;;  %4002 = vmatpush2.bf16.msra.mxu1 %v8516_v40  ;;  %5082 = vtanh.f32 %v8511_v21  ;;  %v8541_v21 = vld [vmem:[#allocation9 + $0x148] ss:$16 sps:$4 sm:$0xff]  }
 0x8c2   :  { %3962 = vmatprep.subr.bf16.mxu0 %v8520_v36  ;;  %4003 = vmatprep.subr.bf16.mxu1 %v8523_v15  ;;  %9767 = vst [vmem:[#allocation116_spill] sm:$0xff] %v8541_v21 }
 0x8c5   :  { %3963 = vmatpush2.bf16.msra.mxu0 %v8526_v56  ;;  %4004 = vmatpush2.bf16.msra.mxu1 %v8529_v6 }
 0x8c6   :  { %3964 = vmatprep.subr.bf16.mxu0 %v8532_v51  ;;  %4005 = vmatprep.subr.bf16.mxu1 %v8535_v27 }
 0x8c9   :  { %3965 = vmatpush2.bf16.msra.mxu0 %v8538_v17  ;;  %4006 = vmatpush2.bf16.msra.mxu1 %v8541_v21  ;;  %v5595_v21 = vld [vmem:[#allocation9 + $0xec] ss:$16 sps:$4 sm:$0xff]  }
 0x8ca   :  { %3966 = vmatprep.subr.bf16.mxu0 %v8544_v57  ;;  %4007 = vmatprep.subr.bf16.mxu1 %v8547_v59  ;;  %v8562_v59 = vld [vmem:[#allocation9 + $0x100] ss:$16 sps:$4 sm:$0xff]   ;;  %v8565_v57 = vld [vmem:[#allocation9 + $0x108] ss:$16 sps:$4 sm:$0xff]  }
 0x8cd   :  { %3967 = vmatpush2.bf16.msra.mxu0 %v8550_v34  ;;  %4008 = vmatpush2.bf16.msra.mxu1 %v8553_v38  ;;  %v5594_v38 = vld [vmem:[#allocation9 + $0xe4] ss:$16 sps:$4 sm:$0xff]  }
 0x8ce   :  { %v5083_v54 = vpop.eup %5082  ;;  %3968 = vmatprep.subr.bf16.mxu0 %v8556_v53  ;;  %4009 = vmatprep.subr.bf16.mxu1 %v8559_v14 }
 0x8cf   :  { %v3828_v25 = vmul.f32 %v5083_v54, %v5081_v35  ;;  %v9773_v35 = vld [vmem:[#allocation19_spill] sm:$0xff]  ;;  %v9775_v54 = vld [vmem:[#allocation29_spill] sm:$0xff] }
 0x8d1   :  { %3969 = vmatpush2.bf16.msra.mxu0 %v8562_v59  ;;  %4010 = vmatpush2.bf16.msra.mxu1 %v8565_v57  ;;  %v3937_v34 = vpack.c.bf16 %v3828_v25, %v3828_v25  ;;  %v9774_v25 = vld [vmem:[#allocation27_spill] sm:$0xff] }
 0x8d2   :  { %4046 = vmatprep.subr.bf16.mxu0 %v5594_v38  ;;  %4087 = vmatprep.subr.bf16.mxu1 %v5595_v21  ;;  %v9776_v38 = vld [vmem:[#allocation28_spill] sm:$0xff] }
 0x8d3   :  { %3970 = vmatprep.mubr.bf16.mxu0 %v3937_v34  ;;  %4011 = vmatprep.mubr.bf16.mxu1 %v3937_v34  ;;  %v9772_v34 = vld [vmem:[#allocation116_spill] sm:$0xff] }
 0x8d4   :  { %3971 = vmatmul.mubr.bf16.vlgmr.msra.gmra.mxu0 %v8370_v13  ;;  %4012 = vmatmul.mubr.bf16.vlgmr.msra.gmra.mxu1 %v8370_v13  ;;  %v9784_v21 = vld [vmem:[#allocation144_spill] sm:$0xff] }
 0x8d5   :  { %4047 = vmatpush1.bf16.msra.mxu0 %v8374_v3  ;;  %4088 = vmatpush1.bf16.msra.mxu1 %v8377_v5  ;;  %v9777_v5 = vld [vmem:[#allocation81_spill] sm:$0xff] }
 0x8d6   :  { %4048 = vmatprep.subr.bf16.mxu0 %v8380_v4  ;;  %4089 = vmatprep.subr.bf16.mxu1 %v8383_v41 }
 0x8d9   :  { %4049 = vmatpush1.bf16.msra.mxu0 %v8387_v60  ;;  %4090 = vmatpush1.bf16.msra.mxu1 %v8390_v9 }
 0x8da   :  { %4050 = vmatprep.subr.bf16.mxu0 %v8393_v22  ;;  %4091 = vmatprep.subr.bf16.mxu1 %v8396_v20  ;;  %v9778_v22 = vld [vmem:[#allocation82_spill] sm:$0xff] }
 0x8dd   :  { %4051 = vmatpush1.bf16.msra.mxu0 %v8400_v10  ;;  %4092 = vmatpush1.bf16.msra.mxu1 %v8403_v58 }
 0x8de   :  { %4052 = vmatprep.subr.bf16.mxu0 %v8406_v43  ;;  %4093 = vmatprep.subr.bf16.mxu1 %v8409_v45 }
 0x8e1   :  { %4053 = vmatpush1.bf16.msra.mxu0 %v8412_v16  ;;  %4094 = vmatpush1.bf16.msra.mxu1 %v8415_v37 }
 0x8e2   :  { %4054 = vmatprep.subr.bf16.mxu0 %v8418_v44  ;;  %4095 = vmatprep.subr.bf16.mxu1 %v8421_v63 }
 0x8e5   :  { %4055 = vmatpush1.bf16.msra.mxu0 %v8425_v33  ;;  %4096 = vmatpush1.bf16.msra.mxu1 %v8428_v8 }
 0x8e6   :  { %4056 = vmatprep.subr.bf16.mxu0 %v8431_v47  ;;  %4097 = vmatprep.subr.bf16.mxu1 %v8434_v11 }
 0x8e9   :  { %4057 = vmatpush1.bf16.msra.mxu0 %v8437_v49  ;;  %4098 = vmatpush1.bf16.msra.mxu1 %v8440_v2 }
 0x8ea   :  { %4058 = vmatprep.subr.bf16.mxu0 %v8444_v50  ;;  %4099 = vmatprep.subr.bf16.mxu1 %v8447_v32 }
 0x8ed   :  { %4059 = vmatpush1.bf16.msra.mxu0 %v8450_v19  ;;  %4100 = vmatpush1.bf16.msra.mxu1 %v8453_v52  ;;  %v9781_v19 = vld [vmem:[#allocation114_spill] sm:$0xff] }
 0x8ee   :  { %4060 = vmatprep.subr.bf16.mxu0 %v8456_v0  ;;  %4101 = vmatprep.subr.bf16.mxu1 %v8459_v18 }
 0x8f1   :  { %4061 = vmatpush1.bf16.msra.mxu0 %v8462_v48  ;;  %4102 = vmatpush1.bf16.msra.mxu1 %v8465_v31 }
 0x8f2   :  { %4062 = vmatprep.subr.bf16.mxu0 %v8468_v1  ;;  %4103 = vmatprep.subr.bf16.mxu1 %v8471_v62 }
 0x8f5   :  { %4063 = vmatpush2.bf16.msra.mxu0 %v8474_v39  ;;  %4104 = vmatpush2.bf16.msra.mxu1 %v8477_v12  ;;  %v9782_v39 = vld [vmem:[#allocation142_spill] sm:$0xff] }
 0x8f6   :  { %4064 = vmatprep.subr.bf16.mxu0 %v8480_v29  ;;  %4105 = vmatprep.subr.bf16.mxu1 %v8483_v7 }
 0x8f9   :  { %4065 = vmatpush2.bf16.msra.mxu0 %v8486_v28  ;;  %4106 = vmatpush2.bf16.msra.mxu1 %v8489_v42  ;;  %v9783_v42 = vld [vmem:[#allocation143_spill] sm:$0xff] }
 0x8fa   :  { %4066 = vmatprep.subr.bf16.mxu0 %v8492_v55  ;;  %4107 = vmatprep.subr.bf16.mxu1 %v8495_v46 }
 0x8fd   :  { %4067 = vmatpush2.bf16.msra.mxu0 %v8499_v61  ;;  %4108 = vmatpush2.bf16.msra.mxu1 %v8502_v23 }
 0x8fe   :  { %4068 = vmatprep.subr.bf16.mxu0 %v8505_v24  ;;  %4109 = vmatprep.subr.bf16.mxu1 %v8508_v26 }
 0x901   :  { %4069 = vmatpush2.bf16.msra.mxu0 %v8513_v30  ;;  %4110 = vmatpush2.bf16.msra.mxu1 %v8516_v40 }
 0x902   :  { %4070 = vmatprep.subr.bf16.mxu0 %v8520_v36  ;;  %4111 = vmatprep.subr.bf16.mxu1 %v8523_v15  ;;  %v9785_v15 = vld [vmem:[#allocation40_spill] sm:$0xff] }
 0x905   :  { %4071 = vmatpush2.bf16.msra.mxu0 %v8526_v56  ;;  %4112 = vmatpush2.bf16.msra.mxu1 %v8529_v6 }
 0x906   :  { %4072 = vmatprep.subr.bf16.mxu0 %v8532_v51  ;;  %4113 = vmatprep.subr.bf16.mxu1 %v8535_v27 }
 0x909   :  { %4073 = vmatpush2.bf16.msra.mxu0 %v8538_v17  ;;  %4114 = vmatpush2.bf16.msra.mxu1 %v9772_v34 }
 0x90a   :  { %4074 = vmatprep.subr.bf16.mxu0 %v9773_v35  ;;  %4115 = vmatprep.subr.bf16.mxu1 %v9774_v25 }
 0x90d   :  { %4075 = vmatpush2.bf16.msra.mxu0 %v9775_v54  ;;  %4116 = vmatpush2.bf16.msra.mxu1 %v9776_v38  ;;  %v9786_v38 = vld [vmem:[#allocation115_spill] sm:$0xff] }
 0x90e   :  { %4076 = vmatprep.subr.bf16.mxu0 %v8556_v53  ;;  %4117 = vmatprep.subr.bf16.mxu1 %v8559_v14  ;;  %v9779_v14 = vld [vmem:[#allocation83_spill] sm:$0xff] }
 0x911   :  { %4077 = vmatpush2.bf16.msra.mxu0 %v8562_v59  ;;  %4118 = vmatpush2.bf16.msra.mxu1 %v8565_v57  ;;  %v9780_v57 = vld [vmem:[#allocation39_spill] sm:$0xff] }
 0x954   :  { %v3865_v13 = vpop.f32.mrf.mxu0  ;;  %v3906_v3 = vpop.f32.mrf.mxu1 }
 0x955   :  { %v3866_v4 = vadd.f32 %v3865_v13, %v9777_v5  ;;  %v3907_v59 = vadd.f32 %v3906_v3, %v9779_v14 }
 0x956   :  { %v3867_v41 = vpop.f32.mrf.mxu0  ;;  %v3908_v60 = vpop.f32.mrf.mxu1 }
 0x957   :  { %v4438_v9 = vmul.f32 -1.442695, %v3866_v4  ;;  %v3868_v20 = vadd.f32 %v3867_v41, %v9778_v22  ;;  %v4440_v16 = vmul.f32 -1.442695, %v3907_v59  ;;  %v3909_v37 = vadd.f32 %v3908_v60, %v9780_v57 }
 0x958   :  { %v3869_v10 = vpop.f32.mrf.mxu0  ;;  %v3910_v58 = vpop.f32.mrf.mxu1 }
 0x959   :  { %5084 = vpow2.f32 %v4438_v9  ;;  %v4439_v43 = vmul.f32 -1.442695, %v3868_v20 }
 0x95a   :  { %v3870_v53 = vpop.f32.mrf.mxu0  ;;  %v3911_v45 = vpop.f32.mrf.mxu1 }
 0x95b   :  { %5086 = vpow2.f32 %v4439_v43 }
 0x95c   :  { %5088 = vpow2.f32 %v4440_v16 }
 0x95d   :  { %5090 = vtanh.f32 %v3909_v37 }
 0x966   :  { %v5085_v44 = vpop.eup %5084 }
 0x967   :  { %v3922_v63 = vadd.f32 1.0, %v5085_v44 }
 0x968   :  { %v5087_v33 = vpop.eup %5086 }
 0x969   :  { %5092 = vrcp.f32 %v3922_v63  ;;  %v3923_v8 = vadd.f32 1.0, %v5087_v33  ;;  %v5089_v47 = vpop.eup %5088 }
 0x96a   :  { %v5091_v11 = vpop.eup %5090  ;;  %v3924_v32 = vadd.f32 1.0, %v5089_v47 }
 0x96b   :  { %5094 = vrcp.f32 %v3923_v8 }
 0x96c   :  { %5096 = vrcp.f32 %v3924_v32 }
 0x976   :  { %v5093_v49 = vpop.eup %5092 }
 0x977   :  { %v3933_v2 = vmul.f32 %v5093_v49, %v5091_v11 }
 0x978   :  { %v5095_v50 = vpop.eup %5094 }
 0x979   :  { %v3932_v52 = vmul.f32 %v5095_v50, %v9781_v19  ;;  %v5097_v18 = vpop.eup %5096 }
 0x97b   :  { %v3934_v0 = vadd.f32 %v3933_v2, %v3932_v52 }
 0x97d   :  { %5098 = vtanh.f32 %v3934_v0 }
 0x98a   :  { %v5099_v48 = vpop.eup %5098 }
 0x98b   :  { %v3936_v31 = vmul.f32 %v5099_v48, %v5097_v18 }
 0x98d   :  { %v4044_v22 = vpack.c.bf16 %v3936_v31, %v3936_v31 }
 0x994   :  { %v3972_v1 = vpop.f32.mrf.mxu0  ;;  %v4013_v62 = vpop.f32.mrf.mxu1 }
 0x995   :  { %v3973_v12 = vadd.f32 %v3972_v1, %v9782_v39  ;;  %v4014_v30 = vadd.f32 %v4013_v62, %v9784_v21 }
 0x996   :  { %v3974_v29 = vpop.f32.mrf.mxu0  ;;  %v4015_v7 = vpop.f32.mrf.mxu1 }
 0x997   :  { %v4441_v28 = vmul.f32 -1.442695, %v3973_v12  ;;  %v3975_v55 = vadd.f32 %v3974_v29, %v9783_v42  ;;  %v4443_v40 = vmul.f32 -1.442695, %v4014_v30  ;;  %v4016_v56 = vadd.f32 %v4015_v7, %v9785_v15  ;;  %v4448_v7 = vld [vmem:[#allocation3] ss:$0 sm:$0xff] }
 0x998   :  { %v3976_v46 = vpop.f32.mrf.mxu0  ;;  %v4017_v61 = vpop.f32.mrf.mxu1 }
 0x999   :  { %5100 = vpow2.f32 %v4441_v28  ;;  %v4442_v23 = vmul.f32 -1.442695, %v3975_v55 }
 0x99a   :  { %v3977_v24 = vpop.f32.mrf.mxu0  ;;  %v4018_v26 = vpop.f32.mrf.mxu1 }
 0x99b   :  { %5102 = vpow2.f32 %v4442_v23 }
 0x99c   :  { %5104 = vpow2.f32 %v4443_v40 }
 0x9a6   :  { %v5101_v36 = vpop.eup %5100 }
 0x9a7   :  { %v4029_v6 = vadd.f32 1.0, %v5101_v36 }
 0x9a8   :  { %v5103_v51 = vpop.eup %5102 }
 0x9a9   :  { %5106 = vrcp.f32 %v4029_v6  ;;  %v4030_v27 = vadd.f32 1.0, %v5103_v51  ;;  %v5105_v17 = vpop.eup %5104 }
 0x9aa   :  { %5108 = vtanh.f32 %v4016_v56  ;;  %v4031_v54 = vadd.f32 1.0, %v5105_v17 }
 0x9ab   :  { %5110 = vrcp.f32 %v4030_v27 }
 0x9ac   :  { %5112 = vrcp.f32 %v4031_v54 }
 0x9b6   :  { %v5107_v34 = vpop.eup %5106 }
 0x9b7   :  { %v5109_v35 = vpop.eup %5108 }
 0x9b8   :  { %v5111_v25 = vpop.eup %5110  ;;  %v4040_v3 = vmul.f32 %v5109_v35, %v5107_v34 }
 0x9b9   :  { %v4039_v13 = vmul.f32 %v5111_v25, %v9786_v38  ;;  %v5113_v4 = vpop.eup %5112 }
 0x9bb   :  { %v4041_v5 = vadd.f32 %v4040_v3, %v4039_v13 }
 0x9bd   :  { %5114 = vtanh.f32 %v4041_v5 }
 0x9ca   :  { %v5115_v41 = vpop.eup %5114 }
 0x9cb   :  { %v4043_v60 = vmul.f32 %v5115_v41, %v5113_v4 }
 0x9cd   :  { %v4045_v9 = vpack.c.bf16 %v4043_v60, %v4043_v60 }
 0x9cf   :  { %4078 = vmatprep.mubr.bf16.mxu0 %v4045_v9  ;;  %4119 = vmatprep.mubr.bf16.mxu1 %v4045_v9 }
 0x9d0   :  { %4079 = vmatmul.mubr.bf16.vlgmr.msra.gmra.mxu0 %v4044_v22  ;;  %4120 = vmatmul.mubr.bf16.vlgmr.msra.gmra.mxu1 %v4044_v22 }
 0xa90   :  { %v4080_v20 = vpop.f32.mrf.mxu0  ;;  %v4121_v10 = vpop.f32.mrf.mxu1 }
 0xa91   :  { %v4081_v58 = vadd.f32 %v4080_v20, %v9782_v39  ;;  %v4122_v63 = vadd.f32 %v4121_v10, %v9784_v21  ;;  %v4447_v39 = vld [vmem:[%s8660_s8] ss:$0 sm:$0xff] }
 0xa92   :  { %v4082_v43 = vpop.f32.mrf.mxu0  ;;  %v4123_v53 = vpop.f32.mrf.mxu1 }
 0xa93   :  { %v4444_v45 = vmul.f32 -1.442695, %v4081_v58  ;;  %v4083_v14 = vadd.f32 %v4082_v43, %v9783_v42  ;;  %v4446_v33 = vmul.f32 -1.442695, %v4122_v63  ;;  %v4124_v47 = vadd.f32 %v4123_v53, %v9785_v15 }
 0xa94   :  { %v4084_v59 = vpop.f32.mrf.mxu0  ;;  %v4125_v16 = vpop.f32.mrf.mxu1 }
 0xa95   :  { %5116 = vpow2.f32 %v4444_v45  ;;  %v4445_v57 = vmul.f32 -1.442695, %v4083_v14 }
 0xa96   :  { %v4085_v37 = vpop.f32.mrf.mxu0  ;;  %v4126_v44 = vpop.f32.mrf.mxu1 }
 0xa97   :  { %5118 = vpow2.f32 %v4445_v57 }
 0xa98   :  { %5120 = vpow2.f32 %v4446_v33 }
 0xaa2   :  { %v5117_v8 = vpop.eup %5116 }
 0xaa3   :  { %v4137_v11 = vadd.f32 1.0, %v5117_v8 }
 0xaa4   :  { %v5119_v49 = vpop.eup %5118 }
 0xaa5   :  { %5122 = vrcp.f32 %v4137_v11  ;;  %v4138_v2 = vadd.f32 1.0, %v5119_v49  ;;  %v5121_v50 = vpop.eup %5120 }
 0xaa6   :  { %5124 = vtanh.f32 %v4124_v47  ;;  %v4139_v0 = vadd.f32 1.0, %v5121_v50 }
 0xaa7   :  { %5126 = vrcp.f32 %v4138_v2 }
 0xaa8   :  { %5128 = vrcp.f32 %v4139_v0 }
 0xab2   :  { %v5123_v32 = vpop.eup %5122 }
 0xab3   :  { %v5125_v19 = vpop.eup %5124 }
 0xab4   :  { %v5127_v52 = vpop.eup %5126  ;;  %v4148_v18 = vmul.f32 %v5125_v19, %v5123_v32 }
 0xab5   :  { %v4147_v48 = vmul.f32 %v5127_v52, %v4041_v5  ;;  %v5129_v1 = vpop.eup %5128 }
 0xab7   :  { %v4149_v31 = vadd.f32 %v4148_v18, %v4147_v48 }
 0xab9   :  { %5130 = vtanh.f32 %v4149_v31 }
 0xac6   :  { %v5131_v62 = vpop.eup %5130 }
 0xac7   :  { %v4151_v12 = vmul.f32 %v5131_v62, %v5129_v1 }
 0xac9   :  { %v4159_v29 = vmul.f32 %v4447_v39, %v4151_v12 }
 0xacb   :  { %4160 = vadd.xlane.f32.xlu0 %v4159_v29 }
 0xb54   :  { %v4161_v28 = vpop.xlane.xlu0 %4160 }
 0xb55   :  { %v4169_v42 = vadd.f32 %v4448_v7, %v4161_v28 }
 0xb57   :  { %4171 = vst.msk [vmem:[%s8662_s10] sm:$0xff] %vm4170_vm0, %v4169_v42 }
 0xb58   :  { %4176 = vsyncpa [#allocation5], 1 }
 0xb59   :  { %4177 = vsyncpa [#allocation7], 1 }
 0xb5a   :  { %4178 = vsyncpa [#allocation10], 1 }

</bundles_post_ra>
